<compile_context>
chip_gen: v7x
topology: tpu7x:2x2x1
jax: 0.10.0
libtpu: 0.0.40
codegen_flags: <defaults>
</compile_context>

<pallas_src>
import functools

import jax
import jax.numpy as jnp
from jax import lax
from jax.experimental import pallas as pl
from jax.experimental.pallas import tpu as pltpu


# ------------------------------ Pallas kernels ------------------------------ #

def _fused_conv3x3_kernel(*refs, n_in, in_act, stats, out_halo,
                          offsets, n_rows, pad_rows):
    """Fused 3x3 conv (+optional input BN-affine+ReLU) (+optional BN stats).

    Ref order: x_refs[0..n_in-1], [scale, shift], mask, w, b  |  o, [sum, sq]  |  [act_scratch]
      x_refs : (L, Ci) f32, flattened padded canvas with `pad_rows` zero halo rows
      mask   : (L, 1)  f32 0/1, 1 on interior canvas pixels
      w      : (9*sum(Ci), Cout) bf16, tap-major rows matching the column build
      o      : (L, Cout) if out_halo else (n_rows, Cout), f32
    """
    idx = 0
    x_refs = refs[idx:idx + n_in]; idx += n_in
    if in_act:
        sc_ref, sh_ref = refs[idx], refs[idx + 1]; idx += 2
    mask_ref = refs[idx]; idx += 1
    w_ref, b_ref = refs[idx], refs[idx + 1]; idx += 2
    o_ref = refs[idx]; idx += 1
    if stats:
        sum_ref, sq_ref = refs[idx], refs[idx + 1]; idx += 2
    act_ref = refs[idx] if in_act else None

    # Build the (n_rows, 9*sum(Ci)) column matrix from 9 statically shifted
    # slices per input -> ONE bf16 MXU matmul instead of 9 tiny ones.
    taps = []
    if in_act:
        # Previous layer's BN affine + ReLU fused into this conv's input path.
        x = x_refs[0][...]
        xa = jnp.maximum(x * sc_ref[...] + sh_ref[...], 0.0) * mask_ref[...]
        act_ref[...] = xa.astype(jnp.bfloat16)
        for off in offsets:
            taps.append(act_ref[pl.ds(off, n_rows), :])
    else:
        for x_ref in x_refs:
            for off in offsets:
                taps.append(x_ref[pl.ds(off, n_rows), :].astype(jnp.bfloat16))
    cols = jnp.concatenate(taps, axis=-1)

    acc = jnp.dot(cols, w_ref[...], preferred_element_type=jnp.float32)
    mask_out = mask_ref[pl.ds(pad_rows, n_rows), :]
    y = (acc + b_ref[...]) * mask_out          # zero the border -> ready-padded output

    if stats:
        @pl.when(pl.program_id(0) == 0)
        def _init():
            sum_ref[...] = jnp.zeros_like(sum_ref)
            sq_ref[...] = jnp.zeros_like(sq_ref)
        sum_ref[...] += jnp.sum(y, axis=0, keepdims=True)
        sq_ref[...] += jnp.sum(y * y, axis=0, keepdims=True)

    if out_halo:
        o_ref[...] = jnp.zeros(o_ref.shape, o_ref.dtype)
        o_ref[pl.ds(pad_rows, n_rows), :] = y.astype(o_ref.dtype)
    else:
        o_ref[...] = y.astype(o_ref.dtype)


def _affine_relu_kernel(y_ref, sc_ref, sh_ref, o_ref):
    """Final BN affine + ReLU: max(y*scale + shift, 0)."""
    o_ref[...] = jnp.maximum(y_ref[...] * sc_ref[...] + sh_ref[...], 0.0)


# ----------------------------- Pallas wrappers ------------------------------ #

def fused_conv3x3(xs, mask, w_flat, bias, *, h_out, w_out, wp, pad_rows,
                  in_act=None, stats=False, out_halo=True):
    """xs: list of (B, L, Ci) halo'd flat canvases.  Returns y [, sum, sumsq]."""
    assert in_act is None or len(xs) == 1
    B, L, _ = xs[0].shape
    n_rows = (h_out + 2) * wp
    cout = w_flat.shape[-1]
    offsets = tuple(pad_rows + dh * wp + dw for dh in (-1, 0, 1) for dw in (-1, 0, 1))

    in_arrays = list(xs)
    in_specs = [pl.BlockSpec((None, L, xi.shape[-1]), lambda b: (b, 0, 0)) for xi in xs]
    if in_act is not None:
        sc, sh = in_act
        in_arrays += [sc, sh]
        in_specs += [pl.BlockSpec((1, sc.shape[-1]), lambda b: (0, 0)),
                     pl.BlockSpec((1, sh.shape[-1]), lambda b: (0, 0))]
    in_arrays += [mask, w_flat, bias.reshape(1, cout).astype(jnp.float32)]
    in_specs += [pl.BlockSpec((L, 1), lambda b: (0, 0)),
                 pl.BlockSpec(w_flat.shape, lambda b: (0, 0)),
                 pl.BlockSpec((1, cout), lambda b: (0, 0))]

    out_rows = L if out_halo else n_rows
    out_shape = [jax.ShapeDtypeStruct((B, out_rows, cout), jnp.float32)]
    out_specs = [pl.BlockSpec((None, out_rows, cout), lambda b: (b, 0, 0))]
    if stats:
        out_shape += [jax.ShapeDtypeStruct((1, cout), jnp.float32)] * 2
        out_specs += [pl.BlockSpec((1, cout), lambda b: (0, 0))] * 2

    scratch_shapes = []
    if in_act is not None:
        scratch_shapes.append(pltpu.VMEM((L, xs[0].shape[-1]), jnp.bfloat16))

    kernel = functools.partial(
        _fused_conv3x3_kernel, n_in=len(xs), in_act=in_act is not None,
        stats=stats, out_halo=out_halo, offsets=offsets, n_rows=n_rows,
        pad_rows=pad_rows)

    # Scoped-VMEM budget from the actual blocks (double-buffered) + temporaries.
    k_total = w_flat.shape[0]
    blk_bytes = (sum(L * xi.shape[-1] * 4 for xi in xs) + out_rows * cout * 4
                 + n_rows * k_total * 2 + n_rows * cout * 4 + w_flat.size * 2)
    vmem_limit = int(min(max(3 * blk_bytes, 32 * 1024 * 1024), 64 * 1024 * 1024))

    outs = pl.pallas_call(
        kernel,
        out_shape=tuple(out_shape),
        grid=(B,),
        in_specs=in_specs,
        out_specs=tuple(out_specs),
        scratch_shapes=scratch_shapes,
        compiler_params=pltpu.CompilerParams(
            dimension_semantics=("arbitrary",) if stats else ("parallel",),
            vmem_limit_bytes=vmem_limit),
    )(*in_arrays)
    return outs if stats else outs[0]


def affine_relu(y, scale, shift):
    B, n, c = y.shape
    return pl.pallas_call(
        _affine_relu_kernel,
        out_shape=jax.ShapeDtypeStruct((B, n, c), jnp.float32),
        grid=(B,),
        in_specs=[pl.BlockSpec((None, n, c), lambda b: (b, 0, 0)),
                  pl.BlockSpec((1, c), lambda b: (0, 0)),
                  pl.BlockSpec((1, c), lambda b: (0, 0))],
        out_specs=pl.BlockSpec((None, n, c), lambda b: (b, 0, 0)),
        compiler_params=pltpu.CompilerParams(dimension_semantics=("parallel",)),
    )(y, scale, shift)


# ------------------------------ module forward ------------------------------ #

def _w9_flat(w_oihw):
    """(Cout, Cin, 3, 3) -> (9*Cin, Cout); rows are tap-major (k = kh*3 + kw)."""
    cout, cin = w_oihw.shape[0], w_oihw.shape[1]
    return jnp.transpose(w_oihw, (2, 3, 1, 0)).reshape(9 * cin, cout)


def _build_mask(h_out, w_out, pad_rows):
    """(L, 1) f32 mask: 1 at interior canvas pixels, 0 on border + halo rows."""
    hp, wp = h_out + 2, w_out + 2
    i = jnp.arange(hp)[:, None]
    j = jnp.arange(wp)[None, :]
    m = ((i >= 1) & (i <= h_out) & (j >= 1) & (j <= w_out)).astype(jnp.float32)
    return jnp.pad(m.reshape(hp * wp, 1), ((pad_rows, pad_rows), (0, 0)))


def _bn_affine(s, q, gamma, beta, n, eps):
    """sum / sumsq -> BN(train-mode batch stats) affine scale & shift."""
    c = s.shape[-1]
    mean = s / n
    var = jnp.maximum(q / n - mean * mean, 0.0)
    scale = gamma.reshape(1, c) / jnp.sqrt(var + eps)
    shift = beta.reshape(1, c) - mean * scale
    return scale, shift


def upconv_block_forward(params, x_nchw, skip_nchw, eps=1e-5):
    x = jnp.transpose(x_nchw, (0, 2, 3, 1)).astype(jnp.float32)       # NHWC
    skip = jnp.transpose(skip_nchw, (0, 2, 3, 1)).astype(jnp.float32)
    B, H, W, Cin = x.shape
    Cskip = skip.shape[-1]
    Ho, Wo = 2 * H, 2 * W
    Hp, Wp = Ho + 2, Wo + 2
    HW = Hp * Wp
    P = Wp + 1                      # halo rows so all 9 flat shifts stay in-bounds
    L = HW + 2 * P

    mask = _build_mask(Ho, Wo, P)

    # --- ConvTranspose2d(k3,s2,p1,op1) as 3x3 conv over a zero-stuffed canvas ---
    canvas = jnp.zeros((B, Hp, Wp, Cin), jnp.float32)
    canvas = canvas.at[:, 1:Ho:2, 1:Wo:2, :].set(x)
    xs_flat = jnp.pad(canvas.reshape(B, HW, Cin), ((0, 0), (P, P), (0, 0)))
    w_eq = jnp.transpose(jnp.flip(params["up_w"], (2, 3)), (1, 0, 2, 3))   # -> OIHW
    up_flat = fused_conv3x3(
        [xs_flat], mask, _w9_flat(w_eq).astype(jnp.bfloat16), params["up_b"],
        h_out=Ho, w_out=Wo, wp=Wp, pad_rows=P, stats=False, out_halo=True)

    # --- skip path in the same halo'd flat layout (concat never materialized) ---
    skip_flat = jnp.pad(
        jnp.pad(skip, ((0, 0), (1, 1), (1, 1), (0, 0))).reshape(B, HW, Cskip),
        ((0, 0), (P, P), (0, 0)))

    # --- conv1: up + skip as two inputs, conv + BN sum/sumsq fused ---
    w1 = jnp.concatenate([_w9_flat(params["c1_w"][:, :Cin]),
                          _w9_flat(params["c1_w"][:, Cin:])],
                         axis=0).astype(jnp.bfloat16)
    y1, s1, q1 = fused_conv3x3(
        [up_flat, skip_flat], mask, w1, params["c1_b"],
        h_out=Ho, w_out=Wo, wp=Wp, pad_rows=P, stats=True, out_halo=True)
    sc1, sh1 = _bn_affine(s1, q1, params["c1_g"], params["c1_be"], float(B * Ho * Wo), eps)

    # --- conv2: BN1-affine+ReLU fused into its input path, conv + BN stats fused ---
    w2 = _w9_flat(params["c2_w"]).astype(jnp.bfloat16)
    y2, s2, q2 = fused_conv3x3(
        [y1], mask, w2, params["c2_b"],
        h_out=Ho, w_out=Wo, wp=Wp, pad_rows=P, in_act=(sc1, sh1),
        stats=True, out_halo=False)
    sc2, sh2 = _bn_affine(s2, q2, params["c2_g"], params["c2_be"], float(B * Ho * Wo), eps)

    # --- final BN2 affine + ReLU ---
    out_flat = affine_relu(y2, sc2, sh2)                  # (B, HW, Cout)
    Cout = out_flat.shape[-1]
    out = out_flat.reshape(B, Hp, Wp, Cout)[:, 1:1 + Ho, 1:1 + Wo, :]
    return jnp.transpose(out, (0, 3, 1, 2))               # back to NCHW


# ----------------------------- pure-JAX reference ---------------------------- #

def reference_forward(params, x, skip, eps=1e-5):
    dn = ("NCHW", "OIHW", "NCHW")
    prec = lax.Precision.HIGHEST
    w_eq = jnp.transpose(jnp.flip(params["up_w"], (2, 3)), (1, 0, 2, 3))
    up = lax.conv_general_dilated(x, w_eq, (1, 1), ((1, 2), (1, 2)),
                                  lhs_dilation=(2, 2), dimension_numbers=dn,
                                  precision=prec)
    up = up + params["up_b"].reshape(1, -1, 1, 1)
    h = jnp.concatenate([up, skip], axis=1)

    def cb(h, w, b, g, be):
        y = lax.conv_general_dilated(h, w, (1, 1), ((1, 1), (1, 1)),
                                     dimension_numbers=dn, precision=prec)
        y = y + b.reshape(1, -1, 1, 1)
        mean = jnp.mean(y, axis=(0, 2, 3), keepdims=True)
        var = jnp.mean((y - mean) ** 2, axis=(0, 2, 3), keepdims=True)
        y = (y - mean) / jnp.sqrt(var + eps)
        y = y * g.reshape(1, -1, 1, 1) + be.reshape(1, -1, 1, 1)
        return jnp.maximum(y, 0.0)

    h = cb(h, params["c1_w"], params["c1_b"], params["c1_g"], params["c1_be"])
    h = cb(h, params["c2_w"], params["c2_b"], params["c2_g"], params["c2_be"])
    return h


# ------------------------------------ main ----------------------------------- #

if __name__ == "__main__":
    key = jax.random.PRNGKey(0)
    B, Cin, H, W = 2, 8, 8, 8
    Cout = 8
    Cskip = Cin // 2                       # post_skip = int(1.5 * Cin) = Cin + Cin//2
    post_skip = Cin + Cskip
    ks = jax.random.split(key, 8)

    params = {
        # ConvTranspose2d weight layout: (in_channels, out_channels, kH, kW)
        "up_w": 0.1 * jax.random.normal(ks[0], (Cin, Cin, 3, 3), jnp.float32),
        "up_b": 0.1 * jax.random.normal(ks[1], (Cin,), jnp.float32),
        "c1_w": 0.1 * jax.random.normal(ks[2], (Cout, post_skip, 3, 3), jnp.float32),
        "c1_b": 0.1 * jax.random.normal(ks[3], (Cout,), jnp.float32),
        "c1_g": jnp.ones((Cout,), jnp.float32),    # BN gamma init (PyTorch default)
        "c1_be": jnp.zeros((Cout,), jnp.float32),  # BN beta init
        "c2_w": 0.1 * jax.random.normal(ks[4], (Cout, Cout, 3, 3), jnp.float32),
        "c2_b": 0.1 * jax.random.normal(ks[5], (Cout,), jnp.float32),
        "c2_g": jnp.ones((Cout,), jnp.float32),
        "c2_be": jnp.zeros((Cout,), jnp.float32),
    }

    x = jax.random.normal(ks[6], (B, Cin, H, W), jnp.float32)
    skip = jax.random.normal(ks[7], (B, Cskip, 2 * H, 2 * W), jnp.float32)

    out = jax.block_until_ready(jax.jit(upconv_block_forward)(params, x, skip))
    ref = jax.block_until_ready(reference_forward(params, x, skip))

    assert out.shape == (B, Cout, 2 * H, 2 * W), out.shape
    # bf16 MXU operands (f32 accumulate) through two BN'd conv layers -> ~1e-2 max err.
    err = float(jnp.max(jnp.abs(out - ref)))
    assert jnp.allclose(out, ref, atol=5e-2, rtol=5e-2), err
    print("KERNEL_OK")
</pallas_src>

<mosaic_0001>
module attributes {stable_mosaic.version = 11 : i64} {
  func.func @_fused_conv3x3_kernel(%arg0: i32, %arg1: memref<1x362x8xf32, #tpu.memory_space<vmem>>, %arg2: memref<362x1xf32, #tpu.memory_space<vmem>>, %arg3: memref<72x8xbf16, #tpu.memory_space<vmem>>, %arg4: memref<1x8xf32, #tpu.memory_space<vmem>>, %arg5: memref<1x362x8xf32, #tpu.memory_space<vmem>>) attributes {dimension_semantics = [#tpu.dimension_semantics<parallel>], iteration_bounds = array<i64: 2>, scalar_prefetch = 0 : i64, scratch_operands = 0 : i64, tpu.core_type = #tpu.core_type<tc>, window_params = [{transform_indices = @transform_0, window_bounds = array<i64: 1, 362, 8>}, {pipeline_mode = #tpu.pipeline_mode<synchronous>, transform_indices = @transform_1, window_bounds = array<i64: 362, 1>}, {pipeline_mode = #tpu.pipeline_mode<synchronous>, transform_indices = @transform_2, window_bounds = array<i64: 72, 8>}, {pipeline_mode = #tpu.pipeline_mode<synchronous>, transform_indices = @transform_3, window_bounds = array<i64: 1, 8>}, {transform_indices = @transform_4, window_bounds = array<i64: 1, 362, 8>}]} {
    %c0 = arith.constant 0 : index
    %c0_0 = arith.constant 0 : index
    %c0_1 = arith.constant 0 : index
    %0 = vector.load %arg1[%c0, %c0_0, %c0_1] : memref<1x362x8xf32, #tpu.memory_space<vmem>>, vector<1x324x8xf32>
    %1 = vector.shape_cast %0 : vector<1x324x8xf32> to vector<324x8xf32>
    %2 = arith.truncf %1 : vector<324x8xf32> to vector<324x8xbf16>
    %c0_2 = arith.constant 0 : index
    %c1 = arith.constant 1 : index
    %c0_3 = arith.constant 0 : index
    %3 = vector.load %arg1[%c0_2, %c1, %c0_3] : memref<1x362x8xf32, #tpu.memory_space<vmem>>, vector<1x324x8xf32>
    %4 = vector.shape_cast %3 : vector<1x324x8xf32> to vector<324x8xf32>
    %5 = arith.truncf %4 : vector<324x8xf32> to vector<324x8xbf16>
    %c0_4 = arith.constant 0 : index
    %c2 = arith.constant 2 : index
    %c0_5 = arith.constant 0 : index
    %6 = vector.load %arg1[%c0_4, %c2, %c0_5] : memref<1x362x8xf32, #tpu.memory_space<vmem>>, vector<1x324x8xf32>
    %7 = vector.shape_cast %6 : vector<1x324x8xf32> to vector<324x8xf32>
    %8 = arith.truncf %7 : vector<324x8xf32> to vector<324x8xbf16>
    %c0_6 = arith.constant 0 : index
    %c18 = arith.constant 18 : index
    %c0_7 = arith.constant 0 : index
    %9 = vector.load %arg1[%c0_6, %c18, %c0_7] : memref<1x362x8xf32, #tpu.memory_space<vmem>>, vector<1x324x8xf32>
    %10 = vector.shape_cast %9 : vector<1x324x8xf32> to vector<324x8xf32>
    %11 = arith.truncf %10 : vector<324x8xf32> to vector<324x8xbf16>
    %c0_8 = arith.constant 0 : index
    %c19 = arith.constant 19 : index
    %c0_9 = arith.constant 0 : index
    %12 = vector.load %arg1[%c0_8, %c19, %c0_9] : memref<1x362x8xf32, #tpu.memory_space<vmem>>, vector<1x324x8xf32>
    %13 = vector.shape_cast %12 : vector<1x324x8xf32> to vector<324x8xf32>
    %14 = arith.truncf %13 : vector<324x8xf32> to vector<324x8xbf16>
    %c0_10 = arith.constant 0 : index
    %c20 = arith.constant 20 : index
    %c0_11 = arith.constant 0 : index
    %15 = vector.load %arg1[%c0_10, %c20, %c0_11] : memref<1x362x8xf32, #tpu.memory_space<vmem>>, vector<1x324x8xf32>
    %16 = vector.shape_cast %15 : vector<1x324x8xf32> to vector<324x8xf32>
    %17 = arith.truncf %16 : vector<324x8xf32> to vector<324x8xbf16>
    %c0_12 = arith.constant 0 : index
    %c36 = arith.constant 36 : index
    %c0_13 = arith.constant 0 : index
    %18 = vector.load %arg1[%c0_12, %c36, %c0_13] : memref<1x362x8xf32, #tpu.memory_space<vmem>>, vector<1x324x8xf32>
    %19 = vector.shape_cast %18 : vector<1x324x8xf32> to vector<324x8xf32>
    %20 = arith.truncf %19 : vector<324x8xf32> to vector<324x8xbf16>
    %c0_14 = arith.constant 0 : index
    %c37 = arith.constant 37 : index
    %c0_15 = arith.constant 0 : index
    %21 = vector.load %arg1[%c0_14, %c37, %c0_15] : memref<1x362x8xf32, #tpu.memory_space<vmem>>, vector<1x324x8xf32>
    %22 = vector.shape_cast %21 : vector<1x324x8xf32> to vector<324x8xf32>
    %23 = arith.truncf %22 : vector<324x8xf32> to vector<324x8xbf16>
    %c0_16 = arith.constant 0 : index
    %c38 = arith.constant 38 : index
    %c0_17 = arith.constant 0 : index
    %24 = vector.load %arg1[%c0_16, %c38, %c0_17] : memref<1x362x8xf32, #tpu.memory_space<vmem>>, vector<1x324x8xf32>
    %25 = vector.shape_cast %24 : vector<1x324x8xf32> to vector<324x8xf32>
    %26 = arith.truncf %25 : vector<324x8xf32> to vector<324x8xbf16>
    %27 = tpu.concatenate %2, %5, %8, %11, %14, %17, %20, %23, %26 in 1 : vector<324x8xbf16>, vector<324x8xbf16>, vector<324x8xbf16>, vector<324x8xbf16>, vector<324x8xbf16>, vector<324x8xbf16>, vector<324x8xbf16>, vector<324x8xbf16>, vector<324x8xbf16> -> vector<324x72xbf16>
    %c0_18 = arith.constant 0 : index
    %c0_19 = arith.constant 0 : index
    %28 = vector.load %arg3[%c0_18, %c0_19] : memref<72x8xbf16, #tpu.memory_space<vmem>>, vector<72x8xbf16>
    %cst = arith.constant dense<0.000000e+00> : vector<324x8xf32>
    %29 = tpu.matmul %27, %28, %cst {dimension_numbers = #tpu.dot_dimension_numbers<[1], [0], [0], [1], [0, 0, 1, 1], [], []>} : vector<324x72xbf16>, vector<72x8xbf16>, vector<324x8xf32> -> vector<324x8xf32>
    %c19_20 = arith.constant 19 : index
    %c0_21 = arith.constant 0 : index
    %30 = vector.load %arg2[%c19_20, %c0_21] : memref<362x1xf32, #tpu.memory_space<vmem>>, vector<324x1xf32>
    %c0_22 = arith.constant 0 : index
    %c0_23 = arith.constant 0 : index
    %31 = vector.load %arg4[%c0_22, %c0_23] : memref<1x8xf32, #tpu.memory_space<vmem>>, vector<1x8xf32>
    %32 = vector.broadcast %31 : vector<1x8xf32> to vector<324x8xf32>
    %33 = arith.addf %29, %32 : vector<324x8xf32>
    %34 = vector.broadcast %30 : vector<324x1xf32> to vector<324x8xf32>
    %35 = arith.mulf %33, %34 : vector<324x8xf32>
    %cst_24 = arith.constant 0.000000e+00 : f32
    %36 = vector.broadcast %cst_24 : f32 to vector<362x8xf32>
    %c0_25 = arith.constant 0 : index
    %c0_26 = arith.constant 0 : index
    %c0_27 = arith.constant 0 : index
    %37 = vector.load %arg5[%c0_25, %c0_26, %c0_27] : memref<1x362x8xf32, #tpu.memory_space<vmem>>, vector<1x362x8xf32>
    %38 = vector.shape_cast %37 : vector<1x362x8xf32> to vector<362x8xf32>
    %39 = vector.shape_cast %36 : vector<362x8xf32> to vector<1x362x8xf32>
    tpu.vector_store %arg5[%c0_25, %c0_26, %c0_27], %39 {strides = array<i32>} : memref<1x362x8xf32, #tpu.memory_space<vmem>>, vector<1x362x8xf32>,
    %c0_28 = arith.constant 0 : index
    %c19_29 = arith.constant 19 : index
    %c0_30 = arith.constant 0 : index
    %40 = vector.load %arg5[%c0_28, %c19_29, %c0_30] : memref<1x362x8xf32, #tpu.memory_space<vmem>>, vector<1x324x8xf32>
    %41 = vector.shape_cast %40 : vector<1x324x8xf32> to vector<324x8xf32>
    %42 = vector.shape_cast %35 : vector<324x8xf32> to vector<1x324x8xf32>
    tpu.vector_store %arg5[%c0_28, %c19_29, %c0_30], %42 {strides = array<i32>} : memref<1x362x8xf32, #tpu.memory_space<vmem>>, vector<1x324x8xf32>,
    return
  }
  func.func @transform_0(%arg0: i32) -> (i32, i32, i32) {
    %c0_i32 = arith.constant 0 : i32
    %c0_i32_0 = arith.constant 0 : i32
    %c0_i32_1 = arith.constant 0 : i32
    return %arg0, %c0_i32, %c0_i32_0 : i32, i32, i32
  }
  func.func @transform_1(%arg0: i32) -> (i32, i32) {
    %c0_i32 = arith.constant 0 : i32
    %c0_i32_0 = arith.constant 0 : i32
    %c0_i32_1 = arith.constant 0 : i32
    return %c0_i32, %c0_i32_0 : i32, i32
  }
  func.func @transform_2(%arg0: i32) -> (i32, i32) {
    %c0_i32 = arith.constant 0 : i32
    %c0_i32_0 = arith.constant 0 : i32
    %c0_i32_1 = arith.constant 0 : i32
    return %c0_i32, %c0_i32_0 : i32, i32
  }
  func.func @transform_3(%arg0: i32) -> (i32, i32) {
    %c0_i32 = arith.constant 0 : i32
    %c0_i32_0 = arith.constant 0 : i32
    %c0_i32_1 = arith.constant 0 : i32
    return %c0_i32, %c0_i32_0 : i32, i32
  }
  func.func @transform_4(%arg0: i32) -> (i32, i32, i32) {
    %c0_i32 = arith.constant 0 : i32
    %c0_i32_0 = arith.constant 0 : i32
    %c0_i32_1 = arith.constant 0 : i32
    return %arg0, %c0_i32, %c0_i32_0 : i32, i32, i32
  }
}

module attributes {stable_mosaic.version = 11 : i64} {
  func.func @_fused_conv3x3_kernel(%arg0: i32, %arg1: memref<1x362x8xf32, #tpu.memory_space<vmem>>, %arg2: memref<1x362x4xf32, #tpu.memory_space<vmem>>, %arg3: memref<362x1xf32, #tpu.memory_space<vmem>>, %arg4: memref<108x8xbf16, #tpu.memory_space<vmem>>, %arg5: memref<1x8xf32, #tpu.memory_space<vmem>>, %arg6: memref<1x362x8xf32, #tpu.memory_space<vmem>>, %arg7: memref<1x8xf32, #tpu.memory_space<vmem>>, %arg8: memref<1x8xf32, #tpu.memory_space<vmem>>) attributes {dimension_semantics = [#tpu.dimension_semantics<arbitrary>], iteration_bounds = array<i64: 2>, scalar_prefetch = 0 : i64, scratch_operands = 0 : i64, tpu.core_type = #tpu.core_type<tc>, window_params = [{transform_indices = @transform_0, window_bounds = array<i64: 1, 362, 8>}, {transform_indices = @transform_1, window_bounds = array<i64: 1, 362, 4>}, {pipeline_mode = #tpu.pipeline_mode<synchronous>, transform_indices = @transform_2, window_bounds = array<i64: 362, 1>}, {pipeline_mode = #tpu.pipeline_mode<synchronous>, transform_indices = @transform_3, window_bounds = array<i64: 108, 8>}, {pipeline_mode = #tpu.pipeline_mode<synchronous>, transform_indices = @transform_4, window_bounds = array<i64: 1, 8>}, {transform_indices = @transform_5, window_bounds = array<i64: 1, 362, 8>}, {pipeline_mode = #tpu.pipeline_mode<synchronous>, transform_indices = @transform_6, window_bounds = array<i64: 1, 8>}, {pipeline_mode = #tpu.pipeline_mode<synchronous>, transform_indices = @transform_7, window_bounds = array<i64: 1, 8>}]} {
    %c0 = arith.constant 0 : index
    %c0_0 = arith.constant 0 : index
    %c0_1 = arith.constant 0 : index
    %0 = vector.load %arg1[%c0, %c0_0, %c0_1] : memref<1x362x8xf32, #tpu.memory_space<vmem>>, vector<1x324x8xf32>
    %1 = vector.shape_cast %0 : vector<1x324x8xf32> to vector<324x8xf32>
    %2 = arith.truncf %1 : vector<324x8xf32> to vector<324x8xbf16>
    %c0_2 = arith.constant 0 : index
    %c1 = arith.constant 1 : index
    %c0_3 = arith.constant 0 : index
    %3 = vector.load %arg1[%c0_2, %c1, %c0_3] : memref<1x362x8xf32, #tpu.memory_space<vmem>>, vector<1x324x8xf32>
    %4 = vector.shape_cast %3 : vector<1x324x8xf32> to vector<324x8xf32>
    %5 = arith.truncf %4 : vector<324x8xf32> to vector<324x8xbf16>
    %c0_4 = arith.constant 0 : index
    %c2 = arith.constant 2 : index
    %c0_5 = arith.constant 0 : index
    %6 = vector.load %arg1[%c0_4, %c2, %c0_5] : memref<1x362x8xf32, #tpu.memory_space<vmem>>, vector<1x324x8xf32>
    %7 = vector.shape_cast %6 : vector<1x324x8xf32> to vector<324x8xf32>
    %8 = arith.truncf %7 : vector<324x8xf32> to vector<324x8xbf16>
    %c0_6 = arith.constant 0 : index
    %c18 = arith.constant 18 : index
    %c0_7 = arith.constant 0 : index
    %9 = vector.load %arg1[%c0_6, %c18, %c0_7] : memref<1x362x8xf32, #tpu.memory_space<vmem>>, vector<1x324x8xf32>
    %10 = vector.shape_cast %9 : vector<1x324x8xf32> to vector<324x8xf32>
    %11 = arith.truncf %10 : vector<324x8xf32> to vector<324x8xbf16>
    %c0_8 = arith.constant 0 : index
    %c19 = arith.constant 19 : index
    %c0_9 = arith.constant 0 : index
    %12 = vector.load %arg1[%c0_8, %c19, %c0_9] : memref<1x362x8xf32, #tpu.memory_space<vmem>>, vector<1x324x8xf32>
    %13 = vector.shape_cast %12 : vector<1x324x8xf32> to vector<324x8xf32>
    %14 = arith.truncf %13 : vector<324x8xf32> to vector<324x8xbf16>
    %c0_10 = arith.constant 0 : index
    %c20 = arith.constant 20 : index
    %c0_11 = arith.constant 0 : index
    %15 = vector.load %arg1[%c0_10, %c20, %c0_11] : memref<1x362x8xf32, #tpu.memory_space<vmem>>, vector<1x324x8xf32>
    %16 = vector.shape_cast %15 : vector<1x324x8xf32> to vector<324x8xf32>
    %17 = arith.truncf %16 : vector<324x8xf32> to vector<324x8xbf16>
    %c0_12 = arith.constant 0 : index
    %c36 = arith.constant 36 : index
    %c0_13 = arith.constant 0 : index
    %18 = vector.load %arg1[%c0_12, %c36, %c0_13] : memref<1x362x8xf32, #tpu.memory_space<vmem>>, vector<1x324x8xf32>
    %19 = vector.shape_cast %18 : vector<1x324x8xf32> to vector<324x8xf32>
    %20 = arith.truncf %19 : vector<324x8xf32> to vector<324x8xbf16>
    %c0_14 = arith.constant 0 : index
    %c37 = arith.constant 37 : index
    %c0_15 = arith.constant 0 : index
    %21 = vector.load %arg1[%c0_14, %c37, %c0_15] : memref<1x362x8xf32, #tpu.memory_space<vmem>>, vector<1x324x8xf32>
    %22 = vector.shape_cast %21 : vector<1x324x8xf32> to vector<324x8xf32>
    %23 = arith.truncf %22 : vector<324x8xf32> to vector<324x8xbf16>
    %c0_16 = arith.constant 0 : index
    %c38 = arith.constant 38 : index
    %c0_17 = arith.constant 0 : index
    %24 = vector.load %arg1[%c0_16, %c38, %c0_17] : memref<1x362x8xf32, #tpu.memory_space<vmem>>, vector<1x324x8xf32>
    %25 = vector.shape_cast %24 : vector<1x324x8xf32> to vector<324x8xf32>
    %26 = arith.truncf %25 : vector<324x8xf32> to vector<324x8xbf16>
    %c0_18 = arith.constant 0 : index
    %c0_19 = arith.constant 0 : index
    %c0_20 = arith.constant 0 : index
    %27 = vector.load %arg2[%c0_18, %c0_19, %c0_20] : memref<1x362x4xf32, #tpu.memory_space<vmem>>, vector<1x324x4xf32>
    %28 = vector.shape_cast %27 : vector<1x324x4xf32> to vector<324x4xf32>
    %29 = arith.truncf %28 : vector<324x4xf32> to vector<324x4xbf16>
    %c0_21 = arith.constant 0 : index
    %c1_22 = arith.constant 1 : index
    %c0_23 = arith.constant 0 : index
    %30 = vector.load %arg2[%c0_21, %c1_22, %c0_23] : memref<1x362x4xf32, #tpu.memory_space<vmem>>, vector<1x324x4xf32>
    %31 = vector.shape_cast %30 : vector<1x324x4xf32> to vector<324x4xf32>
    %32 = arith.truncf %31 : vector<324x4xf32> to vector<324x4xbf16>
    %c0_24 = arith.constant 0 : index
    %c2_25 = arith.constant 2 : index
    %c0_26 = arith.constant 0 : index
    %33 = vector.load %arg2[%c0_24, %c2_25, %c0_26] : memref<1x362x4xf32, #tpu.memory_space<vmem>>, vector<1x324x4xf32>
    %34 = vector.shape_cast %33 : vector<1x324x4xf32> to vector<324x4xf32>
    %35 = arith.truncf %34 : vector<324x4xf32> to vector<324x4xbf16>
    %c0_27 = arith.constant 0 : index
    %c18_28 = arith.constant 18 : index
    %c0_29 = arith.constant 0 : index
    %36 = vector.load %arg2[%c0_27, %c18_28, %c0_29] : memref<1x362x4xf32, #tpu.memory_space<vmem>>, vector<1x324x4xf32>
    %37 = vector.shape_cast %36 : vector<1x324x4xf32> to vector<324x4xf32>
    %38 = arith.truncf %37 : vector<324x4xf32> to vector<324x4xbf16>
    %c0_30 = arith.constant 0 : index
    %c19_31 = arith.constant 19 : index
    %c0_32 = arith.constant 0 : index
    %39 = vector.load %arg2[%c0_30, %c19_31, %c0_32] : memref<1x362x4xf32, #tpu.memory_space<vmem>>, vector<1x324x4xf32>
    %40 = vector.shape_cast %39 : vector<1x324x4xf32> to vector<324x4xf32>
    %41 = arith.truncf %40 : vector<324x4xf32> to vector<324x4xbf16>
    %c0_33 = arith.constant 0 : index
    %c20_34 = arith.constant 20 : index
    %c0_35 = arith.constant 0 : index
    %42 = vector.load %arg2[%c0_33, %c20_34, %c0_35] : memref<1x362x4xf32, #tpu.memory_space<vmem>>, vector<1x324x4xf32>
    %43 = vector.shape_cast %42 : vector<1x324x4xf32> to vector<324x4xf32>
    %44 = arith.truncf %43 : vector<324x4xf32> to vector<324x4xbf16>
    %c0_36 = arith.constant 0 : index
    %c36_37 = arith.constant 36 : index
    %c0_38 = arith.constant 0 : index
    %45 = vector.load %arg2[%c0_36, %c36_37, %c0_38] : memref<1x362x4xf32, #tpu.memory_space<vmem>>, vector<1x324x4xf32>
    %46 = vector.shape_cast %45 : vector<1x324x4xf32> to vector<324x4xf32>
    %47 = arith.truncf %46 : vector<324x4xf32> to vector<324x4xbf16>
    %c0_39 = arith.constant 0 : index
    %c37_40 = arith.constant 37 : index
    %c0_41 = arith.constant 0 : index
    %48 = vector.load %arg2[%c0_39, %c37_40, %c0_41] : memref<1x362x4xf32, #tpu.memory_space<vmem>>, vector<1x324x4xf32>
    %49 = vector.shape_cast %48 : vector<1x324x4xf32> to vector<324x4xf32>
    %50 = arith.truncf %49 : vector<324x4xf32> to vector<324x4xbf16>
    %c0_42 = arith.constant 0 : index
    %c38_43 = arith.constant 38 : index
    %c0_44 = arith.constant 0 : index
    %51 = vector.load %arg2[%c0_42, %c38_43, %c0_44] : memref<1x362x4xf32, #tpu.memory_space<vmem>>, vector<1x324x4xf32>
    %52 = vector.shape_cast %51 : vector<1x324x4xf32> to vector<324x4xf32>
    %53 = arith.truncf %52 : vector<324x4xf32> to vector<324x4xbf16>
    %54 = tpu.concatenate %2, %5, %8, %11, %14, %17, %20, %23, %26, %29, %32, %35, %38, %41, %44, %47 in 1 : vector<324x8xbf16>, vector<324x8xbf16>, vector<324x8xbf16>, vector<324x8xbf16>, vector<324x8xbf16>, vector<324x8xbf16>, vector<324x8xbf16>, vector<324x8xbf16>, vector<324x8xbf16>, vector<324x4xbf16>, vector<324x4xbf16>, vector<324x4xbf16>, vector<324x4xbf16>, vector<324x4xbf16>, vector<324x4xbf16>, vector<324x4xbf16> -> vector<324x100xbf16>
    %55 = tpu.concatenate %50, %53 in 1 : vector<324x4xbf16>, vector<324x4xbf16> -> vector<324x8xbf16>
    %56 = tpu.concatenate %54, %55 in 1 : vector<324x100xbf16>, vector<324x8xbf16> -> vector<324x108xbf16>
    %c0_45 = arith.constant 0 : index
    %c0_46 = arith.constant 0 : index
    %57 = vector.load %arg4[%c0_45, %c0_46] : memref<108x8xbf16, #tpu.memory_space<vmem>>, vector<108x8xbf16>
    %cst = arith.constant dense<0.000000e+00> : vector<324x8xf32>
    %58 = tpu.matmul %56, %57, %cst {dimension_numbers = #tpu.dot_dimension_numbers<[1], [0], [0], [1], [0, 0, 1, 1], [], []>} : vector<324x108xbf16>, vector<108x8xbf16>, vector<324x8xf32> -> vector<324x8xf32>
    %c19_47 = arith.constant 19 : index
    %c0_48 = arith.constant 0 : index
    %59 = vector.load %arg3[%c19_47, %c0_48] : memref<362x1xf32, #tpu.memory_space<vmem>>, vector<324x1xf32>
    %c0_49 = arith.constant 0 : index
    %c0_50 = arith.constant 0 : index
    %60 = vector.load %arg5[%c0_49, %c0_50] : memref<1x8xf32, #tpu.memory_space<vmem>>, vector<1x8xf32>
    %61 = vector.broadcast %60 : vector<1x8xf32> to vector<324x8xf32>
    %62 = arith.addf %58, %61 : vector<324x8xf32>
    %63 = vector.broadcast %59 : vector<324x1xf32> to vector<324x8xf32>
    %64 = arith.mulf %62, %63 : vector<324x8xf32>
    %c0_i32 = arith.constant 0 : i32
    %65 = arith.cmpi eq, %arg0, %c0_i32 : i32
    %66 = arith.extui %65 : i1 to i32
    %c0_i32_51 = arith.constant 0 : i32
    %67 = arith.cmpi ne, %66, %c0_i32_51 : i32
    scf.if %67 {
      %cst_69 = arith.constant 0.000000e+00 : f32
      %86 = vector.broadcast %cst_69 : f32 to vector<1x8xf32>
      %c0_70 = arith.constant 0 : index
      %c0_71 = arith.constant 0 : index
      %87 = vector.load %arg7[%c0_70, %c0_71] : memref<1x8xf32, #tpu.memory_space<vmem>>, vector<1x8xf32>
      tpu.vector_store %arg7[%c0_70, %c0_71], %86 {strides = array<i32>} : memref<1x8xf32, #tpu.memory_space<vmem>>, vector<1x8xf32>,
      %cst_72 = arith.constant 0.000000e+00 : f32
      %88 = vector.broadcast %cst_72 : f32 to vector<1x8xf32>
      %c0_73 = arith.constant 0 : index
      %c0_74 = arith.constant 0 : index
      %89 = vector.load %arg8[%c0_73, %c0_74] : memref<1x8xf32, #tpu.memory_space<vmem>>, vector<1x8xf32>
      tpu.vector_store %arg8[%c0_73, %c0_74], %88 {strides = array<i32>} : memref<1x8xf32, #tpu.memory_space<vmem>>, vector<1x8xf32>,
    } else {
    }
    %c0_52 = arith.constant 0 : index
    %c0_53 = arith.constant 0 : index
    %68 = vector.load %arg7[%c0_52, %c0_53] : memref<1x8xf32, #tpu.memory_space<vmem>>, vector<1x8xf32>
    %cst_54 = arith.constant dense<0.000000e+00> : vector<8xf32>
    %69 = vector.multi_reduction <add>, %64, %cst_54 [0] : vector<324x8xf32> to vector<8xf32>
    %70 = vector.shape_cast %69 : vector<8xf32> to vector<1x8xf32>
    %71 = arith.addf %68, %70 : vector<1x8xf32>
    %c0_55 = arith.constant 0 : index
    %c0_56 = arith.constant 0 : index
    %72 = vector.load %arg7[%c0_55, %c0_56] : memref<1x8xf32, #tpu.memory_space<vmem>>, vector<1x8xf32>
    tpu.vector_store %arg7[%c0_55, %c0_56], %71 {strides = array<i32>} : memref<1x8xf32, #tpu.memory_space<vmem>>, vector<1x8xf32>,
    %c0_57 = arith.constant 0 : index
    %c0_58 = arith.constant 0 : index
    %73 = vector.load %arg8[%c0_57, %c0_58] : memref<1x8xf32, #tpu.memory_space<vmem>>, vector<1x8xf32>
    %74 = arith.mulf %64, %64 : vector<324x8xf32>
    %cst_59 = arith.constant dense<0.000000e+00> : vector<8xf32>
    %75 = vector.multi_reduction <add>, %74, %cst_59 [0] : vector<324x8xf32> to vector<8xf32>
    %76 = vector.shape_cast %75 : vector<8xf32> to vector<1x8xf32>
    %77 = arith.addf %73, %76 : vector<1x8xf32>
    %c0_60 = arith.constant 0 : index
    %c0_61 = arith.constant 0 : index
    %78 = vector.load %arg8[%c0_60, %c0_61] : memref<1x8xf32, #tpu.memory_space<vmem>>, vector<1x8xf32>
    tpu.vector_store %arg8[%c0_60, %c0_61], %77 {strides = array<i32>} : memref<1x8xf32, #tpu.memory_space<vmem>>, vector<1x8xf32>,
    %cst_62 = arith.constant 0.000000e+00 : f32
    %79 = vector.broadcast %cst_62 : f32 to vector<362x8xf32>
    %c0_63 = arith.constant 0 : index
    %c0_64 = arith.constant 0 : index
    %c0_65 = arith.constant 0 : index
    %80 = vector.load %arg6[%c0_63, %c0_64, %c0_65] : memref<1x362x8xf32, #tpu.memory_space<vmem>>, vector<1x362x8xf32>
    %81 = vector.shape_cast %80 : vector<1x362x8xf32> to vector<362x8xf32>
    %82 = vector.shape_cast %79 : vector<362x8xf32> to vector<1x362x8xf32>
    tpu.vector_store %arg6[%c0_63, %c0_64, %c0_65], %82 {strides = array<i32>} : memref<1x362x8xf32, #tpu.memory_space<vmem>>, vector<1x362x8xf32>,
    %c0_66 = arith.constant 0 : index
    %c19_67 = arith.constant 19 : index
    %c0_68 = arith.constant 0 : index
    %83 = vector.load %arg6[%c0_66, %c19_67, %c0_68] : memref<1x362x8xf32, #tpu.memory_space<vmem>>, vector<1x324x8xf32>
    %84 = vector.shape_cast %83 : vector<1x324x8xf32> to vector<324x8xf32>
    %85 = vector.shape_cast %64 : vector<324x8xf32> to vector<1x324x8xf32>
    tpu.vector_store %arg6[%c0_66, %c19_67, %c0_68], %85 {strides = array<i32>} : memref<1x362x8xf32, #tpu.memory_space<vmem>>, vector<1x324x8xf32>,
    return
  }
  func.func @transform_0(%arg0: i32) -> (i32, i32, i32) {
    %c0_i32 = arith.constant 0 : i32
    %c0_i32_0 = arith.constant 0 : i32
    %c0_i32_1 = arith.constant 0 : i32
    return %arg0, %c0_i32, %c0_i32_0 : i32, i32, i32
  }
  func.func @transform_1(%arg0: i32) -> (i32, i32, i32) {
    %c0_i32 = arith.constant 0 : i32
    %c0_i32_0 = arith.constant 0 : i32
    %c0_i32_1 = arith.constant 0 : i32
    return %arg0, %c0_i32, %c0_i32_0 : i32, i32, i32
  }
  func.func @transform_2(%arg0: i32) -> (i32, i32) {
    %c0_i32 = arith.constant 0 : i32
    %c0_i32_0 = arith.constant 0 : i32
    %c0_i32_1 = arith.constant 0 : i32
    return %c0_i32, %c0_i32_0 : i32, i32
  }
  func.func @transform_3(%arg0: i32) -> (i32, i32) {
    %c0_i32 = arith.constant 0 : i32
    %c0_i32_0 = arith.constant 0 : i32
    %c0_i32_1 = arith.constant 0 : i32
    return %c0_i32, %c0_i32_0 : i32, i32
  }
  func.func @transform_4(%arg0: i32) -> (i32, i32) {
    %c0_i32 = arith.constant 0 : i32
    %c0_i32_0 = arith.constant 0 : i32
    %c0_i32_1 = arith.constant 0 : i32
    return %c0_i32, %c0_i32_0 : i32, i32
  }
  func.func @transform_5(%arg0: i32) -> (i32, i32, i32) {
    %c0_i32 = arith.constant 0 : i32
    %c0_i32_0 = arith.constant 0 : i32
    %c0_i32_1 = arith.constant 0 : i32
    return %arg0, %c0_i32, %c0_i32_0 : i32, i32, i32
  }
  func.func @transform_6(%arg0: i32) -> (i32, i32) {
    %c0_i32 = arith.constant 0 : i32
    %c0_i32_0 = arith.constant 0 : i32
    %c0_i32_1 = arith.constant 0 : i32
    return %c0_i32, %c0_i32_0 : i32, i32
  }
  func.func @transform_7(%arg0: i32) -> (i32, i32) {
    %c0_i32 = arith.constant 0 : i32
    %c0_i32_0 = arith.constant 0 : i32
    %c0_i32_1 = arith.constant 0 : i32
    return %c0_i32, %c0_i32_0 : i32, i32
  }
}

module attributes {stable_mosaic.version = 11 : i64} {
  func.func @_fused_conv3x3_kernel(%arg0: i32, %arg1: memref<1x362x8xf32, #tpu.memory_space<vmem>>, %arg2: memref<1x8xf32, #tpu.memory_space<vmem>>, %arg3: memref<1x8xf32, #tpu.memory_space<vmem>>, %arg4: memref<362x1xf32, #tpu.memory_space<vmem>>, %arg5: memref<72x8xbf16, #tpu.memory_space<vmem>>, %arg6: memref<1x8xf32, #tpu.memory_space<vmem>>, %arg7: memref<1x324x8xf32, #tpu.memory_space<vmem>>, %arg8: memref<1x8xf32, #tpu.memory_space<vmem>>, %arg9: memref<1x8xf32, #tpu.memory_space<vmem>>, %arg10: memref<362x8xbf16, #tpu.memory_space<vmem>>) attributes {dimension_semantics = [#tpu.dimension_semantics<arbitrary>], iteration_bounds = array<i64: 2>, scalar_prefetch = 0 : i64, scratch_operands = 1 : i64, tpu.core_type = #tpu.core_type<tc>, window_params = [{transform_indices = @transform_0, window_bounds = array<i64: 1, 362, 8>}, {pipeline_mode = #tpu.pipeline_mode<synchronous>, transform_indices = @transform_1, window_bounds = array<i64: 1, 8>}, {pipeline_mode = #tpu.pipeline_mode<synchronous>, transform_indices = @transform_2, window_bounds = array<i64: 1, 8>}, {pipeline_mode = #tpu.pipeline_mode<synchronous>, transform_indices = @transform_3, window_bounds = array<i64: 362, 1>}, {pipeline_mode = #tpu.pipeline_mode<synchronous>, transform_indices = @transform_4, window_bounds = array<i64: 72, 8>}, {pipeline_mode = #tpu.pipeline_mode<synchronous>, transform_indices = @transform_5, window_bounds = array<i64: 1, 8>}, {transform_indices = @transform_6, window_bounds = array<i64: 1, 324, 8>}, {pipeline_mode = #tpu.pipeline_mode<synchronous>, transform_indices = @transform_7, window_bounds = array<i64: 1, 8>}, {pipeline_mode = #tpu.pipeline_mode<synchronous>, transform_indices = @transform_8, window_bounds = array<i64: 1, 8>}]} {
    %c0 = arith.constant 0 : index
    %c0_0 = arith.constant 0 : index
    %c0_1 = arith.constant 0 : index
    %0 = vector.load %arg1[%c0, %c0_0, %c0_1] : memref<1x362x8xf32, #tpu.memory_space<vmem>>, vector<1x362x8xf32>
    %1 = vector.shape_cast %0 : vector<1x362x8xf32> to vector<362x8xf32>
    %c0_2 = arith.constant 0 : index
    %c0_3 = arith.constant 0 : index
    %2 = vector.load %arg2[%c0_2, %c0_3] : memref<1x8xf32, #tpu.memory_space<vmem>>, vector<1x8xf32>
    %3 = vector.broadcast %2 : vector<1x8xf32> to vector<362x8xf32>
    %4 = arith.mulf %1, %3 : vector<362x8xf32>
    %c0_4 = arith.constant 0 : index
    %c0_5 = arith.constant 0 : index
    %5 = vector.load %arg3[%c0_4, %c0_5] : memref<1x8xf32, #tpu.memory_space<vmem>>, vector<1x8xf32>
    %6 = vector.broadcast %5 : vector<1x8xf32> to vector<362x8xf32>
    %7 = arith.addf %4, %6 : vector<362x8xf32>
    %cst = arith.constant 0.000000e+00 : f32
    %8 = vector.broadcast %cst : f32 to vector<362x8xf32>
    %9 = arith.maximumf %7, %8 : vector<362x8xf32>
    %c0_6 = arith.constant 0 : index
    %c0_7 = arith.constant 0 : index
    %10 = vector.load %arg4[%c0_6, %c0_7] : memref<362x1xf32, #tpu.memory_space<vmem>>, vector<362x1xf32>
    %11 = vector.broadcast %10 : vector<362x1xf32> to vector<362x8xf32>
    %12 = arith.mulf %9, %11 : vector<362x8xf32>
    %13 = arith.truncf %12 : vector<362x8xf32> to vector<362x8xbf16>
    %c0_8 = arith.constant 0 : index
    %c0_9 = arith.constant 0 : index
    %14 = vector.load %arg10[%c0_8, %c0_9] : memref<362x8xbf16, #tpu.memory_space<vmem>>, vector<362x8xbf16>
    tpu.vector_store %arg10[%c0_8, %c0_9], %13 {strides = array<i32>} : memref<362x8xbf16, #tpu.memory_space<vmem>>, vector<362x8xbf16>,
    %c0_10 = arith.constant 0 : index
    %c0_11 = arith.constant 0 : index
    %15 = vector.load %arg10[%c0_10, %c0_11] : memref<362x8xbf16, #tpu.memory_space<vmem>>, vector<324x8xbf16>
    %c1 = arith.constant 1 : index
    %c0_12 = arith.constant 0 : index
    %16 = vector.load %arg10[%c1, %c0_12] : memref<362x8xbf16, #tpu.memory_space<vmem>>, vector<324x8xbf16>
    %c2 = arith.constant 2 : index
    %c0_13 = arith.constant 0 : index
    %17 = vector.load %arg10[%c2, %c0_13] : memref<362x8xbf16, #tpu.memory_space<vmem>>, vector<324x8xbf16>
    %c18 = arith.constant 18 : index
    %c0_14 = arith.constant 0 : index
    %18 = vector.load %arg10[%c18, %c0_14] : memref<362x8xbf16, #tpu.memory_space<vmem>>, vector<324x8xbf16>
    %c19 = arith.constant 19 : index
    %c0_15 = arith.constant 0 : index
    %19 = vector.load %arg10[%c19, %c0_15] : memref<362x8xbf16, #tpu.memory_space<vmem>>, vector<324x8xbf16>
    %c20 = arith.constant 20 : index
    %c0_16 = arith.constant 0 : index
    %20 = vector.load %arg10[%c20, %c0_16] : memref<362x8xbf16, #tpu.memory_space<vmem>>, vector<324x8xbf16>
    %c36 = arith.constant 36 : index
    %c0_17 = arith.constant 0 : index
    %21 = vector.load %arg10[%c36, %c0_17] : memref<362x8xbf16, #tpu.memory_space<vmem>>, vector<324x8xbf16>
    %c37 = arith.constant 37 : index
    %c0_18 = arith.constant 0 : index
    %22 = vector.load %arg10[%c37, %c0_18] : memref<362x8xbf16, #tpu.memory_space<vmem>>, vector<324x8xbf16>
    %c38 = arith.constant 38 : index
    %c0_19 = arith.constant 0 : index
    %23 = vector.load %arg10[%c38, %c0_19] : memref<362x8xbf16, #tpu.memory_space<vmem>>, vector<324x8xbf16>
    %24 = tpu.concatenate %15, %16, %17, %18, %19, %20, %21, %22, %23 in 1 : vector<324x8xbf16>, vector<324x8xbf16>, vector<324x8xbf16>, vector<324x8xbf16>, vector<324x8xbf16>, vector<324x8xbf16>, vector<324x8xbf16>, vector<324x8xbf16>, vector<324x8xbf16> -> vector<324x72xbf16>
    %c0_20 = arith.constant 0 : index
    %c0_21 = arith.constant 0 : index
    %25 = vector.load %arg5[%c0_20, %c0_21] : memref<72x8xbf16, #tpu.memory_space<vmem>>, vector<72x8xbf16>
    %cst_22 = arith.constant dense<0.000000e+00> : vector<324x8xf32>
    %26 = tpu.matmul %24, %25, %cst_22 {dimension_numbers = #tpu.dot_dimension_numbers<[1], [0], [0], [1], [0, 0, 1, 1], [], []>} : vector<324x72xbf16>, vector<72x8xbf16>, vector<324x8xf32> -> vector<324x8xf32>
    %c19_23 = arith.constant 19 : index
    %c0_24 = arith.constant 0 : index
    %27 = vector.load %arg4[%c19_23, %c0_24] : memref<362x1xf32, #tpu.memory_space<vmem>>, vector<324x1xf32>
    %c0_25 = arith.constant 0 : index
    %c0_26 = arith.constant 0 : index
    %28 = vector.load %arg6[%c0_25, %c0_26] : memref<1x8xf32, #tpu.memory_space<vmem>>, vector<1x8xf32>
    %29 = vector.broadcast %28 : vector<1x8xf32> to vector<324x8xf32>
    %30 = arith.addf %26, %29 : vector<324x8xf32>
    %31 = vector.broadcast %27 : vector<324x1xf32> to vector<324x8xf32>
    %32 = arith.mulf %30, %31 : vector<324x8xf32>
    %c0_i32 = arith.constant 0 : i32
    %33 = arith.cmpi eq, %arg0, %c0_i32 : i32
    %34 = arith.extui %33 : i1 to i32
    %c0_i32_27 = arith.constant 0 : i32
    %35 = arith.cmpi ne, %34, %c0_i32_27 : i32
    scf.if %35 {
      %cst_41 = arith.constant 0.000000e+00 : f32
      %50 = vector.broadcast %cst_41 : f32 to vector<1x8xf32>
      %c0_42 = arith.constant 0 : index
      %c0_43 = arith.constant 0 : index
      %51 = vector.load %arg8[%c0_42, %c0_43] : memref<1x8xf32, #tpu.memory_space<vmem>>, vector<1x8xf32>
      tpu.vector_store %arg8[%c0_42, %c0_43], %50 {strides = array<i32>} : memref<1x8xf32, #tpu.memory_space<vmem>>, vector<1x8xf32>,
      %cst_44 = arith.constant 0.000000e+00 : f32
      %52 = vector.broadcast %cst_44 : f32 to vector<1x8xf32>
      %c0_45 = arith.constant 0 : index
      %c0_46 = arith.constant 0 : index
      %53 = vector.load %arg9[%c0_45, %c0_46] : memref<1x8xf32, #tpu.memory_space<vmem>>, vector<1x8xf32>
      tpu.vector_store %arg9[%c0_45, %c0_46], %52 {strides = array<i32>} : memref<1x8xf32, #tpu.memory_space<vmem>>, vector<1x8xf32>,
    } else {
    }
    %c0_28 = arith.constant 0 : index
    %c0_29 = arith.constant 0 : index
    %36 = vector.load %arg8[%c0_28, %c0_29] : memref<1x8xf32, #tpu.memory_space<vmem>>, vector<1x8xf32>
    %cst_30 = arith.constant dense<0.000000e+00> : vector<8xf32>
    %37 = vector.multi_reduction <add>, %32, %cst_30 [0] : vector<324x8xf32> to vector<8xf32>
    %38 = vector.shape_cast %37 : vector<8xf32> to vector<1x8xf32>
    %39 = arith.addf %36, %38 : vector<1x8xf32>
    %c0_31 = arith.constant 0 : index
    %c0_32 = arith.constant 0 : index
    %40 = vector.load %arg8[%c0_31, %c0_32] : memref<1x8xf32, #tpu.memory_space<vmem>>, vector<1x8xf32>
    tpu.vector_store %arg8[%c0_31, %c0_32], %39 {strides = array<i32>} : memref<1x8xf32, #tpu.memory_space<vmem>>, vector<1x8xf32>,
    %c0_33 = arith.constant 0 : index
    %c0_34 = arith.constant 0 : index
    %41 = vector.load %arg9[%c0_33, %c0_34] : memref<1x8xf32, #tpu.memory_space<vmem>>, vector<1x8xf32>
    %42 = arith.mulf %32, %32 : vector<324x8xf32>
    %cst_35 = arith.constant dense<0.000000e+00> : vector<8xf32>
    %43 = vector.multi_reduction <add>, %42, %cst_35 [0] : vector<324x8xf32> to vector<8xf32>
    %44 = vector.shape_cast %43 : vector<8xf32> to vector<1x8xf32>
    %45 = arith.addf %41, %44 : vector<1x8xf32>
    %c0_36 = arith.constant 0 : index
    %c0_37 = arith.constant 0 : index
    %46 = vector.load %arg9[%c0_36, %c0_37] : memref<1x8xf32, #tpu.memory_space<vmem>>, vector<1x8xf32>
    tpu.vector_store %arg9[%c0_36, %c0_37], %45 {strides = array<i32>} : memref<1x8xf32, #tpu.memory_space<vmem>>, vector<1x8xf32>,
    %c0_38 = arith.constant 0 : index
    %c0_39 = arith.constant 0 : index
    %c0_40 = arith.constant 0 : index
    %47 = vector.load %arg7[%c0_38, %c0_39, %c0_40] : memref<1x324x8xf32, #tpu.memory_space<vmem>>, vector<1x324x8xf32>
    %48 = vector.shape_cast %47 : vector<1x324x8xf32> to vector<324x8xf32>
    %49 = vector.shape_cast %32 : vector<324x8xf32> to vector<1x324x8xf32>
    tpu.vector_store %arg7[%c0_38, %c0_39, %c0_40], %49 {strides = array<i32>} : memref<1x324x8xf32, #tpu.memory_space<vmem>>, vector<1x324x8xf32>,
    return
  }
  func.func @transform_0(%arg0: i32) -> (i32, i32, i32) {
    %c0_i32 = arith.constant 0 : i32
    %c0_i32_0 = arith.constant 0 : i32
    %c0_i32_1 = arith.constant 0 : i32
    return %arg0, %c0_i32, %c0_i32_0 : i32, i32, i32
  }
  func.func @transform_1(%arg0: i32) -> (i32, i32) {
    %c0_i32 = arith.constant 0 : i32
    %c0_i32_0 = arith.constant 0 : i32
    %c0_i32_1 = arith.constant 0 : i32
    return %c0_i32, %c0_i32_0 : i32, i32
  }
  func.func @transform_2(%arg0: i32) -> (i32, i32) {
    %c0_i32 = arith.constant 0 : i32
    %c0_i32_0 = arith.constant 0 : i32
    %c0_i32_1 = arith.constant 0 : i32
    return %c0_i32, %c0_i32_0 : i32, i32
  }
  func.func @transform_3(%arg0: i32) -> (i32, i32) {
    %c0_i32 = arith.constant 0 : i32
    %c0_i32_0 = arith.constant 0 : i32
    %c0_i32_1 = arith.constant 0 : i32
    return %c0_i32, %c0_i32_0 : i32, i32
  }
  func.func @transform_4(%arg0: i32) -> (i32, i32) {
    %c0_i32 = arith.constant 0 : i32
    %c0_i32_0 = arith.constant 0 : i32
    %c0_i32_1 = arith.constant 0 : i32
    return %c0_i32, %c0_i32_0 : i32, i32
  }
  func.func @transform_5(%arg0: i32) -> (i32, i32) {
    %c0_i32 = arith.constant 0 : i32
    %c0_i32_0 = arith.constant 0 : i32
    %c0_i32_1 = arith.constant 0 : i32
    return %c0_i32, %c0_i32_0 : i32, i32
  }
  func.func @transform_6(%arg0: i32) -> (i32, i32, i32) {
    %c0_i32 = arith.constant 0 : i32
    %c0_i32_0 = arith.constant 0 : i32
    %c0_i32_1 = arith.constant 0 : i32
    return %arg0, %c0_i32, %c0_i32_0 : i32, i32, i32
  }
  func.func @transform_7(%arg0: i32) -> (i32, i32) {
    %c0_i32 = arith.constant 0 : i32
    %c0_i32_0 = arith.constant 0 : i32
    %c0_i32_1 = arith.constant 0 : i32
    return %c0_i32, %c0_i32_0 : i32, i32
  }
  func.func @transform_8(%arg0: i32) -> (i32, i32) {
    %c0_i32 = arith.constant 0 : i32
    %c0_i32_0 = arith.constant 0 : i32
    %c0_i32_1 = arith.constant 0 : i32
    return %c0_i32, %c0_i32_0 : i32, i32
  }
}

module attributes {stable_mosaic.version = 11 : i64} {
  func.func @_affine_relu_kernel(%arg0: i32, %arg1: memref<1x324x8xf32, #tpu.memory_space<vmem>>, %arg2: memref<1x8xf32, #tpu.memory_space<vmem>>, %arg3: memref<1x8xf32, #tpu.memory_space<vmem>>, %arg4: memref<1x324x8xf32, #tpu.memory_space<vmem>>) attributes {dimension_semantics = [#tpu.dimension_semantics<parallel>], iteration_bounds = array<i64: 2>, scalar_prefetch = 0 : i64, scratch_operands = 0 : i64, tpu.core_type = #tpu.core_type<tc>, window_params = [{transform_indices = @transform_0, window_bounds = array<i64: 1, 324, 8>}, {pipeline_mode = #tpu.pipeline_mode<synchronous>, transform_indices = @transform_1, window_bounds = array<i64: 1, 8>}, {pipeline_mode = #tpu.pipeline_mode<synchronous>, transform_indices = @transform_2, window_bounds = array<i64: 1, 8>}, {transform_indices = @transform_3, window_bounds = array<i64: 1, 324, 8>}]} {
    %c0 = arith.constant 0 : index
    %c0_0 = arith.constant 0 : index
    %c0_1 = arith.constant 0 : index
    %0 = vector.load %arg1[%c0, %c0_0, %c0_1] : memref<1x324x8xf32, #tpu.memory_space<vmem>>, vector<1x324x8xf32>
    %1 = vector.shape_cast %0 : vector<1x324x8xf32> to vector<324x8xf32>
    %c0_2 = arith.constant 0 : index
    %c0_3 = arith.constant 0 : index
    %2 = vector.load %arg2[%c0_2, %c0_3] : memref<1x8xf32, #tpu.memory_space<vmem>>, vector<1x8xf32>
    %3 = vector.broadcast %2 : vector<1x8xf32> to vector<324x8xf32>
    %4 = arith.mulf %1, %3 : vector<324x8xf32>
    %c0_4 = arith.constant 0 : index
    %c0_5 = arith.constant 0 : index
    %5 = vector.load %arg3[%c0_4, %c0_5] : memref<1x8xf32, #tpu.memory_space<vmem>>, vector<1x8xf32>
    %6 = vector.broadcast %5 : vector<1x8xf32> to vector<324x8xf32>
    %7 = arith.addf %4, %6 : vector<324x8xf32>
    %cst = arith.constant 0.000000e+00 : f32
    %8 = vector.broadcast %cst : f32 to vector<324x8xf32>
    %9 = arith.maximumf %7, %8 : vector<324x8xf32>
    %c0_6 = arith.constant 0 : index
    %c0_7 = arith.constant 0 : index
    %c0_8 = arith.constant 0 : index
    %10 = vector.load %arg4[%c0_6, %c0_7, %c0_8] : memref<1x324x8xf32, #tpu.memory_space<vmem>>, vector<1x324x8xf32>
    %11 = vector.shape_cast %10 : vector<1x324x8xf32> to vector<324x8xf32>
    %12 = vector.shape_cast %9 : vector<324x8xf32> to vector<1x324x8xf32>
    tpu.vector_store %arg4[%c0_6, %c0_7, %c0_8], %12 {strides = array<i32>} : memref<1x324x8xf32, #tpu.memory_space<vmem>>, vector<1x324x8xf32>,
    return
  }
  func.func @transform_0(%arg0: i32) -> (i32, i32, i32) {
    %c0_i32 = arith.constant 0 : i32
    %c0_i32_0 = arith.constant 0 : i32
    %c0_i32_1 = arith.constant 0 : i32
    return %arg0, %c0_i32, %c0_i32_0 : i32, i32, i32
  }
  func.func @transform_1(%arg0: i32) -> (i32, i32) {
    %c0_i32 = arith.constant 0 : i32
    %c0_i32_0 = arith.constant 0 : i32
    %c0_i32_1 = arith.constant 0 : i32
    return %c0_i32, %c0_i32_0 : i32, i32
  }
  func.func @transform_2(%arg0: i32) -> (i32, i32) {
    %c0_i32 = arith.constant 0 : i32
    %c0_i32_0 = arith.constant 0 : i32
    %c0_i32_1 = arith.constant 0 : i32
    return %c0_i32, %c0_i32_0 : i32, i32
  }
  func.func @transform_3(%arg0: i32) -> (i32, i32, i32) {
    %c0_i32 = arith.constant 0 : i32
    %c0_i32_0 = arith.constant 0 : i32
    %c0_i32_1 = arith.constant 0 : i32
    return %arg0, %c0_i32, %c0_i32_0 : i32, i32, i32
  }
}

</mosaic_0001>

<bundles_post_ra>
// kernel: upconv_block_forward.7
= control target key start
LH: loop header
LB: loop body
LE: loop exit
PB: predicated region body
PF: predicated region fallthrough
CT: control target
= control target key end

     0   :  { %s495_s12 = smov 0   ;;  %s730_s0 = inlined_call_operand.vmem [shape: f32[2,324,8], index: 0, kind: input, shape index: {}]   ;;  %s731_s1 = inlined_call_operand.vmem [shape: f32[1,8], index: 1, kind: input, shape index: {}]   ;;  %s732_s2 = inlined_call_operand.vmem [shape: f32[1,8], index: 2, kind: input, shape index: {}]   ;;  %s733_s3 = inlined_call_operand.vmem [shape: f32[2,324,8], index: 3, kind: output, shape index: {}]  }
   0x1 LB: > { %s447_s13 = sadd.s32 4294967295, %s473_s12   ;;  %p451_p0 = scmp.ge.s32.totalorder %s473_s12, 1  ;;  %s473_s12 = sphi %s495_s12, %s13_s12  }
   0x2   : > { %p137_p1 = scmp.lt.s32.totalorder %s473_s12, 3 }
   0x4   : > { %p138_p2 = pnand %p451_p0, %p137_p1 }
   0x5   : > { %p161_p3 = scmp.lt.s32.totalorder (!%p138_p2), %s447_s13, 1  ;;  %v506_v0 = vld [vmem:[%s731_s1] ss:$0 sm:$0xff] (!%p138_p2)  ;;  %vm349_vm0 = vcmask (!%p138_p2), 64512   ;;  %vm390_vm1 = vcmask (!%p138_p2), 60416  }
   0x6   : > { %141 = sbr.rel (%p138_p2) target bundleno = 55 (0x37), region = 32  ;;  %v516_v1 = vld [vmem:[%s732_s2] ss:$0 sm:$0xff] (!%p138_p2) }
   0xd   : > { %s735_s13 = smov (!%p161_p3, %s447_s13), 1 }
   0xe   : > { %s458_s14 = smul.u32 328, %s735_s13 }
  0x10   : > { %s511_s19 = scalar_lea.vmem %s730_s0, %s458_s14  ;;  %s539_s24 = scalar_lea.vmem %s733_s3, %s458_s14 }
  0x11   : > { %v171_v2 = vld [vmem:[%s511_s19] sm:$0xff]  ;;  %v172_v3 = vld [vmem:[%s511_s19 + $0x8] sm:$0xff]  ;;  %v173_v4 = vld [vmem:[%s511_s19 + $0x10] sm:$0xff] }
  0x12   : > { %v219_v5 = vmul.f32 %v506_v0, %v171_v2  ;;  %v220_v6 = vmul.f32 %v506_v0, %v172_v3  ;;  %v221_v7 = vmul.f32 %v506_v0, %v173_v4  ;;  %v174_v8 = vld [vmem:[%s511_s19 + $0x18] sm:$0xff]  ;;  %v175_v9 = vld [vmem:[%s511_s19 + $0x20] sm:$0xff]  ;;  %v176_v10 = vld [vmem:[%s511_s19 + $0x28] sm:$0xff] }
  0x13   : > { %v222_v11 = vmul.f32 %v506_v0, %v174_v8  ;;  %v223_v12 = vmul.f32 %v506_v0, %v175_v9  ;;  %v224_v13 = vmul.f32 %v506_v0, %v176_v10  ;;  %v177_v14 = vld [vmem:[%s511_s19 + $0x30] sm:$0xff]  ;;  %v178_v15 = vld [vmem:[%s511_s19 + $0x38] sm:$0xff]  ;;  %v179_v24 = vld [vmem:[%s511_s19 + $0x40] sm:$0xff] }
  0x14   : > { %v267_v16 = vadd.f32 %v516_v1, %v219_v5  ;;  %v268_v17 = vadd.f32 %v516_v1, %v220_v6  ;;  %v269_v18 = vadd.f32 %v516_v1, %v221_v7  ;;  %v225_v19 = vmul.f32 %v506_v0, %v177_v14  ;;  %v180_v25 = vld [vmem:[%s511_s19 + $0x48] sm:$0xff]  ;;  %v181_v26 = vld [vmem:[%s511_s19 + $0x50] sm:$0xff]  ;;  %v182_v31 = vld [vmem:[%s511_s19 + $0x58] sm:$0xff] }
  0x15   : > { %v270_v20 = vadd.f32 %v516_v1, %v222_v11  ;;  %v271_v21 = vadd.f32 %v516_v1, %v223_v12  ;;  %v272_v22 = vadd.f32 %v516_v1, %v224_v13  ;;  %v226_v23 = vmul.f32 %v506_v0, %v178_v15  ;;  %v183_v32 = vld [vmem:[%s511_s19 + $0x60] sm:$0xff]  ;;  %v184_v33 = vld [vmem:[%s511_s19 + $0x68] sm:$0xff]  ;;  %v185_v38 = vld [vmem:[%s511_s19 + $0x70] sm:$0xff] }
  0x16   : > { %v308_v27 = vmax.f32 %v267_v16, 0.0  ;;  %v309_v28 = vmax.f32 %v268_v17, 0.0  ;;  %v310_v29 = vmax.f32 %v269_v18, 0.0  ;;  %v273_v30 = vadd.f32 %v516_v1, %v225_v19  ;;  %v186_v43 = vld [vmem:[%s511_s19 + $0x78] sm:$0xff]  ;;  %v187_v56 = vld [vmem:[%s511_s19 + $0x80] sm:$0xff]  ;;  %v188_v57 = vld [vmem:[%s511_s19 + $0x88] sm:$0xff] }
  0x17   : > { %v311_v34 = vmax.f32 %v270_v20, 0.0  ;;  %v312_v35 = vmax.f32 %v271_v21, 0.0  ;;  %v313_v36 = vmax.f32 %v272_v22, 0.0  ;;  %v274_v37 = vadd.f32 %v516_v1, %v226_v23  ;;  %v189_v58 = vld [vmem:[%s511_s19 + $0x90] sm:$0xff]  ;;  %v190_v63 = vld [vmem:[%s511_s19 + $0x98] sm:$0xff]  ;;  %v191_v2 = vld [vmem:[%s511_s19 + $0xa0] sm:$0xff] }
  0x18   : > { %350 = vst.msk [vmem:[%s539_s24] sm:$0xff] %vm349_vm0, %v308_v27  ;;  %351 = vst.msk [vmem:[%s539_s24 + $0x8] sm:$0xff] %vm349_vm0, %v309_v28  ;;  %v314_v39 = vmax.f32 %v273_v30, 0.0  ;;  %v227_v40 = vmul.f32 %v506_v0, %v179_v24  ;;  %v228_v41 = vmul.f32 %v506_v0, %v180_v25  ;;  %v229_v42 = vmul.f32 %v506_v0, %v181_v26  ;;  %v192_v3 = vld [vmem:[%s511_s19 + $0xa8] sm:$0xff]  ;;  %v193_v8 = vld [vmem:[%s511_s19 + $0xb0] sm:$0xff] }
  0x19   : > { %352 = vst.msk [vmem:[%s539_s24 + $0x10] sm:$0xff] %vm349_vm0, %v310_v29  ;;  %353 = vst.msk [vmem:[%s539_s24 + $0x18] sm:$0xff] %vm349_vm0, %v311_v34  ;;  %v315_v44 = vmax.f32 %v274_v37, 0.0  ;;  %v230_v45 = vmul.f32 %v506_v0, %v182_v31  ;;  %v231_v46 = vmul.f32 %v506_v0, %v183_v32  ;;  %v232_v47 = vmul.f32 %v506_v0, %v184_v33  ;;  %v194_v13 = vld [vmem:[%s511_s19 + $0xb8] sm:$0xff]  ;;  %v195_v26 = vld [vmem:[%s511_s19 + $0xc0] sm:$0xff] }
  0x1a   : > { %354 = vst.msk [vmem:[%s539_s24 + $0x20] sm:$0xff] %vm349_vm0, %v312_v35  ;;  %355 = vst.msk [vmem:[%s539_s24 + $0x28] sm:$0xff] %vm349_vm0, %v313_v36  ;;  %v275_v48 = vadd.f32 %v516_v1, %v227_v40  ;;  %v276_v49 = vadd.f32 %v516_v1, %v228_v41  ;;  %v277_v50 = vadd.f32 %v516_v1, %v229_v42  ;;  %v196_v27 = vld [vmem:[%s511_s19 + $0xc8] sm:$0xff]  ;;  %v197_v28 = vld [vmem:[%s511_s19 + $0xd0] sm:$0xff] }
  0x1b   : > { %356 = vst.msk [vmem:[%s539_s24 + $0x30] sm:$0xff] %vm349_vm0, %v314_v39  ;;  %v233_v51 = vmul.f32 %v506_v0, %v185_v38  ;;  %357 = vst.msk [vmem:[%s539_s24 + $0x38] sm:$0xff] %vm349_vm0, %v315_v44  ;;  %v278_v52 = vadd.f32 %v516_v1, %v230_v45  ;;  %v279_v53 = vadd.f32 %v516_v1, %v231_v46  ;;  %v198_v33 = vld [vmem:[%s511_s19 + $0xd8] sm:$0xff]  ;;  %v199_v34 = vld [vmem:[%s511_s19 + $0xe0] sm:$0xff] }
  0x1c   : > { %v280_v54 = vadd.f32 %v516_v1, %v232_v47  ;;  %v234_v55 = vmul.f32 %v506_v0, %v186_v43  ;;  %v316_v59 = vmax.f32 %v275_v48, 0.0  ;;  %v317_v60 = vmax.f32 %v276_v49, 0.0  ;;  %v200_v35 = vld [vmem:[%s511_s19 + $0xe8] sm:$0xff]  ;;  %v201_v40 = vld [vmem:[%s511_s19 + $0xf0] sm:$0xff]  ;;  %v202_v45 = vld [vmem:[%s511_s19 + $0xf8] sm:$0xff] }
  0x1d   : > { %v318_v61 = vmax.f32 %v277_v50, 0.0  ;;  %v281_v62 = vadd.f32 %v516_v1, %v233_v51  ;;  %v319_v4 = vmax.f32 %v278_v52, 0.0  ;;  %v320_v5 = vmax.f32 %v279_v53, 0.0 }
  0x1e   : > { %v321_v6 = vmax.f32 %v280_v54, 0.0  ;;  %v282_v7 = vadd.f32 %v516_v1, %v234_v55  ;;  %358 = vst.msk [vmem:[%s539_s24 + $0x40] sm:$0xff] %vm349_vm0, %v316_v59  ;;  %359 = vst.msk [vmem:[%s539_s24 + $0x48] sm:$0xff] %vm349_vm0, %v317_v60  ;;  %v235_v10 = vmul.f32 %v506_v0, %v187_v56  ;;  %v236_v11 = vmul.f32 %v506_v0, %v188_v57  ;;  %v204_v59 = vld [vmem:[%s511_s19 + $0x108] sm:$0xff]  ;;  %v205_v60 = vld [vmem:[%s511_s19 + $0x110] sm:$0xff] }
  0x1f   : > { %360 = vst.msk [vmem:[%s539_s24 + $0x50] sm:$0xff] %vm349_vm0, %v318_v61  ;;  %v322_v9 = vmax.f32 %v281_v62, 0.0  ;;  %v237_v12 = vmul.f32 %v506_v0, %v189_v58  ;;  %361 = vst.msk [vmem:[%s539_s24 + $0x58] sm:$0xff] %vm349_vm0, %v319_v4  ;;  %v238_v15 = vmul.f32 %v506_v0, %v190_v63  ;;  %v239_v16 = vmul.f32 %v506_v0, %v191_v2  ;;  %v203_v58 = vld [vmem:[%s511_s19 + $0x100] sm:$0xff] }
  0x20   : > { %362 = vst.msk [vmem:[%s539_s24 + $0x60] sm:$0xff] %vm349_vm0, %v320_v5  ;;  %363 = vst.msk [vmem:[%s539_s24 + $0x68] sm:$0xff] %vm349_vm0, %v321_v6  ;;  %v323_v14 = vmax.f32 %v282_v7, 0.0  ;;  %v240_v17 = vmul.f32 %v506_v0, %v192_v3  ;;  %v283_v18 = vadd.f32 %v516_v1, %v235_v10  ;;  %v284_v19 = vadd.f32 %v516_v1, %v236_v11  ;;  %v206_v3 = vld [vmem:[%s511_s19 + $0x118] sm:$0xff]  ;;  %v207_v4 = vld [vmem:[%s511_s19 + $0x120] sm:$0xff] }
  0x21   : > { %364 = vst.msk [vmem:[%s539_s24 + $0x70] sm:$0xff] %vm349_vm0, %v322_v9  ;;  %v285_v20 = vadd.f32 %v516_v1, %v237_v12  ;;  %v241_v21 = vmul.f32 %v506_v0, %v193_v8  ;;  %v286_v22 = vadd.f32 %v516_v1, %v238_v15  ;;  %v287_v23 = vadd.f32 %v516_v1, %v239_v16  ;;  %v208_v5 = vld [vmem:[%s511_s19 + $0x128] sm:$0xff]  ;;  %v209_v10 = vld [vmem:[%s511_s19 + $0x130] sm:$0xff]  ;;  %v210_v15 = vld [vmem:[%s511_s19 + $0x138] sm:$0xff] }
  0x22   : > { %365 = vst.msk [vmem:[%s539_s24 + $0x78] sm:$0xff] %vm349_vm0, %v323_v14  ;;  %v288_v24 = vadd.f32 %v516_v1, %v240_v17  ;;  %v242_v25 = vmul.f32 %v506_v0, %v194_v13  ;;  %v324_v29 = vmax.f32 %v283_v18, 0.0  ;;  %v325_v30 = vmax.f32 %v284_v19, 0.0 }
  0x23   : > { %v326_v31 = vmax.f32 %v285_v20, 0.0  ;;  %v289_v32 = vadd.f32 %v516_v1, %v241_v21  ;;  %v327_v36 = vmax.f32 %v286_v22, 0.0  ;;  %v328_v37 = vmax.f32 %v287_v23, 0.0 }
  0x24   : > { %v329_v38 = vmax.f32 %v288_v24, 0.0  ;;  %v290_v39 = vadd.f32 %v516_v1, %v242_v25  ;;  %366 = vst.msk [vmem:[%s539_s24 + $0x80] sm:$0xff] %vm349_vm0, %v324_v29  ;;  %367 = vst.msk [vmem:[%s539_s24 + $0x88] sm:$0xff] %vm349_vm0, %v325_v30  ;;  %v243_v42 = vmul.f32 %v506_v0, %v195_v26  ;;  %v244_v43 = vmul.f32 %v506_v0, %v196_v27 }
  0x25   : > { %368 = vst.msk [vmem:[%s539_s24 + $0x90] sm:$0xff] %vm349_vm0, %v326_v31  ;;  %v330_v41 = vmax.f32 %v289_v32, 0.0  ;;  %v245_v44 = vmul.f32 %v506_v0, %v197_v28  ;;  %369 = vst.msk [vmem:[%s539_s24 + $0x98] sm:$0xff] %vm349_vm0, %v327_v36  ;;  %v246_v47 = vmul.f32 %v506_v0, %v198_v33  ;;  %v247_v48 = vmul.f32 %v506_v0, %v199_v34  ;;  %v211_v28 = vld [vmem:[%s511_s19 + $0x140] sm:$0xf] }
  0x26   : > { %370 = vst.msk [vmem:[%s539_s24 + $0xa0] sm:$0xff] %vm349_vm0, %v328_v37  ;;  %371 = vst.msk [vmem:[%s539_s24 + $0xa8] sm:$0xff] %vm349_vm0, %v329_v38  ;;  %v331_v46 = vmax.f32 %v290_v39, 0.0  ;;  %v248_v49 = vmul.f32 %v506_v0, %v200_v35  ;;  %v291_v50 = vadd.f32 %v516_v1, %v243_v42  ;;  %v292_v51 = vadd.f32 %v516_v1, %v244_v43 }
  0x27   : > { %372 = vst.msk [vmem:[%s539_s24 + $0xb0] sm:$0xff] %vm349_vm0, %v330_v41  ;;  %v293_v52 = vadd.f32 %v516_v1, %v245_v44  ;;  %v249_v53 = vmul.f32 %v506_v0, %v201_v40  ;;  %v294_v54 = vadd.f32 %v516_v1, %v246_v47  ;;  %v295_v55 = vadd.f32 %v516_v1, %v247_v48 }
  0x28   : > { %373 = vst.msk [vmem:[%s539_s24 + $0xb8] sm:$0xff] %vm349_vm0, %v331_v46  ;;  %v296_v56 = vadd.f32 %v516_v1, %v248_v49  ;;  %v250_v57 = vmul.f32 %v506_v0, %v202_v45  ;;  %v332_v61 = vmax.f32 %v291_v50, 0.0  ;;  %v333_v62 = vmax.f32 %v292_v51, 0.0 }
  0x29   : > { %v334_v63 = vmax.f32 %v293_v52, 0.0  ;;  %v297_v2 = vadd.f32 %v516_v1, %v249_v53  ;;  %v335_v6 = vmax.f32 %v294_v54, 0.0  ;;  %v336_v7 = vmax.f32 %v295_v55, 0.0 }
  0x2a   : > { %v337_v8 = vmax.f32 %v296_v56, 0.0  ;;  %v298_v9 = vadd.f32 %v516_v1, %v250_v57  ;;  %374 = vst.msk [vmem:[%s539_s24 + $0xc0] sm:$0xff] %vm349_vm0, %v332_v61  ;;  %375 = vst.msk [vmem:[%s539_s24 + $0xc8] sm:$0xff] %vm349_vm0, %v333_v62  ;;  %v251_v12 = vmul.f32 %v506_v0, %v203_v58  ;;  %v252_v13 = vmul.f32 %v506_v0, %v204_v59 }
  0x2b   : > { %376 = vst.msk [vmem:[%s539_s24 + $0xd0] sm:$0xff] %vm349_vm0, %v334_v63  ;;  %v338_v11 = vmax.f32 %v297_v2, 0.0  ;;  %v253_v14 = vmul.f32 %v506_v0, %v205_v60  ;;  %377 = vst.msk [vmem:[%s539_s24 + $0xd8] sm:$0xff] %vm349_vm0, %v335_v6  ;;  %v254_v17 = vmul.f32 %v506_v0, %v206_v3  ;;  %v255_v18 = vmul.f32 %v506_v0, %v207_v4 }
  0x2c   : > { %378 = vst.msk [vmem:[%s539_s24 + $0xe0] sm:$0xff] %vm349_vm0, %v336_v7  ;;  %379 = vst.msk [vmem:[%s539_s24 + $0xe8] sm:$0xff] %vm349_vm0, %v337_v8  ;;  %v339_v16 = vmax.f32 %v298_v9, 0.0  ;;  %v256_v19 = vmul.f32 %v506_v0, %v208_v5  ;;  %v299_v20 = vadd.f32 %v516_v1, %v251_v12  ;;  %v300_v21 = vadd.f32 %v516_v1, %v252_v13 }
  0x2d   : > { %380 = vst.msk [vmem:[%s539_s24 + $0xf0] sm:$0xff] %vm349_vm0, %v338_v11  ;;  %v301_v22 = vadd.f32 %v516_v1, %v253_v14  ;;  %v257_v23 = vmul.f32 %v506_v0, %v209_v10  ;;  %v302_v24 = vadd.f32 %v516_v1, %v254_v17  ;;  %v303_v25 = vadd.f32 %v516_v1, %v255_v18 }
  0x2e   : > { %381 = vst.msk [vmem:[%s539_s24 + $0xf8] sm:$0xff] %vm349_vm0, %v339_v16  ;;  %v304_v26 = vadd.f32 %v516_v1, %v256_v19  ;;  %v258_v27 = vmul.f32 %v506_v0, %v210_v15  ;;  %v340_v29 = vmax.f32 %v299_v20, 0.0  ;;  %v341_v30 = vmax.f32 %v300_v21, 0.0 }
  0x2f   : > { %v342_v31 = vmax.f32 %v301_v22, 0.0  ;;  %v305_v32 = vadd.f32 %v516_v1, %v257_v23  ;;  %v343_v33 = vmax.f32 %v302_v24, 0.0  ;;  %v344_v34 = vmax.f32 %v303_v25, 0.0 }
  0x30   : > { %v345_v35 = vmax.f32 %v304_v26, 0.0  ;;  %v306_v36 = vadd.f32 %v516_v1, %v258_v27  ;;  %382 = vst.msk [vmem:[%s539_s24 + $0x100] sm:$0xff] %vm349_vm0, %v340_v29  ;;  %383 = vst.msk [vmem:[%s539_s24 + $0x108] sm:$0xff] %vm349_vm0, %v341_v30  ;;  %v259_v38 = vmul.f32 %v506_v0, %v211_v28 }
  0x31   : > { %384 = vst.msk [vmem:[%s539_s24 + $0x110] sm:$0xff] %vm349_vm0, %v342_v31  ;;  %v346_v37 = vmax.f32 %v305_v32, 0.0  ;;  %385 = vst.msk [vmem:[%s539_s24 + $0x118] sm:$0xff] %vm349_vm0, %v343_v33 }
  0x32   : > { %386 = vst.msk [vmem:[%s539_s24 + $0x120] sm:$0xff] %vm349_vm0, %v344_v34  ;;  %387 = vst.msk [vmem:[%s539_s24 + $0x128] sm:$0xff] %vm349_vm0, %v345_v35  ;;  %v347_v39 = vmax.f32 %v306_v36, 0.0  ;;  %v307_v40 = vadd.f32 %v516_v1, %v259_v38 }
  0x33   : > { %388 = vst.msk [vmem:[%s539_s24 + $0x130] sm:$0xff] %vm349_vm0, %v346_v37 }
  0x34   : > { %389 = vst.msk [vmem:[%s539_s24 + $0x138] sm:$0xff] %vm349_vm0, %v347_v39  ;;  %v348_v41 = vmax.f32 %v307_v40, 0.0 }
  0x36   : > { %391 = vst.msk [vmem:[%s539_s24 + $0x140] sm:$0xf] %vm390_vm1, %v348_v41 }
  0x37 PF: > { %s13_s12 = sadd.s32 1, %s473_s12  }
  0x38   : > { %p10_p4 = scmp.ge.s32.totalorder %s13_s12, 4  }
  0x3a   :  { %12 = sbr.rel (!%p10_p4) target bundleno = 1 (0x1), region = 62 }

// kernel: upconv_block_forward.4
= control target key start
LH: loop header
LB: loop body
LE: loop exit
PB: predicated region body
PF: predicated region fallthrough
CT: control target
= control target key end

     0   :  { %s2432_s15 = smov 0   ;;  %s3896_s0 = inlined_call_operand.vmem [shape: f32[2,362,8], index: 0, kind: input, shape index: {}]   ;;  %s3897_s1 = inlined_call_operand.vmem [shape: f32[362,1], index: 1, kind: input, shape index: {}]   ;;  %s3898_s2 = inlined_call_operand.vmem [shape: bf16[72,8], index: 2, kind: input, shape index: {}]   ;;  %s3899_s3 = inlined_call_operand.vmem [shape: f32[1,8], index: 3, kind: input, shape index: {}]   ;;  %s3900_s4 = inlined_call_operand.vmem [shape: f32[2,362,8], index: 4, kind: output, shape index: {}]  }
   0x1 LB: > { %s2195_s16 = sadd.s32 4294967295, %s2394_s15   ;;  %p2199_p0 = scmp.ge.s32.totalorder %s2394_s15, 1  ;;  %s2394_s15 = sphi %s2432_s15, %s14_s15  }
   0x2   : > { %p162_p1 = scmp.lt.s32.totalorder %s2394_s15, 3 }
   0x4   : > { %p163_p2 = pnand %p2199_p0, %p162_p1 }
   0x6   : > { %166 = sbr.rel (%p163_p2) target bundleno = 689 (0x2b1), region = 36 }
   0xd   : > { %p188_p3 = scmp.lt.s32.totalorder %s2195_s16, 1  ;;  %s2396_s21 = smov 8   ;;  %vm1601_vm0 = vcmask 1043456   ;;  %vm2401_vm1 = vmmov 0   ;;  %vm1109_vm2 = vcmask 64512   ;;  %vm1173_vm3 = vcmask 130048  }
   0xe   : > { %s2397_s22 = smov 16   ;;  %s2398_s23 = smov 24   ;;  %vm1216_vm4 = vcmask 195584   ;;  %vm1259_vm5 = vcmask 261120   ;;  %vm1302_vm6 = vcmask 326656   ;;  %vm1345_vm7 = vcmask 392192  }
   0xf   : > { %s3914_s16 = smov (!%p188_p3, %s2195_s16), 1  ;;  %s2400_s30 = smov 32   ;;  %vm1388_vm8 = vcmask 457728   ;;  %vm1431_vm9 = vcmask 523264   ;;  %vm1558_vm10 = vcmask 588800   ;;  %vm2096_vm11 = vcmask 58368  }
  0x10   : > { %s2361_s17 = smul.u32 368, %s3914_s16  ;;  %s2402_s9 = smov 48   ;;  %vm2138_vm12 = vcmask 60416  }
  0x11   : > { %s2403_s10 = smov 40   ;;  %s2404_s11 = smov 64  }
  0x12   : > { %s2448_s20 = scalar_lea.vmem %s3896_s0, %s2361_s17  ;;  %s2405_s12 = smov 56  }
  0x13   : > { %v265_v0 = vld [vmem:[%s2448_s20 + $0x21] sm:$0xff]  ;;  %v266_v1 = vld [vmem:[%s2448_s20 + $0x29] sm:$0xff]  ;;  %v267_v5 = vld [vmem:[%s2448_s20 + $0x31] sm:$0xff] }
  0x14   : > { %v261_v2 = vld [vmem:[%s2448_s20 + $0x1] sm:$0xff]  ;;  %v304_v3 = vpack.c.bf16 %v266_v1, %v265_v0  ;;  %v262_v4 = vld [vmem:[%s2448_s20 + $0x9] sm:$0xff]  ;;  %v268_v6 = vld [vmem:[%s2448_s20 + $0x39] sm:$0xff] }
  0x15   : > { %v302_v7 = vpack.c.bf16 %v262_v4, %v261_v2  ;;  %v263_v8 = vld [vmem:[%s2448_s20 + $0x11] sm:$0xff]  ;;  %v264_v9 = vld [vmem:[%s2448_s20 + $0x19] sm:$0xff]  ;;  %v305_v10 = vpack.c.bf16 %v268_v6, %v267_v5  ;;  %v269_v14 = vld [vmem:[%s2448_s20 + $0x41] sm:$0xff] }
  0x16   : > { %668 = vrot.lane.b32.xlu1 %v304_v3, %s2396_s21  ;;  %v303_v11 = vpack.c.bf16 %v264_v9, %v263_v8  ;;  %v271_v12 = vld [vmem:[%s2448_s20 + $0x51] sm:$0xff]  ;;  %v272_v13 = vld [vmem:[%s2448_s20 + $0x59] sm:$0xff]  ;;  %v270_v15 = vld [vmem:[%s2448_s20 + $0x49] sm:$0xff] }
  0x17   : > { %664 = vrot.lane.b32.xlu0 %v302_v7, %s2396_s21  ;;  %v307_v16 = vpack.c.bf16 %v272_v13, %v271_v12  ;;  %v306_v17 = vpack.c.bf16 %v270_v15, %v269_v14  ;;  %v275_v18 = vld [vmem:[%s2448_s20 + $0x71] sm:$0xff]  ;;  %v276_v19 = vld [vmem:[%s2448_s20 + $0x79] sm:$0xff]  ;;  %v273_v20 = vld [vmem:[%s2448_s20 + $0x61] sm:$0xff] }
  0x18   : > { %v274_v21 = vld [vmem:[%s2448_s20 + $0x69] sm:$0xff]  ;;  %v309_v22 = vpack.c.bf16 %v276_v19, %v275_v18  ;;  %v279_v24 = vld [vmem:[%s2448_s20 + $0x91] sm:$0xff]  ;;  %v280_v25 = vld [vmem:[%s2448_s20 + $0x99] sm:$0xff] }
  0x19   : > { %v308_v23 = vpack.c.bf16 %v274_v21, %v273_v20  ;;  %v277_v26 = vld [vmem:[%s2448_s20 + $0x81] sm:$0xff]  ;;  %v278_v27 = vld [vmem:[%s2448_s20 + $0x89] sm:$0xff]  ;;  %v311_v28 = vpack.c.bf16 %v280_v25, %v279_v24  ;;  %v283_v30 = vld [vmem:[%s2448_s20 + $0xb1] sm:$0xff] }
  0x1a   : > { %670 = vrot.lane.b32.xlu1 %v305_v10, %s2396_s21  ;;  %v310_v29 = vpack.c.bf16 %v278_v27, %v277_v26  ;;  %v284_v31 = vld [vmem:[%s2448_s20 + $0xb9] sm:$0xff]  ;;  %v281_v32 = vld [vmem:[%s2448_s20 + $0xa1] sm:$0xff]  ;;  %v282_v33 = vld [vmem:[%s2448_s20 + $0xa9] sm:$0xff] }
  0x1b   : > { %666 = vrot.lane.b32.xlu0 %v303_v11, %s2396_s21  ;;  %v313_v34 = vpack.c.bf16 %v284_v31, %v283_v30  ;;  %v312_v35 = vpack.c.bf16 %v282_v33, %v281_v32  ;;  %v287_v36 = vld [vmem:[%s2448_s20 + $0xd1] sm:$0xff]  ;;  %v288_v37 = vld [vmem:[%s2448_s20 + $0xd9] sm:$0xff]  ;;  %v285_v38 = vld [vmem:[%s2448_s20 + $0xc1] sm:$0xff] }
  0x1c   : > { %v286_v39 = vld [vmem:[%s2448_s20 + $0xc9] sm:$0xff]  ;;  %v315_v40 = vpack.c.bf16 %v288_v37, %v287_v36  ;;  %v291_v42 = vld [vmem:[%s2448_s20 + $0xf1] sm:$0xff]  ;;  %v292_v43 = vld [vmem:[%s2448_s20 + $0xf9] sm:$0xff] }
  0x1d   : > { %v314_v41 = vpack.c.bf16 %v286_v39, %v285_v38  ;;  %v289_v44 = vld [vmem:[%s2448_s20 + $0xe1] sm:$0xff]  ;;  %v290_v45 = vld [vmem:[%s2448_s20 + $0xe9] sm:$0xff]  ;;  %v317_v46 = vpack.c.bf16 %v292_v43, %v291_v42  ;;  %v295_v48 = vld [vmem:[%s2448_s20 + $0x111] sm:$0xff] }
  0x1e   : > { %674 = vrot.lane.b32.xlu1 %v307_v16, %s2396_s21  ;;  %v316_v47 = vpack.c.bf16 %v290_v45, %v289_v44  ;;  %v296_v49 = vld [vmem:[%s2448_s20 + $0x119] sm:$0xff]  ;;  %v293_v50 = vld [vmem:[%s2448_s20 + $0x101] sm:$0xff]  ;;  %v294_v51 = vld [vmem:[%s2448_s20 + $0x109] sm:$0xff] }
  0x1f   : > { %672 = vrot.lane.b32.xlu0 %v306_v17, %s2396_s21  ;;  %v319_v52 = vpack.c.bf16 %v296_v49, %v295_v48  ;;  %v318_v53 = vpack.c.bf16 %v294_v51, %v293_v50  ;;  %v299_v54 = vld [vmem:[%s2448_s20 + $0x131] sm:$0xff]  ;;  %v300_v55 = vld [vmem:[%s2448_s20 + $0x139] sm:$0xff]  ;;  %v297_v56 = vld [vmem:[%s2448_s20 + $0x121] sm:$0xff] }
  0x20   : > { %v298_v57 = vld [vmem:[%s2448_s20 + $0x129] sm:$0xff]  ;;  %v321_v58 = vpack.c.bf16 %v300_v55, %v299_v54  ;;  %v301_v62 = vld [vmem:[%s2448_s20 + $0x141] sm:$0xf]  ;;  %v325_v3 = vld [vmem:[%s2448_s20 + $0x12] sm:$0xff] }
  0x21   : > { %v320_v59 = vpack.c.bf16 %v298_v57, %v297_v56  ;;  %v323_v60 = vld [vmem:[%s2448_s20 + $0x2] sm:$0xff]  ;;  %v324_v61 = vld [vmem:[%s2448_s20 + $0xa] sm:$0xff]  ;;  %v322_v0 = vpack.c.bf16 %v301_v62, %v301_v62  ;;  %v326_v4 = vld [vmem:[%s2448_s20 + $0x1a] sm:$0xff] }
  0x22   : > { %678 = vrot.lane.b32.xlu1 %v309_v22, %s2396_s21  ;;  %v364_v63 = vpack.c.bf16 %v324_v61, %v323_v60  ;;  %v327_v1 = vld [vmem:[%s2448_s20 + $0x22] sm:$0xff]  ;;  %v328_v2 = vld [vmem:[%s2448_s20 + $0x2a] sm:$0xff]  ;;  %v2521_v6 = vpack.c.bf16 %v326_v4, %v325_v3  ;;  %v329_v9 = vld [vmem:[%s2448_s20 + $0x32] sm:$0xff] }
  0x23   : > { %676 = vrot.lane.b32.xlu0 %v308_v23, %s2396_s21  ;;  %v2518_v5 = vpack.c.bf16 %v328_v2, %v327_v1  ;;  %v331_v7 = vld [vmem:[%s2448_s20 + $0x42] sm:$0xff]  ;;  %v332_v8 = vld [vmem:[%s2448_s20 + $0x4a] sm:$0xff]  ;;  %v330_v10 = vld [vmem:[%s2448_s20 + $0x3a] sm:$0xff] }
  0x24   : > { %v2529_v11 = vpack.c.bf16 %v332_v8, %v331_v7  ;;  %v2533_v12 = vpack.c.bf16 %v330_v10, %v329_v9  ;;  %v335_v13 = vld [vmem:[%s2448_s20 + $0x62] sm:$0xff]  ;;  %v336_v14 = vld [vmem:[%s2448_s20 + $0x6a] sm:$0xff]  ;;  %v333_v15 = vld [vmem:[%s2448_s20 + $0x52] sm:$0xff] }
  0x25   : > { %v334_v16 = vld [vmem:[%s2448_s20 + $0x5a] sm:$0xff]  ;;  %v2541_v17 = vpack.c.bf16 %v336_v14, %v335_v13  ;;  %v339_v19 = vld [vmem:[%s2448_s20 + $0x82] sm:$0xff]  ;;  %v340_v20 = vld [vmem:[%s2448_s20 + $0x8a] sm:$0xff] }
  0x26   : > { %682 = vrot.lane.b32.xlu1 %v311_v28, %s2396_s21  ;;  %v2545_v18 = vpack.c.bf16 %v334_v16, %v333_v15  ;;  %v337_v21 = vld [vmem:[%s2448_s20 + $0x72] sm:$0xff]  ;;  %v338_v22 = vld [vmem:[%s2448_s20 + $0x7a] sm:$0xff]  ;;  %v372_v23 = vpack.c.bf16 %v340_v20, %v339_v19  ;;  %v343_v25 = vld [vmem:[%s2448_s20 + $0xa2] sm:$0xff] }
  0x27   : > { %680 = vrot.lane.b32.xlu0 %v310_v29, %s2396_s21  ;;  %v371_v24 = vpack.c.bf16 %v338_v22, %v337_v21  ;;  %v344_v26 = vld [vmem:[%s2448_s20 + $0xaa] sm:$0xff]  ;;  %v341_v27 = vld [vmem:[%s2448_s20 + $0x92] sm:$0xff]  ;;  %v342_v28 = vld [vmem:[%s2448_s20 + $0x9a] sm:$0xff] }
  0x28   : > { %v374_v29 = vpack.c.bf16 %v344_v26, %v343_v25  ;;  %v373_v30 = vpack.c.bf16 %v342_v28, %v341_v27  ;;  %v347_v31 = vld [vmem:[%s2448_s20 + $0xc2] sm:$0xff]  ;;  %v348_v32 = vld [vmem:[%s2448_s20 + $0xca] sm:$0xff]  ;;  %v345_v33 = vld [vmem:[%s2448_s20 + $0xb2] sm:$0xff] }
  0x29   : > { %v351_v37 = vld [vmem:[%s2448_s20 + $0xe2] sm:$0xff]  ;;  %v352_v38 = vld [vmem:[%s2448_s20 + $0xea] sm:$0xff]  ;;  %v349_v39 = vld [vmem:[%s2448_s20 + $0xd2] sm:$0xff] }
  0x2a   : > { %686 = vrot.lane.b32.xlu1 %v313_v34, %s2396_s21  ;;  %v346_v34 = vld [vmem:[%s2448_s20 + $0xba] sm:$0xff]  ;;  %v355_v43 = vld [vmem:[%s2448_s20 + $0x102] sm:$0xff]  ;;  %v356_v44 = vld [vmem:[%s2448_s20 + $0x10a] sm:$0xff] }
  0x2b   : > { %684 = vrot.lane.b32.xlu0 %v312_v35, %s2396_s21  ;;  %v376_v35 = vpack.c.bf16 %v348_v32, %v347_v31  ;;  %v375_v36 = vpack.c.bf16 %v346_v34, %v345_v33  ;;  %v353_v45 = vld [vmem:[%s2448_s20 + $0xf2] sm:$0xff]  ;;  %v359_v49 = vld [vmem:[%s2448_s20 + $0x122] sm:$0xff]  ;;  %v360_v50 = vld [vmem:[%s2448_s20 + $0x12a] sm:$0xff] }
  0x2c   : > { %v357_v51 = vld [vmem:[%s2448_s20 + $0x112] sm:$0xff]  ;;  %v363_v55 = vld [vmem:[%s2448_s20 + $0x142] sm:$0xf]  ;;  %v362_v57 = vld [vmem:[%s2448_s20 + $0x13a] sm:$0xff] }
  0x2d   : > { %v361_v56 = vld [vmem:[%s2448_s20 + $0x132] sm:$0xff]  ;;  %v385_v60 = vld [vmem:[%s2448_s20 + $0x142] sm:$0xff]  ;;  %v386_v61 = vld [vmem:[%s2448_s20 + $0x14a] sm:$0xff] }
  0x2e   : > { %690 = vrot.lane.b32.xlu1 %v315_v40, %s2396_s21  ;;  %v350_v40 = vld [vmem:[%s2448_s20 + $0xda] sm:$0xff]  ;;  %v388_v2 = vpack.c.bf16 %v386_v61, %v385_v60  ;;  %v387_v7 = vld [vmem:[%s2448_s20 + $0x152] sm:$0xf]  ;;  %v392_v15 = vld [vmem:[%s2448_s20 + $0x23] sm:$0xff] }
  0x2f   : > { %688 = vrot.lane.b32.xlu0 %v314_v41, %s2396_s21  ;;  %v378_v41 = vpack.c.bf16 %v352_v38, %v351_v37  ;;  %v377_v42 = vpack.c.bf16 %v350_v40, %v349_v39  ;;  %v2383_v62 = vld [vmem:[%s3898_s2] sm:$0xff]   ;;  %v390_v3 = vld [vmem:[%s2448_s20 + $0x13] sm:$0xff]  ;;  %v389_v10 = vpack.c.bf16 %v387_v7, %v387_v7  ;;  %v393_v16 = vld [vmem:[%s2448_s20 + $0x2b] sm:$0xff] }
  0x30   : > { %v391_v4 = vld [vmem:[%s2448_s20 + $0x1b] sm:$0xff]  ;;  %v2385_v13 = vld [vmem:[%s3898_s2 + $0x10] sm:$0xff]   ;;  %v432_v19 = vpack.c.bf16 %v393_v16, %v392_v15  ;;  %v400_v33 = vld [vmem:[%s2448_s20 + $0x63] sm:$0xff] }
  0x31   : > { %v431_v9 = vpack.c.bf16 %v391_v4, %v390_v3  ;;  %v398_v20 = vld [vmem:[%s2448_s20 + $0x53] sm:$0xff]  ;;  %v399_v21 = vld [vmem:[%s2448_s20 + $0x5b] sm:$0xff]  ;;  %v397_v25 = vld [vmem:[%s2448_s20 + $0x4b] sm:$0xff] }
  0x32   : > { %694 = vrot.lane.b32.xlu1 %v317_v46, %s2396_s21  ;;  %v354_v46 = vld [vmem:[%s2448_s20 + $0xfa] sm:$0xff]  ;;  %v435_v27 = vpack.c.bf16 %v399_v21, %v398_v20  ;;  %v401_v34 = vld [vmem:[%s2448_s20 + $0x6b] sm:$0xff] }
  0x33   : > { %692 = vrot.lane.b32.xlu0 %v316_v47, %s2396_s21  ;;  %v380_v47 = vpack.c.bf16 %v356_v44, %v355_v43  ;;  %v379_v48 = vpack.c.bf16 %v354_v46, %v353_v45  ;;  %v2386_v22 = vld [vmem:[%s3898_s2 + $0x18] sm:$0xff]   ;;  %v2387_v28 = vld [vmem:[%s3898_s2 + $0x20] ss:$0 sps:$4 sm:$0xff]   ;;  %v436_v38 = vpack.c.bf16 %v401_v34, %v400_v33  ;;  %v454_v39 = vld [vmem:[%s2448_s20 + $0x24] sm:$0xff] }
  0x34   : > { %v403_v31 = vld [vmem:[%s2448_s20 + $0x7b] sm:$0xff]  ;;  %v455_v40 = vld [vmem:[%s2448_s20 + $0x2c] sm:$0xff]  ;;  %v474_v60 = vld [vmem:[%s2448_s20 + $0xc4] sm:$0xff] }
  0x35   : > { %v453_v43 = vld [vmem:[%s2448_s20 + $0x1c] sm:$0xff]  ;;  %v494_v45 = vpack.c.bf16 %v455_v40, %v454_v39  ;;  %v475_v61 = vld [vmem:[%s2448_s20 + $0xcc] sm:$0xff] }
  0x36   : > { %698 = vrot.lane.b32.xlu1 %v319_v52, %s2396_s21  ;;  %v358_v52 = vld [vmem:[%s2448_s20 + $0x11a] sm:$0xff] }
  0x37   : > { %696 = vrot.lane.b32.xlu0 %v318_v53, %s2396_s21  ;;  %v382_v53 = vpack.c.bf16 %v360_v50, %v359_v49  ;;  %v381_v54 = vpack.c.bf16 %v358_v52, %v357_v51  ;;  %v519_v50 = vld [vmem:[%s2448_s20 + $0x25] sm:$0xff]  ;;  %v520_v51 = vld [vmem:[%s2448_s20 + $0x2d] sm:$0xff]  ;;  %v457_v3 = vld [vmem:[%s2448_s20 + $0x3c] sm:$0xff] }
  0x38   : > { %v542_v20 = vld [vmem:[%s2448_s20 + $0xdd] sm:$0xff]  ;;  %v414_v39 = vld [vmem:[%s2448_s20 + $0xd3] sm:$0xff] }
  0x39   : > { %v415_v40 = vld [vmem:[%s2448_s20 + $0xdb] sm:$0xff] }
  0x3a   : > { %702 = vrot.lane.b32.xlu1 %v321_v58, %s2396_s21  ;;  %v384_v58 = vpack.c.bf16 %v363_v55, %v363_v55  ;;  %v412_v55 = vld [vmem:[%s2448_s20 + $0xc3] sm:$0xff] }
  0x3b   : > { %700 = vrot.lane.b32.xlu0 %v320_v59, %s2396_s21  ;;  %v383_v59 = vpack.c.bf16 %v362_v57, %v361_v56  ;;  %v413_v56 = vld [vmem:[%s2448_s20 + $0xcb] sm:$0xff] }
  0x3e   : > { %727 = vrot.lane.b32.xlu1 %v364_v63, %s2397_s22 }
  0x3f   : > { %704 = vrot.lane.b32.xlu0 %v322_v0, %s2396_s21  ;;  %v3901_v0 = vmov 0.0  }
  0x40   : > { %2257 = vmatprep.subr.bf16.mxu0 %v3901_v0  ;;  %2351 = vmatprep.subr.bf16.mxu1 %v3901_v0 }
  0x41   : > { %2258 = vmatpush3.bf16.msra.mxu0 %v2383_v62  ;;  %2356 = vmatpush3.bf16.msra.mxu1 %v2383_v62 }
  0x42   : > { %731 = vrot.lane.b32.xlu1 %v2518_v5, %s2397_s22  ;;  %2259 = vmatprep.subr.bf16.mxu0 %v3901_v0 }
  0x43   : > { %729 = vrot.lane.b32.xlu0 %v2521_v6, %s2397_s22  ;;  %2352 = vmatprep.subr.bf16.mxu1 %v3901_v0 }
  0x44   : > { %2267 = vmatprep.mubr.msk.bf16.mxu0 %vm2401_vm1, %v3901_v0  ;;  %2311 = vmatprep.mubr.msk.bf16.mxu1 %vm2401_vm1, %v3901_v0 }
  0x46   : > { %735 = vrot.lane.b32.xlu1 %v2529_v11, %s2397_s22 }
  0x47   : > { %733 = vrot.lane.b32.xlu0 %v2533_v12, %s2397_s22 }
  0x4a   : > { %739 = vrot.lane.b32.xlu1 %v2541_v17, %s2397_s22 }
  0x4b   : > { %737 = vrot.lane.b32.xlu0 %v2545_v18, %s2397_s22 }
  0x4e   : > { %743 = vrot.lane.b32.xlu1 %v372_v23, %s2397_s22 }
  0x4f   : > { %741 = vrot.lane.b32.xlu0 %v371_v24, %s2397_s22 }
  0x52   : > { %747 = vrot.lane.b32.xlu1 %v374_v29, %s2397_s22 }
  0x53   : > { %745 = vrot.lane.b32.xlu0 %v373_v30, %s2397_s22 }
  0x56   : > { %751 = vrot.lane.b32.xlu1 %v376_v35, %s2397_s22 }
  0x57   : > { %749 = vrot.lane.b32.xlu0 %v375_v36, %s2397_s22 }
  0x5a   : > { %755 = vrot.lane.b32.xlu1 %v378_v41, %s2397_s22 }
  0x5b   : > { %753 = vrot.lane.b32.xlu0 %v377_v42, %s2397_s22 }
  0x5e   : > { %759 = vrot.lane.b32.xlu1 %v380_v47, %s2397_s22 }
  0x5f   : > { %757 = vrot.lane.b32.xlu0 %v379_v48, %s2397_s22 }
  0x62   : > { %763 = vrot.lane.b32.xlu1 %v382_v53, %s2397_s22 }
  0x63   : > { %761 = vrot.lane.b32.xlu0 %v381_v54, %s2397_s22 }
  0x66   : > { %767 = vrot.lane.b32.xlu1 %v384_v58, %s2397_s22 }
  0x67   : > { %765 = vrot.lane.b32.xlu0 %v383_v59, %s2397_s22 }
  0x6a   : > { %773 = vrot.lane.b32.xlu1 %v2518_v5, %s2398_s23  ;;  %v2384_v5 = vld [vmem:[%s3898_s2 + $0x8] sm:$0xff]  }
  0x6b   : > { %771 = vrot.lane.b32.xlu0 %v2521_v6, %s2398_s23  ;;  %2260 = vmatpush3.bf16.msra.mxu0 %v2384_v5 }
  0x6c   : > { %2357 = vmatpush3.bf16.msra.mxu1 %v2384_v5  ;;  %2261 = vmatprep.subr.bf16.mxu0 %v3901_v0  ;;  %v2727_v5 = vpack.c.bf16 %v475_v61, %v474_v60 }
  0x6d   : > { %2353 = vmatprep.subr.bf16.mxu1 %v3901_v0 }
  0x6e   : > { %777 = vrot.lane.b32.xlu1 %v2529_v11, %s2398_s23  ;;  %v394_v11 = vld [vmem:[%s2448_s20 + $0x33] sm:$0xff]  ;;  %3905 = vst [vmem:[#allocation3_spill] sm:$0xff] %v2727_v5 }
  0x6f   : > { %775 = vrot.lane.b32.xlu0 %v2533_v12, %s2398_s23  ;;  %v395_v12 = vld [vmem:[%s2448_s20 + $0x3b] sm:$0xff]  ;;  %2262 = vmatpush3.bf16.msra.mxu0 %v2385_v13 }
  0x70   : > { %2358 = vmatpush3.bf16.msra.mxu1 %v2385_v13  ;;  %2263 = vmatprep.subr.bf16.mxu0 %v3901_v0  ;;  %v522_v13 = vld [vmem:[%s2448_s20 + $0x3d] sm:$0xff] }
  0x71   : > { %2354 = vmatprep.subr.bf16.mxu1 %v3901_v0 }
  0x72   : > { %781 = vrot.lane.b32.xlu1 %v2541_v17, %s2398_s23 }
  0x73   : > { %779 = vrot.lane.b32.xlu0 %v2545_v18, %s2398_s23  ;;  %v433_v18 = vpack.c.bf16 %v395_v12, %v394_v11  ;;  %2264 = vmatpush3.bf16.msra.mxu0 %v2386_v22  ;;  %v521_v12 = vld [vmem:[%s2448_s20 + $0x35] sm:$0xff] }
  0x74   : > { %2359 = vmatpush3.bf16.msra.mxu1 %v2386_v22  ;;  %2265 = vmatprep.subr.bf16.mxu0 %v3901_v0  ;;  %v583_v22 = vld [vmem:[%s2448_s20 + $0x36] sm:$0xff] }
  0x75   : > { %2355 = vmatprep.subr.bf16.mxu1 %v3901_v0  ;;  %v214_v0 = vld [vmem:[%s2448_s20 + $0x78] sm:$0xff] }
  0x76   : > { %785 = vrot.lane.b32.xlu1 %v372_v23, %s2398_s23 }
  0x77   : > { %783 = vrot.lane.b32.xlu0 %v371_v24, %s2398_s23  ;;  %v396_v24 = vld [vmem:[%s2448_s20 + $0x43] sm:$0xff] }
  0x7a   : > { %789 = vrot.lane.b32.xlu1 %v374_v29, %s2398_s23  ;;  %v434_v29 = vpack.c.bf16 %v397_v25, %v396_v24  ;;  %v584_v24 = vld [vmem:[%s2448_s20 + $0x3e] sm:$0xff] }
  0x7b   : > { %787 = vrot.lane.b32.xlu0 %v373_v30, %s2398_s23  ;;  %v402_v30 = vld [vmem:[%s2448_s20 + $0x73] sm:$0xff] }
  0x7c   : > { %v437_v37 = vpack.c.bf16 %v403_v31, %v402_v30  ;;  %v603_v30 = vld [vmem:[%s2448_s20 + $0xd6] sm:$0xff]  ;;  %v604_v31 = vld [vmem:[%s2448_s20 + $0xde] sm:$0xff] }
  0x7d   : > { %v633_v34 = vpack.c.bf16 %v604_v31, %v603_v30  ;;  %v460_v30 = vld [vmem:[%s2448_s20 + $0x54] sm:$0xff]  ;;  %v461_v31 = vld [vmem:[%s2448_s20 + $0x5c] sm:$0xff] }
  0x7e   : > { %793 = vrot.lane.b32.xlu1 %v376_v35, %s2398_s23  ;;  %v1603_v35 = vsel %vm1601_vm0, %v2387_v28, 0  ;;  %v623_v28 = vpack.c.bf16 %v584_v24, %v583_v22 }
  0x7f   : > { %791 = vrot.lane.b32.xlu0 %v375_v36, %s2398_s23  ;;  %2266 = vmatpush3.bf16.msra.mxu0 %v1603_v35 }
  0x80   : > { %2360 = vmatpush3.bf16.msra.mxu1 %v1603_v35  ;;  %v458_v35 = vld [vmem:[%s2448_s20 + $0x44] sm:$0xff] }
  0x82   : > { %797 = vrot.lane.b32.xlu1 %v378_v41, %s2398_s23 }
  0x83   : > { %795 = vrot.lane.b32.xlu0 %v377_v42, %s2398_s23  ;;  %v452_v42 = vld [vmem:[%s2448_s20 + $0x14] sm:$0xff] }
  0x84   : > { %v493_v46 = vpack.c.bf16 %v453_v43, %v452_v42 }
  0x86   : > { %801 = vrot.lane.b32.xlu1 %v380_v47, %s2398_s23  ;;  %v581_v47 = vld [vmem:[%s2448_s20 + $0x26] sm:$0xff] }
  0x87   : > { %799 = vrot.lane.b32.xlu0 %v379_v48, %s2398_s23  ;;  %v582_v48 = vld [vmem:[%s2448_s20 + $0x2e] sm:$0xff] }
  0x88   : > { %v2619_v63 = vpop.permute.xlu1 %668 }
  0x89   : > { %v2623_v1 = vpop.permute.xlu0 %664 }
  0x8a   : > { %805 = vrot.lane.b32.xlu1 %v382_v53, %s2398_s23  ;;  %v622_v53 = vpack.c.bf16 %v582_v48, %v581_v47  ;;  %v524_v47 = vld [vmem:[%s2448_s20 + $0x4d] sm:$0xff] }
  0x8b   : > { %803 = vrot.lane.b32.xlu0 %v381_v54, %s2398_s23  ;;  %v560_v54 = vpack.c.bf16 %v520_v51, %v519_v50 }
  0x8c   : > { %v2634_v6 = vpop.permute.xlu1 %670 }
  0x8d   : > { %v2637_v8 = vpop.permute.xlu0 %666 }
  0x8e   : > { %809 = vrot.lane.b32.xlu1 %v388_v2, %s2398_s23  ;;  %v456_v2 = vld [vmem:[%s2448_s20 + $0x34] sm:$0xff] }
  0x8f   : > { %807 = vrot.lane.b32.xlu0 %v383_v59, %s2398_s23  ;;  %v442_v59 = vpack.c.bf16 %v413_v56, %v412_v55  ;;  %v495_v7 = vpack.c.bf16 %v457_v3, %v456_v2  ;;  %v478_v56 = vld [vmem:[%s2448_s20 + $0xe4] sm:$0xff] }
  0x90   : > { %v2648_v14 = vpop.permute.xlu1 %674  ;;  %v605_v3 = vld [vmem:[%s2448_s20 + $0xe6] sm:$0xff] }
  0x91   : > { %v2652_v17 = vpop.permute.xlu0 %672 }
  0x92   : > { %834 = vrot.lane.b32.xlu1 %v431_v9, %s2400_s30  ;;  %v476_v9 = vld [vmem:[%s2448_s20 + $0xd4] sm:$0xff] }
  0x93   : > { %811 = vrot.lane.b32.xlu0 %v389_v10, %s2398_s23  ;;  %v477_v10 = vld [vmem:[%s2448_s20 + $0xdc] sm:$0xff] }
  0x94   : > { %v2663_v23 = vpop.permute.xlu1 %678  ;;  %v505_v16 = vpack.c.bf16 %v477_v10, %v476_v9  ;;  %v543_v10 = vld [vmem:[%s2448_s20 + $0xe5] sm:$0xff] }
  0x95   : > { %v2667_v26 = vpop.permute.xlu0 %676 }
  0x96   : > { %838 = vrot.lane.b32.xlu1 %v433_v18, %s2400_s30  ;;  %v561_v18 = vpack.c.bf16 %v522_v13, %v521_v12  ;;  %v544_v12 = vld [vmem:[%s2448_s20 + $0xed] sm:$0xff] }
  0x97   : > { %836 = vrot.lane.b32.xlu0 %v432_v19, %s2400_s30  ;;  %v541_v19 = vld [vmem:[%s2448_s20 + $0xd5] sm:$0xff] }
  0x98   : > { %v2678_v32 = vpop.permute.xlu1 %682 }
  0x99   : > { %v2682_v36 = vpop.permute.xlu0 %680 }
  0x9a   : > { %842 = vrot.lane.b32.xlu1 %v435_v27, %s2400_s30  ;;  %v571_v27 = vpack.c.bf16 %v542_v20, %v541_v19  ;;  %v572_v19 = vpack.c.bf16 %v544_v12, %v543_v10  ;;  %v417_v20 = vld [vmem:[%s2448_s20 + $0xeb] sm:$0xff]  ;;  %v607_v12 = vld [vmem:[%s2448_s20 + $0xf6] sm:$0xff] }
  0x9b   : > { %840 = vrot.lane.b32.xlu0 %v434_v29, %s2400_s30 }
  0x9c   : > { %v2690_v41 = vpop.permute.xlu1 %686 }
  0x9d   : > { %v2696_v44 = vpop.permute.xlu0 %684 }
  0x9e   : > { %846 = vrot.lane.b32.xlu1 %v437_v37, %s2400_s30  ;;  %v459_v37 = vld [vmem:[%s2448_s20 + $0x4c] sm:$0xff] }
  0x9f   : > { %844 = vrot.lane.b32.xlu0 %v436_v38, %s2400_s30  ;;  %v496_v43 = vpack.c.bf16 %v459_v37, %v458_v35  ;;  %v497_v35 = vpack.c.bf16 %v461_v31, %v460_v30  ;;  %v480_v37 = vld [vmem:[%s2448_s20 + $0xf4] sm:$0xff]  ;;  %v463_v30 = vld [vmem:[%s2448_s20 + $0x6c] sm:$0xff] }
  0xa0   : > { %v2702_v49 = vpop.permute.xlu1 %690  ;;  %v210_v31 = vld [vmem:[%s2448_s20 + $0x58] sm:$0xff] }
  0xa1   : > { %3904 = vst [vmem:[#allocation2_spill] sm:$0xff] %v2702_v49  ;;  %v2706_v52 = vpop.permute.xlu0 %688  ;;  %v212_v49 = vld [vmem:[%s2448_s20 + $0x68] sm:$0xff] }
  0xa2   : > { %941 = vrot.lane.b32.xlu1 %v494_v45, %s2402_s9 }
  0xa3   : > { %897 = vrot.lane.b32.xlu0 %v493_v46, %s2403_s10  ;;  %v523_v46 = vld [vmem:[%s2448_s20 + $0x45] sm:$0xff] }
  0xa4   : > { %v2712_v57 = vpop.permute.xlu1 %694  ;;  %v562_v51 = vpack.c.bf16 %v524_v47, %v523_v46  ;;  %v526_v46 = vld [vmem:[%s2448_s20 + $0x5d] sm:$0xff] }
  0xa5   : > { %v2714_v58 = vpop.permute.xlu0 %692 }
  0xa6   : > { %1067 = vrot.lane.b32.xlu1 %v622_v53, %s2404_s11  ;;  %v585_v53 = vld [vmem:[%s2448_s20 + $0x46] sm:$0xff] }
  0xa7   : > { %1004 = vrot.lane.b32.xlu0 %v560_v54, %s2405_s12  ;;  %v586_v54 = vld [vmem:[%s2448_s20 + $0x4e] sm:$0xff] }
  0xa8   : > { %v2720_v62 = vpop.permute.xlu1 %698  ;;  %v624_v61 = vpack.c.bf16 %v586_v54, %v585_v53  ;;  %v546_v54 = vld [vmem:[%s2448_s20 + $0xfd] sm:$0xff] }
  0xa9   : > { %v2724_v4 = vpop.permute.xlu0 %696 }
  0xaa   : > { %856 = vrot.lane.b32.xlu1 %v442_v59, %s2400_s30  ;;  %v479_v59 = vld [vmem:[%s2448_s20 + $0xec] sm:$0xff] }
  0xab   : > { %899 = vrot.lane.b32.xlu0 %v494_v45, %s2403_s10  ;;  %v443_v45 = vpack.c.bf16 %v415_v40, %v414_v39  ;;  %v506_v2 = vpack.c.bf16 %v479_v59, %v478_v56  ;;  %v481_v39 = vld [vmem:[%s2448_s20 + $0xfc] sm:$0xff] }
  0xac   : > { %v2732_v11 = vpop.permute.xlu1 %702  ;;  %v587_v59 = vld [vmem:[%s2448_s20 + $0x56] sm:$0xff] }
  0xad   : > { %v2736_v15 = vpop.permute.xlu0 %700 }
  0xae   : > { %919 = vrot.lane.b32.xlu1 %v2727_v5, %s2403_s10 }
  0xaf   : > { %943 = vrot.lane.b32.xlu0 %v495_v7, %s2402_s9 }
  0xb0   : > { %v2743_v21 = vpop.permute.xlu1 %727 }
  0xb1   : > { %v2747_v25 = vpop.permute.xlu0 %704 }
  0xb2   : > { %963 = vrot.lane.b32.xlu1 %v505_v16, %s2402_s9 }
  0xb3   : > { %1006 = vrot.lane.b32.xlu0 %v561_v18, %s2405_s12 }
  0xb4   : > { %v2751_v29 = vpop.permute.xlu1 %731 }
  0xb5   : > { %v2755_v33 = vpop.permute.xlu0 %729 }
  0xb6   : > { %1026 = vrot.lane.b32.xlu1 %v571_v27, %s2405_s12 }
  0xb7   : > { %1069 = vrot.lane.b32.xlu0 %v623_v28, %s2404_s11 }
  0xb8   : > { %v2761_v38 = vpop.permute.xlu1 %735 }
  0xb9   : > { %v2765_v42 = vpop.permute.xlu0 %733 }
  0xba   : > { %901 = vrot.lane.b32.xlu1 %v495_v7, %s2403_s10  ;;  %v606_v7 = vld [vmem:[%s2448_s20 + $0xee] sm:$0xff] }
  0xbb   : > { %1089 = vrot.lane.b32.xlu0 %v633_v34, %s2404_s11  ;;  %v634_v18 = vpack.c.bf16 %v606_v7, %v605_v3 }
  0xbc   : > { %v2771_v48 = vpop.permute.xlu1 %739 }
  0xbd   : > { %v2773_v50 = vpop.permute.xlu0 %737 }
  0xbe   : > { %945 = vrot.lane.b32.xlu1 %v496_v43, %s2402_s9 }
  0xbf   : > { %858 = vrot.lane.b32.xlu0 %v443_v45, %s2400_s30  ;;  %v525_v45 = vld [vmem:[%s2448_s20 + $0x55] sm:$0xff] }
  0xc0   : > { %v2779_v55 = vpop.permute.xlu1 %743  ;;  %v563_v53 = vpack.c.bf16 %v526_v46, %v525_v45  ;;  %v419_v45 = vld [vmem:[%s2448_s20 + $0xfb] sm:$0xff] }
  0xc1   : > { %v2783_v60 = vpop.permute.xlu0 %741  ;;  %v207_v46 = vld [vmem:[%s2448_s20 + $0x40] sm:$0xff] }
  0xc2   : > { %1008 = vrot.lane.b32.xlu1 %v562_v51, %s2405_s12  ;;  %v2822_v51 = vpack.c.bf16 %v481_v39, %v480_v37  ;;  %v418_v39 = vld [vmem:[%s2448_s20 + $0xf3] sm:$0xff] }
  0xc3   : > { %921 = vrot.lane.b32.xlu0 %v505_v16, %s2403_s10  ;;  %v416_v16 = vld [vmem:[%s2448_s20 + $0xe3] sm:$0xff] }
  0xc4   : > { %v2789_v9 = vpop.permute.xlu1 %747  ;;  %v444_v27 = vpack.c.bf16 %v417_v20, %v416_v16  ;;  %v209_v16 = vld [vmem:[%s2448_s20 + $0x50] sm:$0xff] }
  0xc5   : > { %v2793_v13 = vpop.permute.xlu0 %745 }
  0xc6   : > { %1071 = vrot.lane.b32.xlu1 %v624_v61, %s2404_s11  ;;  %v588_v61 = vld [vmem:[%s2448_s20 + $0x5e] sm:$0xff] }
  0xc7   : > { %965 = vrot.lane.b32.xlu0 %v506_v2, %s2402_s9  ;;  %v625_v7 = vpack.c.bf16 %v588_v61, %v587_v59  ;;  %v245_v59 = vpack.c.bf16 %v210_v31, %v209_v16  ;;  %v445_v61 = vpack.c.bf16 %v419_v45, %v418_v39  ;;  %v589_v31 = vld [vmem:[%s2448_s20 + $0x66] sm:$0xff]  ;;  %v590_v39 = vld [vmem:[%s2448_s20 + $0x6e] sm:$0xff] }
  0xc8   : > { %v2799_v22 = vpop.permute.xlu1 %751 }
  0xc9   : > { %v2801_v24 = vpop.permute.xlu0 %749 }
  0xca   : > { %1091 = vrot.lane.b32.xlu1 %v634_v18, %s2404_s11  ;;  %v608_v18 = vld [vmem:[%s2448_s20 + $0xfe] sm:$0xff] }
  0xcb   : > { %1028 = vrot.lane.b32.xlu0 %v572_v19, %s2405_s12  ;;  %v635_v20 = vpack.c.bf16 %v608_v18, %v607_v12  ;;  %v213_v18 = vld [vmem:[%s2448_s20 + $0x70] sm:$0xff] }
  0xcc   : > { %v2805_v28 = vpop.permute.xlu1 %755 }
  0xcd   : > { %v2809_v34 = vpop.permute.xlu0 %753 }
  0xce   : > { %3906 = vst [vmem:[#allocation4_spill] sm:$0xff] %v2809_v34  ;;  %860 = vrot.lane.b32.xlu1 %v444_v27, %s2400_s30  ;;  %v462_v27 = vld [vmem:[%s2448_s20 + $0x64] sm:$0xff] }
  0xcf   : > { %903 = vrot.lane.b32.xlu0 %v496_v43, %s2403_s10  ;;  %v545_v43 = vld [vmem:[%s2448_s20 + $0xf5] sm:$0xff]  ;;  %v211_v34 = vld [vmem:[%s2448_s20 + $0x60] sm:$0xff] }
  0xd0   : > { %v2815_v40 = vpop.permute.xlu1 %759 }
  0xd1   : > { %v2819_v47 = vpop.permute.xlu0 %757 }
  0xd2   : > { %923 = vrot.lane.b32.xlu1 %v506_v2, %s2403_s10  ;;  %v573_v2 = vpack.c.bf16 %v546_v54, %v545_v43  ;;  %v2857_v54 = vpack.c.bf16 %v463_v30, %v462_v27  ;;  %v247_v27 = vpack.c.bf16 %v214_v0, %v213_v18  ;;  %v217_v30 = vld [vmem:[%s2448_s20 + $0x90] sm:$0xff]  ;;  %v215_v0 = vld [vmem:[%s2448_s20 + $0x80] sm:$0xff] }
  0xd3   : > { %947 = vrot.lane.b32.xlu0 %v497_v35, %s2402_s9 }
  0xd4   : > { %v2827_v56 = vpop.permute.xlu1 %763 }
  0xd5   : > { %v2831_v3 = vpop.permute.xlu0 %761 }
  0xd6   : > { %967 = vrot.lane.b32.xlu1 %v2822_v51, %s2402_s9 }
  0xd7   : > { %1010 = vrot.lane.b32.xlu0 %v563_v53, %s2405_s12  ;;  %v208_v53 = vld [vmem:[%s2448_s20 + $0x48] sm:$0xff] }
  0xd8   : > { %v2836_v10 = vpop.permute.xlu1 %767  ;;  %v244_v12 = vpack.c.bf16 %v208_v53, %v207_v46  ;;  %v246_v46 = vpack.c.bf16 %v212_v49, %v211_v34  ;;  %v218_v53 = vld [vmem:[%s2448_s20 + $0x98] sm:$0xff]  ;;  %v2406_v34 = vmov 0  }
  0xd9   : > { %v2840_v19 = vpop.permute.xlu0 %765  ;;  %2381 = vset.pattern.permute.xlu0 %v2406_v34  ;;  %2382 = vset.pattern.permute.xlu1 %v2406_v34 }
  0xda   : > { %1030 = vrot.lane.b32.xlu1 %v573_v2, %s2405_s12  ;;  %v527_v2 = vld [vmem:[%s2448_s20 + $0x65] sm:$0xff]  ;;  %v1124_v45 = vsel %vm1109_vm2, %v244_v12, %v2652_v17  ;;  %v1133_v12 = vsel %vm1109_vm2, %v247_v27, %v2663_v23  ;;  %v548_v23 = vld [vmem:[%s2448_s20 + $0x10d] sm:$0xff] }
  0xdb   : > { %1073 = vrot.lane.b32.xlu0 %v625_v7, %s2404_s11  ;;  %v528_v7 = vld [vmem:[%s2448_s20 + $0x6d] sm:$0xff]  ;;  %v219_v27 = vld [vmem:[%s2448_s20 + $0xa0] sm:$0xff] }
  0xdc   : > { %v2848_v37 = vpop.permute.xlu1 %773  ;;  %v564_v16 = vpack.c.bf16 %v528_v7, %v527_v2 }
  0xdd   : > { %v2854_v43 = vpop.permute.xlu0 %771 }
  0xde   : > { %905 = vrot.lane.b32.xlu1 %v497_v35, %s2403_s10 }
  0xdf   : > { %1093 = vrot.lane.b32.xlu0 %v635_v20, %s2404_s11  ;;  %v1127_v20 = vsel %vm1109_vm2, %v245_v59, %v2648_v14  ;;  %v483_v14 = vld [vmem:[%s2448_s20 + $0x10c] sm:$0xff] }
  0xe0   : > { %v2864_v5 = vpop.permute.xlu1 %777  ;;  %v1185_v2 = vsel %vm1173_vm3, %v1127_v20, %v2773_v50  ;;  %v216_v59 = vld [vmem:[%s2448_s20 + $0x88] sm:$0xff]  ;;  %v626_v50 = vpack.c.bf16 %v590_v39, %v589_v31  ;;  %v1189_v31 = vsel %vm1173_vm3, %v1133_v12, %v2783_v60 }
  0xe1   : > { %3907 = vst [vmem:[#allocation5_spill] sm:$0xff] %v2864_v5  ;;  %v2868_v35 = vpop.permute.xlu0 %775  ;;  %v482_v5 = vld [vmem:[%s2448_s20 + $0x104] sm:$0xff] }
  0xe2   : > { %949 = vrot.lane.b32.xlu1 %v2857_v54, %s2402_s9  ;;  %v508_v20 = vpack.c.bf16 %v483_v14, %v482_v5 }
  0xe3   : > { %862 = vrot.lane.b32.xlu0 %v445_v61, %s2400_s30  ;;  %v1183_v61 = vsel %vm1173_vm3, %v1124_v45, %v2761_v38  ;;  %v249_v38 = vpack.c.bf16 %v218_v53, %v217_v30  ;;  %v609_v45 = vld [vmem:[%s2448_s20 + $0x106] sm:$0xff] }
  0xe4   : > { %v782_v7 = vpop.permute.xlu1 %781  ;;  %v220_v30 = vld [vmem:[%s2448_s20 + $0xa8] sm:$0xff] }
  0xe5   : > { %v2890_v18 = vsel %vm1216_vm4, %v1185_v2, %v782_v7  ;;  %v780_v17 = vpop.permute.xlu0 %779  ;;  %v610_v2 = vld [vmem:[%s2448_s20 + $0x10e] sm:$0xff]  ;;  %v248_v7 = vpack.c.bf16 %v216_v59, %v215_v0  ;;  %v1139_v60 = vsel %vm1109_vm2, %v249_v38, %v2678_v32  ;;  %v420_v0 = vld [vmem:[%s2448_s20 + $0x103] sm:$0xff] }
  0xe6   : > { %v2893_v49 = vsel %vm1216_vm4, %v1183_v61, %v780_v17  ;;  %1012 = vrot.lane.b32.xlu1 %v564_v16, %s2405_s12  ;;  %v1130_v16 = vsel %vm1109_vm2, %v246_v46, %v2667_v26  ;;  %v547_v61 = vld [vmem:[%s2448_s20 + $0x105] sm:$0xff]  ;;  %v636_v46 = vpack.c.bf16 %v610_v2, %v609_v45  ;;  %v250_v17 = vpack.c.bf16 %v220_v30, %v219_v27  ;;  %v229_v2 = vld [vmem:[%s2448_s20 + $0xf0] sm:$0xff] }
  0xe7   : > { %925 = vrot.lane.b32.xlu0 %v2822_v51, %s2403_s10  ;;  %v1187_v5 = vsel %vm1173_vm3, %v1130_v16, %v2771_v48  ;;  %v574_v14 = vpack.c.bf16 %v548_v23, %v547_v61  ;;  %v421_v48 = vld [vmem:[%s2448_s20 + $0x10b] sm:$0xff]  ;;  %v1136_v59 = vsel %vm1109_vm2, %v248_v7, %v2682_v36  ;;  %v464_v7 = vld [vmem:[%s2448_s20 + $0x74] sm:$0xff] }
  0xe8   : > { %v786_v39 = vpop.permute.xlu1 %785  ;;  %v1191_v32 = vsel %vm1173_vm3, %v1136_v59, %v2779_v55  ;;  %v446_v36 = vpack.c.bf16 %v421_v48, %v420_v0  ;;  %v230_v55 = vld [vmem:[%s2448_s20 + $0xf8] sm:$0xff]  ;;  %v228_v61 = vld [vmem:[%s2448_s20 + $0xe8] sm:$0xff] }
  0xe9   : > { %v2913_v51 = vsel %vm1216_vm4, %v1189_v31, %v786_v39  ;;  %v784_v53 = vpop.permute.xlu0 %783  ;;  %v465_v31 = vld [vmem:[%s2448_s20 + $0x7c] sm:$0xff] }
  0xea   : > { %v2916_v26 = vsel %vm1216_vm4, %v1187_v5, %v784_v53  ;;  %1075 = vrot.lane.b32.xlu1 %v626_v50, %s2404_s11  ;;  %v1193_v50 = vsel %vm1173_vm3, %v1139_v60, %v2793_v13  ;;  %v1142_v13 = vsel %vm1109_vm2, %v250_v17, %v2696_v44  ;;  %v227_v39 = vld [vmem:[%s2448_s20 + $0xe0] sm:$0xff]  ;;  %v255_v44 = vpack.c.bf16 %v230_v55, %v229_v2  ;;  %v233_v5 = vld [vmem:[%s2448_s20 + $0x110] sm:$0xff] }
  0xeb   : > { %969 = vrot.lane.b32.xlu0 %v508_v20, %s2402_s9  ;;  %v1195_v23 = vsel %vm1173_vm3, %v1142_v13, %v2789_v9  ;;  %v2957_v53 = vpack.c.bf16 %v465_v31, %v464_v7  ;;  %v485_v60 = vld [vmem:[%s2448_s20 + $0x11c] sm:$0xff] }
  0xec   : > { %v790_v34 = vpop.permute.xlu1 %789  ;;  %v234_v9 = vld [vmem:[%s2448_s20 + $0x118] sm:$0xff]  ;;  %v231_v17 = vld [vmem:[%s2448_s20 + $0x100] sm:$0xff] }
  0xed   : > { %v2931_v12 = vsel %vm1216_vm4, %v1193_v50, %v790_v34  ;;  %v788_v38 = vpop.permute.xlu0 %787  ;;  %v529_v48 = vld [vmem:[%s2448_s20 + $0x75] sm:$0xff]  ;;  %v530_v59 = vld [vmem:[%s2448_s20 + $0x7d] sm:$0xff]  ;;  %v232_v50 = vld [vmem:[%s2448_s20 + $0x108] sm:$0xff] }
  0xee   : > { %v2934_v45 = vsel %vm1216_vm4, %v1191_v32, %v788_v38  ;;  %1095 = vrot.lane.b32.xlu1 %v636_v46, %s2404_s11  ;;  %v484_v46 = vld [vmem:[%s2448_s20 + $0x114] sm:$0xff]  ;;  %v1157_v32 = vsel %vm1109_vm2, %v255_v44, %v2712_v57  ;;  %v257_v38 = vpack.c.bf16 %v234_v9, %v233_v5  ;;  %v565_v2 = vpack.c.bf16 %v530_v59, %v529_v48  ;;  %v550_v55 = vld [vmem:[%s2448_s20 + $0x11d] sm:$0xff]  ;;  %v236_v44 = vld [vmem:[%s2448_s20 + $0x128] sm:$0xff] }
  0xef   : > { %1032 = vrot.lane.b32.xlu0 %v574_v14, %s2405_s12  ;;  %v254_v14 = vpack.c.bf16 %v228_v61, %v227_v39  ;;  %v549_v13 = vld [vmem:[%s2448_s20 + $0x115] sm:$0xff]  ;;  %v256_v31 = vpack.c.bf16 %v232_v50, %v231_v17  ;;  %v1205_v39 = vsel %vm1173_vm3, %v1157_v32, %v2819_v47  ;;  %v235_v57 = vld [vmem:[%s2448_s20 + $0x120] sm:$0xff] }
  0xf0   : > { %v2942_v16 = vpop.permute.xlu1 %793  ;;  %v575_v47 = vpack.c.bf16 %v550_v55, %v549_v13  ;;  %v258_v59 = vpack.c.bf16 %v236_v44, %v235_v57  ;;  %v611_v32 = vld [vmem:[%s2448_s20 + $0x116] sm:$0xff]  ;;  %v239_v13 = vld [vmem:[%s2448_s20 + $0x140] sm:$0xf]  ;;  %v466_v55 = vld [vmem:[%s2448_s20 + $0x84] sm:$0xff] }
  0xf1   : > { %v792_v27 = vpop.permute.xlu0 %791  ;;  %v1154_v7 = vsel %vm1109_vm2, %v254_v14, %v2714_v58  ;;  %v1163_v14 = vsel %vm1109_vm2, %v257_v38, %v2720_v62 }
  0xf2   : > { %v2951_v30 = vsel %vm1216_vm4, %v1195_v23, %v792_v27  ;;  %864 = vrot.lane.b32.xlu1 %v446_v36, %s2400_s30  ;;  %v237_v36 = vld [vmem:[%s2448_s20 + $0x130] sm:$0xff]  ;;  %v592_v27 = vld [vmem:[%s2448_s20 + $0x7e] sm:$0xff]  ;;  %v1203_v5 = vsel %vm1173_vm3, %v1154_v7, %v2805_v28  ;;  %v1160_v28 = vsel %vm1109_vm2, %v256_v31, %v2724_v4  ;;  %v1209_v17 = vsel %vm1173_vm3, %v1163_v14, %v2831_v3 }
  0xf3   : > { %907 = vrot.lane.b32.xlu0 %v2857_v54, %s2403_s10  ;;  %v2971_v54 = vpack.c.bf16 %v485_v60, %v484_v46  ;;  %v591_v23 = vld [vmem:[%s2448_s20 + $0x76] sm:$0xff]  ;;  %v612_v7 = vld [vmem:[%s2448_s20 + $0x11e] sm:$0xff]  ;;  %v1207_v62 = vsel %vm1173_vm3, %v1160_v28, %v2815_v40  ;;  %v467_v31 = vld [vmem:[%s2448_s20 + $0x8c] sm:$0xff]  ;;  %v1166_v40 = vsel %vm1109_vm2, %v258_v59, %v2736_v15 }
  0xf4   : > { %v2962_v0 = vpop.permute.xlu1 %797  ;;  %v627_v48 = vpack.c.bf16 %v592_v27, %v591_v23  ;;  %v422_v23 = vld [vmem:[%s2448_s20 + $0x113] sm:$0xff]  ;;  %v423_v27 = vld [vmem:[%s2448_s20 + $0x11b] sm:$0xff]  ;;  %v500_v15 = vpack.c.bf16 %v467_v31, %v466_v55  ;;  %v593_v59 = vld [vmem:[%s2448_s20 + $0x86] sm:$0xff] }
  0xf5   : > { %v2968_v34 = vpop.permute.xlu0 %795  ;;  %v551_v31 = vld [vmem:[%s2448_s20 + $0x125] sm:$0xff] }
  0xf6   : > { %927 = vrot.lane.b32.xlu1 %v508_v20, %s2403_s10  ;;  %v238_v20 = vld [vmem:[%s2448_s20 + $0x138] sm:$0xff] }
  0xf7   : > { %951 = vrot.lane.b32.xlu0 %v2957_v53, %s2402_s9  ;;  %v259_v9 = vpack.c.bf16 %v238_v20, %v237_v36  ;;  %v260_v20 = vpack.c.bf16 %v239_v13, %v239_v13 }
  0xf8   : > { %v802_v61 = vpop.permute.xlu1 %801 }
  0xf9   : > { %v2992_v46 = vsel %vm1216_vm4, %v1205_v39, %v802_v61  ;;  %v800_v58 = vpop.permute.xlu0 %799  ;;  %v1169_v3 = vsel %vm1109_vm2, %v259_v9, %v2732_v11  ;;  %v1211_v11 = vsel %vm1173_vm3, %v1166_v40, %v2827_v56  ;;  %v532_v56 = vld [vmem:[%s2448_s20 + $0x8d] sm:$0xff] }
  0xfa   : > { %v2995_v60 = vsel %vm1216_vm4, %v1203_v5, %v800_v58  ;;  %971 = vrot.lane.b32.xlu1 %v2971_v54, %s2402_s9  ;;  %v1213_v39 = vsel %vm1173_vm3, %v1169_v3, %v2840_v19  ;;  %v447_v19 = vpack.c.bf16 %v423_v27, %v422_v23  ;;  %v531_v58 = vld [vmem:[%s2448_s20 + $0x85] sm:$0xff]  ;;  %v552_v40 = vld [vmem:[%s2448_s20 + $0x12d] sm:$0xff] }
  0xfb   : > { %1014 = vrot.lane.b32.xlu0 %v565_v2, %s2405_s12  ;;  %v637_v2 = vpack.c.bf16 %v612_v7, %v611_v32  ;;  %v566_v28 = vpack.c.bf16 %v532_v56, %v531_v58  ;;  %v487_v32 = vld [vmem:[%s2448_s20 + $0x12c] sm:$0xff]  ;;  %v199_v7 = vld [vmem:[%s2448_s20] sm:$0xff] }
  0xfc   : > { %v806_v50 = vpop.permute.xlu1 %805  ;;  %v613_v3 = vld [vmem:[%s2448_s20 + $0x126] sm:$0xff] }
  0xfd   : > { %v3012_v38 = vsel %vm1216_vm4, %v1209_v17, %v806_v50  ;;  %v804_v36 = vpop.permute.xlu0 %803  ;;  %v486_v50 = vld [vmem:[%s2448_s20 + $0x124] sm:$0xff] }
  0xfe   : > { %v3015_v4 = vsel %vm1216_vm4, %v1207_v62, %v804_v36  ;;  %1034 = vrot.lane.b32.xlu1 %v575_v47, %s2405_s12  ;;  %v1172_v47 = vsel %vm1109_vm2, %v260_v20, %v2747_v25  ;;  %v594_v25 = vld [vmem:[%s2448_s20 + $0x8e] sm:$0xff]  ;;  %v3064_v36 = vpack.c.bf16 %v487_v32, %v486_v50  ;;  %v404_v27 = vld [vmem:[%s2448_s20 + $0x83] sm:$0xff] }
  0xff   : > { %1077 = vrot.lane.b32.xlu0 %v627_v48, %s2404_s11  ;;  %v1215_v9 = vsel %vm1173_vm3, %v1172_v47, %v2836_v10  ;;  %v628_v13 = vpack.c.bf16 %v594_v25, %v593_v59  ;;  %v200_v62 = vld [vmem:[%s2448_s20 + $0x8] sm:$0xff]  ;;  %v468_v47 = vld [vmem:[%s2448_s20 + $0x94] sm:$0xff] }
 0x100   : > { %v810_v61 = vpop.permute.xlu1 %809  ;;  %v424_v59 = vld [vmem:[%s2448_s20 + $0x123] sm:$0xff] }
 0x101   : > { %v3032_v57 = vsel %vm1216_vm4, %v1213_v39, %v810_v61  ;;  %v808_v44 = vpop.permute.xlu0 %807  ;;  %v240_v39 = vpack.c.bf16 %v200_v62, %v199_v7  ;;  %v533_v7 = vld [vmem:[%s2448_s20 + $0x95] sm:$0xff] }
 0x102   : > { %v3035_v5 = vsel %vm1216_vm4, %v1211_v11, %v808_v44  ;;  %909 = vrot.lane.b32.xlu1 %v2957_v53, %s2403_s10  ;;  %v405_v11 = vld [vmem:[%s2448_s20 + $0x8b] sm:$0xff] }
 0x103   : > { %1097 = vrot.lane.b32.xlu0 %v637_v2, %s2404_s11  ;;  %v614_v2 = vld [vmem:[%s2448_s20 + $0x12e] sm:$0xff]  ;;  %v438_v56 = vpack.c.bf16 %v405_v11, %v404_v27 }
 0x104   : > { %v835_v14 = vpop.permute.xlu1 %834  ;;  %v638_v61 = vpack.c.bf16 %v614_v2, %v613_v3  ;;  %v488_v11 = vld [vmem:[%s2448_s20 + $0x134] sm:$0xff] }
 0x105   : > { %v812_v48 = vpop.permute.xlu0 %811 }
 0x106   : > { %v3047_v53 = vsel %vm1216_vm4, %v1215_v9, %v812_v48  ;;  %953 = vrot.lane.b32.xlu1 %v500_v15, %s2402_s9  ;;  %v469_v9 = vld [vmem:[%s2448_s20 + $0x9c] sm:$0xff] }
 0x107   : > { %866 = vrot.lane.b32.xlu0 %v447_v19, %s2400_s30  ;;  %v1112_v19 = vsel %vm1109_vm2, %v240_v39, %v2623_v1  ;;  %v425_v1 = vld [vmem:[%s2448_s20 + $0x12b] sm:$0xff]  ;;  %v595_v39 = vld [vmem:[%s2448_s20 + $0x96] sm:$0xff] }
 0x108   : > { %v3053_v17 = vpop.permute.xlu1 %838  ;;  %v1175_v58 = vsel %vm1173_vm3, %v1112_v19, %v2743_v21  ;;  %v3098_v21 = vpack.c.bf16 %v469_v9, %v468_v47  ;;  %v489_v19 = vld [vmem:[%s2448_s20 + $0x13c] sm:$0xff] }
 0x109   : > { %v3057_v10 = vpop.permute.xlu0 %836  ;;  %v1218_v48 = vsel %vm1216_vm4, %v1175_v58, %v2854_v43  ;;  %v448_v43 = vpack.c.bf16 %v425_v1, %v424_v59  ;;  %v615_v59 = vld [vmem:[%s2448_s20 + $0x136] sm:$0xff]  ;;  %v616_v1 = vld [vmem:[%s2448_s20 + $0x13e] sm:$0xff] }
 0x10a   : > { %1016 = vrot.lane.b32.xlu1 %v566_v28, %s2405_s12  ;;  %v1261_v25 = vsel %vm1259_vm5, %v1218_v48, %v835_v14  ;;  %v221_v48 = vld [vmem:[%s2448_s20 + $0xb0] sm:$0xff] }
 0x10b   : > { %929 = vrot.lane.b32.xlu0 %v2971_v54, %s2403_s10  ;;  %v576_v54 = vpack.c.bf16 %v552_v40, %v551_v31  ;;  %v201_v31 = vld [vmem:[%s2448_s20 + $0x10] sm:$0xff] }
 0x10c   : > { %v3068_v55 = vpop.permute.xlu1 %842 }
 0x10d   : > { %v3072_v20 = vpop.permute.xlu0 %840 }
 0x10e   : > { %1079 = vrot.lane.b32.xlu1 %v628_v13, %s2404_s11  ;;  %v534_v13 = vld [vmem:[%s2448_s20 + $0x9d] sm:$0xff] }
 0x10f   : > { %973 = vrot.lane.b32.xlu0 %v3064_v36, %s2402_s9  ;;  %v567_v2 = vpack.c.bf16 %v534_v13, %v533_v7  ;;  %v639_v13 = vpack.c.bf16 %v616_v1, %v615_v59  ;;  %v203_v1 = vld [vmem:[%s2448_s20 + $0x20] sm:$0xff] }
 0x110   : > { %v3077_v23 = vpop.permute.xlu1 %846 }
 0x111   : > { %v3081_v44 = vpop.permute.xlu0 %844 }
 0x112   : > { %1099 = vrot.lane.b32.xlu1 %v638_v61, %s2404_s11  ;;  %v596_v61 = vld [vmem:[%s2448_s20 + $0x9e] sm:$0xff] }
 0x113   : > { %1036 = vrot.lane.b32.xlu0 %v576_v54, %s2405_s12  ;;  %v202_v54 = vld [vmem:[%s2448_s20 + $0x18] sm:$0xff]  ;;  %v629_v47 = vpack.c.bf16 %v596_v61, %v595_v39 }
 0x114   : > { %v942_v28 = vpop.permute.xlu1 %941  ;;  %v241_v9 = vpack.c.bf16 %v202_v54, %v201_v31  ;;  %v407_v31 = vld [vmem:[%s2448_s20 + $0x9b] sm:$0xff] }
 0x115   : > { %v898_v50 = vpop.permute.xlu0 %897 }
 0x116   : > { %v1304_v32 = vsel %vm1302_vm6, %v1261_v25, %v898_v50  ;;  %911 = vrot.lane.b32.xlu1 %v500_v15, %s2403_s10  ;;  %v222_v25 = vld [vmem:[%s2448_s20 + $0xb8] sm:$0xff] }
 0x117   : > { %848 = vrot.lane.b32.xlu0 %v438_v56, %s2400_s30  ;;  %v1347_v15 = vsel %vm1345_vm7, %v1304_v32, %v942_v28  ;;  %v3908_v56 = vmov 0.0   ;;  %v3122_v28 = vpack.c.bf16 %v489_v19, %v488_v11  ;;  %v553_v32 = vld [vmem:[%s2448_s20 + $0x135] sm:$0xff]  ;;  %v470_v11 = vld [vmem:[%s2448_s20 + $0xa4] sm:$0xff]  ;;  %v471_v19 = vld [vmem:[%s2448_s20 + $0xac] sm:$0xff] }
 0x118   : > { %v1068_v62 = vpop.permute.xlu1 %1067 }
 0x119   : > { %v1005_v14 = vpop.permute.xlu0 %1004 }
 0x11a   : > { %v1390_v3 = vsel %vm1388_vm8, %v1347_v15, %v1005_v14  ;;  %955 = vrot.lane.b32.xlu1 %v3098_v21, %s2402_s9  ;;  %v251_v14 = vpack.c.bf16 %v222_v25, %v221_v48  ;;  %v427_v48 = vld [vmem:[%s2448_s20 + $0x13b] sm:$0xff] }
 0x11b   : > { %868 = vrot.lane.b32.xlu0 %v448_v43, %s2400_s30  ;;  %v1433_v40 = vsel %vm1431_vm9, %v1390_v3, %v1068_v62  ;;  %v554_v43 = vld [vmem:[%s2448_s20 + $0x13d] sm:$0xff]  ;;  %v1115_v62 = vsel %vm1109_vm2, %v241_v9, %v2637_v8  ;;  %v426_v9 = vld [vmem:[%s2448_s20 + $0x133] sm:$0xff] }
 0x11c   : > { %2268 = vmatmul.mubr.msk.bf16.vlgmr.msra.gmra.mrb[0].mxu0 %vm1558_vm10, %v1433_v40  ;;  %v857_v27 = vpop.permute.xlu1 %856  ;;  %v1177_v15 = vsel %vm1173_vm3, %v1115_v62, %v2755_v33  ;;  %v1145_v61 = vsel %vm1109_vm2, %v251_v14, %v2690_v41 }
 0x11d   : > { %v900_v58 = vpop.permute.xlu0 %899  ;;  %2271 = vmatprep.mubr.msk.bf16.mxu0 %vm2401_vm1, %v3908_v56  ;;  %v1220_v40 = vsel %vm1216_vm4, %v1177_v15, %v2848_v37  ;;  %v1197_v37 = vsel %vm1173_vm3, %v1145_v61, %v2801_v24  ;;  %v3162_v24 = vpack.c.bf16 %v471_v19, %v470_v11  ;;  %v223_v61 = vld [vmem:[%s2448_s20 + $0xc0] sm:$0xff] }
 0x11e   : > { %1018 = vrot.lane.b32.xlu1 %v567_v2, %s2405_s12  ;;  %v406_v2 = vld [vmem:[%s2448_s20 + $0x93] sm:$0xff]  ;;  %v1263_v8 = vsel %vm1259_vm5, %v1220_v40, %v3057_v10  ;;  %v1240_v41 = vsel %vm1216_vm4, %v1197_v37, %v2942_v16  ;;  %v449_v16 = vpack.c.bf16 %v427_v48, %v426_v9 }
 0x11f   : > { %931 = vrot.lane.b32.xlu0 %v3064_v36, %s2403_s10  ;;  %v577_v36 = vpack.c.bf16 %v554_v43, %v553_v32  ;;  %v1306_v33 = vsel %vm1302_vm6, %v1263_v8, %v900_v58  ;;  %v439_v54 = vpack.c.bf16 %v407_v31, %v406_v2  ;;  %v1283_v25 = vsel %vm1259_vm5, %v1240_v41, %v857_v27  ;;  %v204_v43 = vld [vmem:[%s2448_s20 + $0x28] sm:$0xff] }
 0x120   : > { %v920_v50 = vpop.permute.xlu1 %919  ;;  %v536_v27 = vld [vmem:[%s2448_s20 + $0xad] sm:$0xff] }
 0x121   : > { %v944_v7 = vpop.permute.xlu0 %943  ;;  %v598_v31 = vld [vmem:[%s2448_s20 + $0xae] sm:$0xff] }
 0x122   : > { %1081 = vrot.lane.b32.xlu1 %v629_v47, %s2404_s11  ;;  %v1349_v47 = vsel %vm1345_vm7, %v1306_v33, %v944_v7  ;;  %v1326_v7 = vsel %vm1302_vm6, %v1283_v25, %v920_v50  ;;  %v491_v8 = vld [vmem:[%s2448_s20 + $0x14c] sm:$0xff] }
 0x123   : > { %975 = vrot.lane.b32.xlu0 %v3122_v28, %s2402_s9  ;;  %v224_v33 = vld [vmem:[%s2448_s20 + $0xc8] sm:$0xff] }
 0x124   : > { %v964_v3 = vpop.permute.xlu1 %963  ;;  %v618_v9 = vld [vmem:[%s2448_s20 + $0x14e] sm:$0xff]  ;;  %v252_v48 = vpack.c.bf16 %v224_v33, %v223_v61 }
 0x125   : > { %v1007_v39 = vpop.permute.xlu0 %1006  ;;  %v1369_v62 = vsel %vm1345_vm7, %v1326_v7, %v964_v3  ;;  %v597_v3 = vld [vmem:[%s2448_s20 + $0xa6] sm:$0xff] }
 0x126   : > { %1101 = vrot.lane.b32.xlu1 %v639_v13, %s2404_s11  ;;  %v1392_v58 = vsel %vm1388_vm8, %v1349_v47, %v1007_v39  ;;  %v535_v13 = vld [vmem:[%s2448_s20 + $0xa5] sm:$0xff]  ;;  %v630_v19 = vpack.c.bf16 %v598_v31, %v597_v3 }
 0x127   : > { %1038 = vrot.lane.b32.xlu0 %v577_v36, %s2405_s12  ;;  %v242_v36 = vpack.c.bf16 %v204_v43, %v203_v1  ;;  %v568_v2 = vpack.c.bf16 %v536_v27, %v535_v13  ;;  %v490_v39 = vld [vmem:[%s2448_s20 + $0x144] sm:$0xff]  ;;  %v1148_v43 = vsel %vm1109_vm2, %v252_v48, %v2706_v52 }
 0x128   : > { %v1027_v10 = vpop.permute.xlu1 %1026  ;;  %v3194_v47 = vpack.c.bf16 %v491_v8, %v490_v39  ;;  %v409_v13 = vld [vmem:[%s2448_s20 + $0xab] sm:$0xff]  ;;  %v1199_v27 = vsel %vm1173_vm3, %v1148_v43, %v2799_v22 }
 0x129   : > { %v1070_v59 = vpop.permute.xlu0 %1069  ;;  %v1118_v11 = vsel %vm1109_vm2, %v242_v36, %v2619_v63  ;;  %v472_v36 = vld [vmem:[%s2448_s20 + $0xb4] sm:$0xff]  ;;  %v429_v3 = vld [vmem:[%s2448_s20 + $0x14b] sm:$0xff] }
 0x12a   : > { %v1435_v32 = vsel %vm1431_vm9, %v1392_v58, %v1070_v59  ;;  %913 = vrot.lane.b32.xlu1 %v3098_v21, %s2403_s10  ;;  %v1412_v21 = vsel %vm1388_vm8, %v1369_v62, %v1027_v10  ;;  %v1179_v37 = vsel %vm1173_vm3, %v1118_v11, %v2751_v29  ;;  %v617_v10 = vld [vmem:[%s2448_s20 + $0x146] sm:$0xff]  ;;  %v538_v11 = vld [vmem:[%s2448_s20 + $0xbd] sm:$0xff] }
 0x12b   : > { %850 = vrot.lane.b32.xlu0 %v439_v54, %s2400_s30  ;;  %2272 = vmatmul.mubr.msk.bf16.gmra.mrb[4].mxu0 %vm1558_vm10, %v1435_v32  ;;  %v1222_v41 = vsel %vm1216_vm4, %v1179_v37, %v2868_v35  ;;  %v555_v58 = vld [vmem:[%s2448_s20 + $0x145] sm:$0xff]  ;;  %v556_v59 = vld [vmem:[%s2448_s20 + $0x14d] sm:$0xff]  ;;  %v206_v37 = vld [vmem:[%s2448_s20 + $0x38] sm:$0xff] }
 0x12c   : > { %v902_v14 = vpop.permute.xlu1 %901  ;;  %2275 = vmatprep.mubr.msk.bf16.mxu0 %vm2401_vm1, %v3908_v56  ;;  %v1265_v1 = vsel %vm1259_vm5, %v1222_v41, %v3053_v17  ;;  %v578_v35 = vpack.c.bf16 %v556_v59, %v555_v58  ;;  %v225_v41 = vld [vmem:[%s2448_s20 + $0xd0] sm:$0xff]  ;;  %v600_v58 = vld [vmem:[%s2448_s20 + $0xbe] sm:$0xff] }
 0x12d   : > { %v1090_v50 = vpop.permute.xlu0 %1089  ;;  %v1308_v25 = vsel %vm1302_vm6, %v1265_v1, %v902_v14  ;;  %v226_v59 = vld [vmem:[%s2448_s20 + $0xd8] sm:$0xff] }
 0x12e   : > { %v1455_v15 = vsel %vm1431_vm9, %v1412_v21, %v1090_v50  ;;  %957 = vrot.lane.b32.xlu1 %v3162_v24, %s2402_s9  ;;  %v1242_v21 = vsel %vm1216_vm4, %v1199_v27, %v2968_v34  ;;  %v253_v43 = vpack.c.bf16 %v226_v59, %v225_v41  ;;  %v540_v59 = vld [vmem:[%s2448_s20 + $0xcd] sm:$0xff] }
 0x12f   : > { %870 = vrot.lane.b32.xlu0 %v449_v16, %s2400_s30  ;;  %2312 = vmatmul.mubr.msk.bf16.vlgmr.msra.gmra.mrb[0].mxu1 %vm1558_vm10, %v1455_v15  ;;  %v408_v16 = vld [vmem:[%s2448_s20 + $0xa3] sm:$0xff] }
 0x130   : > { %v946_v40 = vpop.permute.xlu1 %945  ;;  %2315 = vmatprep.mubr.msk.bf16.mxu1 %vm2401_vm1, %v3908_v56  ;;  %v440_v50 = vpack.c.bf16 %v409_v13, %v408_v16  ;;  %v473_v15 = vld [vmem:[%s2448_s20 + $0xbc] sm:$0xff] }
 0x131   : > { %v859_v54 = vpop.permute.xlu0 %858  ;;  %v1351_v32 = vsel %vm1345_vm7, %v1308_v25, %v946_v40  ;;  %v3234_v8 = vpack.c.bf16 %v473_v15, %v472_v36  ;;  %v515_v25 = vld [vmem:[%s2448_s20 + $0x15c] sm:$0xff] }
 0x132   : > { %1020 = vrot.lane.b32.xlu1 %v568_v2, %s2405_s12  ;;  %v1285_v52 = vsel %vm1259_vm5, %v1242_v21, %v859_v54  ;;  %v428_v2 = vld [vmem:[%s2448_s20 + $0x143] sm:$0xff]  ;;  %v537_v54 = vld [vmem:[%s2448_s20 + $0xb5] sm:$0xff] }
 0x133   : > { %933 = vrot.lane.b32.xlu0 %v3122_v28, %s2403_s10  ;;  %v640_v28 = vpack.c.bf16 %v618_v9, %v617_v10  ;;  %v450_v33 = vpack.c.bf16 %v429_v3, %v428_v2  ;;  %v569_v9 = vpack.c.bf16 %v538_v11, %v537_v54  ;;  %v620_v16 = vld [vmem:[%s2448_s20 + $0x15e] sm:$0xff] }
 0x134   : > { %v1009_v63 = vpop.permute.xlu1 %1008  ;;  %v3909_v21 = vld [vmem:[#allocation5_spill] sm:$0xff]  ;;  %v3910_v36 = vld [vmem:[#allocation2_spill] sm:$0xff] }
 0x135   : > { %v922_v29 = vpop.permute.xlu0 %921  ;;  %v1394_v7 = vsel %vm1388_vm8, %v1351_v32, %v1009_v63  ;;  %v599_v63 = vld [vmem:[%s2448_s20 + $0xb6] sm:$0xff]  ;;  %v1151_v15 = vsel %vm1109_vm2, %v253_v43, %v3910_v36  ;;  %v602_v43 = vld [vmem:[%s2448_s20 + $0xce] sm:$0xff] }
 0x136   : > { %1083 = vrot.lane.b32.xlu1 %v630_v19, %s2404_s11  ;;  %v1328_v22 = vsel %vm1302_vm6, %v1285_v52, %v922_v29  ;;  %v205_v19 = vld [vmem:[%s2448_s20 + $0x30] sm:$0xff]  ;;  %v631_v32 = vpack.c.bf16 %v600_v58, %v599_v63  ;;  %v539_v58 = vld [vmem:[%s2448_s20 + $0xc5] sm:$0xff] }
 0x137   : > { %977 = vrot.lane.b32.xlu0 %v3194_v47, %s2402_s9  ;;  %v243_v48 = vpack.c.bf16 %v206_v37, %v205_v19  ;;  %v514_v29 = vld [vmem:[%s2448_s20 + $0x154] sm:$0xff] }
 0x138   : > { %v1072_v17 = vpop.permute.xlu1 %1071 }
 0x139   : > { %v1437_v62 = vsel %vm1431_vm9, %v1394_v7, %v1072_v17  ;;  %v966_v14 = vpop.permute.xlu0 %965  ;;  %v517_v7 = vpack.c.bf16 %v515_v25, %v514_v29  ;;  %v619_v17 = vld [vmem:[%s2448_s20 + $0x156] sm:$0xff] }
 0x13a   : > { %1103 = vrot.lane.b32.xlu1 %v640_v28, %s2404_s11  ;;  %2276 = vmatmul.mubr.msk.bf16.gmra.mrb[8].mxu0 %vm1558_vm10, %v1437_v62  ;;  %v1371_v31 = vsel %vm1345_vm7, %v1328_v22, %v966_v14  ;;  %v557_v62 = vld [vmem:[%s2448_s20 + $0x155] sm:$0xff]  ;;  %v558_v14 = vld [vmem:[%s2448_s20 + $0x15d] sm:$0xff] }
 0x13b   : > { %1040 = vrot.lane.b32.xlu0 %v578_v35, %s2405_s12  ;;  %2279 = vmatprep.mubr.msk.bf16.mxu0 %vm2401_vm1, %v3908_v56  ;;  %v1121_v35 = vsel %vm1109_vm2, %v243_v48, %v2634_v6  ;;  %v579_v22 = vpack.c.bf16 %v558_v14, %v557_v62  ;;  %v492_v29 = vld [vmem:[%s2448_s20 + $0x154] sm:$0xf] }
 0x13c   : > { %v1092_v34 = vpop.permute.xlu1 %1091  ;;  %v1181_v13 = vsel %vm1173_vm3, %v1121_v35, %v2765_v42  ;;  %v601_v35 = vld [vmem:[%s2448_s20 + $0xc6] sm:$0xff] }
 0x13d   : > { %v1029_v40 = vpop.permute.xlu0 %1028  ;;  %v1224_v52 = vsel %vm1216_vm4, %v1181_v13, %v3909_v21  ;;  %v632_v62 = vpack.c.bf16 %v602_v43, %v601_v35 }
 0x13e   : > { %v1414_v39 = vsel %vm1388_vm8, %v1371_v31, %v1029_v40  ;;  %915 = vrot.lane.b32.xlu1 %v3162_v24, %s2403_s10  ;;  %v1267_v6 = vsel %vm1259_vm5, %v1224_v52, %v3072_v20  ;;  %v410_v40 = vld [vmem:[%s2448_s20 + $0xb3] sm:$0xff]  ;;  %v411_v20 = vld [vmem:[%s2448_s20 + $0xbb] sm:$0xff]  ;;  %v621_v52 = vld [vmem:[%s2448_s20 + $0x166] sm:$0xf] }
 0x13f   : > { %852 = vrot.lane.b32.xlu0 %v440_v50, %s2400_s30  ;;  %v1457_v61 = vsel %vm1431_vm9, %v1414_v39, %v1092_v34  ;;  %v3911_v34 = vld [vmem:[#allocation4_spill] sm:$0xff]  ;;  %v441_v37 = vpack.c.bf16 %v411_v20, %v410_v40  ;;  %v1484_v40 = vld [vmem:[%s3897_s1 + $0x1b] sm:$0xff] }
 0x140   : > { %2316 = vmatmul.mubr.msk.bf16.gmra.mrb[4].mxu1 %vm1558_vm10, %v1457_v61  ;;  %v861_v24 = vpop.permute.xlu1 %860  ;;  %v1201_v2 = vsel %vm1173_vm3, %v1151_v15, %v3911_v34 }
 0x141   : > { %v904_v10 = vpop.permute.xlu0 %903  ;;  %2319 = vmatprep.mubr.msk.bf16.mxu1 %vm2401_vm1, %v3908_v56  ;;  %v1244_v39 = vsel %vm1216_vm4, %v1201_v2, %v2962_v0 }
 0x142   : > { %959 = vrot.lane.b32.xlu1 %v3234_v8, %s2402_s9  ;;  %v1310_v42 = vsel %vm1302_vm6, %v1267_v6, %v904_v10  ;;  %v1287_v54 = vsel %vm1259_vm5, %v1244_v39, %v861_v24  ;;  %v1483_v39 = vld [vmem:[%s3897_s1 + $0x13] sm:$0xff] }
 0x143   : > { %872 = vrot.lane.b32.xlu0 %v450_v33, %s2400_s30 }
 0x144   : > { %v924_v1 = vpop.permute.xlu1 %923 }
 0x145   : > { %v948_v28 = vpop.permute.xlu0 %947  ;;  %v1330_v19 = vsel %vm1302_vm6, %v1287_v54, %v924_v1 }
 0x146   : > { %1022 = vrot.lane.b32.xlu1 %v569_v9, %s2405_s12  ;;  %v1353_v3 = vsel %vm1345_vm7, %v1310_v42, %v948_v28  ;;  %v430_v9 = vld [vmem:[%s2448_s20 + $0x153] sm:$0xf]  ;;  %v3912_v28 = vld [vmem:[#allocation3_spill] sm:$0xff] }
 0x147   : > { %935 = vrot.lane.b32.xlu0 %v3194_v47, %s2403_s10  ;;  %v641_v47 = vpack.c.bf16 %v620_v16, %v619_v17  ;;  %v451_v63 = vpack.c.bf16 %v430_v9, %v430_v9  ;;  %v516_v17 = vld [vmem:[%s2448_s20 + $0x164] sm:$0xf]  ;;  %v1269_v16 = vsel %vm1259_vm5, %v2893_v49, %v3068_v55  ;;  %v642_v49 = vpack.c.bf16 %v621_v52, %v621_v52 }
 0x148   : > { %v968_v27 = vpop.permute.xlu1 %967  ;;  %v518_v21 = vpack.c.bf16 %v516_v17, %v516_v17  ;;  %v1493_v17 = vld [vmem:[%s3897_s1 + $0x63] sm:$0xff]  ;;  %v1273_v52 = vsel %vm1259_vm5, %v2916_v26, %v3077_v23 }
 0x149   : > { %v1011_v50 = vpop.permute.xlu0 %1010  ;;  %v1373_v0 = vsel %vm1345_vm7, %v1330_v19, %v968_v27 }
 0x14a   : > { %1085 = vrot.lane.b32.xlu1 %v631_v32, %s2404_s11  ;;  %v1396_v61 = vsel %vm1388_vm8, %v1353_v3, %v1011_v50  ;;  %v570_v32 = vpack.c.bf16 %v540_v59, %v539_v58 }
 0x14b   : > { %979 = vrot.lane.b32.xlu0 %v517_v7, %s2402_s9 }
 0x14c   : > { %v1031_v31 = vpop.permute.xlu1 %1030 }
 0x14d   : > { %v1074_v33 = vpop.permute.xlu0 %1073  ;;  %v1416_v24 = vsel %vm1388_vm8, %v1373_v0, %v1031_v31 }
 0x14e   : > { %v1439_v11 = vsel %vm1431_vm9, %v1396_v61, %v1074_v33  ;;  %1105 = vrot.lane.b32.xlu1 %v641_v47, %s2404_s11  ;;  %v559_v47 = vld [vmem:[%s2448_s20 + $0x165] sm:$0xf] }
 0x14f   : > { %1042 = vrot.lane.b32.xlu0 %v579_v22, %s2405_s12  ;;  %2280 = vmatmul.mubr.msk.bf16.gmra.mrb[12].mxu0 %vm1558_vm10, %v1439_v11  ;;  %v580_v42 = vpack.c.bf16 %v559_v47, %v559_v47  ;;  %v1485_v33 = vld [vmem:[%s3897_s1 + $0x23] sm:$0xff]  ;;  %v1486_v11 = vld [vmem:[%s3897_s1 + $0x2b] sm:$0xff] }
 0x150   : > { %v906_v10 = vpop.permute.xlu1 %905  ;;  %2283 = vmatprep.mubr.msk.bf16.mxu0 %vm2401_vm1, %v3908_v56 }
 0x151   : > { %v1094_v48 = vpop.permute.xlu0 %1093  ;;  %v1312_v27 = vsel %vm1302_vm6, %v1269_v16, %v906_v10  ;;  %v1488_v10 = vld [vmem:[%s3897_s1 + $0x3b] sm:$0xff] }
 0x152   : > { %v1459_v41 = vsel %vm1431_vm9, %v1416_v24, %v1094_v48  ;;  %917 = vrot.lane.b32.xlu1 %v3234_v8, %s2403_s10  ;;  %v513_v8 = vpack.c.bf16 %v492_v29, %v492_v29  ;;  %v1271_v24 = vsel %vm1259_vm5, %v2890_v18, %v3081_v44  ;;  %v1489_v44 = vld [vmem:[%s3897_s1 + $0x43] sm:$0xff] }
 0x153   : > { %854 = vrot.lane.b32.xlu0 %v441_v37, %s2400_s30  ;;  %2320 = vmatmul.mubr.msk.bf16.gmra.mrb[8].mxu1 %vm1558_vm10, %v1459_v41  ;;  %v1487_v37 = vld [vmem:[%s3897_s1 + $0x33] sm:$0xff] }
 0x154   : > { %v950_v1 = vpop.permute.xlu1 %949  ;;  %2323 = vmatprep.mubr.msk.bf16.mxu1 %vm2401_vm1, %v3908_v56 }
 0x155   : > { %v863_v25 = vpop.permute.xlu0 %862  ;;  %v1355_v14 = vsel %vm1345_vm7, %v1312_v27, %v950_v1 }
 0x156   : > { %961 = vrot.lane.b32.xlu1 %v3912_v28, %s2402_s9  ;;  %v1289_v55 = vsel %vm1259_vm5, %v2995_v60, %v863_v25  ;;  %v1491_v28 = vld [vmem:[%s3897_s1 + $0x53] sm:$0xff] }
 0x157   : > { %874 = vrot.lane.b32.xlu0 %v451_v63, %s2400_s30  ;;  %s3368_s30 = scalar_lea.vmem %s3900_s4, %s2361_s17  ;;  %v1490_v63 = vld [vmem:[%s3897_s1 + $0x4b] sm:$0xff] }
 0x158   : > { %v1013_v7 = vpop.permute.xlu1 %1012  ;;  %2053 = vst.msk [vmem:[%s3368_s30 + $0x10] sm:$0xff] %vm1109_vm2, %v3908_v56  ;;  %2054 = vst.msk [vmem:[%s3368_s30 + $0x18] sm:$0xff] %vm1109_vm2, %v3908_v56 }
 0x159   : > { %v926_v13 = vpop.permute.xlu0 %925  ;;  %v1398_v50 = vsel %vm1388_vm8, %v1355_v14, %v1013_v7  ;;  %2051 = vst.msk [vmem:[%s3368_s30] sm:$0xff] %vm1109_vm2, %v3908_v56  ;;  %2052 = vst.msk [vmem:[%s3368_s30 + $0x8] sm:$0xff] %vm1109_vm2, %v3908_v56 }
 0x15a   : > { %1024 = vrot.lane.b32.xlu1 %v570_v32, %s2405_s12  ;;  %v1332_v22 = vsel %vm1302_vm6, %v1289_v55, %v926_v13  ;;  %2055 = vst.msk [vmem:[%s3368_s30 + $0x20] sm:$0xff] %vm1109_vm2, %v3908_v56  ;;  %2056 = vst.msk [vmem:[%s3368_s30 + $0x28] sm:$0xff] %vm1109_vm2, %v3908_v56  ;;  %v1494_v13 = vld [vmem:[%s3897_s1 + $0x6b] sm:$0xff] }
 0x15b   : > { %937 = vrot.lane.b32.xlu0 %v513_v8, %s2403_s10  ;;  %2057 = vst.msk [vmem:[%s3368_s30 + $0x30] sm:$0xff] %vm1109_vm2, %v3908_v56  ;;  %2058 = vst.msk [vmem:[%s3368_s30 + $0x38] sm:$0xff] %vm1109_vm2, %v3908_v56  ;;  %v1498_v55 = vld [vmem:[%s3897_s1 + $0x8b] sm:$0xff] }
 0x15c   : > { %v1076_v6 = vpop.permute.xlu1 %1075  ;;  %2059 = vst.msk [vmem:[%s3368_s30 + $0x40] sm:$0xff] %vm1109_vm2, %v3908_v56  ;;  %2060 = vst.msk [vmem:[%s3368_s30 + $0x48] sm:$0xff] %vm1109_vm2, %v3908_v56 }
 0x15d   : > { %v1441_v36 = vsel %vm1431_vm9, %v1398_v50, %v1076_v6  ;;  %v970_v15 = vpop.permute.xlu0 %969  ;;  %2061 = vst.msk [vmem:[%s3368_s30 + $0x50] sm:$0xff] %vm1109_vm2, %v3908_v56  ;;  %2062 = vst.msk [vmem:[%s3368_s30 + $0x58] sm:$0xff] %vm1109_vm2, %v3908_v56 }
 0x15e   : > { %1087 = vrot.lane.b32.xlu1 %v632_v62, %s2404_s11  ;;  %2284 = vmatmul.mubr.msk.bf16.gmra.mrb[16].mxu0 %vm1558_vm10, %v1441_v36  ;;  %v1375_v2 = vsel %vm1345_vm7, %v1332_v22, %v970_v15  ;;  %2063 = vst.msk [vmem:[%s3368_s30 + $0x60] sm:$0xff] %vm1109_vm2, %v3908_v56  ;;  %2064 = vst.msk [vmem:[%s3368_s30 + $0x68] sm:$0xff] %vm1109_vm2, %v3908_v56  ;;  %v1495_v62 = vld [vmem:[%s3897_s1 + $0x73] sm:$0xff] }
 0x15f   : > { %981 = vrot.lane.b32.xlu0 %v518_v21, %s2402_s9  ;;  %2287 = vmatprep.mubr.msk.bf16.mxu0 %vm2401_vm1, %v3908_v56  ;;  %2065 = vst.msk [vmem:[%s3368_s30 + $0x70] sm:$0xff] %vm1109_vm2, %v3908_v56  ;;  %2066 = vst.msk [vmem:[%s3368_s30 + $0x78] sm:$0xff] %vm1109_vm2, %v3908_v56  ;;  %v1496_v21 = vld [vmem:[%s3897_s1 + $0x7b] sm:$0xff] }
 0x160   : > { %v1096_v34 = vpop.permute.xlu1 %1095  ;;  %2067 = vst.msk [vmem:[%s3368_s30 + $0x80] sm:$0xff] %vm1109_vm2, %v3908_v56  ;;  %2068 = vst.msk [vmem:[%s3368_s30 + $0x88] sm:$0xff] %vm1109_vm2, %v3908_v56  ;;  %v1497_v36 = vld [vmem:[%s3897_s1 + $0x83] sm:$0xff]  ;;  %v1499_v22 = vld [vmem:[%s3897_s1 + $0x93] sm:$0xff] }
 0x161   : > { %v1033_v3 = vpop.permute.xlu0 %1032  ;;  %2069 = vst.msk [vmem:[%s3368_s30 + $0x90] sm:$0xff] %vm1109_vm2, %v3908_v56  ;;  %2070 = vst.msk [vmem:[%s3368_s30 + $0x98] sm:$0xff] %vm1109_vm2, %v3908_v56 }
 0x162   : > { %v1418_v31 = vsel %vm1388_vm8, %v1375_v2, %v1033_v3  ;;  %1107 = vrot.lane.b32.xlu1 %v642_v49, %s2404_s11  ;;  %2071 = vst.msk [vmem:[%s3368_s30 + $0xa0] sm:$0xff] %vm1109_vm2, %v3908_v56  ;;  %2072 = vst.msk [vmem:[%s3368_s30 + $0xa8] sm:$0xff] %vm1109_vm2, %v3908_v56  ;;  %v1500_v3 = vld [vmem:[%s3897_s1 + $0x9b] sm:$0xff] }
 0x163   : > { %1044 = vrot.lane.b32.xlu0 %v580_v42, %s2405_s12  ;;  %v1461_v60 = vsel %vm1431_vm9, %v1418_v31, %v1096_v34  ;;  %2073 = vst.msk [vmem:[%s3368_s30 + $0xb0] sm:$0xff] %vm1109_vm2, %v3908_v56  ;;  %2074 = vst.msk [vmem:[%s3368_s30 + $0xb8] sm:$0xff] %vm1109_vm2, %v3908_v56 }
 0x164   : > { %2324 = vmatmul.mubr.msk.bf16.gmra.mrb[12].mxu1 %vm1558_vm10, %v1461_v60  ;;  %v3337_v20 = vpop.permute.xlu1 %864  ;;  %2075 = vst.msk [vmem:[%s3368_s30 + $0xc0] sm:$0xff] %vm1109_vm2, %v3908_v56  ;;  %2076 = vst.msk [vmem:[%s3368_s30 + $0xc8] sm:$0xff] %vm1109_vm2, %v3908_v56 }
 0x165   : > { %v908_v61 = vpop.permute.xlu0 %907  ;;  %2327 = vmatprep.mubr.msk.bf16.mxu1 %vm2401_vm1, %v3908_v56  ;;  %2077 = vst.msk [vmem:[%s3368_s30 + $0xd0] sm:$0xff] %vm1109_vm2, %v3908_v56  ;;  %2078 = vst.msk [vmem:[%s3368_s30 + $0xd8] sm:$0xff] %vm1109_vm2, %v3908_v56  ;;  %v1291_v1 = vsel %vm1259_vm5, %v2992_v46, %v3337_v20  ;;  %v1492_v46 = vld [vmem:[%s3897_s1 + $0x5b] sm:$0xff]  ;;  %v1501_v20 = vld [vmem:[%s3897_s1 + $0xa3] sm:$0xff] }
 0x166   : > { %1812 = vperm.xlu1 %2382, %v1484_v40   ;;  %v1314_v18 = vsel %vm1302_vm6, %v1271_v24, %v908_v61  ;;  %2079 = vst.msk [vmem:[%s3368_s30 + $0xe0] sm:$0xff] %vm1109_vm2, %v3908_v56  ;;  %2080 = vst.msk [vmem:[%s3368_s30 + $0xe8] sm:$0xff] %vm1109_vm2, %v3908_v56  ;;  %v1502_v61 = vld [vmem:[%s3897_s1 + $0xab] sm:$0xff] }
 0x167   : > { %1807 = vperm.xlu0 %2381, %v1483_v39   ;;  %2081 = vst.msk [vmem:[%s3368_s30 + $0xf0] sm:$0xff] %vm1109_vm2, %v3908_v56  ;;  %2082 = vst.msk [vmem:[%s3368_s30 + $0xf8] sm:$0xff] %vm1109_vm2, %v3908_v56  ;;  %v1506_v24 = vld [vmem:[%s3897_s1 + $0xcb] sm:$0xff] }
 0x168   : > { %v3347_v54 = vpop.permute.xlu1 %927  ;;  %2083 = vst.msk [vmem:[%s3368_s30 + $0x100] sm:$0xff] %vm1109_vm2, %v3908_v56  ;;  %2084 = vst.msk [vmem:[%s3368_s30 + $0x108] sm:$0xff] %vm1109_vm2, %v3908_v56 }
 0x169   : > { %v952_v19 = vpop.permute.xlu0 %951  ;;  %2085 = vst.msk [vmem:[%s3368_s30 + $0x110] sm:$0xff] %vm1109_vm2, %v3908_v56  ;;  %2086 = vst.msk [vmem:[%s3368_s30 + $0x118] sm:$0xff] %vm1109_vm2, %v3908_v56  ;;  %v1334_v25 = vsel %vm1302_vm6, %v1291_v1, %v3347_v54  ;;  %v1503_v54 = vld [vmem:[%s3897_s1 + $0xb3] sm:$0xff] }
 0x16a   : > { %1817 = vperm.xlu1 %2382, %v1485_v33   ;;  %2087 = vst.msk [vmem:[%s3368_s30 + $0x120] sm:$0xff] %vm1109_vm2, %v3908_v56  ;;  %2088 = vst.msk [vmem:[%s3368_s30 + $0x128] sm:$0xff] %vm1109_vm2, %v3908_v56  ;;  %v1357_v48 = vsel %vm1345_vm7, %v1314_v18, %v952_v19  ;;  %v1504_v19 = vld [vmem:[%s3897_s1 + $0xbb] sm:$0xff] }
 0x16b   : > { %1822 = vperm.xlu0 %2381, %v1486_v11   ;;  %2089 = vst.msk [vmem:[%s3368_s30 + $0x130] sm:$0xff] %vm1109_vm2, %v3908_v56  ;;  %2090 = vst.msk [vmem:[%s3368_s30 + $0x138] sm:$0xff] %vm1109_vm2, %v3908_v56 }
 0x16c   : > { %v3355_v0 = vpop.permute.xlu1 %971  ;;  %2091 = vst.msk [vmem:[%s3368_s30 + $0x140] sm:$0xff] %vm1109_vm2, %v3908_v56  ;;  %2092 = vst.msk [vmem:[%s3368_s30 + $0x148] sm:$0xff] %vm1109_vm2, %v3908_v56 }
 0x16d   : > { %v1015_v9 = vpop.permute.xlu0 %1014  ;;  %2093 = vst.msk [vmem:[%s3368_s30 + $0x150] sm:$0xff] %vm1109_vm2, %v3908_v56  ;;  %2094 = vst.msk [vmem:[%s3368_s30 + $0x158] sm:$0xff] %vm1109_vm2, %v3908_v56  ;;  %v1377_v32 = vsel %vm1345_vm7, %v1334_v25, %v3355_v0  ;;  %v1509_v25 = vld [vmem:[%s3897_s1 + $0xe3] sm:$0xff] }
 0x16e   : > { %1827 = vperm.xlu1 %2382, %v1487_v37   ;;  %2095 = vst.msk [vmem:[%s3368_s30 + $0x160] sm:$0xff] %vm1109_vm2, %v3908_v56  ;;  %v1400_v58 = vsel %vm1388_vm8, %v1357_v48, %v1015_v9 }
 0x16f   : > { %1832 = vperm.xlu0 %2381, %v1488_v10   ;;  %v1505_v10 = vld [vmem:[%s3897_s1 + $0xc3] sm:$0xff]  ;;  %2097 = vst.msk [vmem:[%s3368_s30 + $0x168] sm:$0x3] %vm2096_vm11, %v3908_v56 }
 0x170   : > { %v1035_v41 = vpop.permute.xlu1 %1034 }
 0x171   : > { %v1078_v59 = vpop.permute.xlu0 %1077  ;;  %v1420_v35 = vsel %vm1388_vm8, %v1377_v32, %v1035_v41 }
 0x172   : > { %v1443_v29 = vsel %vm1431_vm9, %v1400_v58, %v1078_v59  ;;  %1837 = vperm.xlu1 %2382, %v1489_v44   ;;  %v1508_v58 = vld [vmem:[%s3897_s1 + $0xdb] sm:$0xff] }
 0x173   : > { %1842 = vperm.xlu0 %2381, %v1490_v63   ;;  %2288 = vmatmul.mubr.msk.bf16.gmra.mrb[20].mxu0 %vm1558_vm10, %v1443_v29 }
 0x174   : > { %v910_v8 = vpop.permute.xlu1 %909  ;;  %2291 = vmatprep.mubr.msk.bf16.mxu0 %vm2401_vm1, %v3908_v56 }
 0x175   : > { %v1098_v43 = vpop.permute.xlu0 %1097  ;;  %v1316_v6 = vsel %vm1302_vm6, %v1273_v52, %v910_v8  ;;  %v1510_v8 = vld [vmem:[%s3897_s1 + $0xeb] sm:$0xff] }
 0x176   : > { %v1463_v7 = vsel %vm1431_vm9, %v1420_v35, %v1098_v43  ;;  %1847 = vperm.xlu1 %2382, %v1491_v28  }
 0x177   : > { %1852 = vperm.xlu0 %2381, %v1492_v46   ;;  %2328 = vmatmul.mubr.msk.bf16.gmra.mrb[16].mxu1 %vm1558_vm10, %v1463_v7  ;;  %v1511_v7 = vld [vmem:[%s3897_s1 + $0xf3] sm:$0xff] }
 0x178   : > { %v954_v16 = vpop.permute.xlu1 %953  ;;  %2331 = vmatprep.mubr.msk.bf16.mxu1 %vm2401_vm1, %v3908_v56 }
 0x179   : > { %v867_v27 = vpop.permute.xlu0 %866  ;;  %v1359_v47 = vsel %vm1345_vm7, %v1316_v6, %v954_v16  ;;  %v1512_v16 = vld [vmem:[%s3897_s1 + $0xfb] sm:$0xff] }
 0x17a   : > { %1857 = vperm.xlu1 %2382, %v1493_v17   ;;  %v1293_v42 = vsel %vm1259_vm5, %v3015_v4, %v867_v27  ;;  %v1513_v27 = vld [vmem:[%s3897_s1 + $0x103] sm:$0xff] }
 0x17b   : > { %1862 = vperm.xlu0 %2381, %v1494_v13  }
 0x17c   : > { %v1017_v14 = vpop.permute.xlu1 %1016 }
 0x17d   : > { %v930_v50 = vpop.permute.xlu0 %929  ;;  %v1402_v15 = vsel %vm1388_vm8, %v1359_v47, %v1017_v14  ;;  %v1514_v14 = vld [vmem:[%s3897_s1 + $0x10b] sm:$0xff]  ;;  %v1516_v47 = vld [vmem:[%s3897_s1 + $0x11b] sm:$0xff] }
 0x17e   : > { %1867 = vperm.xlu1 %2382, %v1495_v62   ;;  %v1336_v34 = vsel %vm1302_vm6, %v1293_v42, %v930_v50  ;;  %v1515_v50 = vld [vmem:[%s3897_s1 + $0x113] sm:$0xff] }
 0x17f   : > { %1872 = vperm.xlu0 %2381, %v1496_v21  }
 0x180   : > { %v1080_v49 = vpop.permute.xlu1 %1079 }
 0x181   : > { %v1445_v26 = vsel %vm1431_vm9, %v1402_v15, %v1080_v49  ;;  %v974_v23 = vpop.permute.xlu0 %973 }
 0x182   : > { %1877 = vperm.xlu1 %2382, %v1497_v36   ;;  %2292 = vmatmul.mubr.msk.bf16.gmra.mrb[24].mxu0 %vm1558_vm10, %v1445_v26  ;;  %v1379_v31 = vsel %vm1345_vm7, %v1336_v34, %v974_v23  ;;  %v1518_v23 = vld [vmem:[%s3897_s1 + $0x12b] sm:$0xff] }
 0x183   : > { %1882 = vperm.xlu0 %2381, %v1498_v55   ;;  %2295 = vmatprep.mubr.msk.bf16.mxu0 %vm2401_vm1, %v3908_v56 }
 0x184   : > { %v1100_v2 = vpop.permute.xlu1 %1099 }
 0x185   : > { %v1037_v60 = vpop.permute.xlu0 %1036 }
 0x186   : > { %v1422_v4 = vsel %vm1388_vm8, %v1379_v31, %v1037_v60  ;;  %1887 = vperm.xlu1 %2382, %v1499_v22   ;;  %v1520_v60 = vld [vmem:[%s3897_s1 + $0x13b] sm:$0xff] }
 0x187   : > { %1892 = vperm.xlu0 %2381, %v1500_v3   ;;  %v1465_v40 = vsel %vm1431_vm9, %v1422_v4, %v1100_v2  ;;  %v1519_v2 = vld [vmem:[%s3897_s1 + $0x133] sm:$0xff] }
 0x188   : > { %2332 = vmatmul.mubr.msk.bf16.gmra.mrb[20].mxu1 %vm1558_vm10, %v1465_v40  ;;  %v912_v39 = vpop.permute.xlu1 %911 }
 0x189   : > { %v849_v33 = vpop.permute.xlu0 %848  ;;  %2335 = vmatprep.mubr.msk.bf16.mxu1 %vm2401_vm1, %v3908_v56 }
 0x18a   : > { %1897 = vperm.xlu1 %2382, %v1501_v20   ;;  %v1275_v0 = vsel %vm1259_vm5, %v2913_v51, %v849_v33  ;;  %v1507_v51 = vld [vmem:[%s3897_s1 + $0xd3] sm:$0xff]  ;;  %v1522_v33 = vld [vmem:[%s3897_s1 + $0x14b] sm:$0xff] }
 0x18b   : > { %1902 = vperm.xlu0 %2381, %v1502_v61   ;;  %v1318_v44 = vsel %vm1302_vm6, %v1275_v0, %v912_v39  ;;  %v1521_v39 = vld [vmem:[%s3897_s1 + $0x143] sm:$0xff] }
 0x18c   : > { %v956_v11 = vpop.permute.xlu1 %955 }
 0x18d   : > { %v869_v37 = vpop.permute.xlu0 %868  ;;  %v1361_v48 = vsel %vm1345_vm7, %v1318_v44, %v956_v11  ;;  %v1523_v11 = vld [vmem:[%s3897_s1 + $0x153] sm:$0xf] }
 0x18e   : > { %1907 = vperm.xlu1 %2382, %v1503_v54   ;;  %v1295_v29 = vsel %vm1259_vm5, %v3012_v38, %v869_v37 }
 0x18f   : > { %1912 = vperm.xlu0 %2381, %v1504_v19  }
 0x190   : > { %v1019_v9 = vpop.permute.xlu1 %1018 }
 0x191   : > { %v932_v18 = vpop.permute.xlu0 %931  ;;  %v1404_v41 = vsel %vm1388_vm8, %v1361_v48, %v1019_v9 }
 0x192   : > { %1917 = vperm.xlu1 %2382, %v1505_v10   ;;  %v1338_v28 = vsel %vm1302_vm6, %v1295_v29, %v932_v18 }
 0x193   : > { %1922 = vperm.xlu0 %2381, %v1506_v24  }
 0x194   : > { %v1082_v63 = vpop.permute.xlu1 %1081 }
 0x195   : > { %v1447_v59 = vsel %vm1431_vm9, %v1404_v41, %v1082_v63  ;;  %v976_v1 = vpop.permute.xlu0 %975 }
 0x196   : > { %1927 = vperm.xlu1 %2382, %v1507_v51   ;;  %2296 = vmatmul.mubr.msk.bf16.gmra.mrb[28].mxu0 %vm1558_vm10, %v1447_v59  ;;  %v1381_v46 = vsel %vm1345_vm7, %v1338_v28, %v976_v1 }
 0x197   : > { %1932 = vperm.xlu0 %2381, %v1508_v58   ;;  %2299 = vmatprep.mubr.msk.bf16.mxu0 %vm2401_vm1, %v3908_v56 }
 0x198   : > { %v1102_v32 = vpop.permute.xlu1 %1101 }
 0x199   : > { %v1039_v35 = vpop.permute.xlu0 %1038 }
 0x19a   : > { %v1424_v38 = vsel %vm1388_vm8, %v1381_v46, %v1039_v35  ;;  %1937 = vperm.xlu1 %2382, %v1509_v25  }
 0x19b   : > { %v1467_v43 = vsel %vm1431_vm9, %v1424_v38, %v1102_v32  ;;  %1942 = vperm.xlu0 %2381, %v1510_v8  }
 0x19c   : > { %2336 = vmatmul.mubr.msk.bf16.gmra.mrb[24].mxu1 %vm1558_vm10, %v1467_v43  ;;  %v914_v17 = vpop.permute.xlu1 %913 }
 0x19d   : > { %v851_v13 = vpop.permute.xlu0 %850  ;;  %2339 = vmatprep.mubr.msk.bf16.mxu1 %vm2401_vm1, %v3908_v56 }
 0x19e   : > { %1947 = vperm.xlu1 %2382, %v1511_v7   ;;  %v1277_v52 = vsel %vm1259_vm5, %v2934_v45, %v851_v13  ;;  %v1517_v45 = vld [vmem:[%s3897_s1 + $0x123] sm:$0xff] }
 0x19f   : > { %1952 = vperm.xlu0 %2381, %v1512_v16   ;;  %v1320_v15 = vsel %vm1302_vm6, %v1277_v52, %v914_v17 }
 0x1a0   : > { %v958_v62 = vpop.permute.xlu1 %957 }
 0x1a1   : > { %v871_v21 = vpop.permute.xlu0 %870  ;;  %v1363_v49 = vsel %vm1345_vm7, %v1320_v15, %v958_v62 }
 0x1a2   : > { %1957 = vperm.xlu1 %2382, %v1513_v27   ;;  %v1297_v34 = vsel %vm1259_vm5, %v3035_v5, %v871_v21 }
 0x1a3   : > { %1962 = vperm.xlu0 %2381, %v1514_v14  }
 0x1a4   : > { %v1021_v6 = vpop.permute.xlu1 %1020 }
 0x1a5   : > { %v934_v36 = vpop.permute.xlu0 %933  ;;  %v1406_v55 = vsel %vm1388_vm8, %v1363_v49, %v1021_v6 }
 0x1a6   : > { %1967 = vperm.xlu1 %2382, %v1515_v50   ;;  %v1340_v3 = vsel %vm1302_vm6, %v1297_v34, %v934_v36 }
 0x1a7   : > { %1972 = vperm.xlu0 %2381, %v1516_v47  }
 0x1a8   : > { %v1084_v26 = vpop.permute.xlu1 %1083 }
 0x1a9   : > { %v1449_v42 = vsel %vm1431_vm9, %v1406_v55, %v1084_v26  ;;  %v978_v22 = vpop.permute.xlu0 %977 }
 0x1aa   : > { %2300 = vmatmul.mubr.msk.bf16.gmra.mrb[32].mxu0 %vm1558_vm10, %v1449_v42  ;;  %1977 = vperm.xlu1 %2382, %v1517_v45   ;;  %v1383_v4 = vsel %vm1345_vm7, %v1340_v3, %v978_v22 }
 0x1ab   : > { %2303 = vmatprep.mubr.msk.bf16.mxu0 %vm2401_vm1, %v3908_v56  ;;  %1982 = vperm.xlu0 %2381, %v1518_v23  }
 0x1ac   : > { %v1104_v31 = vpop.permute.xlu1 %1103 }
 0x1ad   : > { %v1041_v40 = vpop.permute.xlu0 %1040 }
 0x1ae   : > { %v1426_v5 = vsel %vm1388_vm8, %v1383_v4, %v1041_v40  ;;  %1987 = vperm.xlu1 %2382, %v1519_v2  }
 0x1af   : > { %v1469_v20 = vsel %vm1431_vm9, %v1426_v5, %v1104_v31  ;;  %1992 = vperm.xlu0 %2381, %v1520_v60  }
 0x1b0   : > { %2340 = vmatmul.mubr.msk.bf16.gmra.mrb[28].mxu1 %vm1558_vm10, %v1469_v20  ;;  %v916_v61 = vpop.permute.xlu1 %915 }
 0x1b1   : > { %v853_v54 = vpop.permute.xlu0 %852  ;;  %2343 = vmatprep.mubr.msk.bf16.mxu1 %vm2401_vm1, %v3908_v56 }
 0x1b2   : > { %1997 = vperm.xlu1 %2382, %v1521_v39   ;;  %v1279_v0 = vsel %vm1259_vm5, %v2931_v12, %v853_v54 }
 0x1b3   : > { %2002 = vperm.xlu0 %2381, %v1522_v33   ;;  %v1322_v24 = vsel %vm1302_vm6, %v1279_v0, %v916_v61 }
 0x1b4   : > { %v960_v19 = vpop.permute.xlu1 %959 }
 0x1b5   : > { %v873_v37 = vpop.permute.xlu0 %872  ;;  %v1365_v18 = vsel %vm1345_vm7, %v1322_v24, %v960_v19 }
 0x1b6   : > { %2007 = vperm.xlu1 %2382, %v1523_v11   ;;  %v1299_v63 = vsel %vm1259_vm5, %v3032_v57, %v873_v37 }
 0x1b8   : > { %v1023_v10 = vpop.permute.xlu1 %1022 }
 0x1b9   : > { %v936_v9 = vpop.permute.xlu0 %935  ;;  %v1408_v44 = vsel %vm1388_vm8, %v1365_v18, %v1023_v10 }
 0x1ba   : > { %v1342_v12 = vsel %vm1302_vm6, %v1299_v63, %v936_v9 }
 0x1bc   : > { %v1086_v48 = vpop.permute.xlu1 %1085 }
 0x1bd   : > { %v1451_v51 = vsel %vm1431_vm9, %v1408_v44, %v1086_v48  ;;  %v980_v41 = vpop.permute.xlu0 %979 }
 0x1be   : > { %2304 = vmatmul.mubr.msk.bf16.gmra.mrb[36].mxu0 %vm1558_vm10, %v1451_v51  ;;  %v1385_v59 = vsel %vm1345_vm7, %v1342_v12, %v980_v41 }
 0x1bf   : > { %2307 = vmatprep.mubr.msk.bf16.mxu0 %vm2401_vm1, %v3908_v56 }
 0x1c0   : > { %v1106_v58 = vpop.permute.xlu1 %1105 }
 0x1c1   : > { %v1043_v1 = vpop.permute.xlu0 %1042 }
 0x1c2   : > { %v1428_v29 = vsel %vm1388_vm8, %v1385_v59, %v1043_v1 }
 0x1c3   : > { %v1471_v25 = vsel %vm1431_vm9, %v1428_v29, %v1106_v58 }
 0x1c4   : > { %2344 = vmatmul.mubr.msk.bf16.gmra.mrb[32].mxu1 %vm1558_vm10, %v1471_v25  ;;  %v918_v28 = vpop.permute.xlu1 %917 }
 0x1c5   : > { %v855_v32 = vpop.permute.xlu0 %854  ;;  %2347 = vmatprep.mubr.msk.bf16.mxu1 %vm2401_vm1, %v3908_v56 }
 0x1c6   : > { %v1281_v46 = vsel %vm1259_vm5, %v2951_v30, %v855_v32 }
 0x1c7   : > { %v1324_v43 = vsel %vm1302_vm6, %v1281_v46, %v918_v28 }
 0x1c8   : > { %v962_v57 = vpop.permute.xlu1 %961 }
 0x1c9   : > { %v875_v8 = vpop.permute.xlu0 %874  ;;  %v1367_v7 = vsel %vm1345_vm7, %v1324_v43, %v962_v57 }
 0x1ca   : > { %v1301_v62 = vsel %vm1259_vm5, %v3047_v53, %v875_v8  ;;  %v3719_v53 = vld [vmem:[%s3899_s3] ss:$0 sm:$0xff] }
 0x1cc   : > { %v1025_v35 = vpop.permute.xlu1 %1024 }
 0x1cd   : > { %v938_v38 = vpop.permute.xlu0 %937  ;;  %v1410_v17 = vsel %vm1388_vm8, %v1367_v7, %v1025_v35 }
 0x1ce   : > { %v1344_v14 = vsel %vm1302_vm6, %v1301_v62, %v938_v38 }
 0x1d0   : > { %v1088_v16 = vpop.permute.xlu1 %1087 }
 0x1d1   : > { %v1453_v13 = vsel %vm1431_vm9, %v1410_v17, %v1088_v16  ;;  %v982_v27 = vpop.permute.xlu0 %981 }
 0x1d2   : > { %2308 = vmatmul.mubr.msk.bf16.gmra.mrb[40].mxu0 %vm1558_vm10, %v1453_v13  ;;  %v1387_v21 = vsel %vm1345_vm7, %v1344_v14, %v982_v27 }
 0x1d4   : > { %v1108_v30 = vpop.permute.xlu1 %1107 }
 0x1d5   : > { %v1045_v52 = vpop.permute.xlu0 %1044 }
 0x1d6   : > { %v1430_v50 = vsel %vm1388_vm8, %v1387_v21, %v1045_v52 }
 0x1d7   : > { %v1473_v6 = vsel %vm1431_vm9, %v1430_v50, %v1108_v30 }
 0x1d8   : > { %2348 = vmatmul.mubr.msk.bf16.gmra.mrb[36].mxu1 %vm1558_vm10, %v1473_v6 }
 0x1e5   : > { %v1813_v47 = vpop.permute.xlu1 %1812 }
 0x1e6   : > { %v1808_v36 = vpop.permute.xlu0 %1807 }
 0x1e9   : > { %v1818_v15 = vpop.permute.xlu1 %1817 }
 0x1ea   : > { %v1823_v49 = vpop.permute.xlu0 %1822 }
 0x1ed   : > { %v1828_v45 = vpop.permute.xlu1 %1827 }
 0x1ee   : > { %v1833_v55 = vpop.permute.xlu0 %1832 }
 0x1ef   : > { %v1639_v26 = vpop.f32.mrb[0].mxu0 }
 0x1f0   : > { %v1640_v23 = vadd.f32 %v3719_v53, %v1639_v26  ;;  %v2269_v42 = vpop.f32.mrb[1].mxu0 }
 0x1f1   : > { %v1642_v22 = vpop.f32.mrb[2].mxu0  ;;  %v3722_v34 = vpop.permute.xlu1 %1837 }
 0x1f2   : > { %v2010_v2 = vmul.f32 %v1808_v36, %v1640_v23  ;;  %v1643_v3 = vadd.f32 %v3719_v53, %v1642_v22  ;;  %v3725_v31 = vpop.permute.xlu0 %1842  ;;  %v2270_v60 = vpop.f32.mrb[3].mxu0 }
 0x1f4   : > { %2098 = vst.msk [vmem:[%s3368_s30 + $0x13] sm:$0xff] %vm1109_vm2, %v2010_v2  ;;  %v2011_v4 = vmul.f32 %v1813_v47, %v1643_v3 }
 0x1f5   : > { %v3729_v40 = vpop.permute.xlu1 %1847 }
 0x1f6   : > { %2099 = vst.msk [vmem:[%s3368_s30 + $0x1b] sm:$0xff] %vm1109_vm2, %v2011_v4  ;;  %v3733_v5 = vpop.permute.xlu0 %1852 }
 0x1f9   : > { %v3735_v20 = vpop.permute.xlu1 %1857 }
 0x1fa   : > { %v3737_v39 = vpop.permute.xlu0 %1862 }
 0x1fd   : > { %v3739_v61 = vpop.permute.xlu1 %1867 }
 0x1fe   : > { %v3741_v33 = vpop.permute.xlu0 %1872  ;;  %v1647_v54 = vpop.f32.mrb[4].mxu0 }
 0x1ff   : > { %v1648_v11 = vadd.f32 %v3719_v53, %v1647_v54  ;;  %v2273_v19 = vpop.f32.mrb[5].mxu0 }
 0x200   : > { %v1650_v37 = vpop.f32.mrb[6].mxu0 }
 0x201   : > { %v2012_v0 = vmul.f32 %v1818_v15, %v1648_v11  ;;  %v1651_v10 = vadd.f32 %v3719_v53, %v1650_v37  ;;  %v2274_v9 = vpop.f32.mrb[7].mxu0  ;;  %v3745_v24 = vpop.permute.xlu1 %1877 }
 0x202   : > { %v3747_v18 = vpop.permute.xlu0 %1882  ;;  %v1727_v44 = vpop.f32.mrb[0].mxu1 }
 0x203   : > { %2100 = vst.msk [vmem:[%s3368_s30 + $0x23] sm:$0xff] %vm1109_vm2, %v2012_v0  ;;  %v2013_v48 = vmul.f32 %v1823_v49, %v1651_v10  ;;  %v2313_v51 = vpop.f32.mrb[1].mxu1  ;;  %v1728_v46 = vadd.f32 %v3719_v53, %v1727_v44 }
 0x204   : > { %v1730_v41 = vpop.f32.mrb[2].mxu1 }
 0x205   : > { %2101 = vst.msk [vmem:[%s3368_s30 + $0x2b] sm:$0xff] %vm1109_vm2, %v2013_v48  ;;  %v2314_v63 = vpop.f32.mrb[3].mxu1  ;;  %v3753_v12 = vpop.permute.xlu1 %1887  ;;  %v1731_v7 = vadd.f32 %v3719_v53, %v1730_v41 }
 0x206   : > { %v3755_v58 = vpop.permute.xlu0 %1892 }
 0x209   : > { %v3757_v59 = vpop.permute.xlu1 %1897 }
 0x20a   : > { %v3759_v1 = vpop.permute.xlu0 %1902 }
 0x20d   : > { %v3761_v29 = vpop.permute.xlu1 %1907  ;;  %v1655_v25 = vpop.f32.mrb[8].mxu0 }
 0x20e   : > { %v3763_v28 = vpop.permute.xlu0 %1912  ;;  %v1656_v32 = vadd.f32 %v3719_v53, %v1655_v25  ;;  %v2277_v57 = vpop.f32.mrb[9].mxu0 }
 0x20f   : > { %v1658_v8 = vpop.f32.mrb[10].mxu0 }
 0x210   : > { %v2014_v35 = vmul.f32 %v1828_v45, %v1656_v32  ;;  %v1659_v38 = vadd.f32 %v3719_v53, %v1658_v8  ;;  %v2278_v43 = vpop.f32.mrb[11].mxu0 }
 0x211   : > { %v1918_v17 = vpop.permute.xlu1 %1917 }
 0x212   : > { %2102 = vst.msk [vmem:[%s3368_s30 + $0x33] sm:$0xff] %vm1109_vm2, %v2014_v35  ;;  %v2015_v16 = vmul.f32 %v1833_v55, %v1659_v38  ;;  %v2032_v13 = vmul.f32 %v1918_v17, %v1728_v46  ;;  %v1923_v27 = vpop.permute.xlu0 %1922 }
 0x213   : > { %v2033_v62 = vmul.f32 %v1923_v27, %v1731_v7  ;;  %v1735_v14 = vpop.f32.mrb[4].mxu1 }
 0x214   : > { %2103 = vst.msk [vmem:[%s3368_s30 + $0x3b] sm:$0xff] %vm1109_vm2, %v2015_v16  ;;  %2120 = vst.msk [vmem:[%s3368_s30 + $0xc3] sm:$0xff] %vm1109_vm2, %v2032_v13  ;;  %v1736_v30 = vadd.f32 %v3719_v53, %v1735_v14  ;;  %v2317_v21 = vpop.f32.mrb[5].mxu1 }
 0x215   : > { %2121 = vst.msk [vmem:[%s3368_s30 + $0xcb] sm:$0xff] %vm1109_vm2, %v2033_v62  ;;  %v1738_v52 = vpop.f32.mrb[6].mxu1  ;;  %v1928_v50 = vpop.permute.xlu1 %1927 }
 0x216   : > { %v1739_v6 = vadd.f32 %v3719_v53, %v1738_v52  ;;  %v2034_v47 = vmul.f32 %v1928_v50, %v1736_v30  ;;  %v2318_v36 = vpop.f32.mrb[7].mxu1  ;;  %v1933_v15 = vpop.permute.xlu0 %1932 }
 0x218   : > { %2122 = vst.msk [vmem:[%s3368_s30 + $0xd3] sm:$0xff] %vm1109_vm2, %v2034_v47  ;;  %v2035_v49 = vmul.f32 %v1933_v15, %v1739_v6 }
 0x219   : > { %v1938_v60 = vpop.permute.xlu1 %1937 }
 0x21a   : > { %2123 = vst.msk [vmem:[%s3368_s30 + $0xdb] sm:$0xff] %vm1109_vm2, %v2035_v49  ;;  %v1943_v37 = vpop.permute.xlu0 %1942 }
 0x21d   : > { %v1948_v8 = vpop.permute.xlu1 %1947 }
 0x21e   : > { %v1953_v38 = vpop.permute.xlu0 %1952 }
 0x221   : > { %v1958_v50 = vpop.permute.xlu1 %1957 }
 0x222   : > { %v1663_v45 = vpop.f32.mrb[12].mxu0  ;;  %v1963_v15 = vpop.permute.xlu0 %1962 }
 0x223   : > { %v1664_v55 = vadd.f32 %v3719_v53, %v1663_v45  ;;  %v2281_v26 = vpop.f32.mrb[13].mxu0 }
 0x224   : > { %v1666_v23 = vpop.f32.mrb[14].mxu0 }
 0x225   : > { %v2016_v42 = vmul.f32 %v3722_v34, %v1664_v55  ;;  %v1667_v22 = vadd.f32 %v3719_v53, %v1666_v23  ;;  %v2282_v2 = vpop.f32.mrb[15].mxu0 }
 0x226   : > { %v1743_v3 = vpop.f32.mrb[8].mxu1 }
 0x227   : > { %2104 = vst.msk [vmem:[%s3368_s30 + $0x43] sm:$0xff] %vm1109_vm2, %v2016_v42  ;;  %v2017_v4 = vmul.f32 %v3725_v31, %v1667_v22  ;;  %v1744_v54 = vadd.f32 %v3719_v53, %v1743_v3  ;;  %v2321_v11 = vpop.f32.mrb[9].mxu1 }
 0x228   : > { %v1746_v19 = vpop.f32.mrb[10].mxu1 }
 0x229   : > { %2105 = vst.msk [vmem:[%s3368_s30 + $0x4b] sm:$0xff] %vm1109_vm2, %v2017_v4  ;;  %v2036_v34 = vmul.f32 %v1938_v60, %v1744_v54  ;;  %v1747_v0 = vadd.f32 %v3719_v53, %v1746_v19  ;;  %v2322_v10 = vpop.f32.mrb[11].mxu1  ;;  %v1968_v19 = vpop.permute.xlu1 %1967 }
 0x22a   : > { %v1973_v10 = vpop.permute.xlu0 %1972 }
 0x22b   : > { %2124 = vst.msk [vmem:[%s3368_s30 + $0xe3] sm:$0xff] %vm1109_vm2, %v2036_v34  ;;  %v2037_v9 = vmul.f32 %v1943_v37, %v1747_v0 }
 0x22d   : > { %2125 = vst.msk [vmem:[%s3368_s30 + $0xeb] sm:$0xff] %vm1109_vm2, %v2037_v9 }
 0x231   : > { %v1671_v31 = vpop.f32.mrb[16].mxu0 }
 0x232   : > { %v1672_v44 = vadd.f32 %v3719_v53, %v1671_v31  ;;  %v2285_v48 = vpop.f32.mrb[17].mxu0 }
 0x233   : > { %v1674_v51 = vpop.f32.mrb[18].mxu0 }
 0x234   : > { %v2018_v41 = vmul.f32 %v3729_v40, %v1672_v44  ;;  %v1675_v63 = vadd.f32 %v3719_v53, %v1674_v51  ;;  %v2286_v25 = vpop.f32.mrb[19].mxu0 }
 0x236   : > { %2106 = vst.msk [vmem:[%s3368_s30 + $0x53] sm:$0xff] %vm1109_vm2, %v2018_v41  ;;  %v2019_v32 = vmul.f32 %v3733_v5, %v1675_v63 }
 0x237   : > { %v1751_v57 = vpop.f32.mrb[12].mxu1 }
 0x238   : > { %2107 = vst.msk [vmem:[%s3368_s30 + $0x5b] sm:$0xff] %vm1109_vm2, %v2019_v32  ;;  %v1752_v56 = vadd.f32 %v3719_v53, %v1751_v57  ;;  %v2325_v46 = vpop.f32.mrb[13].mxu1 }
 0x239   : > { %v1754_v35 = vpop.f32.mrb[14].mxu1 }
 0x23a   : > { %v2038_v43 = vmul.f32 %v1948_v8, %v1752_v56  ;;  %v1755_v40 = vadd.f32 %v3719_v53, %v1754_v35  ;;  %v2326_v7 = vpop.f32.mrb[15].mxu1  ;;  %v1978_v56 = vpop.permute.xlu1 %1977 }
 0x23c   : > { %2126 = vst.msk [vmem:[%s3368_s30 + $0xf3] sm:$0xff] %vm1109_vm2, %v2038_v43  ;;  %v2039_v17 = vmul.f32 %v1953_v38, %v1755_v40  ;;  %v1983_v43 = vpop.permute.xlu0 %1982 }
 0x23e   : > { %2127 = vst.msk [vmem:[%s3368_s30 + $0xfb] sm:$0xff] %vm1109_vm2, %v2039_v17 }
 0x246   : > { %v1679_v5 = vpop.f32.mrb[20].mxu0 }
 0x247   : > { %v1680_v16 = vadd.f32 %v3719_v53, %v1679_v5  ;;  %v2289_v13 = vpop.f32.mrb[21].mxu0 }
 0x248   : > { %v1682_v27 = vpop.f32.mrb[22].mxu0 }
 0x249   : > { %v2020_v62 = vmul.f32 %v3735_v20, %v1680_v16  ;;  %v1683_v14 = vadd.f32 %v3719_v53, %v1682_v27  ;;  %v2290_v30 = vpop.f32.mrb[23].mxu0 }
 0x24a   : > { %v1759_v21 = vpop.f32.mrb[16].mxu1 }
 0x24b   : > { %2108 = vst.msk [vmem:[%s3368_s30 + $0x63] sm:$0xff] %vm1109_vm2, %v2020_v62  ;;  %v2021_v52 = vmul.f32 %v3737_v39, %v1683_v14  ;;  %v1760_v6 = vadd.f32 %v3719_v53, %v1759_v21  ;;  %v2329_v47 = vpop.f32.mrb[17].mxu1 }
 0x24c   : > { %v1762_v36 = vpop.f32.mrb[18].mxu1 }
 0x24d   : > { %2109 = vst.msk [vmem:[%s3368_s30 + $0x6b] sm:$0xff] %vm1109_vm2, %v2021_v52  ;;  %v2040_v49 = vmul.f32 %v1958_v50, %v1760_v6  ;;  %v1763_v20 = vadd.f32 %v3719_v53, %v1762_v36  ;;  %v2330_v45 = vpop.f32.mrb[19].mxu1  ;;  %v1988_v52 = vpop.permute.xlu1 %1987 }
 0x24e   : > { %v1993_v36 = vpop.permute.xlu0 %1992 }
 0x24f   : > { %2128 = vst.msk [vmem:[%s3368_s30 + $0x103] sm:$0xff] %vm1109_vm2, %v2040_v49  ;;  %v2041_v55 = vmul.f32 %v1963_v15, %v1763_v20 }
 0x251   : > { %2129 = vst.msk [vmem:[%s3368_s30 + $0x10b] sm:$0xff] %vm1109_vm2, %v2041_v55 }
 0x255   : > { %v1687_v39 = vpop.f32.mrb[24].mxu0 }
 0x256   : > { %v1688_v26 = vadd.f32 %v3719_v53, %v1687_v39  ;;  %v2293_v23 = vpop.f32.mrb[25].mxu0 }
 0x257   : > { %v1690_v42 = vpop.f32.mrb[26].mxu0 }
 0x258   : > { %v2022_v22 = vmul.f32 %v3739_v61, %v1688_v26  ;;  %v1691_v2 = vadd.f32 %v3719_v53, %v1690_v42  ;;  %v2294_v3 = vpop.f32.mrb[27].mxu0 }
 0x259   : > { %v1998_v3 = vpop.permute.xlu1 %1997 }
 0x25a   : > { %2110 = vst.msk [vmem:[%s3368_s30 + $0x73] sm:$0xff] %vm1109_vm2, %v2022_v22  ;;  %v2023_v60 = vmul.f32 %v3741_v33, %v1691_v2 }
 0x25b   : > { %v1767_v4 = vpop.f32.mrb[20].mxu1 }
 0x25c   : > { %2111 = vst.msk [vmem:[%s3368_s30 + $0x7b] sm:$0xff] %vm1109_vm2, %v2023_v60  ;;  %v1768_v54 = vadd.f32 %v3719_v53, %v1767_v4  ;;  %v2333_v11 = vpop.f32.mrb[21].mxu1 }
 0x25d   : > { %v1770_v37 = vpop.f32.mrb[22].mxu1  ;;  %v2003_v11 = vpop.permute.xlu0 %2002 }
 0x25e   : > { %v2042_v34 = vmul.f32 %v1968_v19, %v1768_v54  ;;  %v1771_v61 = vadd.f32 %v3719_v53, %v1770_v37  ;;  %v2334_v0 = vpop.f32.mrb[23].mxu1 }
 0x260   : > { %2130 = vst.msk [vmem:[%s3368_s30 + $0x113] sm:$0xff] %vm1109_vm2, %v2042_v34  ;;  %v2043_v9 = vmul.f32 %v1973_v10, %v1771_v61 }
 0x262   : > { %2131 = vst.msk [vmem:[%s3368_s30 + $0x11b] sm:$0xff] %vm1109_vm2, %v2043_v9 }
 0x269   : > { %v1695_v33 = vpop.f32.mrb[28].mxu0 }
 0x26a   : > { %v1696_v31 = vadd.f32 %v3719_v53, %v1695_v33  ;;  %v2297_v44 = vpop.f32.mrb[29].mxu0 }
 0x26b   : > { %v1698_v48 = vpop.f32.mrb[30].mxu0 }
 0x26c   : > { %v2024_v51 = vmul.f32 %v3745_v24, %v1696_v31  ;;  %v1699_v41 = vadd.f32 %v3719_v53, %v1698_v48  ;;  %v2298_v63 = vpop.f32.mrb[31].mxu0 }
 0x26e   : > { %2112 = vst.msk [vmem:[%s3368_s30 + $0x83] sm:$0xff] %vm1109_vm2, %v2024_v51  ;;  %v2025_v25 = vmul.f32 %v3747_v18, %v1699_v41  ;;  %v2008_v51 = vpop.permute.xlu1 %2007 }
 0x26f   : > { %v1775_v32 = vpop.f32.mrb[24].mxu1 }
 0x270   : > { %2113 = vst.msk [vmem:[%s3368_s30 + $0x8b] sm:$0xff] %vm1109_vm2, %v2025_v25  ;;  %v1776_v57 = vadd.f32 %v3719_v53, %v1775_v32  ;;  %v2337_v8 = vpop.f32.mrb[25].mxu1 }
 0x271   : > { %v1778_v46 = vpop.f32.mrb[26].mxu1 }
 0x272   : > { %v2044_v35 = vmul.f32 %v1978_v56, %v1776_v57  ;;  %v1779_v24 = vadd.f32 %v3719_v53, %v1778_v46  ;;  %v2338_v38 = vpop.f32.mrb[27].mxu1 }
 0x274   : > { %2132 = vst.msk [vmem:[%s3368_s30 + $0x123] sm:$0xff] %vm1109_vm2, %v2044_v35  ;;  %v2045_v40 = vmul.f32 %v1983_v43, %v1779_v24 }
 0x276   : > { %2133 = vst.msk [vmem:[%s3368_s30 + $0x12b] sm:$0xff] %vm1109_vm2, %v2045_v40 }
 0x27d   : > { %v1703_v18 = vpop.f32.mrb[32].mxu0 }
 0x27e   : > { %v1704_v7 = vadd.f32 %v3719_v53, %v1703_v18  ;;  %v2301_v17 = vpop.f32.mrb[33].mxu0 }
 0x27f   : > { %v1706_v5 = vpop.f32.mrb[34].mxu0 }
 0x280   : > { %v2026_v16 = vmul.f32 %v3753_v12, %v1704_v7  ;;  %v1707_v13 = vadd.f32 %v3719_v53, %v1706_v5  ;;  %v2302_v27 = vpop.f32.mrb[35].mxu0 }
 0x282   : > { %2114 = vst.msk [vmem:[%s3368_s30 + $0x93] sm:$0xff] %vm1109_vm2, %v2026_v16  ;;  %v2027_v62 = vmul.f32 %v3755_v58, %v1707_v13 }
 0x283   : > { %v1783_v14 = vpop.f32.mrb[28].mxu1 }
 0x284   : > { %2115 = vst.msk [vmem:[%s3368_s30 + $0x9b] sm:$0xff] %vm1109_vm2, %v2027_v62  ;;  %v1784_v30 = vadd.f32 %v3719_v53, %v1783_v14  ;;  %v2341_v21 = vpop.f32.mrb[29].mxu1 }
 0x285   : > { %v1786_v50 = vpop.f32.mrb[30].mxu1 }
 0x286   : > { %v2046_v6 = vmul.f32 %v1988_v52, %v1784_v30  ;;  %v1787_v12 = vadd.f32 %v3719_v53, %v1786_v50  ;;  %v2342_v47 = vpop.f32.mrb[31].mxu1 }
 0x288   : > { %2134 = vst.msk [vmem:[%s3368_s30 + $0x133] sm:$0xff] %vm1109_vm2, %v2046_v6  ;;  %v2047_v15 = vmul.f32 %v1993_v36, %v1787_v12 }
 0x28a   : > { %2135 = vst.msk [vmem:[%s3368_s30 + $0x13b] sm:$0xff] %vm1109_vm2, %v2047_v15 }
 0x291   : > { %v1711_v58 = vpop.f32.mrb[36].mxu0 }
 0x292   : > { %v1712_v49 = vadd.f32 %v3719_v53, %v1711_v58  ;;  %v2305_v20 = vpop.f32.mrb[37].mxu0 }
 0x293   : > { %v1714_v45 = vpop.f32.mrb[38].mxu0 }
 0x294   : > { %v2028_v55 = vmul.f32 %v3757_v59, %v1712_v49  ;;  %v1715_v39 = vadd.f32 %v3719_v53, %v1714_v45  ;;  %v2306_v26 = vpop.f32.mrb[39].mxu0 }
 0x296   : > { %2116 = vst.msk [vmem:[%s3368_s30 + $0xa3] sm:$0xff] %vm1109_vm2, %v2028_v55  ;;  %v2029_v23 = vmul.f32 %v3759_v1, %v1715_v39 }
 0x297   : > { %v1791_v42 = vpop.f32.mrb[32].mxu1 }
 0x298   : > { %2117 = vst.msk [vmem:[%s3368_s30 + $0xab] sm:$0xff] %vm1109_vm2, %v2029_v23  ;;  %v1792_v22 = vadd.f32 %v3719_v53, %v1791_v42  ;;  %v2345_v2 = vpop.f32.mrb[33].mxu1 }
 0x299   : > { %v1794_v60 = vpop.f32.mrb[34].mxu1 }
 0x29a   : > { %v2048_v4 = vmul.f32 %v1998_v3, %v1792_v22  ;;  %v1795_v59 = vadd.f32 %v3719_v53, %v1794_v60  ;;  %v2346_v54 = vpop.f32.mrb[35].mxu1 }
 0x29c   : > { %2136 = vst.msk [vmem:[%s3368_s30 + $0x143] sm:$0xff] %vm1109_vm2, %v2048_v4  ;;  %v2049_v19 = vmul.f32 %v2003_v11, %v1795_v59 }
 0x29e   : > { %2137 = vst.msk [vmem:[%s3368_s30 + $0x14b] sm:$0xff] %vm1109_vm2, %v2049_v19 }
 0x2a5   : > { %v1719_v1 = vpop.f32.mrb[40].mxu0 }
 0x2a6   : > { %v1720_v37 = vadd.f32 %v3719_v53, %v1719_v1  ;;  %v2309_v34 = vpop.f32.mrb[41].mxu0 }
 0x2a7   : > { %v1722_v61 = vpop.f32.mrb[42].mxu0 }
 0x2a8   : > { %v2030_v0 = vmul.f32 %v3761_v29, %v1720_v37  ;;  %v1723_v10 = vadd.f32 %v3719_v53, %v1722_v61  ;;  %v2310_v9 = vpop.f32.mrb[43].mxu0 }
 0x2aa   : > { %2118 = vst.msk [vmem:[%s3368_s30 + $0xb3] sm:$0xff] %vm1109_vm2, %v2030_v0  ;;  %v2031_v33 = vmul.f32 %v3763_v28, %v1723_v10 }
 0x2ab   : > { %v1799_v31 = vpop.f32.mrb[36].mxu1 }
 0x2ac   : > { %2119 = vst.msk [vmem:[%s3368_s30 + $0xbb] sm:$0xff] %vm1109_vm2, %v2031_v33  ;;  %v1800_v44 = vadd.f32 %v3719_v53, %v1799_v31  ;;  %v2349_v48 = vpop.f32.mrb[37].mxu1 }
 0x2ad   : > { %v1802_v41 = vpop.f32.mrb[38].mxu1 }
 0x2ae   : > { %v2050_v63 = vmul.f32 %v2008_v51, %v1800_v44  ;;  %v2350_v25 = vpop.f32.mrb[39].mxu1 }
 0x2b0   : > { %2139 = vst.msk [vmem:[%s3368_s30 + $0x153] sm:$0xf] %vm2138_vm12, %v2050_v63 }
 0x2b1 PF: > { %s14_s15 = sadd.s32 1, %s2394_s15  }
 0x2b2   : > { %p11_p4 = scmp.ge.s32.totalorder %s14_s15, 4  }
 0x2b4   :  { %13 = sbr.rel (!%p11_p4) target bundleno = 1 (0x1), region = 66 }

// kernel: upconv_block_forward.5
= control target key start
LH: loop header
LB: loop body
LE: loop exit
PB: predicated region body
PF: predicated region fallthrough
CT: control target
= control target key end

     0   :  { %s4232_s24 = smov 0   ;;  %s7532_s0 = inlined_call_operand.vmem [shape: f32[2,362,8], index: 0, kind: input, shape index: {}]   ;;  %s7533_s1 = inlined_call_operand.vmem [shape: f32[2,362,4], index: 1, kind: input, shape index: {}]   ;;  %s7534_s2 = inlined_call_operand.vmem [shape: f32[362,1], index: 2, kind: input, shape index: {}]   ;;  %s7535_s3 = inlined_call_operand.vmem [shape: bf16[108,8], index: 3, kind: input, shape index: {}]   ;;  %s7536_s4 = inlined_call_operand.vmem [shape: f32[1,8], index: 4, kind: input, shape index: {}]   ;;  %s7537_s5 = inlined_call_operand.vmem [shape: f32[2,362,8], index: 5, kind: output, shape index: {0}]   ;;  %s7538_s6 = inlined_call_operand.vmem [shape: f32[1,8], index: 6, kind: output, shape index: {1}]   ;;  %s7539_s7 = inlined_call_operand.vmem [shape: f32[1,8], index: 7, kind: output, shape index: {2}]  }
   0x1 LB: > { %s4238_s25 = sadd.s32 4294967295, %s4169_s24   ;;  %p3948_p0 = scmp.ge.s32.totalorder %s4169_s24, 1  ;;  %s4169_s24 = sphi %s4232_s24, %s18_s24  }
   0x2   : > { %p242_p1 = scmp.lt.s32.totalorder %s4169_s24, 3 }
   0x4   : > { %p243_p2 = pnand %p3948_p0, %p242_p1 }
   0x6   : > { %246 = sbr.rel (%p243_p2) target bundleno = 1237 (0x4d5), region = 40 }
   0xd   : > { %p279_p3 = scmp.lt.s32.totalorder %s4238_s25, 1  ;;  %s4171_s11 = smov 8   ;;  %vm2052_vm0 = vcmask 64512   ;;  %vm2116_vm1 = vcmask 130048   ;;  %vm2159_vm2 = vcmask 195584   ;;  %vm2202_vm3 = vcmask 261120  }
   0xe   : > { %s4172_s12 = smov 16   ;;  %s4173_s13 = smov 24   ;;  %vm7551_vm4 = vcmask 326656   ;;  %vm7550_vm5 = vcmask 392192   ;;  %vm7548_vm6 = vcmask 457728   ;;  %vm7549_vm7 = vcmask 523264  }
   0xf   : > { %s280_s26 = scalar_select %p279_p3, %s4238_s25, 1  ;;  %vm2417_vm8 = vcmask 588800   ;;  %vm7546_vm9 = vcmask 621568   ;;  %vm7545_vm10 = vcmask 654336   ;;  %vm3097_vm11 = vcmask 1045504  }
  0x10   : > { %s4174_s14 = smov 32   ;;  %s4175_s15 = smov 40   ;;  %vm4188_vm12 = vmmov 0   ;;  %vm7552_vm13 = vcmask 31744   ;;  %vm7547_vm14 = vcmask 687104   ;;  %vm2589_vm15 = vcmask 719872  }
  0x11   : > { %s4244_s27 = smul.u32 368, %s280_s26  ;;  %s4176_s16 = smov 48  }
  0x12   : > { %s4177_s17 = smov 56   ;;  %s4178_s18 = smov 64  }
  0x13   : > { %s4250_s30 = scalar_lea.vmem %s7532_s0, %s4244_s27  ;;  %s4256_s10 = scalar_lea.vmem %s7537_s5, %s4244_s27 }
  0x14   : > { %v361_v0 = vld [vmem:[%s4250_s30 + $0x21] sm:$0xff]  ;;  %v362_v1 = vld [vmem:[%s4250_s30 + $0x29] sm:$0xff]  ;;  %v363_v5 = vld [vmem:[%s4250_s30 + $0x31] sm:$0xff]  ;;  %s5145_s21 = scalar_lea.vmem %s7533_s1, %s4244_s27  ;;  %s4179_s22 = smov 72  }
  0x15   : > { %v357_v2 = vld [vmem:[%s4250_s30 + $0x1] sm:$0xff]  ;;  %v400_v3 = vpack.c.bf16 %v362_v1, %v361_v0  ;;  %v358_v4 = vld [vmem:[%s4250_s30 + $0x9] sm:$0xff]  ;;  %v364_v6 = vld [vmem:[%s4250_s30 + $0x39] sm:$0xff]  ;;  %s4180_s23 = smov 76   ;;  %s4181_s26 = smov 80  }
  0x16   : > { %v398_v7 = vpack.c.bf16 %v358_v4, %v357_v2  ;;  %v359_v8 = vld [vmem:[%s4250_s30 + $0x11] sm:$0xff]  ;;  %v360_v9 = vld [vmem:[%s4250_s30 + $0x19] sm:$0xff]  ;;  %v401_v10 = vpack.c.bf16 %v364_v6, %v363_v5  ;;  %v365_v14 = vld [vmem:[%s4250_s30 + $0x41] sm:$0xff]  ;;  %s4182_s27 = smov 84   ;;  %s4183_s28 = smov 4  }
  0x17   : > { %1208 = vrot.lane.b32.xlu1 %v400_v3, %s4171_s11  ;;  %v399_v11 = vpack.c.bf16 %v360_v9, %v359_v8  ;;  %v367_v12 = vld [vmem:[%s4250_s30 + $0x51] sm:$0xff]  ;;  %v368_v13 = vld [vmem:[%s4250_s30 + $0x59] sm:$0xff]  ;;  %v366_v15 = vld [vmem:[%s4250_s30 + $0x49] sm:$0xff]  ;;  %s4184_s29 = smov 88   ;;  %s4185_s8 = smov 96  }
  0x18   : > { %1204 = vrot.lane.b32.xlu0 %v398_v7, %s4171_s11  ;;  %v403_v16 = vpack.c.bf16 %v368_v13, %v367_v12  ;;  %v402_v17 = vpack.c.bf16 %v366_v15, %v365_v14  ;;  %v371_v18 = vld [vmem:[%s4250_s30 + $0x71] sm:$0xff]  ;;  %v372_v19 = vld [vmem:[%s4250_s30 + $0x79] sm:$0xff]  ;;  %v369_v20 = vld [vmem:[%s4250_s30 + $0x61] sm:$0xff]  ;;  %s4186_s9 = smov 92   ;;  %p3981_p4 = scmp.ne.s32.totalorder %s4238_s25, 0 }
  0x19   : > { %v370_v21 = vld [vmem:[%s4250_s30 + $0x69] sm:$0xff]  ;;  %v405_v22 = vpack.c.bf16 %v372_v19, %v371_v18  ;;  %v375_v24 = vld [vmem:[%s4250_s30 + $0x91] sm:$0xff]  ;;  %v376_v25 = vld [vmem:[%s4250_s30 + $0x99] sm:$0xff] }
  0x1a   : > { %v404_v23 = vpack.c.bf16 %v370_v21, %v369_v20  ;;  %v373_v26 = vld [vmem:[%s4250_s30 + $0x81] sm:$0xff]  ;;  %v374_v27 = vld [vmem:[%s4250_s30 + $0x89] sm:$0xff]  ;;  %v407_v28 = vpack.c.bf16 %v376_v25, %v375_v24  ;;  %v379_v30 = vld [vmem:[%s4250_s30 + $0xb1] sm:$0xff] }
  0x1b   : > { %1210 = vrot.lane.b32.xlu1 %v401_v10, %s4171_s11  ;;  %v406_v29 = vpack.c.bf16 %v374_v27, %v373_v26  ;;  %v380_v31 = vld [vmem:[%s4250_s30 + $0xb9] sm:$0xff]  ;;  %v377_v32 = vld [vmem:[%s4250_s30 + $0xa1] sm:$0xff]  ;;  %v378_v33 = vld [vmem:[%s4250_s30 + $0xa9] sm:$0xff] }
  0x1c   : > { %1206 = vrot.lane.b32.xlu0 %v399_v11, %s4171_s11  ;;  %v409_v34 = vpack.c.bf16 %v380_v31, %v379_v30  ;;  %v408_v35 = vpack.c.bf16 %v378_v33, %v377_v32  ;;  %v383_v36 = vld [vmem:[%s4250_s30 + $0xd1] sm:$0xff]  ;;  %v384_v37 = vld [vmem:[%s4250_s30 + $0xd9] sm:$0xff]  ;;  %v381_v38 = vld [vmem:[%s4250_s30 + $0xc1] sm:$0xff] }
  0x1d   : > { %v382_v39 = vld [vmem:[%s4250_s30 + $0xc9] sm:$0xff]  ;;  %v411_v40 = vpack.c.bf16 %v384_v37, %v383_v36  ;;  %v387_v42 = vld [vmem:[%s4250_s30 + $0xf1] sm:$0xff]  ;;  %v388_v43 = vld [vmem:[%s4250_s30 + $0xf9] sm:$0xff] }
  0x1e   : > { %v410_v41 = vpack.c.bf16 %v382_v39, %v381_v38  ;;  %v385_v44 = vld [vmem:[%s4250_s30 + $0xe1] sm:$0xff]  ;;  %v386_v45 = vld [vmem:[%s4250_s30 + $0xe9] sm:$0xff]  ;;  %v413_v46 = vpack.c.bf16 %v388_v43, %v387_v42  ;;  %v391_v48 = vld [vmem:[%s4250_s30 + $0x111] sm:$0xff] }
  0x1f   : > { %1214 = vrot.lane.b32.xlu1 %v403_v16, %s4171_s11  ;;  %v412_v47 = vpack.c.bf16 %v386_v45, %v385_v44  ;;  %v392_v49 = vld [vmem:[%s4250_s30 + $0x119] sm:$0xff]  ;;  %v389_v50 = vld [vmem:[%s4250_s30 + $0x101] sm:$0xff]  ;;  %v390_v51 = vld [vmem:[%s4250_s30 + $0x109] sm:$0xff] }
  0x20   : > { %1212 = vrot.lane.b32.xlu0 %v402_v17, %s4171_s11  ;;  %v415_v52 = vpack.c.bf16 %v392_v49, %v391_v48  ;;  %v414_v53 = vpack.c.bf16 %v390_v51, %v389_v50  ;;  %v395_v54 = vld [vmem:[%s4250_s30 + $0x131] sm:$0xff]  ;;  %v396_v55 = vld [vmem:[%s4250_s30 + $0x139] sm:$0xff]  ;;  %v393_v56 = vld [vmem:[%s4250_s30 + $0x121] sm:$0xff] }
  0x21   : > { %v394_v57 = vld [vmem:[%s4250_s30 + $0x129] sm:$0xff]  ;;  %v417_v58 = vpack.c.bf16 %v396_v55, %v395_v54  ;;  %v397_v62 = vld [vmem:[%s4250_s30 + $0x141] sm:$0xf]  ;;  %v421_v3 = vld [vmem:[%s4250_s30 + $0x12] sm:$0xff] }
  0x22   : > { %v416_v59 = vpack.c.bf16 %v394_v57, %v393_v56  ;;  %v419_v60 = vld [vmem:[%s4250_s30 + $0x2] sm:$0xff]  ;;  %v420_v61 = vld [vmem:[%s4250_s30 + $0xa] sm:$0xff]  ;;  %v418_v0 = vpack.c.bf16 %v397_v62, %v397_v62  ;;  %v422_v4 = vld [vmem:[%s4250_s30 + $0x1a] sm:$0xff] }
  0x23   : > { %1218 = vrot.lane.b32.xlu1 %v405_v22, %s4171_s11  ;;  %v460_v63 = vpack.c.bf16 %v420_v61, %v419_v60  ;;  %v423_v1 = vld [vmem:[%s4250_s30 + $0x22] sm:$0xff]  ;;  %v424_v2 = vld [vmem:[%s4250_s30 + $0x2a] sm:$0xff]  ;;  %v4329_v6 = vpack.c.bf16 %v422_v4, %v421_v3  ;;  %v425_v9 = vld [vmem:[%s4250_s30 + $0x32] sm:$0xff] }
  0x24   : > { %1216 = vrot.lane.b32.xlu0 %v404_v23, %s4171_s11  ;;  %v4326_v5 = vpack.c.bf16 %v424_v2, %v423_v1  ;;  %v427_v7 = vld [vmem:[%s4250_s30 + $0x42] sm:$0xff]  ;;  %v428_v8 = vld [vmem:[%s4250_s30 + $0x4a] sm:$0xff]  ;;  %v426_v10 = vld [vmem:[%s4250_s30 + $0x3a] sm:$0xff] }
  0x25   : > { %v4337_v11 = vpack.c.bf16 %v428_v8, %v427_v7  ;;  %v4341_v12 = vpack.c.bf16 %v426_v10, %v425_v9  ;;  %v431_v13 = vld [vmem:[%s4250_s30 + $0x62] sm:$0xff]  ;;  %v432_v14 = vld [vmem:[%s4250_s30 + $0x6a] sm:$0xff]  ;;  %v429_v15 = vld [vmem:[%s4250_s30 + $0x52] sm:$0xff] }
  0x26   : > { %v430_v16 = vld [vmem:[%s4250_s30 + $0x5a] sm:$0xff]  ;;  %v4349_v17 = vpack.c.bf16 %v432_v14, %v431_v13  ;;  %v435_v19 = vld [vmem:[%s4250_s30 + $0x82] sm:$0xff]  ;;  %v436_v20 = vld [vmem:[%s4250_s30 + $0x8a] sm:$0xff] }
  0x27   : > { %1222 = vrot.lane.b32.xlu1 %v407_v28, %s4171_s11  ;;  %v4353_v18 = vpack.c.bf16 %v430_v16, %v429_v15  ;;  %v433_v21 = vld [vmem:[%s4250_s30 + $0x72] sm:$0xff]  ;;  %v434_v22 = vld [vmem:[%s4250_s30 + $0x7a] sm:$0xff]  ;;  %v468_v23 = vpack.c.bf16 %v436_v20, %v435_v19  ;;  %v439_v25 = vld [vmem:[%s4250_s30 + $0xa2] sm:$0xff] }
  0x28   : > { %1220 = vrot.lane.b32.xlu0 %v406_v29, %s4171_s11  ;;  %v467_v24 = vpack.c.bf16 %v434_v22, %v433_v21  ;;  %v440_v26 = vld [vmem:[%s4250_s30 + $0xaa] sm:$0xff]  ;;  %v437_v27 = vld [vmem:[%s4250_s30 + $0x92] sm:$0xff]  ;;  %v438_v28 = vld [vmem:[%s4250_s30 + $0x9a] sm:$0xff] }
  0x29   : > { %v470_v29 = vpack.c.bf16 %v440_v26, %v439_v25  ;;  %v469_v30 = vpack.c.bf16 %v438_v28, %v437_v27  ;;  %v443_v31 = vld [vmem:[%s4250_s30 + $0xc2] sm:$0xff]  ;;  %v444_v32 = vld [vmem:[%s4250_s30 + $0xca] sm:$0xff]  ;;  %v441_v33 = vld [vmem:[%s4250_s30 + $0xb2] sm:$0xff] }
  0x2a   : > { %v447_v37 = vld [vmem:[%s4250_s30 + $0xe2] sm:$0xff]  ;;  %v448_v38 = vld [vmem:[%s4250_s30 + $0xea] sm:$0xff]  ;;  %v445_v39 = vld [vmem:[%s4250_s30 + $0xd2] sm:$0xff] }
  0x2b   : > { %1226 = vrot.lane.b32.xlu1 %v409_v34, %s4171_s11  ;;  %v442_v34 = vld [vmem:[%s4250_s30 + $0xba] sm:$0xff]  ;;  %v451_v43 = vld [vmem:[%s4250_s30 + $0x102] sm:$0xff]  ;;  %v452_v44 = vld [vmem:[%s4250_s30 + $0x10a] sm:$0xff] }
  0x2c   : > { %1224 = vrot.lane.b32.xlu0 %v408_v35, %s4171_s11  ;;  %v472_v35 = vpack.c.bf16 %v444_v32, %v443_v31  ;;  %v471_v36 = vpack.c.bf16 %v442_v34, %v441_v33  ;;  %v449_v45 = vld [vmem:[%s4250_s30 + $0xf2] sm:$0xff]  ;;  %v455_v49 = vld [vmem:[%s4250_s30 + $0x122] sm:$0xff]  ;;  %v456_v50 = vld [vmem:[%s4250_s30 + $0x12a] sm:$0xff] }
  0x2d   : > { %v453_v51 = vld [vmem:[%s4250_s30 + $0x112] sm:$0xff]  ;;  %v459_v55 = vld [vmem:[%s4250_s30 + $0x142] sm:$0xf]  ;;  %v458_v57 = vld [vmem:[%s4250_s30 + $0x13a] sm:$0xff] }
  0x2e   : > { %v457_v56 = vld [vmem:[%s4250_s30 + $0x132] sm:$0xff]  ;;  %v481_v60 = vld [vmem:[%s4250_s30 + $0x142] sm:$0xff]  ;;  %v482_v61 = vld [vmem:[%s4250_s30 + $0x14a] sm:$0xff] }
  0x2f   : > { %1230 = vrot.lane.b32.xlu1 %v411_v40, %s4171_s11  ;;  %v446_v40 = vld [vmem:[%s4250_s30 + $0xda] sm:$0xff]  ;;  %v483_v4 = vld [vmem:[%s4250_s30 + $0x152] sm:$0xf]  ;;  %v492_v19 = vld [vmem:[%s4250_s30 + $0x43] sm:$0xff] }
  0x30   : > { %1228 = vrot.lane.b32.xlu0 %v410_v41, %s4171_s11  ;;  %v474_v41 = vpack.c.bf16 %v448_v38, %v447_v37  ;;  %v473_v42 = vpack.c.bf16 %v446_v40, %v445_v39  ;;  %v486_v1 = vld [vmem:[%s4250_s30 + $0x13] sm:$0xff]  ;;  %v487_v2 = vld [vmem:[%s4250_s30 + $0x1b] sm:$0xff]  ;;  %v485_v7 = vpack.c.bf16 %v483_v4, %v483_v4  ;;  %v493_v20 = vld [vmem:[%s4250_s30 + $0x4b] sm:$0xff] }
  0x31   : > { %v490_v8 = vld [vmem:[%s4250_s30 + $0x33] sm:$0xff]  ;;  %v491_v9 = vld [vmem:[%s4250_s30 + $0x3b] sm:$0xff]  ;;  %v496_v27 = vld [vmem:[%s4250_s30 + $0x63] sm:$0xff] }
  0x32   : > { %v529_v14 = vpack.c.bf16 %v491_v9, %v490_v8  ;;  %v494_v16 = vld [vmem:[%s4250_s30 + $0x53] sm:$0xff]  ;;  %v499_v25 = vld [vmem:[%s4250_s30 + $0x7b] sm:$0xff]  ;;  %v497_v28 = vld [vmem:[%s4250_s30 + $0x6b] sm:$0xff] }
  0x33   : > { %1234 = vrot.lane.b32.xlu1 %v413_v46, %s4171_s11  ;;  %v450_v46 = vld [vmem:[%s4250_s30 + $0xfa] sm:$0xff]  ;;  %v532_v31 = vpack.c.bf16 %v497_v28, %v496_v27  ;;  %v517_v8 = vld [vmem:[%s4250_s30 + $0x10b] sm:$0xff]  ;;  %v526_v27 = vld [vmem:[%s4250_s30 + $0x153] sm:$0xf] }
  0x34   : > { %1232 = vrot.lane.b32.xlu0 %v412_v47, %s4171_s11  ;;  %v476_v47 = vpack.c.bf16 %v452_v44, %v451_v43  ;;  %v475_v48 = vpack.c.bf16 %v450_v46, %v449_v45  ;;  %v502_v32 = vld [vmem:[%s4250_s30 + $0x93] sm:$0xff]  ;;  %v503_v33 = vld [vmem:[%s4250_s30 + $0x9b] sm:$0xff]  ;;  %v504_v43 = vld [vmem:[%s4250_s30 + $0xa3] sm:$0xff] }
  0x35   : > { %v535_v38 = vpack.c.bf16 %v503_v33, %v502_v32  ;;  %v506_v40 = vld [vmem:[%s4250_s30 + $0xb3] sm:$0xff]  ;;  %v505_v44 = vld [vmem:[%s4250_s30 + $0xab] sm:$0xff]  ;;  %v519_v4 = vld [vmem:[%s4250_s30 + $0x11b] sm:$0xff] }
  0x36   : > { %v525_v32 = vld [vmem:[%s4250_s30 + $0x14b] sm:$0xff]  ;;  %v307_v33 = vld [vmem:[%s4250_s30 + $0x60] sm:$0xff] }
  0x37   : > { %1238 = vrot.lane.b32.xlu1 %v415_v52, %s4171_s11  ;;  %v454_v52 = vld [vmem:[%s4250_s30 + $0x11a] sm:$0xff] }
  0x38   : > { %1236 = vrot.lane.b32.xlu0 %v414_v53, %s4171_s11  ;;  %v478_v53 = vpack.c.bf16 %v456_v50, %v455_v49  ;;  %v477_v54 = vpack.c.bf16 %v454_v52, %v453_v51  ;;  %v511_v49 = vld [vmem:[%s4250_s30 + $0xdb] sm:$0xff]  ;;  %v508_v51 = vld [vmem:[%s4250_s30 + $0xc3] sm:$0xff]  ;;  %v509_v52 = vld [vmem:[%s4250_s30 + $0xcb] sm:$0xff] }
  0x3b   : > { %1242 = vrot.lane.b32.xlu1 %v417_v58, %s4171_s11  ;;  %v480_v58 = vpack.c.bf16 %v459_v55, %v459_v55  ;;  %v538_v55 = vpack.c.bf16 %v509_v52, %v508_v51  ;;  %v549_v51 = vld [vmem:[%s4250_s30 + $0x1c] sm:$0xff] }
  0x3c   : > { %1240 = vrot.lane.b32.xlu0 %v416_v59, %s4171_s11  ;;  %v479_v59 = vpack.c.bf16 %v458_v57, %v457_v56  ;;  %v514_v56 = vld [vmem:[%s4250_s30 + $0xf3] sm:$0xff]  ;;  %v515_v57 = vld [vmem:[%s4250_s30 + $0xfb] sm:$0xff] }
  0x3f   : > { %1267 = vrot.lane.b32.xlu1 %v460_v63, %s4172_s12 }
  0x40   : > { %1244 = vrot.lane.b32.xlu0 %v418_v0, %s4171_s11  ;;  %v484_v0 = vpack.c.bf16 %v482_v61, %v481_v60  ;;  %v513_v60 = vld [vmem:[%s4250_s30 + $0xeb] sm:$0xff] }
  0x43   : > { %1271 = vrot.lane.b32.xlu1 %v4326_v5, %s4172_s12 }
  0x44   : > { %1269 = vrot.lane.b32.xlu0 %v4329_v6, %s4172_s12 }
  0x47   : > { %1275 = vrot.lane.b32.xlu1 %v4337_v11, %s4172_s12 }
  0x48   : > { %1273 = vrot.lane.b32.xlu0 %v4341_v12, %s4172_s12 }
  0x4b   : > { %1279 = vrot.lane.b32.xlu1 %v4349_v17, %s4172_s12 }
  0x4c   : > { %1277 = vrot.lane.b32.xlu0 %v4353_v18, %s4172_s12 }
  0x4f   : > { %1283 = vrot.lane.b32.xlu1 %v468_v23, %s4172_s12 }
  0x50   : > { %1281 = vrot.lane.b32.xlu0 %v467_v24, %s4172_s12 }
  0x53   : > { %1287 = vrot.lane.b32.xlu1 %v470_v29, %s4172_s12 }
  0x54   : > { %1285 = vrot.lane.b32.xlu0 %v469_v30, %s4172_s12 }
  0x57   : > { %1291 = vrot.lane.b32.xlu1 %v472_v35, %s4172_s12 }
  0x58   : > { %1289 = vrot.lane.b32.xlu0 %v471_v36, %s4172_s12 }
  0x5b   : > { %1295 = vrot.lane.b32.xlu1 %v474_v41, %s4172_s12 }
  0x5c   : > { %1293 = vrot.lane.b32.xlu0 %v473_v42, %s4172_s12 }
  0x5f   : > { %1299 = vrot.lane.b32.xlu1 %v476_v47, %s4172_s12 }
  0x60   : > { %1297 = vrot.lane.b32.xlu0 %v475_v48, %s4172_s12 }
  0x63   : > { %1303 = vrot.lane.b32.xlu1 %v478_v53, %s4172_s12 }
  0x64   : > { %1301 = vrot.lane.b32.xlu0 %v477_v54, %s4172_s12 }
  0x67   : > { %1307 = vrot.lane.b32.xlu1 %v480_v58, %s4172_s12 }
  0x68   : > { %1305 = vrot.lane.b32.xlu0 %v479_v59, %s4172_s12  ;;  %s4189_s12 = smov 100  }
  0x6b   : > { %1313 = vrot.lane.b32.xlu1 %v4326_v5, %s4173_s13 }
  0x6c   : > { %1311 = vrot.lane.b32.xlu0 %v4329_v6, %s4173_s13  ;;  %v527_v6 = vpack.c.bf16 %v487_v2, %v486_v1  ;;  %v518_v2 = vld [vmem:[%s4250_s30 + $0x113] sm:$0xff] }
  0x6f   : > { %1317 = vrot.lane.b32.xlu1 %v4337_v11, %s4173_s13  ;;  %v488_v11 = vld [vmem:[%s4250_s30 + $0x23] sm:$0xff] }
  0x70   : > { %1315 = vrot.lane.b32.xlu0 %v4341_v12, %s4173_s13  ;;  %v489_v12 = vld [vmem:[%s4250_s30 + $0x2b] sm:$0xff] }
  0x71   : > { %v528_v15 = vpack.c.bf16 %v489_v12, %v488_v11  ;;  %v543_v11 = vpack.c.bf16 %v519_v4, %v518_v2  ;;  %v555_v2 = vld [vmem:[%s4250_s30 + $0x4c] sm:$0xff] }
  0x73   : > { %1321 = vrot.lane.b32.xlu1 %v4349_v17, %s4173_s13  ;;  %v495_v17 = vld [vmem:[%s4250_s30 + $0x5b] sm:$0xff] }
  0x74   : > { %1319 = vrot.lane.b32.xlu0 %v4353_v18, %s4173_s13  ;;  %v531_v22 = vpack.c.bf16 %v495_v17, %v494_v16  ;;  %v520_v17 = vld [vmem:[%s4250_s30 + $0x123] sm:$0xff] }
  0x77   : > { %1325 = vrot.lane.b32.xlu1 %v468_v23, %s4173_s13  ;;  %v530_v23 = vpack.c.bf16 %v493_v20, %v492_v19  ;;  %v521_v19 = vld [vmem:[%s4250_s30 + $0x12b] sm:$0xff]  ;;  %v303_v20 = vld [vmem:[%s4250_s30 + $0x40] sm:$0xff] }
  0x78   : > { %1323 = vrot.lane.b32.xlu0 %v467_v24, %s4173_s13  ;;  %v498_v24 = vld [vmem:[%s4250_s30 + $0x73] sm:$0xff] }
  0x7b   : > { %1329 = vrot.lane.b32.xlu1 %v470_v29, %s4173_s13 }
  0x7c   : > { %1327 = vrot.lane.b32.xlu0 %v469_v30, %s4173_s13  ;;  %v533_v30 = vpack.c.bf16 %v499_v25, %v498_v24  ;;  %v544_v25 = vpack.c.bf16 %v521_v19, %v520_v17  ;;  %v315_v17 = vld [vmem:[%s4250_s30 + $0xa0] sm:$0xff]  ;;  %v316_v19 = vld [vmem:[%s4250_s30 + $0xa8] sm:$0xff] }
  0x7f   : > { %1333 = vrot.lane.b32.xlu1 %v472_v35, %s4173_s13  ;;  %v500_v35 = vld [vmem:[%s4250_s30 + $0x83] sm:$0xff] }
  0x80   : > { %1331 = vrot.lane.b32.xlu0 %v471_v36, %s4173_s13  ;;  %v501_v36 = vld [vmem:[%s4250_s30 + $0x8b] sm:$0xff] }
  0x81   : > { %v534_v39 = vpack.c.bf16 %v501_v36, %v500_v35  ;;  %v308_v35 = vld [vmem:[%s4250_s30 + $0x68] sm:$0xff] }
  0x83   : > { %1337 = vrot.lane.b32.xlu1 %v474_v41, %s4173_s13  ;;  %v507_v41 = vld [vmem:[%s4250_s30 + $0xbb] sm:$0xff] }
  0x84   : > { %1335 = vrot.lane.b32.xlu0 %v473_v42, %s4173_s13  ;;  %v537_v46 = vpack.c.bf16 %v507_v41, %v506_v40  ;;  %v547_v40 = vpack.c.bf16 %v526_v27, %v526_v27 }
  0x87   : > { %1341 = vrot.lane.b32.xlu1 %v476_v47, %s4173_s13  ;;  %v536_v47 = vpack.c.bf16 %v505_v44, %v504_v43  ;;  %v550_v43 = vld [vmem:[%s4250_s30 + $0x24] sm:$0xff]  ;;  %v551_v44 = vld [vmem:[%s4250_s30 + $0x2c] sm:$0xff] }
  0x88   : > { %1339 = vrot.lane.b32.xlu0 %v475_v48, %s4173_s13  ;;  %v510_v48 = vld [vmem:[%s4250_s30 + $0xd3] sm:$0xff] }
  0x89   : > { %v4424_v62 = vpop.permute.xlu1 %1208 }
  0x8a   : > { %7553 = vst [vmem:[#allocation2_spill] sm:$0xff] %v4424_v62  ;;  %v4426_v63 = vpop.permute.xlu0 %1204 }
  0x8b   : > { %1345 = vrot.lane.b32.xlu1 %v478_v53, %s4173_s13 }
  0x8c   : > { %1343 = vrot.lane.b32.xlu0 %v477_v54, %s4173_s13  ;;  %v539_v54 = vpack.c.bf16 %v511_v49, %v510_v48  ;;  %v548_v49 = vld [vmem:[%s4250_s30 + $0x14] sm:$0xff] }
  0x8d   : > { %v4432_v3 = vpop.permute.xlu1 %1210 }
  0x8e   : > { %7554 = vst [vmem:[#allocation3_spill] sm:$0xff] %v4432_v3  ;;  %v4435_v5 = vpop.permute.xlu0 %1206 }
  0x8f   : > { %1349 = vrot.lane.b32.xlu1 %v484_v0, %s4173_s13  ;;  %v541_v0 = vpack.c.bf16 %v515_v57, %v514_v56 }
  0x90   : > { %1347 = vrot.lane.b32.xlu0 %v479_v59, %s4173_s13  ;;  %v512_v59 = vld [vmem:[%s4250_s30 + $0xe3] sm:$0xff] }
  0x91   : > { %v4441_v10 = vpop.permute.xlu1 %1214  ;;  %v540_v1 = vpack.c.bf16 %v513_v60, %v512_v59  ;;  %v309_v59 = vld [vmem:[%s4250_s30 + $0x70] sm:$0xff]  ;;  %v4560_v60 = vpack.c.bf16 %v551_v44, %v550_v43 }
  0x92   : > { %v4445_v13 = vpop.permute.xlu0 %1212 }
  0x93   : > { %1374 = vrot.lane.b32.xlu1 %v527_v6, %s4174_s14 }
  0x94   : > { %1351 = vrot.lane.b32.xlu0 %v485_v7, %s4173_s13  ;;  %v516_v7 = vld [vmem:[%s4250_s30 + $0x103] sm:$0xff] }
  0x95   : > { %v4451_v18 = vpop.permute.xlu1 %1218  ;;  %v542_v12 = vpack.c.bf16 %v517_v8, %v516_v7 }
  0x96   : > { %v4455_v21 = vpop.permute.xlu0 %1216 }
  0x97   : > { %1378 = vrot.lane.b32.xlu1 %v529_v14, %s4174_s14  ;;  %v522_v14 = vld [vmem:[%s4250_s30 + $0x133] sm:$0xff] }
  0x98   : > { %1376 = vrot.lane.b32.xlu0 %v528_v15, %s4174_s14  ;;  %v523_v15 = vld [vmem:[%s4250_s30 + $0x13b] sm:$0xff] }
  0x99   : > { %v4461_v26 = vpop.permute.xlu1 %1222  ;;  %v545_v24 = vpack.c.bf16 %v523_v15, %v522_v14 }
  0x9a   : > { %v4465_v29 = vpop.permute.xlu0 %1220 }
  0x9b   : > { %1382 = vrot.lane.b32.xlu1 %v531_v22, %s4174_s14  ;;  %v304_v22 = vld [vmem:[%s4250_s30 + $0x48] sm:$0xff] }
  0x9c   : > { %1380 = vrot.lane.b32.xlu0 %v530_v23, %s4174_s14  ;;  %v340_v28 = vpack.c.bf16 %v304_v22, %v303_v20 }
  0x9d   : > { %v4471_v34 = vpop.permute.xlu1 %1226 }
  0x9e   : > { %v4475_v37 = vpop.permute.xlu0 %1224 }
  0x9f   : > { %1386 = vrot.lane.b32.xlu1 %v533_v30, %s4174_s14 }
  0xa0   : > { %1384 = vrot.lane.b32.xlu0 %v532_v31, %s4174_s14  ;;  %v524_v31 = vld [vmem:[%s4250_s30 + $0x143] sm:$0xff] }
  0xa1   : > { %v4481_v42 = vpop.permute.xlu1 %1230  ;;  %v546_v41 = vpack.c.bf16 %v525_v32, %v524_v31  ;;  %v559_v31 = vld [vmem:[%s4250_s30 + $0x6c] sm:$0xff] }
  0xa2   : > { %7555 = vst [vmem:[#allocation4_spill] sm:$0xff] %v4481_v42  ;;  %v4485_v45 = vpop.permute.xlu0 %1228 }
  0xa3   : > { %7556 = vst [vmem:[#allocation5_spill] sm:$0xff] %v4485_v45  ;;  %1390 = vrot.lane.b32.xlu1 %v535_v38, %s4174_s14  ;;  %v305_v38 = vld [vmem:[%s4250_s30 + $0x50] sm:$0xff]  ;;  %v895_v45 = vld [vmem:[%s5145_s21 + $0x102] sm:$0xff] }
  0xa4   : > { %1388 = vrot.lane.b32.xlu0 %v534_v39, %s4174_s14  ;;  %v306_v39 = vld [vmem:[%s4250_s30 + $0x58] sm:$0xff] }
  0xa5   : > { %v4491_v50 = vpop.permute.xlu1 %1234  ;;  %v341_v52 = vpack.c.bf16 %v306_v39, %v305_v38  ;;  %v556_v38 = vld [vmem:[%s4250_s30 + $0x54] sm:$0xff]  ;;  %v557_v39 = vld [vmem:[%s4250_s30 + $0x5c] sm:$0xff] }
  0xa6   : > { %v4495_v53 = vpop.permute.xlu0 %1232 }
  0xa7   : > { %1394 = vrot.lane.b32.xlu1 %v537_v46, %s4174_s14  ;;  %v2067_v46 = vsel %vm2052_vm0, %v340_v28, %v4445_v13  ;;  %v310_v13 = vld [vmem:[%s4250_s30 + $0x78] sm:$0xff]  ;;  %v2070_v14 = vsel %vm2052_vm0, %v341_v52, %v4441_v10  ;;  %v558_v28 = vld [vmem:[%s4250_s30 + $0x64] sm:$0xff] }
  0xa8   : > { %1392 = vrot.lane.b32.xlu0 %v536_v47, %s4174_s14  ;;  %v342_v47 = vpack.c.bf16 %v308_v35, %v307_v33  ;;  %v343_v15 = vpack.c.bf16 %v310_v13, %v309_v59  ;;  %v346_v33 = vpack.c.bf16 %v316_v19, %v315_v17  ;;  %v560_v52 = vld [vmem:[%s4250_s30 + $0x74] sm:$0xff]  ;;  %v323_v59 = vld [vmem:[%s4250_s30 + $0xe0] sm:$0xff]  ;;  %v324_v13 = vld [vmem:[%s4250_s30 + $0xe8] sm:$0xff] }
  0xa9   : > { %v4501_v58 = vpop.permute.xlu1 %1238  ;;  %v328_v17 = vld [vmem:[%s4250_s30 + $0x108] sm:$0xff] }
  0xaa   : > { %v4505_v61 = vpop.permute.xlu0 %1236  ;;  %v2073_v4 = vsel %vm2052_vm0, %v342_v47, %v4455_v21  ;;  %v314_v21 = vld [vmem:[%s4250_s30 + $0x98] sm:$0xff]  ;;  %v4608_v47 = vpack.c.bf16 %v557_v39, %v556_v38 }
  0xab   : > { %1398 = vrot.lane.b32.xlu1 %v539_v54, %s4174_s14  ;;  %v311_v54 = vld [vmem:[%s4250_s30 + $0x80] sm:$0xff]  ;;  %v568_v39 = vld [vmem:[%s4250_s30 + $0xb4] sm:$0xff] }
  0xac   : > { %1396 = vrot.lane.b32.xlu0 %v538_v55, %s4174_s14  ;;  %v312_v55 = vld [vmem:[%s4250_s30 + $0x88] sm:$0xff] }
  0xad   : > { %v4511_v6 = vpop.permute.xlu1 %1242  ;;  %v344_v7 = vpack.c.bf16 %v312_v55, %v311_v54  ;;  %v561_v54 = vld [vmem:[%s4250_s30 + $0x7c] sm:$0xff] }
  0xae   : > { %v4515_v9 = vpop.permute.xlu0 %1240 }
  0xaf   : > { %1402 = vrot.lane.b32.xlu1 %v541_v0, %s4174_s14  ;;  %v589_v0 = vpack.c.bf16 %v549_v51, %v548_v49  ;;  %v2079_v32 = vsel %vm2052_vm0, %v344_v7, %v4465_v29  ;;  %v4604_v29 = vpack.c.bf16 %v559_v31, %v558_v28  ;;  %v2085_v49 = vsel %vm2052_vm0, %v346_v33, %v4475_v37  ;;  %v567_v7 = vld [vmem:[%s4250_s30 + $0xac] sm:$0xff]  ;;  %v570_v31 = vld [vmem:[%s4250_s30 + $0xc4] sm:$0xff] }
  0xb0   : > { %1400 = vrot.lane.b32.xlu0 %v540_v1, %s4174_s14  ;;  %v554_v1 = vld [vmem:[%s4250_s30 + $0x44] sm:$0xff] }
  0xb1   : > { %v4521_v16 = vpop.permute.xlu1 %1267  ;;  %v4583_v27 = vpack.c.bf16 %v555_v2, %v554_v1 }
  0xb2   : > { %v4527_v23 = vpop.permute.xlu0 %1244 }
  0xb3   : > { %1406 = vrot.lane.b32.xlu1 %v543_v11, %s4174_s14  ;;  %v552_v11 = vld [vmem:[%s4250_s30 + $0x34] sm:$0xff] }
  0xb4   : > { %1404 = vrot.lane.b32.xlu0 %v542_v12, %s4174_s14  ;;  %v553_v12 = vld [vmem:[%s4250_s30 + $0x3c] sm:$0xff] }
  0xb5   : > { %v4532_v30 = vpop.permute.xlu1 %1271  ;;  %v4586_v10 = vpack.c.bf16 %v553_v12, %v552_v11  ;;  %v564_v12 = vld [vmem:[%s4250_s30 + $0x94] sm:$0xff] }
  0xb6   : > { %7557 = vst [vmem:[#allocation6_spill] sm:$0xff] %v4532_v30  ;;  %v4538_v36 = vpop.permute.xlu0 %1269 }
  0xb7   : > { %1410 = vrot.lane.b32.xlu1 %v545_v24, %s4174_s14  ;;  %v313_v24 = vld [vmem:[%s4250_s30 + $0x90] sm:$0xff] }
  0xb8   : > { %1408 = vrot.lane.b32.xlu0 %v544_v25, %s4174_s14 }
  0xb9   : > { %v1276_v48 = vpop.permute.xlu1 %1275 }
  0xba   : > { %v4553_v56 = vsel %vm2116_vm1, %v2067_v46, %v1276_v48  ;;  %v4555_v57 = vpop.permute.xlu0 %1273  ;;  %v563_v48 = vld [vmem:[%s4250_s30 + $0x8c] sm:$0xff] }
  0xbb   : > { %7558 = vst [vmem:[#allocation7_spill] sm:$0xff] %v4555_v57  ;;  %1414 = vrot.lane.b32.xlu1 %v547_v40, %s4174_s14  ;;  %v2076_v40 = vsel %vm2052_vm0, %v343_v15, %v4451_v18  ;;  %v562_v18 = vld [vmem:[%s4250_s30 + $0x84] sm:$0xff]  ;;  %v808_v57 = vld [vmem:[%s5145_s21 + $0x39] sm:$0xff] }
  0xbc   : > { %1412 = vrot.lane.b32.xlu0 %v546_v41, %s4174_s14  ;;  %v345_v41 = vpack.c.bf16 %v314_v21, %v313_v24  ;;  %v4628_v2 = vpack.c.bf16 %v563_v48, %v562_v18  ;;  %v327_v15 = vld [vmem:[%s4250_s30 + $0x100] sm:$0xff]  ;;  %v326_v24 = vld [vmem:[%s4250_s30 + $0xf8] sm:$0xff]  ;;  %v332_v18 = vld [vmem:[%s4250_s30 + $0x128] sm:$0xff] }
  0xbd   : > { %v1280_v8 = vpop.permute.xlu1 %1279 }
  0xbe   : > { %v4574_v20 = vsel %vm2116_vm1, %v2073_v4, %v1280_v8  ;;  %v1278_v22 = vpop.permute.xlu0 %1277  ;;  %v2082_v55 = vsel %vm2052_vm0, %v345_v41, %v4461_v26  ;;  %v4632_v26 = vpack.c.bf16 %v561_v54, %v560_v52  ;;  %v566_v4 = vld [vmem:[%s4250_s30 + $0xa4] sm:$0xff]  ;;  %v350_v8 = vpack.c.bf16 %v324_v13, %v323_v59  ;;  %v330_v52 = vld [vmem:[%s4250_s30 + $0x118] sm:$0xff]  ;;  %v575_v59 = vld [vmem:[%s4250_s30 + $0xec] sm:$0xff] }
  0xbf   : > { %v4579_v25 = vsel %vm2116_vm1, %v2070_v14, %v1278_v22  ;;  %1439 = vrot.lane.b32.xlu1 %v4560_v60, %s4175_s15  ;;  %v565_v14 = vld [vmem:[%s4250_s30 + $0x9c] sm:$0xff]  ;;  %v325_v22 = vld [vmem:[%s4250_s30 + $0xf0] sm:$0xff]  ;;  %v4648_v21 = vpack.c.bf16 %v567_v7, %v566_v4 }
  0xc0   : > { %1437 = vrot.lane.b32.xlu0 %v589_v0, %s4175_s15  ;;  %v4652_v28 = vpack.c.bf16 %v565_v14, %v564_v12  ;;  %v2097_v33 = vsel %vm2052_vm0, %v350_v8, %v4495_v53  ;;  %v351_v41 = vpack.c.bf16 %v326_v24, %v325_v22  ;;  %v572_v7 = vld [vmem:[%s4250_s30 + $0xd4] sm:$0xff]  ;;  %v573_v8 = vld [vmem:[%s4250_s30 + $0xdc] sm:$0xff] }
  0xc1   : > { %v1284_v35 = vpop.permute.xlu1 %1283  ;;  %v333_v24 = vld [vmem:[%s4250_s30 + $0x130] sm:$0xff] }
  0xc2   : > { %v4597_v43 = vsel %vm2116_vm1, %v2079_v32, %v1284_v35  ;;  %v1282_v44 = vpop.permute.xlu0 %1281  ;;  %v571_v32 = vld [vmem:[%s4250_s30 + $0xcc] sm:$0xff]  ;;  %v352_v35 = vpack.c.bf16 %v328_v17, %v327_v15  ;;  %v2100_v12 = vsel %vm2052_vm0, %v351_v41, %v4491_v50  ;;  %v335_v15 = vld [vmem:[%s4250_s30 + $0x140] sm:$0xf]  ;;  %v4700_v50 = vpack.c.bf16 %v573_v8, %v572_v7  ;;  %v576_v41 = vld [vmem:[%s4250_s30 + $0xf4] sm:$0xff] }
  0xc3   : > { %v4600_v46 = vsel %vm2116_vm1, %v2076_v40, %v1282_v44  ;;  %1443 = vrot.lane.b32.xlu1 %v4583_v27, %s4175_s15  ;;  %v569_v40 = vld [vmem:[%s4250_s30 + $0xbc] sm:$0xff]  ;;  %v4671_v53 = vpack.c.bf16 %v571_v32, %v570_v31  ;;  %v580_v8 = vld [vmem:[%s4250_s30 + $0x114] sm:$0xff] }
  0xc4   : > { %1441 = vrot.lane.b32.xlu0 %v4586_v10, %s4175_s15  ;;  %v331_v44 = vld [vmem:[%s4250_s30 + $0x120] sm:$0xff]  ;;  %v4675_v54 = vpack.c.bf16 %v569_v40, %v568_v39  ;;  %v2103_v13 = vsel %vm2052_vm0, %v352_v35, %v4505_v61  ;;  %v334_v31 = vld [vmem:[%s4250_s30 + $0x138] sm:$0xff]  ;;  %v579_v35 = vld [vmem:[%s4250_s30 + $0x10c] sm:$0xff]  ;;  %v356_v39 = vpack.c.bf16 %v335_v15, %v335_v15 }
  0xc5   : > { %v1288_v51 = vpop.permute.xlu1 %1287 }
  0xc6   : > { %v4621_v0 = vsel %vm2116_vm1, %v2085_v49, %v1288_v51  ;;  %v1286_v1 = vpop.permute.xlu0 %1285  ;;  %v329_v51 = vld [vmem:[%s4250_s30 + $0x110] sm:$0xff] }
  0xc7   : > { %v4624_v37 = vsel %vm2116_vm1, %v2082_v55, %v1286_v1  ;;  %1447 = vrot.lane.b32.xlu1 %v4604_v29, %s4175_s15  ;;  %v574_v55 = vld [vmem:[%s4250_s30 + $0xe4] sm:$0xff]  ;;  %v354_v1 = vpack.c.bf16 %v332_v18, %v331_v44  ;;  %v353_v14 = vpack.c.bf16 %v330_v52, %v329_v51  ;;  %v577_v44 = vld [vmem:[%s4250_s30 + $0xfc] sm:$0xff]  ;;  %v355_v51 = vpack.c.bf16 %v334_v31, %v333_v24 }
  0xc8   : > { %1445 = vrot.lane.b32.xlu0 %v4608_v47, %s4175_s15  ;;  %v4696_v32 = vpack.c.bf16 %v575_v59, %v574_v55 }
  0xc9   : > { %v4636_v11 = vpop.permute.xlu1 %1291  ;;  %v2106_v18 = vsel %vm2052_vm0, %v353_v14, %v4501_v58  ;;  %v582_v58 = vld [vmem:[%s4250_s30 + $0x124] sm:$0xff]  ;;  %v2112_v14 = vsel %vm2052_vm0, %v355_v51, %v4511_v6  ;;  %v587_v6 = vld [vmem:[%s4250_s30 + $0x14c] sm:$0xff]  ;;  %v588_v51 = vld [vmem:[%s4250_s30 + $0x154] sm:$0xf] }
  0xca   : > { %7559 = vst [vmem:[#allocation8_spill] sm:$0xff] %v4636_v11  ;;  %v4642_v19 = vpop.permute.xlu0 %1289  ;;  %v891_v11 = vld [vmem:[%s5145_s21 + $0xe2] sm:$0xff] }
  0xcb   : > { %1451 = vrot.lane.b32.xlu1 %v4628_v2, %s4175_s15 }
  0xcc   : > { %1449 = vrot.lane.b32.xlu0 %v4632_v26, %s4175_s15 }
  0xcd   : > { %v1296_v38 = vpop.permute.xlu1 %1295 }
  0xce   : > { %v4663_v48 = vsel %vm2116_vm1, %v2097_v33, %v1296_v38  ;;  %v4665_v49 = vpop.permute.xlu0 %1293  ;;  %v578_v33 = vld [vmem:[%s4250_s30 + $0x104] sm:$0xff]  ;;  %v2109_v38 = vsel %vm2052_vm0, %v354_v1, %v4515_v9  ;;  %v583_v1 = vld [vmem:[%s4250_s30 + $0x12c] sm:$0xff] }
  0xcf   : > { %7560 = vst [vmem:[#allocation9_spill] sm:$0xff] %v4665_v49  ;;  %1455 = vrot.lane.b32.xlu1 %v4648_v21, %s4175_s15  ;;  %v4718_v9 = vpack.c.bf16 %v579_v35, %v578_v33  ;;  %v4740_v31 = vpack.c.bf16 %v583_v1, %v582_v58  ;;  %v586_v33 = vld [vmem:[%s4250_s30 + $0x144] sm:$0xff]  ;;  %v609_v58 = vpack.c.bf16 %v588_v51, %v588_v51 }
  0xd0   : > { %1453 = vrot.lane.b32.xlu0 %v4652_v28, %s4175_s15  ;;  %v615_v51 = vld [vmem:[%s4250_s30 + $0x25] sm:$0xff] }
  0xd1   : > { %v1300_v4 = vpop.permute.xlu1 %1299 }
  0xd2   : > { %v4687_v17 = vsel %vm2116_vm1, %v2103_v13, %v1300_v4  ;;  %v1298_v22 = vpop.permute.xlu0 %1297  ;;  %v4722_v13 = vpack.c.bf16 %v577_v44, %v576_v41  ;;  %v2115_v4 = vsel %vm2052_vm0, %v356_v39, %v4527_v23  ;;  %v585_v39 = vld [vmem:[%s4250_s30 + $0x13c] sm:$0xff]  ;;  %v4756_v41 = vpack.c.bf16 %v587_v6, %v586_v33 }
  0xd3   : > { %v4692_v61 = vsel %vm2116_vm1, %v2100_v12, %v1298_v22  ;;  %1459 = vrot.lane.b32.xlu1 %v4671_v53, %s4175_s15  ;;  %v581_v12 = vld [vmem:[%s4250_s30 + $0x11c] sm:$0xff] }
  0xd4   : > { %1457 = vrot.lane.b32.xlu0 %v4675_v54, %s4175_s15  ;;  %v4744_v23 = vpack.c.bf16 %v581_v12, %v580_v8 }
  0xd5   : > { %v1304_v40 = vpop.permute.xlu1 %1303 }
  0xd6   : > { %v4711_v52 = vsel %vm2116_vm1, %v2109_v38, %v1304_v40  ;;  %v1302_v55 = vpop.permute.xlu0 %1301  ;;  %v584_v38 = vld [vmem:[%s4250_s30 + $0x134] sm:$0xff] }
  0xd7   : > { %v4714_v59 = vsel %vm2116_vm1, %v2106_v18, %v1302_v55  ;;  %1463 = vrot.lane.b32.xlu1 %v4696_v32, %s4175_s15  ;;  %v4760_v44 = vpack.c.bf16 %v585_v39, %v584_v38  ;;  %v617_v38 = vld [vmem:[%s4250_s30 + $0x35] sm:$0xff] }
  0xd8   : > { %1461 = vrot.lane.b32.xlu0 %v4700_v50, %s4175_s15 }
  0xd9   : > { %v1308_v7 = vpop.permute.xlu1 %1307 }
  0xda   : > { %v4733_v15 = vsel %vm2116_vm1, %v2115_v4, %v1308_v7  ;;  %v1306_v22 = vpop.permute.xlu0 %1305 }
  0xdb   : > { %v4736_v24 = vsel %vm2116_vm1, %v2112_v14, %v1306_v22  ;;  %1467 = vrot.lane.b32.xlu1 %v4718_v9, %s4175_s15 }
  0xdc   : > { %1465 = vrot.lane.b32.xlu0 %v4722_v13, %s4175_s15 }
  0xdd   : > { %v4748_v35 = vpop.permute.xlu1 %1313 }
  0xde   : > { %v4752_v40 = vpop.permute.xlu0 %1311 }
  0xdf   : > { %1471 = vrot.lane.b32.xlu1 %v4740_v31, %s4175_s15 }
  0xe0   : > { %1469 = vrot.lane.b32.xlu0 %v4744_v23, %s4175_s15 }
  0xe1   : > { %v4762_v18 = vpop.permute.xlu1 %1317 }
  0xe2   : > { %7561 = vst [vmem:[#allocation10_spill] sm:$0xff] %v4762_v18  ;;  %v4765_v55 = vpop.permute.xlu0 %1315  ;;  %v764_v18 = vld [vmem:[%s5145_s21 + $0xc8] sm:$0xff] }
  0xe3   : > { %7562 = vst [vmem:[#allocation11_spill] sm:$0xff] %v4765_v55  ;;  %1475 = vrot.lane.b32.xlu1 %v4756_v41, %s4175_s15 }
  0xe4   : > { %1473 = vrot.lane.b32.xlu0 %v4760_v44, %s4175_s15 }
  0xe5   : > { %v1322_v1 = vpop.permute.xlu1 %1321 }
  0xe6   : > { %v4773_v4 = vsel %vm2159_vm2, %v4579_v25, %v1322_v1  ;;  %v1320_v7 = vpop.permute.xlu0 %1319 }
  0xe7   : > { %v4777_v8 = vsel %vm2159_vm2, %v4553_v56, %v1320_v7  ;;  %1481 = vrot.lane.b32.xlu1 %v4560_v60, %s4176_s16 }
  0xe8   : > { %1477 = vrot.lane.b32.xlu0 %v609_v58, %s4175_s15  ;;  %v616_v58 = vld [vmem:[%s4250_s30 + $0x2d] sm:$0xff] }
  0xe9   : > { %v1326_v12 = vpop.permute.xlu1 %1325 }
  0xea   : > { %v4784_v14 = vsel %vm2159_vm2, %v4600_v46, %v1326_v12  ;;  %v1324_v22 = vpop.permute.xlu0 %1323  ;;  %v621_v12 = vld [vmem:[%s4250_s30 + $0x55] sm:$0xff] }
  0xeb   : > { %v4788_v25 = vsel %vm2159_vm2, %v4574_v20, %v1324_v22  ;;  %1485 = vrot.lane.b32.xlu1 %v4583_v27, %s4176_s16  ;;  %v622_v22 = vld [vmem:[%s4250_s30 + $0x5d] sm:$0xff] }
  0xec   : > { %1483 = vrot.lane.b32.xlu0 %v4586_v10, %s4176_s16 }
  0xed   : > { %v1330_v56 = vpop.permute.xlu1 %1329 }
  0xee   : > { %v4796_v60 = vsel %vm2159_vm2, %v4624_v37, %v1330_v56  ;;  %v1328_v33 = vpop.permute.xlu0 %1327 }
  0xef   : > { %v4800_v46 = vsel %vm2159_vm2, %v4597_v43, %v1328_v33  ;;  %1489 = vrot.lane.b32.xlu1 %v4604_v29, %s4176_s16  ;;  %v619_v33 = vld [vmem:[%s4250_s30 + $0x45] sm:$0xff] }
  0xf0   : > { %1487 = vrot.lane.b32.xlu0 %v4608_v47, %s4176_s16 }
  0xf1   : > { %v4806_v20 = vpop.permute.xlu1 %1333 }
  0xf2   : > { %v1332_v27 = vpop.permute.xlu0 %1331 }
  0xf3   : > { %v4810_v10 = vsel %vm2159_vm2, %v4621_v0, %v1332_v27  ;;  %1493 = vrot.lane.b32.xlu1 %v4628_v2, %s4176_s16  ;;  %v620_v27 = vld [vmem:[%s4250_s30 + $0x4d] sm:$0xff] }
  0xf4   : > { %1491 = vrot.lane.b32.xlu0 %v4632_v26, %s4176_s16 }
  0xf5   : > { %v4816_v43 = vpop.permute.xlu1 %1337 }
  0xf6   : > { %7563 = vst [vmem:[#allocation12_spill] sm:$0xff] %v4816_v43  ;;  %v4818_v37 = vpop.permute.xlu0 %1335 }
  0xf7   : > { %7564 = vst [vmem:[#allocation13_spill] sm:$0xff] %v4818_v37  ;;  %1497 = vrot.lane.b32.xlu1 %v4648_v21, %s4176_s16  ;;  %v888_v37 = vld [vmem:[%s5145_s21 + $0xca] sm:$0xff] }
  0xf8   : > { %1495 = vrot.lane.b32.xlu0 %v4652_v28, %s4176_s16 }
  0xf9   : > { %v1342_v29 = vpop.permute.xlu1 %1341 }
  0xfa   : > { %v4826_v47 = vsel %vm2159_vm2, %v4692_v61, %v1342_v29  ;;  %v1340_v0 = vpop.permute.xlu0 %1339 }
  0xfb   : > { %v4830_v2 = vsel %vm2159_vm2, %v4663_v48, %v1340_v0  ;;  %1501 = vrot.lane.b32.xlu1 %v4671_v53, %s4176_s16 }
  0xfc   : > { %1499 = vrot.lane.b32.xlu0 %v4675_v54, %s4176_s16 }
  0xfd   : > { %v1346_v26 = vpop.permute.xlu1 %1345 }
  0xfe   : > { %v4838_v21 = vsel %vm2159_vm2, %v4714_v59, %v1346_v26  ;;  %v1344_v28 = vpop.permute.xlu0 %1343  ;;  %v659_v26 = vpack.c.bf16 %v622_v22, %v621_v12  ;;  %v633_v22 = vld [vmem:[%s4250_s30 + $0xb5] sm:$0xff] }
  0xff   : > { %v4842_v61 = vsel %vm2159_vm2, %v4687_v17, %v1344_v28  ;;  %1505 = vrot.lane.b32.xlu1 %v4696_v32, %s4176_s16  ;;  %v658_v28 = vpack.c.bf16 %v620_v27, %v619_v33  ;;  %v632_v27 = vld [vmem:[%s4250_s30 + $0xad] sm:$0xff] }
 0x100   : > { %1503 = vrot.lane.b32.xlu0 %v4700_v50, %s4176_s16 }
 0x101   : > { %v1350_v48 = vpop.permute.xlu1 %1349 }
 0x102   : > { %v4850_v53 = vsel %vm2159_vm2, %v4736_v24, %v1350_v48  ;;  %v1348_v54 = vpop.permute.xlu0 %1347  ;;  %v611_v24 = vld [vmem:[%s4250_s30 + $0x15c] sm:$0xff] }
 0x103   : > { %v4854_v59 = vsel %vm2159_vm2, %v4711_v52, %v1348_v54  ;;  %1509 = vrot.lane.b32.xlu1 %v4718_v9, %s4176_s16  ;;  %v612_v52 = vld [vmem:[%s4250_s30 + $0x164] sm:$0xf]  ;;  %v625_v48 = vld [vmem:[%s4250_s30 + $0x75] sm:$0xff] }
 0x104   : > { %1507 = vrot.lane.b32.xlu0 %v4722_v13, %s4176_s16  ;;  %v610_v13 = vld [vmem:[%s4250_s30 + $0x154] sm:$0xff]  ;;  %v626_v54 = vld [vmem:[%s4250_s30 + $0x7d] sm:$0xff] }
 0x105   : > { %v4860_v17 = vpop.permute.xlu1 %1374 }
 0x106   : > { %v1352_v32 = vpop.permute.xlu0 %1351 }
 0x107   : > { %v4864_v50 = vsel %vm2159_vm2, %v4733_v15, %v1352_v32  ;;  %1513 = vrot.lane.b32.xlu1 %v4740_v31, %s4176_s16  ;;  %v614_v15 = vpack.c.bf16 %v612_v52, %v612_v52  ;;  %v613_v31 = vpack.c.bf16 %v611_v24, %v610_v13  ;;  %v623_v32 = vld [vmem:[%s4250_s30 + $0x65] sm:$0xff]  ;;  %v624_v52 = vld [vmem:[%s4250_s30 + $0x6d] sm:$0xff] }
 0x108   : > { %1511 = vrot.lane.b32.xlu0 %v4744_v23, %s4176_s16  ;;  %v618_v23 = vld [vmem:[%s4250_s30 + $0x3d] sm:$0xff] }
 0x109   : > { %v4871_v9 = vpop.permute.xlu1 %1378  ;;  %v657_v7 = vpack.c.bf16 %v618_v23, %v617_v38  ;;  %v629_v38 = vld [vmem:[%s4250_s30 + $0x95] sm:$0xff]  ;;  %v630_v23 = vld [vmem:[%s4250_s30 + $0x9d] sm:$0xff] }
 0x10a   : > { %7565 = vst [vmem:[#allocation14_spill] sm:$0xff] %v4871_v9  ;;  %v4875_v6 = vpop.permute.xlu0 %1376 }
 0x10b   : > { %1517 = vrot.lane.b32.xlu1 %v4756_v41, %s4176_s16 }
 0x10c   : > { %1515 = vrot.lane.b32.xlu0 %v4760_v44, %s4176_s16  ;;  %v656_v44 = vpack.c.bf16 %v616_v58, %v615_v51  ;;  %v628_v51 = vld [vmem:[%s4250_s30 + $0x8d] sm:$0xff] }
 0x10d   : > { %v1383_v39 = vpop.permute.xlu1 %1382 }
 0x10e   : > { %v4887_v1 = vsel %vm2202_vm3, %v4777_v8, %v1383_v39  ;;  %v4889_v41 = vpop.permute.xlu0 %1380 }
 0x10f   : > { %7566 = vst [vmem:[#allocation15_spill] sm:$0xff] %v4889_v41  ;;  %1521 = vrot.lane.b32.xlu1 %v614_v15, %s4176_s16  ;;  %v661_v15 = vpack.c.bf16 %v626_v54, %v625_v48  ;;  %v638_v48 = vld [vmem:[%s4250_s30 + $0xdd] sm:$0xff]  ;;  %v744_v41 = vld [vmem:[%s5145_s21 + $0x28] sm:$0xff] }
 0x110   : > { %1519 = vrot.lane.b32.xlu0 %v613_v31, %s4176_s16  ;;  %v660_v31 = vpack.c.bf16 %v624_v52, %v623_v32  ;;  %v636_v32 = vld [vmem:[%s4250_s30 + $0xcd] sm:$0xff] }
 0x111   : > { %v1387_v56 = vpop.permute.xlu1 %1386 }
 0x112   : > { %v4899_v8 = vsel %vm2202_vm3, %v4788_v25, %v1387_v56  ;;  %v1385_v29 = vpop.permute.xlu0 %1384  ;;  %v634_v56 = vld [vmem:[%s4250_s30 + $0xbd] sm:$0xff] }
 0x113   : > { %v4903_v0 = vsel %vm2202_vm3, %v4773_v4, %v1385_v29  ;;  %1546 = vrot.lane.b32.xlu1 %v657_v7, %s4177_s17 }
 0x114   : > { %1544 = vrot.lane.b32.xlu0 %v656_v44, %s4177_s17  ;;  %v663_v44 = vpack.c.bf16 %v630_v23, %v629_v38  ;;  %v641_v38 = vld [vmem:[%s4250_s30 + $0xf5] sm:$0xff]  ;;  %v642_v23 = vld [vmem:[%s4250_s30 + $0xfd] sm:$0xff] }
 0x115   : > { %v1391_v25 = vpop.permute.xlu1 %1390 }
 0x116   : > { %v4913_v4 = vsel %vm2202_vm3, %v4800_v46, %v1391_v25  ;;  %v1389_v13 = vpop.permute.xlu0 %1388  ;;  %v627_v46 = vld [vmem:[%s4250_s30 + $0x85] sm:$0xff] }
 0x117   : > { %v4917_v24 = vsel %vm2202_vm3, %v4784_v14, %v1389_v13  ;;  %1550 = vrot.lane.b32.xlu1 %v659_v26, %s4177_s17  ;;  %v662_v12 = vpack.c.bf16 %v628_v51, %v627_v46  ;;  %v635_v25 = vld [vmem:[%s4250_s30 + $0xc5] sm:$0xff]  ;;  %v640_v51 = vld [vmem:[%s4250_s30 + $0xed] sm:$0xff] }
 0x118   : > { %1548 = vrot.lane.b32.xlu0 %v658_v28, %s4177_s17  ;;  %v637_v28 = vld [vmem:[%s4250_s30 + $0xd5] sm:$0xff]  ;;  %v639_v46 = vld [vmem:[%s4250_s30 + $0xe5] sm:$0xff] }
 0x119   : > { %v1395_v39 = vpop.permute.xlu1 %1394 }
 0x11a   : > { %v4927_v58 = vsel %vm2202_vm3, %v4810_v10, %v1395_v39  ;;  %v1393_v14 = vpop.permute.xlu0 %1392  ;;  %v631_v10 = vld [vmem:[%s4250_s30 + $0xa5] sm:$0xff] }
 0x11b   : > { %v4931_v7 = vsel %vm2202_vm3, %v4796_v60, %v1393_v14  ;;  %1554 = vrot.lane.b32.xlu1 %v661_v15, %s4177_s17  ;;  %v665_v60 = vpack.c.bf16 %v634_v56, %v633_v22  ;;  %v664_v26 = vpack.c.bf16 %v632_v27, %v631_v10  ;;  %v667_v15 = vpack.c.bf16 %v638_v48, %v637_v28  ;;  %v645_v56 = vld [vmem:[%s4250_s30 + $0x115] sm:$0xff]  ;;  %v646_v10 = vld [vmem:[%s4250_s30 + $0x11d] sm:$0xff] }
 0x11c   : > { %1552 = vrot.lane.b32.xlu0 %v660_v31, %s4177_s17  ;;  %v666_v31 = vpack.c.bf16 %v636_v32, %v635_v25  ;;  %v668_v22 = vpack.c.bf16 %v640_v51, %v639_v46  ;;  %v671_v48 = vpack.c.bf16 %v646_v10, %v645_v56  ;;  %v649_v25 = vld [vmem:[%s4250_s30 + $0x135] sm:$0xff]  ;;  %v650_v32 = vld [vmem:[%s4250_s30 + $0x13d] sm:$0xff] }
 0x11d   : > { %v4937_v33 = vpop.permute.xlu1 %1398  ;;  %v653_v51 = vld [vmem:[%s4250_s30 + $0x155] sm:$0xff] }
 0x11e   : > { %7567 = vst [vmem:[#allocation16_spill] sm:$0xff] %v4937_v33  ;;  %v4941_v29 = vpop.permute.xlu0 %1396 }
 0x11f   : > { %1558 = vrot.lane.b32.xlu1 %v663_v44, %s4177_s17 }
 0x120   : > { %1556 = vrot.lane.b32.xlu0 %v662_v12, %s4177_s17  ;;  %v669_v12 = vpack.c.bf16 %v642_v23, %v641_v38 }
 0x121   : > { %v1403_v54 = vpop.permute.xlu1 %1402 }
 0x122   : > { %v4951_v52 = vsel %vm2202_vm3, %v4830_v2, %v1403_v54  ;;  %v4953_v13 = vpop.permute.xlu0 %1400 }
 0x123   : > { %7568 = vst [vmem:[#allocation17_spill] sm:$0xff] %v4953_v13  ;;  %1562 = vrot.lane.b32.xlu1 %v665_v60, %s4177_s17  ;;  %v644_v60 = vld [vmem:[%s4250_s30 + $0x10d] sm:$0xff]  ;;  %v743_v13 = vld [vmem:[%s5145_s21 + $0x20] sm:$0xff] }
 0x124   : > { %1560 = vrot.lane.b32.xlu0 %v664_v26, %s4177_s17 }
 0x125   : > { %v1407_v39 = vpop.permute.xlu1 %1406 }
 0x126   : > { %v4963_v2 = vsel %vm2202_vm3, %v4842_v61, %v1407_v39  ;;  %v1405_v14 = vpop.permute.xlu0 %1404  ;;  %v643_v61 = vld [vmem:[%s4250_s30 + $0x105] sm:$0xff]  ;;  %v673_v39 = vpack.c.bf16 %v650_v32, %v649_v25 }
 0x127   : > { %v4967_v44 = vsel %vm2202_vm3, %v4826_v47, %v1405_v14  ;;  %1566 = vrot.lane.b32.xlu1 %v667_v15, %s4177_s17  ;;  %v670_v54 = vpack.c.bf16 %v644_v60, %v643_v61  ;;  %v654_v14 = vld [vmem:[%s4250_s30 + $0x15d] sm:$0xff]  ;;  %v678_v61 = vld [vmem:[%s4250_s30 + $0x2e] sm:$0xff]  ;;  %v681_v32 = vld [vmem:[%s4250_s30 + $0x46] sm:$0xff] }
 0x128   : > { %1564 = vrot.lane.b32.xlu0 %v666_v31, %s4177_s17  ;;  %v648_v31 = vld [vmem:[%s4250_s30 + $0x12d] sm:$0xff] }
 0x129   : > { %v1411_v27 = vpop.permute.xlu1 %1410 }
 0x12a   : > { %v4977_v26 = vsel %vm2202_vm3, %v4854_v59, %v1411_v27  ;;  %v1409_v47 = vpop.permute.xlu0 %1408  ;;  %v647_v59 = vld [vmem:[%s4250_s30 + $0x125] sm:$0xff] }
 0x12b   : > { %v4981_v28 = vsel %vm2202_vm3, %v4838_v21, %v1409_v47  ;;  %1570 = vrot.lane.b32.xlu1 %v669_v12, %s4177_s17  ;;  %v672_v46 = vpack.c.bf16 %v648_v31, %v647_v59  ;;  %v677_v27 = vld [vmem:[%s4250_s30 + $0x26] sm:$0xff]  ;;  %v679_v31 = vld [vmem:[%s4250_s30 + $0x36] sm:$0xff] }
 0x12c   : > { %1568 = vrot.lane.b32.xlu0 %v668_v22, %s4177_s17  ;;  %v652_v22 = vld [vmem:[%s4250_s30 + $0x14d] sm:$0xff]  ;;  %v655_v47 = vld [vmem:[%s4250_s30 + $0x165] sm:$0xf] }
 0x12d   : > { %v1415_v15 = vpop.permute.xlu1 %1414  ;;  %v676_v25 = vpack.c.bf16 %v655_v47, %v655_v47 }
 0x12e   : > { %v4991_v38 = vsel %vm2202_vm3, %v4864_v50, %v1415_v15  ;;  %v1413_v21 = vpop.permute.xlu0 %1412  ;;  %v651_v50 = vld [vmem:[%s4250_s30 + $0x145] sm:$0xff]  ;;  %v682_v15 = vld [vmem:[%s4250_s30 + $0x4e] sm:$0xff] }
 0x12f   : > { %v4995_v23 = vsel %vm2202_vm3, %v4850_v53, %v1413_v21  ;;  %1574 = vrot.lane.b32.xlu1 %v671_v48, %s4177_s17  ;;  %v675_v53 = vpack.c.bf16 %v654_v14, %v653_v51  ;;  %v674_v10 = vpack.c.bf16 %v652_v22, %v651_v50  ;;  %v680_v21 = vld [vmem:[%s4250_s30 + $0x3e] sm:$0xff]  ;;  %v720_v14 = vpack.c.bf16 %v682_v15, %v681_v32  ;;  %v685_v22 = vld [vmem:[%s4250_s30 + $0x66] sm:$0xff]  ;;  %v690_v15 = vld [vmem:[%s4250_s30 + $0x8e] sm:$0xff] }
 0x130   : > { %1572 = vrot.lane.b32.xlu0 %v670_v54, %s4177_s17  ;;  %v718_v54 = vpack.c.bf16 %v678_v61, %v677_v27  ;;  %v719_v50 = vpack.c.bf16 %v680_v21, %v679_v31  ;;  %v684_v27 = vld [vmem:[%s4250_s30 + $0x5e] sm:$0xff]  ;;  %v689_v32 = vld [vmem:[%s4250_s30 + $0x86] sm:$0xff] }
 0x131   : > { %v5001_v12 = vpop.permute.xlu1 %1439  ;;  %v688_v31 = vld [vmem:[%s4250_s30 + $0x7e] sm:$0xff] }
 0x132   : > { %v5005_v56 = vpop.permute.xlu0 %1437 }
 0x133   : > { %1578 = vrot.lane.b32.xlu1 %v673_v39, %s4177_s17 }
 0x134   : > { %1576 = vrot.lane.b32.xlu0 %v672_v46, %s4177_s17 }
 0x135   : > { %v5011_v60 = vpop.permute.xlu1 %1443 }
 0x136   : > { %7569 = vst [vmem:[#allocation18_spill] sm:$0xff] %v5011_v60  ;;  %v5014_v48 = vpop.permute.xlu0 %1441 }
 0x137   : > { %7570 = vst [vmem:[#allocation19_spill] sm:$0xff] %v5014_v48  ;;  %1582 = vrot.lane.b32.xlu1 %v675_v53, %s4177_s17  ;;  %v686_v53 = vld [vmem:[%s4250_s30 + $0x6e] sm:$0xff] }
 0x138   : > { %1580 = vrot.lane.b32.xlu0 %v674_v10, %s4177_s17  ;;  %v683_v10 = vld [vmem:[%s4250_s30 + $0x56] sm:$0xff]  ;;  %v884_v48 = vld [vmem:[%s5145_s21 + $0xaa] sm:$0xff] }
 0x139   : > { %v1448_v59 = vpop.permute.xlu1 %1447 }
 0x13a   : > { %v5024_v39 = vsel %vm7551_vm4, %v4903_v0, %v1448_v59  ;;  %v1446_v46 = vpop.permute.xlu0 %1445 }
 0x13b   : > { %v5028_v51 = vsel %vm7551_vm4, %v4887_v1, %v1446_v46  ;;  %1607 = vrot.lane.b32.xlu1 %v718_v54, %s4178_s18  ;;  %v722_v54 = vpack.c.bf16 %v686_v53, %v685_v22  ;;  %v693_v22 = vld [vmem:[%s4250_s30 + $0xa6] sm:$0xff]  ;;  %v694_v53 = vld [vmem:[%s4250_s30 + $0xae] sm:$0xff] }
 0x13c   : > { %1584 = vrot.lane.b32.xlu0 %v676_v25, %s4177_s17  ;;  %v721_v25 = vpack.c.bf16 %v684_v27, %v683_v10  ;;  %v692_v10 = vld [vmem:[%s4250_s30 + $0x9e] sm:$0xff] }
 0x13d   : > { %v1452_v0 = vpop.permute.xlu1 %1451 }
 0x13e   : > { %v5038_v1 = vsel %vm7551_vm4, %v4917_v24, %v1452_v0  ;;  %v1450_v61 = vpop.permute.xlu0 %1449  ;;  %v687_v24 = vld [vmem:[%s4250_s30 + $0x76] sm:$0xff] }
 0x13f   : > { %v5042_v47 = vsel %vm7551_vm4, %v4899_v8, %v1450_v61  ;;  %1611 = vrot.lane.b32.xlu1 %v720_v14, %s4178_s18  ;;  %v724_v14 = vpack.c.bf16 %v690_v15, %v689_v32  ;;  %v726_v61 = vpack.c.bf16 %v694_v53, %v693_v22  ;;  %v698_v32 = vld [vmem:[%s4250_s30 + $0xce] sm:$0xff]  ;;  %v699_v53 = vld [vmem:[%s4250_s30 + $0xd6] sm:$0xff] }
 0x140   : > { %1609 = vrot.lane.b32.xlu0 %v719_v50, %s4178_s18  ;;  %v723_v50 = vpack.c.bf16 %v688_v31, %v687_v24  ;;  %v696_v24 = vld [vmem:[%s4250_s30 + $0xbe] sm:$0xff] }
 0x141   : > { %v1456_v59 = vpop.permute.xlu1 %1455 }
 0x142   : > { %v5052_v21 = vsel %vm7551_vm4, %v4931_v7, %v1456_v59  ;;  %v1454_v8 = vpop.permute.xlu0 %1453  ;;  %v691_v7 = vld [vmem:[%s4250_s30 + $0x96] sm:$0xff] }
 0x143   : > { %v5056_v46 = vsel %vm7551_vm4, %v4913_v4, %v1454_v8  ;;  %1615 = vrot.lane.b32.xlu1 %v722_v54, %s4178_s18  ;;  %v725_v54 = vpack.c.bf16 %v692_v10, %v691_v7  ;;  %v695_v59 = vld [vmem:[%s4250_s30 + $0xb6] sm:$0xff]  ;;  %v700_v7 = vld [vmem:[%s4250_s30 + $0xde] sm:$0xff] }
 0x144   : > { %1613 = vrot.lane.b32.xlu0 %v721_v25, %s4178_s18  ;;  %v697_v25 = vld [vmem:[%s4250_s30 + $0xc6] sm:$0xff]  ;;  %v727_v8 = vpack.c.bf16 %v696_v24, %v695_v59  ;;  %v706_v59 = vld [vmem:[%s4250_s30 + $0x10e] sm:$0xff] }
 0x145   : > { %v5062_v0 = vpop.permute.xlu1 %1459 }
 0x146   : > { %v1458_v27 = vpop.permute.xlu0 %1457 }
 0x147   : > { %v5068_v4 = vsel %vm7551_vm4, %v4927_v58, %v1458_v27  ;;  %1619 = vrot.lane.b32.xlu1 %v724_v14, %s4178_s18  ;;  %v728_v58 = vpack.c.bf16 %v698_v32, %v697_v25  ;;  %v701_v14 = vld [vmem:[%s4250_s30 + $0xe6] sm:$0xff]  ;;  %v729_v25 = vpack.c.bf16 %v700_v7, %v699_v53  ;;  %v710_v53 = vld [vmem:[%s4250_s30 + $0x12e] sm:$0xff] }
 0x148   : > { %1617 = vrot.lane.b32.xlu0 %v723_v50, %s4178_s18  ;;  %v702_v50 = vld [vmem:[%s4250_s30 + $0xee] sm:$0xff]  ;;  %v705_v32 = vld [vmem:[%s4250_s30 + $0x106] sm:$0xff] }
 0x149   : > { %v5074_v15 = vpop.permute.xlu1 %1463 }
 0x14a   : > { %7571 = vst [vmem:[#allocation20_spill] sm:$0xff] %v5074_v15  ;;  %v5078_v31 = vpop.permute.xlu0 %1461 }
 0x14b   : > { %7572 = vst [vmem:[#allocation21_spill] sm:$0xff] %v5078_v31  ;;  %1623 = vrot.lane.b32.xlu1 %v726_v61, %s4178_s18  ;;  %v883_v31 = vld [vmem:[%s5145_s21 + $0xa2] sm:$0xff] }
 0x14c   : > { %1621 = vrot.lane.b32.xlu0 %v725_v54, %s4178_s18  ;;  %v730_v54 = vpack.c.bf16 %v702_v50, %v701_v14  ;;  %v709_v50 = vld [vmem:[%s4250_s30 + $0x126] sm:$0xff] }
 0x14d   : > { %v1468_v22 = vpop.permute.xlu1 %1467 }
 0x14e   : > { %v5088_v10 = vsel %vm7551_vm4, %v4967_v44, %v1468_v22  ;;  %v1466_v27 = vpop.permute.xlu0 %1465  ;;  %v703_v44 = vld [vmem:[%s4250_s30 + $0xf6] sm:$0xff]  ;;  %v704_v22 = vld [vmem:[%s4250_s30 + $0xfe] sm:$0xff] }
 0x14f   : > { %v5092_v61 = vsel %vm7551_vm4, %v4951_v52, %v1466_v27  ;;  %1627 = vrot.lane.b32.xlu1 %v728_v58, %s4178_s18  ;;  %v731_v14 = vpack.c.bf16 %v704_v22, %v703_v44  ;;  %v708_v27 = vld [vmem:[%s4250_s30 + $0x11e] sm:$0xff]  ;;  %v714_v44 = vld [vmem:[%s4250_s30 + $0x14e] sm:$0xff] }
 0x150   : > { %1625 = vrot.lane.b32.xlu0 %v727_v8, %s4178_s18  ;;  %v732_v8 = vpack.c.bf16 %v706_v59, %v705_v32  ;;  %v713_v59 = vld [vmem:[%s4250_s30 + $0x146] sm:$0xff] }
 0x151   : > { %v1472_v24 = vpop.permute.xlu1 %1471 }
 0x152   : > { %v5102_v15 = vsel %vm7551_vm4, %v4981_v28, %v1472_v24  ;;  %v1470_v52 = vpop.permute.xlu0 %1469  ;;  %v707_v28 = vld [vmem:[%s4250_s30 + $0x116] sm:$0xff] }
 0x153   : > { %v5106_v58 = vsel %vm7551_vm4, %v4963_v2, %v1470_v52  ;;  %1631 = vrot.lane.b32.xlu1 %v730_v54, %s4178_s18  ;;  %v733_v32 = vpack.c.bf16 %v708_v27, %v707_v28  ;;  %v712_v52 = vld [vmem:[%s4250_s30 + $0x13e] sm:$0xff]  ;;  %v715_v28 = vld [vmem:[%s4250_s30 + $0x156] sm:$0xff] }
 0x154   : > { %1629 = vrot.lane.b32.xlu0 %v729_v25, %s4178_s18  ;;  %v734_v25 = vpack.c.bf16 %v710_v53, %v709_v50  ;;  %v717_v50 = vld [vmem:[%s4250_s30 + $0x166] sm:$0xf]  ;;  %v716_v27 = vld [vmem:[%s4250_s30 + $0x15e] sm:$0xff] }
 0x155   : > { %v1476_v7 = vpop.permute.xlu1 %1475 }
 0x156   : > { %v5116_v24 = vsel %vm7551_vm4, %v4995_v23, %v1476_v7  ;;  %v1474_v2 = vpop.permute.xlu0 %1473  ;;  %v711_v23 = vld [vmem:[%s4250_s30 + $0x136] sm:$0xff] }
 0x157   : > { %v5120_v54 = vsel %vm7551_vm4, %v4977_v26, %v1474_v2  ;;  %1635 = vrot.lane.b32.xlu1 %v732_v8, %s4178_s18  ;;  %v736_v8 = vpack.c.bf16 %v714_v44, %v713_v59  ;;  %v738_v2 = vpack.c.bf16 %v717_v50, %v717_v50  ;;  %v742_v59 = vld [vmem:[%s5145_s21 + $0x18] sm:$0xff]  ;;  %v745_v50 = vld [vmem:[%s5145_s21 + $0x30] sm:$0xff] }
 0x158   : > { %1633 = vrot.lane.b32.xlu0 %v731_v14, %s4178_s18  ;;  %v735_v14 = vpack.c.bf16 %v712_v52, %v711_v23  ;;  %v739_v23 = vld [vmem:[%s5145_s21] sm:$0xff]  ;;  %v740_v52 = vld [vmem:[%s5145_s21 + $0x8] sm:$0xff] }
 0x159   : > { %v5126_v22 = vpop.permute.xlu1 %1481 }
 0x15a   : > { %v1478_v7 = vpop.permute.xlu0 %1477 }
 0x15b   : > { %v5132_v26 = vsel %vm7551_vm4, %v4991_v38, %v1478_v7  ;;  %1639 = vrot.lane.b32.xlu1 %v734_v25, %s4178_s18  ;;  %v737_v25 = vpack.c.bf16 %v716_v27, %v715_v28  ;;  %v746_v28 = vld [vmem:[%s5145_s21 + $0x38] sm:$0xff] }
 0x15c   : > { %1637 = vrot.lane.b32.xlu0 %v733_v32, %s4178_s18  ;;  %v741_v32 = vld [vmem:[%s5145_s21 + $0x10] sm:$0xff] }
 0x15d   : > { %v5137_v53 = vpop.permute.xlu1 %1485 }
 0x15e   : > { %7573 = vst [vmem:[#allocation22_spill] sm:$0xff] %v5137_v53  ;;  %v5147_v38 = vpop.permute.xlu0 %1483  ;;  %v879_v53 = vld [vmem:[%s5145_s21 + $0x82] sm:$0xff] }
 0x15f   : > { %1643 = vrot.lane.b32.xlu1 %v736_v8, %s4178_s18  ;;  %v781_v8 = vpack.c.bf16 %v742_v59, %v741_v32  ;;  %v782_v32 = vpack.c.bf16 %v744_v41, %v743_v13  ;;  %v749_v59 = vld [vmem:[%s5145_s21 + $0x50] sm:$0xff] }
 0x160   : > { %1641 = vrot.lane.b32.xlu0 %v735_v14, %s4178_s18  ;;  %v780_v14 = vpack.c.bf16 %v740_v52, %v739_v23  ;;  %v750_v23 = vld [vmem:[%s5145_s21 + $0x58] sm:$0xff]  ;;  %v747_v52 = vld [vmem:[%s5145_s21 + $0x40] sm:$0xff] }
 0x161   : > { %v1490_v44 = vpop.permute.xlu1 %1489  ;;  %v785_v41 = vpack.c.bf16 %v750_v23, %v749_v59  ;;  %v757_v23 = vld [vmem:[%s5145_s21 + $0x90] sm:$0xff] }
 0x162   : > { %v5157_v7 = vsel %vm7550_vm5, %v5028_v51, %v1490_v44  ;;  %v5159_v60 = vpop.permute.xlu0 %1487 }
 0x163   : > { %7574 = vst [vmem:[#allocation23_spill] sm:$0xff] %v5159_v60  ;;  %1647 = vrot.lane.b32.xlu1 %v738_v2, %s4178_s18 }
 0x164   : > { %1645 = vrot.lane.b32.xlu0 %v737_v25, %s4178_s18  ;;  %v783_v25 = vpack.c.bf16 %v746_v28, %v745_v50  ;;  %v754_v50 = vld [vmem:[%s5145_s21 + $0x78] sm:$0xff] }
 0x165   : > { %v1494_v27 = vpop.permute.xlu1 %1493 }
 0x166   : > { %v5169_v51 = vsel %vm7550_vm5, %v5042_v47, %v1494_v27  ;;  %v1492_v44 = vpop.permute.xlu0 %1491  ;;  %v748_v27 = vld [vmem:[%s5145_s21 + $0x48] sm:$0xff] }
 0x167   : > { %v5173_v2 = vsel %vm7550_vm5, %v5024_v39, %v1492_v44  ;;  %1672 = vrot.lane.b32.xlu1 %v781_v8, %s4179_s22  ;;  %v784_v13 = vpack.c.bf16 %v748_v27, %v747_v52  ;;  %v758_v52 = vld [vmem:[%s5145_s21 + $0x98] sm:$0xff] }
 0x168   : > { %1670 = vrot.lane.b32.xlu0 %v780_v14, %s4179_s22  ;;  %v753_v14 = vld [vmem:[%s5145_s21 + $0x70] sm:$0xff] }
 0x169   : > { %v1498_v47 = vpop.permute.xlu1 %1497 }
 0x16a   : > { %v5183_v39 = vsel %vm7550_vm5, %v5056_v46, %v1498_v47  ;;  %v1496_v44 = vpop.permute.xlu0 %1495  ;;  %v751_v46 = vld [vmem:[%s5145_s21 + $0x60] sm:$0xff]  ;;  %v752_v47 = vld [vmem:[%s5145_s21 + $0x68] sm:$0xff] }
 0x16b   : > { %v5187_v8 = vsel %vm7550_vm5, %v5038_v1, %v1496_v44  ;;  %1676 = vrot.lane.b32.xlu1 %v783_v25, %s4179_s22  ;;  %v786_v59 = vpack.c.bf16 %v752_v47, %v751_v46  ;;  %v756_v44 = vld [vmem:[%s5145_s21 + $0x88] sm:$0xff]  ;;  %v759_v46 = vld [vmem:[%s5145_s21 + $0xa0] sm:$0xff] }
 0x16c   : > { %1674 = vrot.lane.b32.xlu0 %v782_v32, %s4179_s22  ;;  %v787_v32 = vpack.c.bf16 %v754_v50, %v753_v14  ;;  %v762_v14 = vld [vmem:[%s5145_s21 + $0xb8] sm:$0xff]  ;;  %v760_v47 = vld [vmem:[%s5145_s21 + $0xa8] sm:$0xff] }
 0x16d   : > { %v1502_v28 = vpop.permute.xlu1 %1501 }
 0x16e   : > { %v5197_v60 = vsel %vm7550_vm5, %v5068_v4, %v1502_v28  ;;  %v1500_v1 = vpop.permute.xlu0 %1499  ;;  %v755_v4 = vld [vmem:[%s5145_s21 + $0x80] sm:$0xff] }
 0x16f   : > { %v5201_v25 = vsel %vm7550_vm5, %v5052_v21, %v1500_v1  ;;  %1680 = vrot.lane.b32.xlu1 %v785_v41, %s4179_s22  ;;  %v789_v21 = vpack.c.bf16 %v758_v52, %v757_v23  ;;  %v788_v41 = vpack.c.bf16 %v756_v44, %v755_v4  ;;  %v765_v23 = vld [vmem:[%s5145_s21 + $0xd0] sm:$0xff]  ;;  %v766_v52 = vld [vmem:[%s5145_s21 + $0xd8] sm:$0xff]  ;;  %v763_v44 = vld [vmem:[%s5145_s21 + $0xc0] sm:$0xff] }
 0x170   : > { %1678 = vrot.lane.b32.xlu0 %v784_v13, %s4179_s22  ;;  %v761_v13 = vld [vmem:[%s5145_s21 + $0xb0] sm:$0xff] }
 0x171   : > { %v5207_v27 = vpop.permute.xlu1 %1505 }
 0x172   : > { %7575 = vst [vmem:[#allocation24_spill] sm:$0xff] %v5207_v27  ;;  %v5211_v28 = vpop.permute.xlu0 %1503  ;;  %v868_v27 = vld [vmem:[%s5145_s21 + $0x2a] sm:$0xff] }
 0x173   : > { %1684 = vrot.lane.b32.xlu1 %v787_v32, %s4179_s22  ;;  %v791_v32 = vpack.c.bf16 %v762_v14, %v761_v13  ;;  %v792_v13 = vpack.c.bf16 %v764_v18, %v763_v44  ;;  %v769_v14 = vld [vmem:[%s5145_s21 + $0xf0] sm:$0xff] }
 0x174   : > { %1682 = vrot.lane.b32.xlu0 %v786_v59, %s4179_s22  ;;  %v790_v59 = vpack.c.bf16 %v760_v47, %v759_v46  ;;  %v770_v46 = vld [vmem:[%s5145_s21 + $0xf8] sm:$0xff] }
 0x175   : > { %v1510_v50 = vpop.permute.xlu1 %1509  ;;  %v795_v18 = vpack.c.bf16 %v770_v46, %v769_v14  ;;  %v777_v46 = vld [vmem:[%s5145_s21 + $0x130] sm:$0xff] }
 0x176   : > { %v5221_v1 = vsel %vm7550_vm5, %v5092_v61, %v1510_v50  ;;  %v5223_v43 = vpop.permute.xlu0 %1507 }
 0x177   : > { %7576 = vst [vmem:[#allocation25_spill] sm:$0xff] %v5223_v43  ;;  %1688 = vrot.lane.b32.xlu1 %v789_v21, %s4179_s22 }
 0x178   : > { %1686 = vrot.lane.b32.xlu0 %v788_v41, %s4179_s22  ;;  %v793_v41 = vpack.c.bf16 %v766_v52, %v765_v23  ;;  %v773_v23 = vld [vmem:[%s5145_s21 + $0x110] sm:$0xff]  ;;  %v774_v52 = vld [vmem:[%s5145_s21 + $0x118] sm:$0xff] }
 0x179   : > { %v1514_v4 = vpop.permute.xlu1 %1513 }
 0x17a   : > { %v5233_v61 = vsel %vm7550_vm5, %v5106_v58, %v1514_v4  ;;  %v1512_v50 = vpop.permute.xlu0 %1511  ;;  %v767_v58 = vld [vmem:[%s5145_s21 + $0xe0] sm:$0xff]  ;;  %v768_v4 = vld [vmem:[%s5145_s21 + $0xe8] sm:$0xff] }
 0x17b   : > { %v5237_v21 = vsel %vm7550_vm5, %v5088_v10, %v1512_v50  ;;  %1692 = vrot.lane.b32.xlu1 %v791_v32, %s4179_s22  ;;  %v772_v50 = vld [vmem:[%s5145_s21 + $0x108] sm:$0xff] }
 0x17c   : > { %1690 = vrot.lane.b32.xlu0 %v790_v59, %s4179_s22  ;;  %v794_v59 = vpack.c.bf16 %v768_v4, %v767_v58  ;;  %v778_v58 = vld [vmem:[%s5145_s21 + $0x138] sm:$0xff] }
 0x17d   : > { %v1518_v47 = vpop.permute.xlu1 %1517 }
 0x17e   : > { %v5247_v43 = vsel %vm7550_vm5, %v5120_v54, %v1518_v47  ;;  %v1516_v10 = vpop.permute.xlu0 %1515  ;;  %v771_v54 = vld [vmem:[%s5145_s21 + $0x100] sm:$0xff] }
 0x17f   : > { %v5251_v32 = vsel %vm7550_vm5, %v5102_v15, %v1516_v10  ;;  %1696 = vrot.lane.b32.xlu1 %v793_v41, %s4179_s22  ;;  %v796_v14 = vpack.c.bf16 %v772_v50, %v771_v54  ;;  %v776_v10 = vld [vmem:[%s5145_s21 + $0x128] sm:$0xff]  ;;  %v779_v54 = vld [vmem:[%s5145_s21 + $0x140] sm:$0xf] }
 0x180   : > { %1694 = vrot.lane.b32.xlu0 %v792_v13, %s4179_s22  ;;  %v797_v13 = vpack.c.bf16 %v774_v52, %v773_v23  ;;  %v802_v23 = vld [vmem:[%s5145_s21 + $0x9] sm:$0xff] }
 0x181   : > { %v1522_v44 = vpop.permute.xlu1 %1521 }
 0x182   : > { %v5261_v47 = vsel %vm7550_vm5, %v5132_v26, %v1522_v44  ;;  %v1520_v15 = vpop.permute.xlu0 %1519  ;;  %v775_v26 = vld [vmem:[%s5145_s21 + $0x120] sm:$0xff] }
 0x183   : > { %v5265_v41 = vsel %vm7550_vm5, %v5116_v24, %v1520_v15  ;;  %1700 = vrot.lane.b32.xlu1 %v795_v18, %s4179_s22  ;;  %v799_v24 = vpack.c.bf16 %v778_v58, %v777_v46  ;;  %v798_v18 = vpack.c.bf16 %v776_v10, %v775_v26  ;;  %v805_v46 = vld [vmem:[%s5145_s21 + $0x21] sm:$0xff]  ;;  %v806_v58 = vld [vmem:[%s5145_s21 + $0x29] sm:$0xff]  ;;  %v803_v26 = vld [vmem:[%s5145_s21 + $0x11] sm:$0xff] }
 0x184   : > { %1698 = vrot.lane.b32.xlu0 %v794_v59, %s4179_s22  ;;  %v801_v59 = vld [vmem:[%s5145_s21 + $0x1] sm:$0xff]  ;;  %v804_v10 = vld [vmem:[%s5145_s21 + $0x19] sm:$0xff] }
 0x185   : > { %v5271_v4 = vpop.permute.xlu1 %1546  ;;  %v842_v15 = vpack.c.bf16 %v802_v23, %v801_v59  ;;  %v843_v59 = vpack.c.bf16 %v804_v10, %v803_v26  ;;  %v809_v23 = vld [vmem:[%s5145_s21 + $0x41] sm:$0xff]  ;;  %v814_v26 = vld [vmem:[%s5145_s21 + $0x69] sm:$0xff] }
 0x186   : > { %v5275_v44 = vpop.permute.xlu0 %1544 }
 0x187   : > { %1704 = vrot.lane.b32.xlu1 %v797_v13, %s4179_s22  ;;  %v800_v13 = vpack.c.bf16 %v779_v54, %v779_v54  ;;  %v810_v54 = vld [vmem:[%s5145_s21 + $0x49] sm:$0xff] }
 0x188   : > { %1702 = vrot.lane.b32.xlu0 %v796_v14, %s4179_s22 }
 0x189   : > { %v5281_v52 = vpop.permute.xlu1 %1550 }
 0x18a   : > { %7577 = vst [vmem:[#allocation26_spill] sm:$0xff] %v5281_v52  ;;  %v5284_v50 = vpop.permute.xlu0 %1548 }
 0x18b   : > { %7578 = vst [vmem:[#allocation27_spill] sm:$0xff] %v5284_v50  ;;  %1708 = vrot.lane.b32.xlu1 %v799_v24, %s4179_s22  ;;  %v867_v50 = vld [vmem:[%s5145_s21 + $0x22] sm:$0xff] }
 0x18c   : > { %1706 = vrot.lane.b32.xlu0 %v798_v18, %s4179_s22  ;;  %v844_v18 = vpack.c.bf16 %v806_v58, %v805_v46  ;;  %v813_v58 = vld [vmem:[%s5145_s21 + $0x61] sm:$0xff] }
 0x18d   : > { %v1555_v14 = vpop.permute.xlu1 %1554 }
 0x18e   : > { %v5294_v52 = vsel %vm7548_vm6, %v5173_v2, %v1555_v14  ;;  %v1553_v49 = vpop.permute.xlu0 %1552  ;;  %v807_v14 = vld [vmem:[%s5145_s21 + $0x31] sm:$0xff] }
 0x18f   : > { %v5298_v24 = vsel %vm7548_vm6, %v5157_v7, %v1553_v49  ;;  %1733 = vrot.lane.b32.xlu1 %v842_v15, %s4180_s23  ;;  %v845_v46 = vpack.c.bf16 %v808_v57, %v807_v14  ;;  %v848_v57 = vpack.c.bf16 %v814_v26, %v813_v58  ;;  %v821_v58 = vld [vmem:[%s5145_s21 + $0xa1] sm:$0xff]  ;;  %v822_v26 = vld [vmem:[%s5145_s21 + $0xa9] sm:$0xff] }
 0x190   : > { %1710 = vrot.lane.b32.xlu0 %v800_v13, %s4179_s22  ;;  %v846_v13 = vpack.c.bf16 %v810_v54, %v809_v23  ;;  %v817_v23 = vld [vmem:[%s5145_s21 + $0x81] sm:$0xff]  ;;  %v818_v54 = vld [vmem:[%s5145_s21 + $0x89] sm:$0xff] }
 0x191   : > { %v1559_v2 = vpop.permute.xlu1 %1558 }
 0x192   : > { %v5308_v49 = vsel %vm7548_vm6, %v5187_v8, %v1559_v2  ;;  %v1557_v7 = vpop.permute.xlu0 %1556  ;;  %v811_v8 = vld [vmem:[%s5145_s21 + $0x51] sm:$0xff]  ;;  %v812_v2 = vld [vmem:[%s5145_s21 + $0x59] sm:$0xff] }
 0x193   : > { %v5312_v15 = vsel %vm7548_vm6, %v5169_v51, %v1557_v7  ;;  %1737 = vrot.lane.b32.xlu1 %v844_v18, %s4180_s23  ;;  %v816_v7 = vld [vmem:[%s5145_s21 + $0x79] sm:$0xff] }
 0x194   : > { %1735 = vrot.lane.b32.xlu0 %v843_v59, %s4180_s23  ;;  %v847_v59 = vpack.c.bf16 %v812_v2, %v811_v8  ;;  %v819_v2 = vld [vmem:[%s5145_s21 + $0x91] sm:$0xff] }
 0x195   : > { %v1563_v10 = vpop.permute.xlu1 %1562 }
 0x196   : > { %v5322_v42 = vsel %vm7548_vm6, %v5201_v25, %v1563_v10  ;;  %v1561_v51 = vpop.permute.xlu0 %1560  ;;  %v815_v25 = vld [vmem:[%s5145_s21 + $0x71] sm:$0xff] }
 0x197   : > { %v5326_v18 = vsel %vm7548_vm6, %v5183_v39, %v1561_v51  ;;  %1741 = vrot.lane.b32.xlu1 %v846_v13, %s4180_s23  ;;  %v850_v13 = vpack.c.bf16 %v818_v54, %v817_v23  ;;  %v820_v51 = vld [vmem:[%s5145_s21 + $0x99] sm:$0xff]  ;;  %v826_v23 = vld [vmem:[%s5145_s21 + $0xc9] sm:$0xff] }
 0x198   : > { %1739 = vrot.lane.b32.xlu0 %v845_v46, %s4180_s23  ;;  %v849_v46 = vpack.c.bf16 %v816_v7, %v815_v25  ;;  %v823_v25 = vld [vmem:[%s5145_s21 + $0xb1] sm:$0xff]  ;;  %v824_v7 = vld [vmem:[%s5145_s21 + $0xb9] sm:$0xff] }
 0x199   : > { %v5332_v14 = vpop.permute.xlu1 %1566 }
 0x19a   : > { %7579 = vst [vmem:[#allocation28_spill] sm:$0xff] %v5332_v14  ;;  %v1565_v10 = vpop.permute.xlu0 %1564  ;;  %v1122_v14 = vld [vmem:[%s5145_s21 + $0x2e] sm:$0xff] }
 0x19b   : > { %v5338_v39 = vsel %vm7548_vm6, %v5197_v60, %v1565_v10  ;;  %1745 = vrot.lane.b32.xlu1 %v848_v57, %s4180_s23  ;;  %v852_v60 = vpack.c.bf16 %v822_v26, %v821_v58  ;;  %v851_v57 = vpack.c.bf16 %v820_v51, %v819_v2  ;;  %v853_v58 = vpack.c.bf16 %v824_v7, %v823_v25  ;;  %v829_v26 = vld [vmem:[%s5145_s21 + $0xe1] sm:$0xff]  ;;  %v830_v2 = vld [vmem:[%s5145_s21 + $0xe9] sm:$0xff]  ;;  %v832_v7 = vld [vmem:[%s5145_s21 + $0xf9] sm:$0xff] }
 0x19c   : > { %1743 = vrot.lane.b32.xlu0 %v847_v59, %s4180_s23  ;;  %v825_v59 = vld [vmem:[%s5145_s21 + $0xc1] sm:$0xff] }
 0x19d   : > { %v5344_v8 = vpop.permute.xlu1 %1570 }
 0x19e   : > { %7580 = vst [vmem:[#allocation29_spill] sm:$0xff] %v5344_v8  ;;  %v5348_v3 = vpop.permute.xlu0 %1568 }
 0x19f   : > { %7581 = vst [vmem:[#allocation30_spill] sm:$0xff] %v5348_v3  ;;  %1749 = vrot.lane.b32.xlu1 %v850_v13, %s4180_s23 }
 0x1a0   : > { %1747 = vrot.lane.b32.xlu0 %v849_v46, %s4180_s23  ;;  %v854_v46 = vpack.c.bf16 %v826_v23, %v825_v59  ;;  %v833_v59 = vld [vmem:[%s5145_s21 + $0x101] sm:$0xff]  ;;  %v834_v23 = vld [vmem:[%s5145_s21 + $0x109] sm:$0xff] }
 0x1a1   : > { %v1575_v54 = vpop.permute.xlu1 %1574 }
 0x1a2   : > { %v5358_v10 = vsel %vm7548_vm6, %v5237_v21, %v1575_v54  ;;  %v1573_v8 = vpop.permute.xlu0 %1572  ;;  %v827_v21 = vld [vmem:[%s5145_s21 + $0xd1] sm:$0xff]  ;;  %v828_v54 = vld [vmem:[%s5145_s21 + $0xd9] sm:$0xff] }
 0x1a3   : > { %v5362_v13 = vsel %vm7548_vm6, %v5221_v1, %v1573_v8  ;;  %1753 = vrot.lane.b32.xlu1 %v852_v60, %s4180_s23  ;;  %v856_v60 = vpack.c.bf16 %v830_v2, %v829_v26  ;;  %v837_v2 = vld [vmem:[%s5145_s21 + $0x121] sm:$0xff] }
 0x1a4   : > { %1751 = vrot.lane.b32.xlu0 %v851_v57, %s4180_s23  ;;  %v855_v57 = vpack.c.bf16 %v828_v54, %v827_v21  ;;  %v838_v21 = vld [vmem:[%s5145_s21 + $0x129] sm:$0xff] }
 0x1a5   : > { %v1579_v51 = vpop.permute.xlu1 %1578 }
 0x1a6   : > { %v5372_v3 = vsel %vm7548_vm6, %v5251_v32, %v1579_v51  ;;  %v1577_v1 = vpop.permute.xlu0 %1576  ;;  %v831_v32 = vld [vmem:[%s5145_s21 + $0xf1] sm:$0xff] }
 0x1a7   : > { %v5376_v8 = vsel %vm7548_vm6, %v5233_v61, %v1577_v1  ;;  %1757 = vrot.lane.b32.xlu1 %v854_v46, %s4180_s23  ;;  %v857_v26 = vpack.c.bf16 %v832_v7, %v831_v32  ;;  %v836_v1 = vld [vmem:[%s5145_s21 + $0x119] sm:$0xff]  ;;  %v839_v32 = vld [vmem:[%s5145_s21 + $0x131] sm:$0xff] }
 0x1a8   : > { %1755 = vrot.lane.b32.xlu0 %v853_v58, %s4180_s23  ;;  %v858_v58 = vpack.c.bf16 %v834_v23, %v833_v59  ;;  %v841_v59 = vld [vmem:[%s5145_s21 + $0x141] sm:$0xf]  ;;  %v840_v7 = vld [vmem:[%s5145_s21 + $0x139] sm:$0xff] }
 0x1a9   : > { %v1583_v25 = vpop.permute.xlu1 %1582 }
 0x1aa   : > { %v5386_v51 = vsel %vm7548_vm6, %v5265_v41, %v1583_v25  ;;  %v1581_v61 = vpop.permute.xlu0 %1580  ;;  %v835_v41 = vld [vmem:[%s5145_s21 + $0x111] sm:$0xff] }
 0x1ab   : > { %v5390_v46 = vsel %vm7548_vm6, %v5247_v43, %v1581_v61  ;;  %1761 = vrot.lane.b32.xlu1 %v856_v60, %s4180_s23  ;;  %v860_v60 = vpack.c.bf16 %v838_v21, %v837_v2  ;;  %v865_v2 = vld [vmem:[%s5145_s21 + $0x12] sm:$0xff] }
 0x1ac   : > { %1759 = vrot.lane.b32.xlu0 %v855_v57, %s4180_s23  ;;  %v859_v57 = vpack.c.bf16 %v836_v1, %v835_v41  ;;  %v863_v41 = vld [vmem:[%s5145_s21 + $0x2] sm:$0xff]  ;;  %v864_v1 = vld [vmem:[%s5145_s21 + $0xa] sm:$0xff] }
 0x1ad   : > { %v5396_v54 = vpop.permute.xlu1 %1607 }
 0x1ae   : > { %v1585_v25 = vpop.permute.xlu0 %1584 }
 0x1af   : > { %v5402_v43 = vsel %vm7548_vm6, %v5261_v47, %v1585_v25  ;;  %1765 = vrot.lane.b32.xlu1 %v858_v58, %s4180_s23  ;;  %v862_v47 = vpack.c.bf16 %v841_v59, %v841_v59  ;;  %v861_v58 = vpack.c.bf16 %v840_v7, %v839_v32  ;;  %v869_v59 = vld [vmem:[%s5145_s21 + $0x32] sm:$0xff]  ;;  %v870_v32 = vld [vmem:[%s5145_s21 + $0x3a] sm:$0xff] }
 0x1b0   : > { %1763 = vrot.lane.b32.xlu0 %v857_v26, %s4180_s23  ;;  %v866_v26 = vld [vmem:[%s5145_s21 + $0x1a] sm:$0xff] }
 0x1b1   : > { %v5407_v23 = vpop.permute.xlu1 %1611 }
 0x1b2   : > { %7582 = vst [vmem:[#allocation31_spill] sm:$0xff] %v5407_v23  ;;  %v5411_v61 = vpop.permute.xlu0 %1609 }
 0x1b3   : > { %7583 = vst [vmem:[#allocation32_spill] sm:$0xff] %v5411_v61  ;;  %1769 = vrot.lane.b32.xlu1 %v860_v60, %s4180_s23  ;;  %v5426_v60 = vpack.c.bf16 %v866_v26, %v865_v2  ;;  %v5446_v2 = vpack.c.bf16 %v868_v27, %v867_v50  ;;  %v874_v26 = vld [vmem:[%s5145_s21 + $0x5a] sm:$0xff] }
 0x1b4   : > { %1767 = vrot.lane.b32.xlu0 %v859_v57, %s4180_s23  ;;  %v904_v57 = vpack.c.bf16 %v864_v1, %v863_v41  ;;  %v871_v1 = vld [vmem:[%s5145_s21 + $0x42] sm:$0xff] }
 0x1b5   : > { %v1616_v21 = vpop.permute.xlu1 %1615 }
 0x1b6   : > { %v5421_v25 = vsel %vm7549_vm7, %v5298_v24, %v1616_v21  ;;  %v5423_v23 = vpop.permute.xlu0 %1613 }
 0x1b7   : > { %7584 = vst [vmem:[#allocation33_spill] sm:$0xff] %v5423_v23  ;;  %1773 = vrot.lane.b32.xlu1 %v862_v47, %s4180_s23 }
 0x1b8   : > { %1771 = vrot.lane.b32.xlu0 %v861_v58, %s4180_s23  ;;  %v5443_v58 = vpack.c.bf16 %v870_v32, %v869_v59 }
 0x1b9   : > { %v1620_v7 = vpop.permute.xlu1 %1619 }
 0x1ba   : > { %v5435_v24 = vsel %vm7549_vm7, %v5312_v15, %v1620_v7  ;;  %v1618_v21 = vpop.permute.xlu0 %1617  ;;  %v873_v15 = vld [vmem:[%s5145_s21 + $0x52] sm:$0xff] }
 0x1bb   : > { %v5439_v47 = vsel %vm7549_vm7, %v5294_v52, %v1618_v21  ;;  %1798 = vrot.lane.b32.xlu1 %v5426_v60, %s4181_s26  ;;  %v872_v52 = vld [vmem:[%s5145_s21 + $0x4a] sm:$0xff]  ;;  %v5462_v27 = vpack.c.bf16 %v874_v26, %v873_v15 }
 0x1bc   : > { %1796 = vrot.lane.b32.xlu0 %v904_v57, %s4181_s26  ;;  %v5466_v50 = vpack.c.bf16 %v872_v52, %v871_v1  ;;  %v878_v57 = vld [vmem:[%s5145_s21 + $0x7a] sm:$0xff] }
 0x1bd   : > { %v1624_v41 = vpop.permute.xlu1 %1623  ;;  %v882_v52 = vld [vmem:[%s5145_s21 + $0x9a] sm:$0xff] }
 0x1be   : > { %v5454_v7 = vsel %vm7549_vm7, %v5326_v18, %v1624_v41  ;;  %v1622_v21 = vpop.permute.xlu0 %1621  ;;  %v877_v18 = vld [vmem:[%s5145_s21 + $0x72] sm:$0xff]  ;;  %v875_v41 = vld [vmem:[%s5145_s21 + $0x62] sm:$0xff] }
 0x1bf   : > { %v5458_v59 = vsel %vm7549_vm7, %v5308_v49, %v1622_v21  ;;  %1802 = vrot.lane.b32.xlu1 %v5443_v58, %s4181_s26  ;;  %v876_v49 = vld [vmem:[%s5145_s21 + $0x6a] sm:$0xff]  ;;  %v5482_v26 = vpack.c.bf16 %v878_v57, %v877_v18 }
 0x1c0   : > { %1800 = vrot.lane.b32.xlu0 %v5446_v2, %s4181_s26  ;;  %v5486_v1 = vpack.c.bf16 %v876_v49, %v875_v41  ;;  %v885_v41 = vld [vmem:[%s5145_s21 + $0xb2] sm:$0xff]  ;;  %v886_v49 = vld [vmem:[%s5145_s21 + $0xba] sm:$0xff] }
 0x1c1   : > { %v1628_v32 = vpop.permute.xlu1 %1627 }
 0x1c2   : > { %v5474_v21 = vsel %vm7549_vm7, %v5338_v39, %v1628_v32  ;;  %v1626_v23 = vpop.permute.xlu0 %1625  ;;  %v881_v39 = vld [vmem:[%s5145_s21 + $0x92] sm:$0xff] }
 0x1c3   : > { %v5478_v15 = vsel %vm7549_vm7, %v5322_v42, %v1626_v23  ;;  %1806 = vrot.lane.b32.xlu1 %v5462_v27, %s4181_s26  ;;  %v880_v42 = vld [vmem:[%s5145_s21 + $0x8a] sm:$0xff]  ;;  %v5498_v18 = vpack.c.bf16 %v882_v52, %v881_v39  ;;  %v5516_v39 = vpack.c.bf16 %v886_v49, %v885_v41  ;;  %v889_v52 = vld [vmem:[%s5145_s21 + $0xd2] sm:$0xff]  ;;  %v894_v49 = vld [vmem:[%s5145_s21 + $0xfa] sm:$0xff] }
 0x1c4   : > { %1804 = vrot.lane.b32.xlu0 %v5466_v50, %s4181_s26  ;;  %v5502_v57 = vpack.c.bf16 %v880_v42, %v879_v53  ;;  %v5520_v53 = vpack.c.bf16 %v884_v48, %v883_v31  ;;  %v890_v42 = vld [vmem:[%s5145_s21 + $0xda] sm:$0xff] }
 0x1c5   : > { %v5490_v32 = vpop.permute.xlu1 %1631  ;;  %v5536_v48 = vpack.c.bf16 %v890_v42, %v889_v52 }
 0x1c6   : > { %7585 = vst [vmem:[#allocation34_spill] sm:$0xff] %v5490_v32  ;;  %v5494_v23 = vpop.permute.xlu0 %1629 }
 0x1c7   : > { %7586 = vst [vmem:[#allocation35_spill] sm:$0xff] %v5494_v23  ;;  %1810 = vrot.lane.b32.xlu1 %v5482_v26, %s4181_s26  ;;  %v902_v23 = vld [vmem:[%s5145_s21 + $0x13a] sm:$0xff] }
 0x1c8   : > { %1808 = vrot.lane.b32.xlu0 %v5486_v1, %s4181_s26 }
 0x1c9   : > { %v1636_v32 = vpop.permute.xlu1 %1635 }
 0x1ca   : > { %v5510_v33 = vsel %vm7549_vm7, %v5362_v13, %v1636_v32  ;;  %v5512_v9 = vpop.permute.xlu0 %1633  ;;  %v887_v32 = vld [vmem:[%s5145_s21 + $0xc2] sm:$0xff] }
 0x1cb   : > { %7587 = vst [vmem:[#allocation36_spill] sm:$0xff] %v5512_v9  ;;  %1814 = vrot.lane.b32.xlu1 %v5498_v18, %s4181_s26  ;;  %v5540_v31 = vpack.c.bf16 %v888_v37, %v887_v32  ;;  %v898_v32 = vld [vmem:[%s5145_s21 + $0x11a] sm:$0xff] }
 0x1cc   : > { %1812 = vrot.lane.b32.xlu0 %v5502_v57, %s4181_s26 }
 0x1cd   : > { %v1640_v13 = vpop.permute.xlu1 %1639 }
 0x1ce   : > { %v5528_v9 = vsel %vm7549_vm7, %v5376_v8, %v1640_v13  ;;  %v1638_v55 = vpop.permute.xlu0 %1637  ;;  %v893_v8 = vld [vmem:[%s5145_s21 + $0xf2] sm:$0xff] }
 0x1cf   : > { %v5532_v41 = vsel %vm7549_vm7, %v5358_v10, %v1638_v55  ;;  %1818 = vrot.lane.b32.xlu1 %v5516_v39, %s4181_s26  ;;  %v892_v55 = vld [vmem:[%s5145_s21 + $0xea] sm:$0xff]  ;;  %v5556_v37 = vpack.c.bf16 %v894_v49, %v893_v8 }
 0x1d0   : > { %1816 = vrot.lane.b32.xlu0 %v5520_v53, %s4181_s26  ;;  %v5560_v42 = vpack.c.bf16 %v892_v55, %v891_v11  ;;  %v901_v55 = vld [vmem:[%s5145_s21 + $0x132] sm:$0xff] }
 0x1d1   : > { %v1644_v13 = vpop.permute.xlu1 %1643 }
 0x1d2   : > { %v5548_v10 = vsel %vm7549_vm7, %v5390_v46, %v1644_v13  ;;  %v1642_v30 = vpop.permute.xlu0 %1641  ;;  %v897_v46 = vld [vmem:[%s5145_s21 + $0x112] sm:$0xff] }
 0x1d3   : > { %v5552_v52 = vsel %vm7549_vm7, %v5372_v3, %v1642_v30  ;;  %1822 = vrot.lane.b32.xlu1 %v5536_v48, %s4181_s26  ;;  %v896_v3 = vld [vmem:[%s5145_s21 + $0x10a] sm:$0xff]  ;;  %v5576_v11 = vpack.c.bf16 %v898_v32, %v897_v46  ;;  %v5592_v46 = vpack.c.bf16 %v902_v23, %v901_v55 }
 0x1d4   : > { %1820 = vrot.lane.b32.xlu0 %v5540_v31, %s4181_s26  ;;  %v5580_v49 = vpack.c.bf16 %v896_v3, %v895_v45  ;;  %v903_v3 = vld [vmem:[%s5145_s21 + $0x142] sm:$0xf]  ;;  %v1121_v55 = vld [vmem:[%s5145_s21 + $0x26] sm:$0xff] }
 0x1d5   : > { %v1648_v13 = vpop.permute.xlu1 %1647  ;;  %7589 = vst [vmem:[#allocation38_spill] sm:$0xff] %v5592_v46  ;;  %v924_v61 = vpack.c.bf16 %v903_v3, %v903_v3  ;;  %v1162_v3 = vpack.c.bf16 %v1122_v14, %v1121_v55  ;;  %v1124_v55 = vld [vmem:[%s5145_s21 + $0x3e] sm:$0xff] }
 0x1d6   : > { %v5568_v30 = vsel %vm7549_vm7, %v5402_v43, %v1648_v13  ;;  %v1646_v62 = vpop.permute.xlu0 %1645  ;;  %v899_v13 = vld [vmem:[%s5145_s21 + $0x122] sm:$0xff] }
 0x1d7   : > { %v5572_v8 = vsel %vm7549_vm7, %v5386_v51, %v1646_v62  ;;  %1826 = vrot.lane.b32.xlu1 %v5556_v37, %s4181_s26  ;;  %v900_v62 = vld [vmem:[%s5145_s21 + $0x12a] sm:$0xff] }
 0x1d8   : > { %1824 = vrot.lane.b32.xlu0 %v5560_v42, %s4181_s26  ;;  %v5596_v45 = vpack.c.bf16 %v900_v62, %v899_v13 }
 0x1d9   : > { %v5584_v43 = vpop.permute.xlu1 %1672 }
 0x1da   : > { %7588 = vst [vmem:[#allocation37_spill] sm:$0xff] %v5584_v43  ;;  %v5588_v51 = vpop.permute.xlu0 %1670 }
 0x1db   : > { %1830 = vrot.lane.b32.xlu1 %v5576_v11, %s4181_s26 }
 0x1dc   : > { %1828 = vrot.lane.b32.xlu0 %v5580_v49, %s4181_s26 }
 0x1dd   : > { %v5598_v32 = vpop.permute.xlu1 %1676 }
 0x1de   : > { %7590 = vst [vmem:[#allocation39_spill] sm:$0xff] %v5598_v32  ;;  %v5601_v43 = vpop.permute.xlu0 %1674 }
 0x1df   : > { %7591 = vst [vmem:[#allocation40_spill] sm:$0xff] %v5601_v43  ;;  %1834 = vrot.lane.b32.xlu1 %v5592_v46, %s4181_s26 }
 0x1e0   : > { %1832 = vrot.lane.b32.xlu0 %v5596_v45, %s4181_s26 }
 0x1e1   : > { %v1681_v23 = vpop.permute.xlu1 %1680 }
 0x1e2   : > { %v5611_v13 = vsel %vm2417_vm8, %v5439_v47, %v1681_v23  ;;  %v1679_v62 = vpop.permute.xlu0 %1678 }
 0x1e3   : > { %v5615_v32 = vsel %vm2417_vm8, %v5421_v25, %v1679_v62  ;;  %1840 = vrot.lane.b32.xlu1 %v5426_v60, %s4182_s27  ;;  %v1143_v25 = vld [vmem:[%s5145_s21 + $0xd6] sm:$0xff]  ;;  %v1144_v60 = vld [vmem:[%s5145_s21 + $0xde] sm:$0xff] }
 0x1e4   : > { %1836 = vrot.lane.b32.xlu0 %v924_v61, %s4181_s26  ;;  %v1123_v61 = vld [vmem:[%s5145_s21 + $0x36] sm:$0xff] }
 0x1e5   : > { %v1685_v43 = vpop.permute.xlu1 %1684  ;;  %v1163_v62 = vpack.c.bf16 %v1124_v55, %v1123_v61 }
 0x1e6   : > { %v5622_v46 = vsel %vm2417_vm8, %v5458_v59, %v1685_v43  ;;  %v1683_v47 = vpop.permute.xlu0 %1682  ;;  %v1173_v43 = vpack.c.bf16 %v1144_v60, %v1143_v25  ;;  %v1125_v25 = vld [vmem:[%s5145_s21 + $0x46] sm:$0xff] }
 0x1e7   : > { %v5626_v23 = vsel %vm2417_vm8, %v5435_v24, %v1683_v47  ;;  %1842 = vrot.lane.b32.xlu1 %v5446_v2, %s4182_s27 }
 0x1e8   : > { %2739 = vrot.lane.b32.xlu0 %v1162_v3, %s4183_s28 }
 0x1e9   : > { %v1689_v14 = vpop.permute.xlu1 %1688 }
 0x1ea   : > { %v5637_v59 = vsel %vm2417_vm8, %v5478_v15, %v1689_v14  ;;  %v1687_v24 = vpop.permute.xlu0 %1686  ;;  %v1146_v14 = vld [vmem:[%s5145_s21 + $0xee] sm:$0xff] }
 0x1eb   : > { %v5641_v2 = vsel %vm2417_vm8, %v5454_v7, %v1687_v24  ;;  %1846 = vrot.lane.b32.xlu1 %v5466_v50, %s4182_s27  ;;  %v1145_v7 = vld [vmem:[%s5145_s21 + $0xe6] sm:$0xff] }
 0x1ec   : > { %1844 = vrot.lane.b32.xlu0 %v5443_v58, %s4182_s27  ;;  %v1126_v58 = vld [vmem:[%s5145_s21 + $0x4e] sm:$0xff] }
 0x1ed   : > { %v5647_v3 = vpop.permute.xlu1 %1692  ;;  %v1164_v61 = vpack.c.bf16 %v1126_v58, %v1125_v25 }
 0x1ee   : > { %v1691_v47 = vpop.permute.xlu0 %1690 }
 0x1ef   : > { %v5651_v15 = vsel %vm2417_vm8, %v5474_v21, %v1691_v47  ;;  %2761 = vrot.lane.b32.xlu1 %v1173_v43, %s4183_s28  ;;  %v1174_v21 = vpack.c.bf16 %v1146_v14, %v1145_v7  ;;  %v1148_v47 = vld [vmem:[%s5145_s21 + $0xfe] sm:$0xff] }
 0x1f0   : > { %2741 = vrot.lane.b32.xlu0 %v1163_v62, %s4183_s28  ;;  %v1128_v14 = vld [vmem:[%s5145_s21 + $0x5e] sm:$0xff] }
 0x1f1   : > { %v5657_v50 = vpop.permute.xlu1 %1696 }
 0x1f2   : > { %7592 = vst [vmem:[#allocation41_spill] sm:$0xff] %v5657_v50  ;;  %v5661_v60 = vpop.permute.xlu0 %1694  ;;  %v1071_v50 = vld [vmem:[%s5145_s21 + $0x85] sm:$0xff] }
 0x1f3   : > { %1850 = vrot.lane.b32.xlu1 %v5486_v1, %s4182_s27  ;;  %v1147_v1 = vld [vmem:[%s5145_s21 + $0xf6] sm:$0xff] }
 0x1f4   : > { %1848 = vrot.lane.b32.xlu0 %v5462_v27, %s4182_s27  ;;  %v1127_v27 = vld [vmem:[%s5145_s21 + $0x56] sm:$0xff]  ;;  %v1175_v58 = vpack.c.bf16 %v1148_v47, %v1147_v1  ;;  %v1129_v1 = vld [vmem:[%s5145_s21 + $0x66] sm:$0xff]  ;;  %v1130_v47 = vld [vmem:[%s5145_s21 + $0x6e] sm:$0xff] }
 0x1f5   : > { %v1701_v55 = vpop.permute.xlu1 %1700 }
 0x1f6   : > { %v5669_v24 = vsel %vm2417_vm8, %v5532_v41, %v1701_v55  ;;  %v1699_v43 = vpop.permute.xlu0 %1698 }
 0x1f7   : > { %v5673_v62 = vsel %vm2417_vm8, %v5510_v33, %v1699_v43  ;;  %2763 = vrot.lane.b32.xlu1 %v1174_v21, %s4183_s28  ;;  %v1165_v21 = vpack.c.bf16 %v1128_v14, %v1127_v27  ;;  %v1166_v27 = vpack.c.bf16 %v1130_v47, %v1129_v1 }
 0x1f8   : > { %2743 = vrot.lane.b32.xlu0 %v1164_v61, %s4183_s28 }
 0x1f9   : > { %v1705_v7 = vpop.permute.xlu1 %1704 }
 0x1fa   : > { %v5683_v41 = vsel %vm2417_vm8, %v5552_v52, %v1705_v7  ;;  %v1703_v25 = vpop.permute.xlu0 %1702 }
 0x1fb   : > { %v5687_v33 = vsel %vm2417_vm8, %v5528_v9, %v1703_v25  ;;  %1854 = vrot.lane.b32.xlu1 %v5502_v57, %s4182_s27  ;;  %v1149_v9 = vld [vmem:[%s5145_s21 + $0x106] sm:$0xff]  ;;  %v1150_v57 = vld [vmem:[%s5145_s21 + $0x10e] sm:$0xff] }
 0x1fc   : > { %1852 = vrot.lane.b32.xlu0 %v5482_v26, %s4182_s27 }
 0x1fd   : > { %v1709_v61 = vpop.permute.xlu1 %1708 }
 0x1fe   : > { %v5695_v52 = vsel %vm2417_vm8, %v5572_v8, %v1709_v61  ;;  %v1707_v55 = vpop.permute.xlu0 %1706  ;;  %v1132_v61 = vld [vmem:[%s5145_s21 + $0x7e] sm:$0xff] }
 0x1ff   : > { %v5699_v43 = vsel %vm2417_vm8, %v5548_v10, %v1707_v55  ;;  %2765 = vrot.lane.b32.xlu1 %v1175_v58, %s4183_s28  ;;  %v1176_v10 = vpack.c.bf16 %v1150_v57, %v1149_v9  ;;  %v1151_v58 = vld [vmem:[%s5145_s21 + $0x116] sm:$0xff] }
 0x200   : > { %2745 = vrot.lane.b32.xlu0 %v1165_v21, %s4183_s28  ;;  %v1152_v21 = vld [vmem:[%s5145_s21 + $0x11e] sm:$0xff] }
 0x201   : > { %v5705_v26 = vpop.permute.xlu1 %1733  ;;  %v1177_v9 = vpack.c.bf16 %v1152_v21, %v1151_v58  ;;  %v1134_v58 = vld [vmem:[%s5145_s21 + $0x8e] sm:$0xff] }
 0x202   : > { %v1711_v8 = vpop.permute.xlu0 %1710 }
 0x203   : > { %v5711_v7 = vsel %vm2417_vm8, %v5568_v30, %v1711_v8  ;;  %1858 = vrot.lane.b32.xlu1 %v5520_v53, %s4182_s27  ;;  %v1131_v53 = vld [vmem:[%s5145_s21 + $0x76] sm:$0xff] }
 0x204   : > { %1856 = vrot.lane.b32.xlu0 %v5498_v18, %s4182_s27  ;;  %v1167_v57 = vpack.c.bf16 %v1132_v61, %v1131_v53 }
 0x205   : > { %v5717_v14 = vpop.permute.xlu1 %1737 }
 0x206   : > { %7593 = vst [vmem:[#allocation42_spill] sm:$0xff] %v5717_v14  ;;  %v5719_v25 = vpop.permute.xlu0 %1735 }
 0x207   : > { %2767 = vrot.lane.b32.xlu1 %v1176_v10, %s4183_s28  ;;  %v1154_v10 = vld [vmem:[%s5145_s21 + $0x12e] sm:$0xff] }
 0x208   : > { %2747 = vrot.lane.b32.xlu0 %v1166_v27, %s4183_s28 }
 0x209   : > { %v1742_v30 = vpop.permute.xlu1 %1741 }
 0x20a   : > { %v5729_v18 = vsel %vm7546_vm9, %v5615_v32, %v1742_v30  ;;  %v5731_v55 = vpop.permute.xlu0 %1739 }
 0x20b   : > { %7594 = vst [vmem:[#allocation43_spill] sm:$0xff] %v5731_v55  ;;  %1862 = vrot.lane.b32.xlu1 %v5540_v31, %s4182_s27  ;;  %v1153_v31 = vld [vmem:[%s5145_s21 + $0x126] sm:$0xff] }
 0x20c   : > { %1860 = vrot.lane.b32.xlu0 %v5516_v39, %s4182_s27  ;;  %v1133_v39 = vld [vmem:[%s5145_s21 + $0x86] sm:$0xff]  ;;  %v1178_v30 = vpack.c.bf16 %v1154_v10, %v1153_v31 }
 0x20d   : > { %v1746_v1 = vpop.permute.xlu1 %1745  ;;  %v1168_v53 = vpack.c.bf16 %v1134_v58, %v1133_v39  ;;  %v994_v10 = vld [vmem:[%s5145_s21 + $0x24] sm:$0xff]  ;;  %v992_v58 = vld [vmem:[%s5145_s21 + $0x14] sm:$0xff] }
 0x20e   : > { %v5739_v47 = vsel %vm7546_vm9, %v5626_v23, %v1746_v1  ;;  %v1744_v8 = vpop.permute.xlu0 %1743  ;;  %v930_v1 = vld [vmem:[%s5145_s21 + $0x13] sm:$0xff] }
 0x20f   : > { %v5743_v32 = vsel %vm7546_vm9, %v5611_v13, %v1744_v8  ;;  %2769 = vrot.lane.b32.xlu1 %v1177_v9, %s4183_s28  ;;  %v931_v8 = vld [vmem:[%s5145_s21 + $0x1b] sm:$0xff] }
 0x210   : > { %2749 = vrot.lane.b32.xlu0 %v1167_v57, %s4183_s28 }
 0x211   : > { %v1750_v27 = vpop.permute.xlu1 %1749 }
 0x212   : > { %v5753_v23 = vsel %vm7546_vm9, %v5641_v2, %v1750_v27  ;;  %v1748_v21 = vpop.permute.xlu0 %1747  ;;  %v995_v27 = vld [vmem:[%s5145_s21 + $0x2c] sm:$0xff] }
 0x213   : > { %v5757_v13 = vsel %vm7546_vm9, %v5622_v46, %v1748_v21  ;;  %1866 = vrot.lane.b32.xlu1 %v5560_v42, %s4182_s27  ;;  %v1136_v42 = vld [vmem:[%s5145_s21 + $0x9e] sm:$0xff] }
 0x214   : > { %1864 = vrot.lane.b32.xlu0 %v5536_v48, %s4182_s27  ;;  %v1135_v48 = vld [vmem:[%s5145_s21 + $0x96] sm:$0xff] }
 0x215   : > { %v1754_v61 = vpop.permute.xlu1 %1753  ;;  %v1169_v31 = vpack.c.bf16 %v1136_v42, %v1135_v48  ;;  %v993_v21 = vld [vmem:[%s5145_s21 + $0x1c] sm:$0xff] }
 0x216   : > { %v5765_v2 = vsel %vm7546_vm9, %v5651_v15, %v1754_v61  ;;  %v1752_v9 = vpop.permute.xlu0 %1751  ;;  %v1156_v48 = vld [vmem:[%s5145_s21 + $0x13e] sm:$0xff] }
 0x217   : > { %v5769_v46 = vsel %vm7546_vm9, %v5637_v59, %v1752_v9  ;;  %2771 = vrot.lane.b32.xlu1 %v1178_v30, %s4183_s28  ;;  %v971_v59 = vpack.c.bf16 %v931_v8, %v930_v1  ;;  %v1155_v9 = vld [vmem:[%s5145_s21 + $0x136] sm:$0xff] }
 0x218   : > { %2751 = vrot.lane.b32.xlu0 %v1168_v53, %s4183_s28  ;;  %v1179_v8 = vpack.c.bf16 %v1156_v48, %v1155_v9  ;;  %v997_v9 = vld [vmem:[%s5145_s21 + $0x3c] sm:$0xff] }
 0x219   : > { %v5775_v57 = vpop.permute.xlu1 %1757 }
 0x21a   : > { %7595 = vst [vmem:[#allocation44_spill] sm:$0xff] %v5775_v57  ;;  %v5779_v15 = vpop.permute.xlu0 %1755 }
 0x21b   : > { %1870 = vrot.lane.b32.xlu1 %v5580_v49, %s4182_s27  ;;  %v1034_v49 = vpack.c.bf16 %v995_v27, %v994_v10  ;;  %v933_v10 = vld [vmem:[%s5145_s21 + $0x2b] sm:$0xff] }
 0x21c   : > { %1868 = vrot.lane.b32.xlu0 %v5556_v37, %s4182_s27  ;;  %v1033_v37 = vpack.c.bf16 %v993_v21, %v992_v58 }
 0x21d   : > { %v1762_v39 = vpop.permute.xlu1 %1761 }
 0x21e   : > { %v5791_v30 = vsel %vm7546_vm9, %v5673_v62, %v1762_v39  ;;  %v5793_v53 = vpop.permute.xlu0 %1759 }
 0x21f   : > { %7596 = vst [vmem:[#allocation45_spill] sm:$0xff] %v5793_v53  ;;  %2753 = vrot.lane.b32.xlu1 %v1169_v31, %s4183_s28 }
 0x220   : > { %1903 = vrot.lane.b32.xlu0 %v971_v59, %s4184_s29  ;;  %v932_v59 = vld [vmem:[%s5145_s21 + $0x23] sm:$0xff] }
 0x221   : > { %v1766_v61 = vpop.permute.xlu1 %1765  ;;  %v972_v39 = vpack.c.bf16 %v933_v10, %v932_v59 }
 0x222   : > { %v5801_v42 = vsel %vm7546_vm9, %v5687_v33, %v1766_v61  ;;  %v1764_v62 = vpop.permute.xlu0 %1763 }
 0x223   : > { %v5805_v1 = vsel %vm7546_vm9, %v5669_v24, %v1764_v62  ;;  %2010 = vrot.lane.b32.xlu1 %v1034_v49, %s4185_s8 }
 0x224   : > { %1966 = vrot.lane.b32.xlu0 %v1033_v37, %s4186_s9 }
 0x225   : > { %v1770_v31 = vpop.permute.xlu1 %1769 }
 0x226   : > { %v5813_v33 = vsel %vm7546_vm9, %v5699_v43, %v1770_v31  ;;  %v1768_v27 = vpop.permute.xlu0 %1767  ;;  %v1015_v31 = vld [vmem:[%s5145_s21 + $0xcc] sm:$0xff] }
 0x227   : > { %v5817_v24 = vsel %vm7546_vm9, %v5683_v41, %v1768_v27  ;;  %v996_v41 = vld [vmem:[%s5145_s21 + $0x34] sm:$0xff]  ;;  %v7541_v27 = vmov 0.0  }
 0x228   : > { %2773 = vrot.lane.b32.xlu0 %v1179_v8, %s4183_s28  ;;  %v1035_v62 = vpack.c.bf16 %v997_v9, %v996_v41  ;;  %v1014_v8 = vld [vmem:[%s5145_s21 + $0xc4] sm:$0xff]  ;;  %4012 = vmatprep.subr.bf16.mxu0 %v7541_v27 }
 0x229   : > { %v1774_v58 = vpop.permute.xlu1 %1773  ;;  %v5846_v10 = vpack.c.bf16 %v1015_v31, %v1014_v8  ;;  %4110 = vmatprep.subr.bf16.mxu1 %v7541_v27  ;;  %v4157_v8 = vld [vmem:[%s7535_s3 + $0x8] sm:$0xff]   ;;  %4026 = vmatprep.mubr.msk.bf16.mxu0 %vm4188_vm12, %v7541_v27 }
 0x22a   : > { %v5822_v21 = vsel %vm7546_vm9, %v5711_v7, %v1774_v58  ;;  %v1772_v37 = vpop.permute.xlu0 %1771  ;;  %v1017_v58 = vld [vmem:[%s5145_s21 + $0xdc] sm:$0xff]  ;;  %4070 = vmatprep.mubr.msk.bf16.mxu1 %vm4188_vm12, %v7541_v27 }
 0x22b   : > { %v5826_v43 = vsel %vm7546_vm9, %v5695_v52, %v1772_v37  ;;  %v4156_v52 = vld [vmem:[%s7535_s3] sm:$0xff]   ;;  %7599 = vst [vmem:[#allocation48_spill] sm:$0xff] %v5846_v10 }
 0x22c   : > { %1905 = vrot.lane.b32.xlu0 %v972_v39, %s4184_s29  ;;  %v1016_v39 = vld [vmem:[%s5145_s21 + $0xd4] sm:$0xff]  ;;  %4013 = vmatpush3.bf16.msra.mxu0 %v4156_v52 }
 0x22d   : > { %v5829_v61 = vpop.permute.xlu1 %1798  ;;  %4014 = vmatprep.subr.bf16.mxu0 %v7541_v27  ;;  %4117 = vmatpush3.bf16.msra.mxu1 %v4156_v52  ;;  %v1045_v31 = vpack.c.bf16 %v1017_v58, %v1016_v39  ;;  %v4158_v39 = vld [vmem:[%s7535_s3 + $0x10] sm:$0xff]  }
 0x22e   : > { %v5833_v48 = vpop.permute.xlu0 %1796  ;;  %4111 = vmatprep.subr.bf16.mxu1 %v7541_v27 }
 0x230   : > { %1968 = vrot.lane.b32.xlu0 %v1034_v49, %s4186_s9  ;;  %4015 = vmatpush3.bf16.msra.mxu0 %v4157_v8 }
 0x231   : > { %v5836_v7 = vpop.permute.xlu1 %1802  ;;  %4016 = vmatprep.subr.bf16.mxu0 %v7541_v27  ;;  %4118 = vmatpush3.bf16.msra.mxu1 %v4157_v8 }
 0x232   : > { %7597 = vst [vmem:[#allocation46_spill] sm:$0xff] %v5836_v7  ;;  %v5840_v59 = vpop.permute.xlu0 %1800  ;;  %4112 = vmatprep.subr.bf16.mxu1 %v7541_v27 }
 0x233   : > { %7598 = vst [vmem:[#allocation47_spill] sm:$0xff] %v5840_v59  ;;  %v1092_v59 = vld [vmem:[%s5145_s21 + $0x12d] sm:$0xff] }
 0x234   : > { %2012 = vrot.lane.b32.xlu0 %v1035_v62, %s4185_s8  ;;  %4017 = vmatpush3.bf16.msra.mxu0 %v4158_v39 }
 0x235   : > { %v1807_v49 = vpop.permute.xlu1 %1806  ;;  %4018 = vmatprep.subr.bf16.mxu0 %v7541_v27  ;;  %4119 = vmatpush3.bf16.msra.mxu1 %v4158_v39  ;;  %v4160_v39 = vld [vmem:[%s7535_s3 + $0x20] sm:$0xff]  }
 0x236   : > { %v5854_v37 = vsel %vm7545_vm10, %v5743_v32, %v1807_v49  ;;  %v1805_v41 = vpop.permute.xlu0 %1804  ;;  %v934_v49 = vld [vmem:[%s5145_s21 + $0x33] sm:$0xff]  ;;  %4113 = vmatprep.subr.bf16.mxu1 %v7541_v27 }
 0x237   : > { %7600 = vst [vmem:[#allocation49_spill] sm:$0xff] %v5854_v37  ;;  %v5859_v9 = vsel %vm7545_vm10, %v5729_v18, %v1805_v41  ;;  %v935_v37 = vld [vmem:[%s5145_s21 + $0x3b] sm:$0xff] }
 0x238   : > { %7601 = vst [vmem:[#allocation50_spill] sm:$0xff] %v5859_v9  ;;  %1988 = vrot.lane.b32.xlu0 %v5846_v10, %s4186_s9  ;;  %v1081_v9 = vld [vmem:[%s5145_s21 + $0xd5] sm:$0xff]  ;;  %v1072_v10 = vld [vmem:[%s5145_s21 + $0x8d] sm:$0xff] }
 0x239   : > { %v1811_v32 = vpop.permute.xlu1 %1810 }
 0x23a   : > { %v5871_v52 = vsel %vm7545_vm10, %v5757_v13, %v1811_v32  ;;  %v1809_v18 = vpop.permute.xlu0 %1808  ;;  %v973_v13 = vpack.c.bf16 %v935_v37, %v934_v49  ;;  %v999_v49 = vld [vmem:[%s5145_s21 + $0x4c] sm:$0xff] }
 0x23b   : > { %7602 = vst [vmem:[#allocation51_spill] sm:$0xff] %v5871_v52  ;;  %v5876_v41 = vsel %vm7545_vm10, %v5739_v47, %v1809_v18  ;;  %v4159_v18 = vld [vmem:[%s7535_s3 + $0x18] sm:$0xff]   ;;  %v936_v52 = vld [vmem:[%s5145_s21 + $0x43] sm:$0xff] }
 0x23c   : > { %7603 = vst [vmem:[#allocation52_spill] sm:$0xff] %v5876_v41  ;;  %2032 = vrot.lane.b32.xlu0 %v1045_v31, %s4185_s8  ;;  %4019 = vmatpush3.bf16.msra.mxu0 %v4159_v18  ;;  %v937_v41 = vld [vmem:[%s5145_s21 + $0x4b] sm:$0xff] }
 0x23d   : > { %v1815_v58 = vpop.permute.xlu1 %1814  ;;  %4020 = vmatprep.subr.bf16.mxu0 %v7541_v27  ;;  %4120 = vmatpush3.bf16.msra.mxu1 %v4159_v18 }
 0x23e   : > { %v5885_v8 = vsel %vm7545_vm10, %v5769_v46, %v1815_v58  ;;  %v1813_v32 = vpop.permute.xlu0 %1812  ;;  %v998_v46 = vld [vmem:[%s5145_s21 + $0x44] sm:$0xff]  ;;  %4114 = vmatprep.subr.bf16.mxu1 %v7541_v27 }
 0x23f   : > { %7604 = vst [vmem:[#allocation53_spill] sm:$0xff] %v5885_v8  ;;  %v5890_v47 = vsel %vm7545_vm10, %v5753_v23, %v1813_v32 }
 0x240   : > { %7605 = vst [vmem:[#allocation54_spill] sm:$0xff] %v5890_v47  ;;  %1907 = vrot.lane.b32.xlu0 %v973_v13, %s4184_s29  ;;  %v1036_v13 = vpack.c.bf16 %v999_v49, %v998_v46  ;;  %4021 = vmatpush3.bf16.msra.mxu0 %v4160_v39  ;;  %v1019_v46 = vld [vmem:[%s5145_s21 + $0xec] sm:$0xff] }
 0x241   : > { %v5897_v37 = vpop.permute.xlu1 %1818  ;;  %4022 = vmatprep.subr.bf16.mxu0 %v7541_v27  ;;  %4121 = vmatpush3.bf16.msra.mxu1 %v4160_v39  ;;  %v4162_v39 = vld [vmem:[%s7535_s3 + $0x30] sm:$0x3f]  }
 0x242   : > { %v1817_v58 = vpop.permute.xlu0 %1816  ;;  %4115 = vmatprep.subr.bf16.mxu1 %v7541_v27 }
 0x243   : > { %v5904_v23 = vsel %vm7545_vm10, %v5765_v2, %v1817_v58  ;;  %v4161_v2 = vld [vmem:[%s7535_s3 + $0x28] sm:$0xff]  }
 0x244   : > { %7606 = vst [vmem:[#allocation55_spill] sm:$0xff] %v5904_v23  ;;  %1970 = vrot.lane.b32.xlu0 %v1035_v62, %s4186_s9  ;;  %v1018_v62 = vld [vmem:[%s5145_s21 + $0xe4] sm:$0xff]  ;;  %4023 = vmatpush3.bf16.msra.mxu0 %v4161_v2 }
 0x245   : > { %v5911_v32 = vpop.permute.xlu1 %1822  ;;  %4024 = vmatprep.subr.bf16.mxu0 %v7541_v27  ;;  %4122 = vmatpush3.bf16.msra.mxu1 %v4161_v2  ;;  %v1046_v47 = vpack.c.bf16 %v1019_v46, %v1018_v62 }
 0x246   : > { %7607 = vst [vmem:[#allocation56_spill] sm:$0xff] %v5911_v32  ;;  %v5913_v8 = vpop.permute.xlu0 %1820  ;;  %4116 = vmatprep.subr.bf16.mxu1 %v7541_v27 }
 0x247   : > { %7608 = vst [vmem:[#allocation57_spill] sm:$0xff] %v5913_v8  ;;  %v1091_v8 = vld [vmem:[%s5145_s21 + $0x125] sm:$0xff] }
 0x248   : > { %2014 = vrot.lane.b32.xlu0 %v1036_v13, %s4185_s8 }
 0x249   : > { %v1827_v18 = vpop.permute.xlu1 %1826 }
 0x24a   : > { %v5925_v49 = vsel %vm7545_vm10, %v5805_v1, %v1827_v18  ;;  %v1825_v58 = vpop.permute.xlu0 %1824  ;;  %v3099_v1 = vsel %vm3097_vm11, %v4162_v39, 0  ;;  %vm2632_vm11 = vcmask 752640  }
 0x24b   : > { %7609 = vst [vmem:[#allocation58_spill] sm:$0xff] %v5925_v49  ;;  %v5933_v23 = vsel %vm7545_vm10, %v5791_v30, %v1825_v58  ;;  %4025 = vmatpush3.bf16.msra.mxu0 %v3099_v1  ;;  %4123 = vmatpush3.bf16.msra.mxu1 %v3099_v1  ;;  %v1060_v58 = vld [vmem:[%s5145_s21 + $0x2d] sm:$0xff] }
 0x24c   : > { %7610 = vst [vmem:[#allocation59_spill] sm:$0xff] %v5933_v23  ;;  %1990 = vrot.lane.b32.xlu0 %v1045_v31, %s4186_s9  ;;  %v974_v31 = vpack.c.bf16 %v937_v41, %v936_v52  ;;  %v1000_v1 = vld [vmem:[%s5145_s21 + $0x54] sm:$0xff]  ;;  %v1001_v52 = vld [vmem:[%s5145_s21 + $0x5c] sm:$0xff] }
 0x24d   : > { %v1831_v18 = vpop.permute.xlu1 %1830 }
 0x24e   : > { %v5941_v2 = vsel %vm7545_vm10, %v5817_v24, %v1831_v18  ;;  %v1829_v49 = vpop.permute.xlu0 %1828 }
 0x24f   : > { %7611 = vst [vmem:[#allocation60_spill] sm:$0xff] %v5941_v2  ;;  %v5945_v30 = vsel %vm7545_vm10, %v5801_v42, %v1829_v49  ;;  %v1059_v49 = vld [vmem:[%s5145_s21 + $0x25] sm:$0xff]  ;;  %v1061_v2 = vld [vmem:[%s5145_s21 + $0x35] sm:$0xff] }
 0x250   : > { %7612 = vst [vmem:[#allocation61_spill] sm:$0xff] %v5945_v30  ;;  %2034 = vrot.lane.b32.xlu0 %v1046_v47, %s4185_s8  ;;  %v1100_v18 = vpack.c.bf16 %v1060_v58, %v1059_v49  ;;  %v1021_v58 = vld [vmem:[%s5145_s21 + $0xfc] sm:$0xff] }
 0x251   : > { %v1835_v24 = vpop.permute.xlu1 %1834  ;;  %v1062_v30 = vld [vmem:[%s5145_s21 + $0x3d] sm:$0xff] }
 0x252   : > { %v5954_v62 = vsel %vm7545_vm10, %v5826_v43, %v1835_v24  ;;  %v1833_v46 = vpop.permute.xlu0 %1832  ;;  %v1137_v24 = vld [vmem:[%s5145_s21 + $0xa6] sm:$0xff] }
 0x253   : > { %7613 = vst [vmem:[#allocation62_spill] sm:$0xff] %v5954_v62  ;;  %v5958_v42 = vsel %vm7545_vm10, %v5813_v33, %v1833_v46  ;;  %v5972_v33 = vpack.c.bf16 %v1001_v52, %v1000_v1  ;;  %v1138_v46 = vld [vmem:[%s5145_s21 + $0xae] sm:$0xff]  ;;  %v952_v1 = vld [vmem:[%s5145_s21 + $0xc3] sm:$0xff] }
 0x254   : > { %7614 = vst [vmem:[#allocation63_spill] sm:$0xff] %v5958_v42  ;;  %1909 = vrot.lane.b32.xlu0 %v974_v31, %s4184_s29  ;;  %v953_v52 = vld [vmem:[%s5145_s21 + $0xcb] sm:$0xff] }
 0x255   : > { %v5963_v39 = vpop.permute.xlu1 %1840  ;;  %v1158_v42 = vld [vmem:[%s5145_s21 + $0x14e] sm:$0xff] }
 0x256   : > { %v1837_v41 = vpop.permute.xlu0 %1836 }
 0x257   : > { %v5969_v43 = vsel %vm7545_vm10, %v5822_v21, %v1837_v41  ;;  %v1170_v21 = vpack.c.bf16 %v1138_v46, %v1137_v24  ;;  %v939_v46 = vld [vmem:[%s5145_s21 + $0x5b] sm:$0xff] }
 0x258   : > { %7615 = vst [vmem:[#allocation64_spill] sm:$0xff] %v5969_v43  ;;  %1972 = vrot.lane.b32.xlu0 %v1036_v13, %s4186_s9  ;;  %v1020_v13 = vld [vmem:[%s5145_s21 + $0xf4] sm:$0xff]  ;;  %v1157_v43 = vld [vmem:[%s5145_s21 + $0x146] sm:$0xff] }
 0x259   : > { %v5974_v31 = vpop.permute.xlu1 %1842 }
 0x25a   : > { %v2740_v27 = vpop.permute.xlu0 %2739 }
 0x25b   : > { %v2784_v62 = vsel %vm7552_vm13, %v1100_v18, %v2740_v27  ;;  %v1047_v27 = vpack.c.bf16 %v1021_v58, %v1020_v13  ;;  %v982_v18 = vpack.c.bf16 %v953_v52, %v952_v1  ;;  %v1101_v13 = vpack.c.bf16 %v1062_v30, %v1061_v2  ;;  %v958_v1 = vld [vmem:[%s5145_s21 + $0xf3] sm:$0xff]  ;;  %v959_v52 = vld [vmem:[%s5145_s21 + $0xfb] sm:$0xff] }
 0x25c   : > { %2016 = vrot.lane.b32.xlu0 %v5972_v33, %s4185_s8  ;;  %2866 = vrot.lane.b32.xlu1 %v2784_v62, %s4189_s12  ;;  %v938_v62 = vld [vmem:[%s5145_s21 + $0x53] sm:$0xff] }
 0x25d   : > { %v5983_v49 = vpop.permute.xlu1 %1846 }
 0x25e   : > { %7616 = vst [vmem:[#allocation65_spill] sm:$0xff] %v5983_v49  ;;  %v5988_v41 = vpop.permute.xlu0 %1844  ;;  %v1082_v49 = vld [vmem:[%s5145_s21 + $0xdd] sm:$0xff] }
 0x25f   : > { %7617 = vst [vmem:[#allocation66_spill] sm:$0xff] %v5988_v41 }
 0x260   : > { %1992 = vrot.lane.b32.xlu0 %v1046_v47, %s4186_s9  ;;  %2755 = vrot.lane.b32.xlu1 %v1170_v21, %s4183_s28  ;;  %v975_v47 = vpack.c.bf16 %v939_v46, %v938_v62  ;;  %v1180_v21 = vpack.c.bf16 %v1158_v42, %v1157_v43  ;;  %v1111_v62 = vpack.c.bf16 %v1082_v49, %v1081_v9  ;;  %v1022_v43 = vld [vmem:[%s5145_s21 + $0x104] sm:$0xff] }
 0x261   : > { %v2762_v24 = vpop.permute.xlu1 %2761  ;;  %v1140_v9 = vld [vmem:[%s5145_s21 + $0xbe] sm:$0xff] }
 0x262   : > { %v2742_v23 = vpop.permute.xlu0 %2741  ;;  %v2817_v46 = vsel %vm7552_vm13, %v1111_v62, %v2762_v24  ;;  %v940_v24 = vld [vmem:[%s5145_s21 + $0x63] sm:$0xff]  ;;  %v954_v62 = vld [vmem:[%s5145_s21 + $0xd3] sm:$0xff] }
 0x263   : > { %v2787_v2 = vsel %vm7552_vm13, %v1101_v13, %v2742_v23 }
 0x264   : > { %2036 = vrot.lane.b32.xlu0 %v1047_v27, %s4185_s8  ;;  %1925 = vrot.lane.b32.xlu1 %v982_v18, %s4184_s29  ;;  %v985_v18 = vpack.c.bf16 %v959_v52, %v958_v1  ;;  %v1139_v1 = vld [vmem:[%s5145_s21 + $0xb6] sm:$0xff] }
 0x265   : > { %v6000_v58 = vpop.permute.xlu1 %1850  ;;  %v1171_v13 = vpack.c.bf16 %v1140_v9, %v1139_v1  ;;  %v1159_v1 = vld [vmem:[%s5145_s21 + $0x156] sm:$0xff]  ;;  %v1160_v9 = vld [vmem:[%s5145_s21 + $0x15e] sm:$0xff] }
 0x266   : > { %7618 = vst [vmem:[#allocation67_spill] sm:$0xff] %v6000_v58  ;;  %v6006_v32 = vpop.permute.xlu0 %1848  ;;  %v1064_v58 = vld [vmem:[%s5145_s21 + $0x4d] sm:$0xff] }
 0x267   : > { %7619 = vst [vmem:[#allocation68_spill] sm:$0xff] %v6006_v32 }
 0x268   : > { %1911 = vrot.lane.b32.xlu0 %v975_v47, %s4184_s29  ;;  %2775 = vrot.lane.b32.xlu1 %v1180_v21, %s4183_s28  ;;  %v1023_v21 = vld [vmem:[%s5145_s21 + $0x10c] sm:$0xff] }
 0x269   : > { %v2764_v30 = vpop.permute.xlu1 %2763  ;;  %v1048_v49 = vpack.c.bf16 %v1023_v21, %v1022_v43  ;;  %v960_v43 = vld [vmem:[%s5145_s21 + $0x103] sm:$0xff]  ;;  %v961_v21 = vld [vmem:[%s5145_s21 + $0x10b] sm:$0xff] }
 0x26a   : > { %v2744_v42 = vpop.permute.xlu0 %2743 }
 0x26c   : > { %1931 = vrot.lane.b32.xlu0 %v985_v18, %s4184_s29  ;;  %2868 = vrot.lane.b32.xlu1 %v2787_v2, %s4189_s12  ;;  %v941_v18 = vld [vmem:[%s5145_s21 + $0x6b] sm:$0xff]  ;;  %v955_v2 = vld [vmem:[%s5145_s21 + $0xdb] sm:$0xff] }
 0x26d   : > { %v6015_v47 = vpop.permute.xlu1 %1854 }
 0x26e   : > { %7620 = vst [vmem:[#allocation69_spill] sm:$0xff] %v6015_v47  ;;  %v6020_v23 = vpop.permute.xlu0 %1852 }
 0x26f   : > { %7621 = vst [vmem:[#allocation70_spill] sm:$0xff] %v6020_v23  ;;  %v1063_v23 = vld [vmem:[%s5145_s21 + $0x45] sm:$0xff] }
 0x270   : > { %1994 = vrot.lane.b32.xlu0 %v1047_v27, %s4186_s9  ;;  %2888 = vrot.lane.b32.xlu1 %v2817_v46, %s4189_s12  ;;  %v976_v27 = vpack.c.bf16 %v941_v18, %v940_v24  ;;  %v983_v46 = vpack.c.bf16 %v955_v2, %v954_v62  ;;  %v1181_v24 = vpack.c.bf16 %v1160_v9, %v1159_v1  ;;  %v1083_v62 = vld [vmem:[%s5145_s21 + $0xe5] sm:$0xff]  ;;  %v1084_v2 = vld [vmem:[%s5145_s21 + $0xed] sm:$0xff] }
 0x271   : > { %v6025_v52 = vpop.permute.xlu1 %2765  ;;  %v1102_v18 = vpack.c.bf16 %v1064_v58, %v1063_v23  ;;  %v942_v1 = vld [vmem:[%s5145_s21 + $0x73] sm:$0xff] }
 0x272   : > { %v6030_v47 = vpop.permute.xlu0 %2745 }
 0x274   : > { %2038 = vrot.lane.b32.xlu0 %v1048_v49, %s4185_s8  ;;  %2757 = vrot.lane.b32.xlu1 %v1171_v13, %s4183_s28  ;;  %v986_v13 = vpack.c.bf16 %v961_v21, %v960_v43  ;;  %v1024_v43 = vld [vmem:[%s5145_s21 + $0x114] sm:$0xff]  ;;  %v1025_v21 = vld [vmem:[%s5145_s21 + $0x11c] sm:$0xff] }
 0x275   : > { %v6040_v32 = vpop.permute.xlu1 %1858  ;;  %v6061_v23 = vpack.c.bf16 %v1025_v21, %v1024_v43  ;;  %v957_v43 = vld [vmem:[%s5145_s21 + $0xeb] sm:$0xff] }
 0x276   : > { %7622 = vst [vmem:[#allocation71_spill] sm:$0xff] %v6040_v32  ;;  %v6042_v7 = vpop.permute.xlu0 %1856 }
 0x277   : > { %7623 = vst [vmem:[#allocation72_spill] sm:$0xff] %v6042_v7  ;;  %v1066_v7 = vld [vmem:[%s5145_s21 + $0x5d] sm:$0xff] }
 0x278   : > { %1913 = vrot.lane.b32.xlu0 %v976_v27, %s4184_s29  ;;  %1927 = vrot.lane.b32.xlu1 %v983_v46, %s4184_s29  ;;  %v1112_v27 = vpack.c.bf16 %v1084_v2, %v1083_v62  ;;  %v2790_v46 = vsel %vm7552_vm13, %v1102_v18, %v2744_v42  ;;  %v1141_v42 = vld [vmem:[%s5145_s21 + $0xc6] sm:$0xff] }
 0x279   : > { %v6050_v55 = vpop.permute.xlu1 %2767 }
 0x27a   : > { %v6048_v53 = vpop.permute.xlu0 %2747  ;;  %v2820_v9 = vsel %vm7552_vm13, %v1112_v27, %v2764_v30  ;;  %v1004_v30 = vld [vmem:[%s5145_s21 + $0x74] sm:$0xff]  ;;  %v1005_v27 = vld [vmem:[%s5145_s21 + $0x7c] sm:$0xff] }
 0x27c   : > { %1933 = vrot.lane.b32.xlu0 %v986_v13, %s4184_s29  ;;  %2777 = vrot.lane.b32.xlu1 %v1181_v24, %s4183_s28  ;;  %v943_v13 = vld [vmem:[%s5145_s21 + $0x7b] sm:$0xff]  ;;  %v1142_v24 = vld [vmem:[%s5145_s21 + $0xce] sm:$0xff] }
 0x27d   : > { %v6068_v18 = vpop.permute.xlu1 %1862  ;;  %v1172_v2 = vpack.c.bf16 %v1142_v24, %v1141_v42  ;;  %v1007_v42 = vld [vmem:[%s5145_s21 + $0x8c] sm:$0xff]  ;;  %v1161_v24 = vld [vmem:[%s5145_s21 + $0x166] sm:$0xf] }
 0x27e   : > { %v6057_v58 = vpop.permute.xlu0 %1860 }
 0x27f   : > { %7624 = vst [vmem:[#allocation73_spill] sm:$0xff] %v6057_v58  ;;  %v1065_v58 = vld [vmem:[%s5145_s21 + $0x55] sm:$0xff] }
 0x280   : > { %1996 = vrot.lane.b32.xlu0 %v1048_v49, %s4186_s9  ;;  %2870 = vrot.lane.b32.xlu1 %v2790_v46, %s4189_s12  ;;  %v977_v49 = vpack.c.bf16 %v943_v13, %v942_v1  ;;  %v956_v46 = vld [vmem:[%s5145_s21 + $0xe3] sm:$0xff]  ;;  %v6086_v1 = vpack.c.bf16 %v1005_v27, %v1004_v30  ;;  %v1085_v30 = vld [vmem:[%s5145_s21 + $0xf5] sm:$0xff] }
 0x281   : > { %v6082_v32 = vpop.permute.xlu1 %2769  ;;  %v1006_v13 = vld [vmem:[%s5145_s21 + $0x84] sm:$0xff] }
 0x282   : > { %v6070_v62 = vpop.permute.xlu0 %2749  ;;  %v1086_v27 = vld [vmem:[%s5145_s21 + $0xfd] sm:$0xff] }
 0x283   : > { %v1113_v14 = vpack.c.bf16 %v1086_v27, %v1085_v30  ;;  %v1067_v30 = vld [vmem:[%s5145_s21 + $0x65] sm:$0xff]  ;;  %v1068_v27 = vld [vmem:[%s5145_s21 + $0x6d] sm:$0xff] }
 0x284   : > { %2040 = vrot.lane.b32.xlu0 %v6061_v23, %s4185_s8  ;;  %2890 = vrot.lane.b32.xlu1 %v2820_v9, %s4189_s12  ;;  %v984_v9 = vpack.c.bf16 %v957_v43, %v956_v46  ;;  %v1103_v46 = vpack.c.bf16 %v1066_v7, %v1065_v58  ;;  %v1106_v43 = vpack.c.bf16 %v1072_v10, %v1071_v50  ;;  %v4190_v7 = vmov 0  }
 0x285   : > { %v6101_v41 = vpop.permute.xlu1 %1866  ;;  %4155 = vset.pattern.permute.xlu0 %v4190_v7  ;;  %4154 = vset.pattern.permute.xlu1 %v4190_v7  ;;  %v1088_v7 = vld [vmem:[%s5145_s21 + $0x10d] sm:$0xff] }
 0x286   : > { %v6079_v21 = vpop.permute.xlu0 %1864 }
 0x287   : > { %7625 = vst [vmem:[#allocation74_spill] sm:$0xff] %v6079_v21 }
 0x288   : > { %1915 = vrot.lane.b32.xlu0 %v977_v49, %s4184_s29  ;;  %2759 = vrot.lane.b32.xlu1 %v1172_v2, %s4183_s28  ;;  %v6097_v49 = vpack.c.bf16 %v1007_v42, %v1006_v13  ;;  %v1182_v2 = vpack.c.bf16 %v1161_v24, %v1161_v24  ;;  %v1116_v13 = vpack.c.bf16 %v1092_v59, %v1091_v8  ;;  %v1003_v42 = vld [vmem:[%s5145_s21 + $0x6c] sm:$0xff]  ;;  %v964_v24 = vld [vmem:[%s5145_s21 + $0x123] sm:$0xff] }
 0x289   : > { %v2772_v58 = vpop.permute.xlu1 %2771 }
 0x28a   : > { %v2752_v21 = vpop.permute.xlu0 %2751  ;;  %v2832_v59 = vsel %vm7552_vm13, %v1116_v13, %v2772_v58  ;;  %v1027_v13 = vld [vmem:[%s5145_s21 + $0x12c] sm:$0xff] }
 0x28b   : > { %v2802_v50 = vsel %vm7552_vm13, %v1106_v43, %v2752_v21  ;;  %v1002_v21 = vld [vmem:[%s5145_s21 + $0x64] sm:$0xff]  ;;  %v1104_v43 = vpack.c.bf16 %v1068_v27, %v1067_v30  ;;  %v946_v30 = vld [vmem:[%s5145_s21 + $0x93] sm:$0xff] }
 0x28c   : > { %1978 = vrot.lane.b32.xlu0 %v6086_v1, %s4186_s9  ;;  %1929 = vrot.lane.b32.xlu1 %v984_v9, %s4184_s29  ;;  %v2793_v9 = vsel %vm7552_vm13, %v1103_v46, %v6030_v47  ;;  %v2823_v47 = vsel %vm7552_vm13, %v1113_v14, %v6025_v52  ;;  %v1038_v14 = vpack.c.bf16 %v1003_v42, %v1002_v21  ;;  %v1029_v21 = vld [vmem:[%s5145_s21 + $0x13c] sm:$0xff] }
 0x28e   : > { %v6105_v57 = vpop.permute.xlu0 %1868 }
 0x290   : > { %2022 = vrot.lane.b32.xlu0 %v6097_v49, %s4185_s8  ;;  %2779 = vrot.lane.b32.xlu1 %v1182_v2, %s4183_s28  ;;  %v965_v2 = vld [vmem:[%s5145_s21 + $0x12b] sm:$0xff] }
 0x291   : > { %v988_v52 = vpack.c.bf16 %v965_v2, %v964_v24 }
 0x292   : > { %v6113_v10 = vpop.permute.xlu0 %1903 }
 0x294   : > { %2872 = vrot.lane.b32.xlu1 %v2793_v9, %s4189_s12  ;;  %2878 = vrot.lane.b32.xlu0 %v2802_v50, %s4189_s12  ;;  %v1026_v9 = vld [vmem:[%s5145_s21 + $0x124] sm:$0xff] }
 0x295   : > { %v1087_v50 = vld [vmem:[%s5145_s21 + $0x105] sm:$0xff] }
 0x296   : > { %v6120_v8 = vpop.permute.xlu0 %1966 }
 0x298   : > { %2892 = vrot.lane.b32.xlu1 %v2823_v47, %s4189_s12  ;;  %2898 = vrot.lane.b32.xlu0 %v2832_v59, %s4189_s12  ;;  %v1114_v47 = vpack.c.bf16 %v1088_v7, %v1087_v50  ;;  %v1028_v59 = vld [vmem:[%s5145_s21 + $0x134] sm:$0xff]  ;;  %v1070_v50 = vld [vmem:[%s5145_s21 + $0x7d] sm:$0xff] }
 0x299   : > { %v6155_v24 = vpack.c.bf16 %v1029_v21, %v1028_v59  ;;  %v1011_v59 = vld [vmem:[%s5145_s21 + $0xac] sm:$0xff]  ;;  %v1089_v21 = vld [vmem:[%s5145_s21 + $0x115] sm:$0xff] }
 0x29a   : > { %v6130_v46 = vpop.permute.xlu0 %2773  ;;  %v2826_v2 = vsel %vm7552_vm13, %v1114_v47, %v6050_v55 }
 0x29c   : > { %1974 = vrot.lane.b32.xlu1 %v5972_v33, %s4186_s9  ;;  %1874 = vrot.lane.b32.xlu0 %v5596_v45, %s4182_s27  ;;  %v6144_v33 = vpack.c.bf16 %v1027_v13, %v1026_v9  ;;  %v2796_v45 = vsel %vm7552_vm13, %v1104_v43, %v6048_v53  ;;  %v947_v53 = vld [vmem:[%s5145_s21 + $0x9b] sm:$0xff] }
 0x29d   : > { %v1008_v43 = vld [vmem:[%s5145_s21 + $0x94] sm:$0xff]  ;;  %v1009_v9 = vld [vmem:[%s5145_s21 + $0x9c] sm:$0xff] }
 0x29e   : > { %v6140_v58 = vpop.permute.xlu0 %1905  ;;  %v1069_v13 = vld [vmem:[%s5145_s21 + $0x75] sm:$0xff]  ;;  %v6174_v55 = vpack.c.bf16 %v1009_v9, %v1008_v43 }
 0x29f   : > { %v1105_v47 = vpack.c.bf16 %v1070_v50, %v1069_v13  ;;  %v295_v13 = vld [vmem:[%s4250_s30] sm:$0xff]  ;;  %v296_v50 = vld [vmem:[%s4250_s30 + $0x8] sm:$0xff] }
 0x2a0   : > { %2018 = vrot.lane.b32.xlu1 %v1038_v14, %s4185_s8  ;;  %1937 = vrot.lane.b32.xlu0 %v988_v52, %s4184_s29  ;;  %v979_v52 = vpack.c.bf16 %v947_v53, %v946_v30 }
 0x2a2   : > { %v6150_v42 = vpop.permute.xlu0 %1968 }
 0x2a4   : > { %2874 = vrot.lane.b32.xlu1 %v2796_v45, %s4189_s12  ;;  %2000 = vrot.lane.b32.xlu0 %v6144_v33, %s4186_s9  ;;  %v1010_v45 = vld [vmem:[%s5145_s21 + $0xa4] sm:$0xff] }
 0x2a6   : > { %v6161_v27 = vpop.permute.xlu0 %2012 }
 0x2a8   : > { %2894 = vrot.lane.b32.xlu1 %v2826_v2, %s4189_s12  ;;  %2044 = vrot.lane.b32.xlu0 %v6155_v24, %s4185_s8  ;;  %v1090_v2 = vld [vmem:[%s5145_s21 + $0x11d] sm:$0xff] }
 0x2a9   : > { %v1115_v53 = vpack.c.bf16 %v1090_v2, %v1089_v21  ;;  %v336_v21 = vpack.c.bf16 %v296_v50, %v295_v13  ;;  %v6210_v2 = vpop.permute.xlu1 %1870 }
 0x2aa   : > { %v6170_v7 = vpop.permute.xlu0 %1988 }
 0x2ab   : > { %v2829_v9 = vsel %vm7552_vm13, %v1115_v53, %v6082_v32  ;;  %v2055_v32 = vsel %vm2052_vm0, %v336_v21, %v4426_v63  ;;  %v297_v21 = vld [vmem:[%s4250_s30 + $0x10] sm:$0xff] }
 0x2ac   : > { %1976 = vrot.lane.b32.xlu1 %v1038_v14, %s4186_s9  ;;  %1919 = vrot.lane.b32.xlu0 %v979_v52, %s4184_s29  ;;  %v6186_v14 = vpack.c.bf16 %v1011_v59, %v1010_v45  ;;  %v2799_v52 = vsel %vm7552_vm13, %v1105_v47, %v6070_v62  ;;  %v962_v45 = vld [vmem:[%s5145_s21 + $0x113] sm:$0xff]  ;;  %v963_v59 = vld [vmem:[%s5145_s21 + $0x11b] sm:$0xff] }
 0x2ad   : > { %v987_v47 = vpack.c.bf16 %v963_v59, %v962_v45  ;;  %v6229_v45 = vpop.permute.xlu1 %2753 }
 0x2ae   : > { %v6180_v30 = vpop.permute.xlu0 %2032 }
 0x2b0   : > { %2020 = vrot.lane.b32.xlu1 %v6086_v1, %s4185_s8  ;;  %1982 = vrot.lane.b32.xlu0 %v6174_v55, %s4186_s9 }
 0x2b2   : > { %v6190_v43 = vpop.permute.xlu0 %1907 }
 0x2b4   : > { %2876 = vrot.lane.b32.xlu1 %v2799_v52, %s4189_s12  ;;  %2026 = vrot.lane.b32.xlu0 %v6186_v14, %s4185_s8  ;;  %v2118_v52 = vsel %vm2116_vm1, %v2055_v32, %v4521_v16  ;;  %v318_v32 = vld [vmem:[%s4250_s30 + $0xb8] sm:$0xff] }
 0x2b6   : > { %v6197_v1 = vpop.permute.xlu0 %1970 }
 0x2b8   : > { %2896 = vrot.lane.b32.xlu1 %v2829_v9, %s4189_s12  ;;  %v2161_v9 = vsel %vm2159_vm2, %v2118_v52, %v4752_v40 }
 0x2ba   : > { %v6204_v62 = vpop.permute.xlu0 %2014 }
 0x2bc   : > { %1872 = vrot.lane.b32.xlu1 %v5576_v11, %s4182_s27  ;;  %v2204_v11 = vsel %vm2202_vm3, %v2161_v9, %v4860_v17  ;;  %v944_v17 = vld [vmem:[%s5145_s21 + $0x83] sm:$0xff]  ;;  %v2011_v9 = vpop.permute.xlu1 %2010 }
 0x2bd   : > { %v2247_v63 = vsel %vm7551_vm4, %v2204_v11, %v5005_v56  ;;  %v945_v56 = vld [vmem:[%s5145_s21 + $0x8b] sm:$0xff] }
 0x2be   : > { %v6212_v53 = vpop.permute.xlu0 %1990  ;;  %v2290_v50 = vsel %vm7550_vm5, %v2247_v63, %v5126_v22 }
 0x2bf   : > { %v2333_v16 = vsel %vm7548_vm6, %v2290_v50, %v5275_v44  ;;  %v1075_v50 = vld [vmem:[%s5145_s21 + $0xa5] sm:$0xff] }
 0x2c0   : > { %1935 = vrot.lane.b32.xlu1 %v987_v47, %s4184_s29  ;;  %v2376_v40 = vsel %vm7549_vm7, %v2333_v16, %v5396_v54  ;;  %v298_v47 = vld [vmem:[%s4250_s30 + $0x18] sm:$0xff]  ;;  %v978_v54 = vpack.c.bf16 %v945_v56, %v944_v17  ;;  %v1076_v16 = vld [vmem:[%s5145_s21 + $0xad] sm:$0xff] }
 0x2c1   : > { %v2419_v59 = vsel %vm2417_vm8, %v2376_v40, %v5588_v51  ;;  %v317_v51 = vld [vmem:[%s4250_s30 + $0xb0] sm:$0xff]  ;;  %v337_v63 = vpack.c.bf16 %v298_v47, %v297_v21  ;;  %v1108_v56 = vpack.c.bf16 %v1076_v16, %v1075_v50  ;;  %v1074_v47 = vld [vmem:[%s5145_s21 + $0x9d] sm:$0xff] }
 0x2c2   : > { %v6223_v13 = vpop.permute.xlu0 %2034  ;;  %v2462_v44 = vsel %vm7546_vm9, %v2419_v59, %v5705_v26  ;;  %vm2908_vm9 = vcmask 818176   ;;  %v1073_v21 = vld [vmem:[%s5145_s21 + $0x95] sm:$0xff] }
 0x2c3   : > { %v2058_v17 = vsel %vm2052_vm0, %v337_v63, %v4435_v5  ;;  %v1096_v63 = vld [vmem:[%s5145_s21 + $0x14d] sm:$0xff] }
 0x2c4   : > { %1998 = vrot.lane.b32.xlu1 %v6061_v23, %s4186_s9  ;;  %v2505_v23 = vsel %vm7545_vm10, %v2462_v44, %v5833_v48  ;;  %vm2675_vm10 = vcmask 785408   ;;  %v2120_v44 = vsel %vm2116_vm1, %v2058_v17, %v4538_v36  ;;  %v7628_v50 = vld [vmem:[#allocation32_spill] sm:$0xff] }
 0x2c5   : > { %v2548_v52 = vsel %vm7547_vm14, %v2505_v23, %v5963_v39  ;;  %vm3054_vm14 = vcmask 883712   ;;  %v2163_v23 = vsel %vm2159_vm2, %v2120_v44, %v4748_v35 }
 0x2c6   : > { %v6239_v22 = vpop.permute.xlu0 %1909  ;;  %v2591_v26 = vsel %vm2589_vm15, %v2548_v52, %v6113_v10  ;;  %v2206_v36 = vsel %vm2202_vm3, %v2163_v23, %v4875_v6  ;;  %v1093_v52 = vld [vmem:[%s5145_s21 + $0x135] sm:$0xff] }
 0x2c7   : > { %v2634_v48 = vsel %vm2632_vm11, %v2591_v26, %v6120_v8  ;;  %v2249_v35 = vsel %vm7551_vm4, %v2206_v36, %v5001_v12  ;;  %v1094_v26 = vld [vmem:[%s5145_s21 + $0x13d] sm:$0xff] }
 0x2c8   : > { %2042 = vrot.lane.b32.xlu1 %v6144_v33, %s4185_s8  ;;  %v347_v33 = vpack.c.bf16 %v318_v32, %v317_v51  ;;  %v2677_v39 = vsel %vm2675_vm10, %v2634_v48, %v2011_v9  ;;  %v1107_v32 = vpack.c.bf16 %v1074_v47, %v1073_v21  ;;  %v2292_v6 = vsel %vm7550_vm5, %v2249_v35, %v5147_v38  ;;  %v925_v47 = vld [vmem:[%s5145_s21 + $0x142] sm:$0xff] }
 0x2c9   : > { %v2335_v48 = vsel %vm7548_vm6, %v2292_v6, %v5271_v4  ;;  %v1117_v17 = vpack.c.bf16 %v1094_v26, %v1093_v52  ;;  %v299_v36 = vld [vmem:[%s4250_s30 + $0x20] sm:$0xff]  ;;  %v320_v35 = vld [vmem:[%s4250_s30 + $0xc8] sm:$0xff] }
 0x2ca   : > { %v6255_v11 = vpop.permute.xlu0 %1972  ;;  %v2088_v59 = vsel %vm2052_vm0, %v347_v33, %v4471_v34  ;;  %v7627_v33 = vld [vmem:[#allocation28_spill] sm:$0xff]  ;;  %v2378_v38 = vsel %vm7549_vm7, %v2335_v48, %v7628_v50 }
 0x2cb   : > { %v2140_v5 = vsel %vm2116_vm1, %v2088_v59, %v4642_v19 }
 0x2cc   : > { %1917 = vrot.lane.b32.xlu1 %v978_v54, %s4184_s29  ;;  %v7626_v54 = vmov 0.0   ;;  %v2183_v34 = vsel %vm2159_vm2, %v2140_v5, %v4806_v20 }
 0x2cd   : > { %v2226_v19 = vsel %vm2202_vm3, %v2183_v34, %v4941_v29  ;;  %v1095_v29 = vld [vmem:[%s5145_s21 + $0x145] sm:$0xff] }
 0x2ce   : > { %v2867_v10 = vpop.permute.xlu1 %2866  ;;  %v6263_v40 = vpop.permute.xlu0 %2016  ;;  %v2269_v20 = vsel %vm7551_vm4, %v2226_v19, %v5062_v0  ;;  %v1118_v4 = vpack.c.bf16 %v1096_v63, %v1095_v29 }
 0x2cf   : > { %v2910_v8 = vsel %vm2908_vm9, %v2677_v39, %v2867_v10  ;;  %v2312_v12 = vsel %vm7550_vm5, %v2269_v20, %v5211_v28  ;;  %v7629_v39 = vld [vmem:[#allocation35_spill] sm:$0xff]  ;;  %v2805_v28 = vsel %vm7552_vm13, %v1107_v32, %v6229_v45  ;;  %vm7633_vm5 = vcmask 654336   ;;  %v967_v20 = vld [vmem:[%s5145_s21 + $0x13b] sm:$0xff] }
 0x2d0   : > { %1980 = vrot.lane.b32.xlu1 %v6097_v49, %s4186_s9  ;;  %4027 = vmatmul.mubr.msk.bf16.vlgmr.msra.gmra.mrb[0].mxu0 %vm3054_vm14, %v2910_v8  ;;  %v2355_v0 = vsel %vm7548_vm6, %v2312_v12, %v7627_v33  ;;  %v7630_v8 = vld [vmem:[#allocation37_spill] sm:$0xff]  ;;  %vm7631_vm6 = vcmask 621568   ;;  %v926_v45 = vld [vmem:[%s5145_s21 + $0x14a] sm:$0xff]  ;;  %vm7634_vm4 = vmmov %vm7633_vm5 }
 0x2d1   : > { %4030 = vmatprep.mubr.msk.bf16.mxu0 %vm4188_vm12, %v7626_v54  ;;  %v2398_v10 = vsel %vm7549_vm7, %v2355_v0, %v7629_v39  ;;  %vm7632_vm7 = vmmov %vm7631_vm6  ;;  %v928_v26 = vpack.c.bf16 %v926_v45, %v925_v47  ;;  %v7642_v47 = vld [vmem:[#allocation11_spill] sm:$0xff] }
 0x2d2   : > { %v2756_v49 = vpop.permute.xlu1 %2755  ;;  %v6287_v51 = vpop.permute.xlu0 %1992  ;;  %v2441_v59 = vsel %vm2417_vm8, %v2398_v10, %v5647_v3  ;;  %v7638_v10 = vld [vmem:[#allocation2_spill] sm:$0xff] }
 0x2d3   : > { %v2808_v9 = vsel %vm7552_vm13, %v1108_v56, %v2756_v49  ;;  %v2421_v56 = vsel %vm2417_vm8, %v2378_v38, %v7630_v8  ;;  %v2484_v21 = vsel %vm7632_vm7, %v2441_v59, %v5779_v15  ;;  %v300_v49 = vld [vmem:[%s4250_s30 + $0x28] sm:$0xff] }
 0x2d4   : > { %2024 = vrot.lane.b32.xlu1 %v6174_v55, %s4185_s8  ;;  %2882 = vrot.lane.b32.xlu0 %v2808_v9, %s4189_s12  ;;  %v2464_v44 = vsel %vm7631_vm6, %v2421_v56, %v5719_v25  ;;  %v2527_v23 = vsel %vm7634_vm4, %v2484_v21, %v5897_v37  ;;  %v319_v25 = vld [vmem:[%s4250_s30 + $0xc0] sm:$0xff]  ;;  %vm7635_vm6 = vcmask 687104   ;;  %v969_v9 = vld [vmem:[%s5145_s21 + $0x14b] sm:$0xff]  ;;  %v338_v63 = vpack.c.bf16 %v300_v49, %v299_v36 }
 0x2d5   : > { %v2507_v5 = vsel %vm7633_vm5, %v2464_v44, %v5829_v61  ;;  %vm7636_vm7 = vmmov %vm7635_vm6  ;;  %v2835_v61 = vsel %vm7552_vm13, %v1117_v17, %v6130_v46  ;;  %v966_v46 = vld [vmem:[%s5145_s21 + $0x133] sm:$0xff]  ;;  %v348_v33 = vpack.c.bf16 %v320_v35, %v319_v25  ;;  %v7640_v56 = vld [vmem:[#allocation6_spill] sm:$0xff]  ;;  %vm7647_vm4 = vcmask 326656  }
 0x2d6   : > { %v1926_v16 = vpop.permute.xlu1 %1925  ;;  %v6313_v55 = vpop.permute.xlu0 %2036  ;;  %v2550_v15 = vsel %vm7635_vm6, %v2507_v5, %v5974_v31  ;;  %v2570_v19 = vsel %vm7636_vm7, %v2527_v23, %v6068_v18  ;;  %v968_v31 = vld [vmem:[%s5145_s21 + $0x143] sm:$0xff]  ;;  %v989_v50 = vpack.c.bf16 %v967_v20, %v966_v46  ;;  %v1031_v38 = vld [vmem:[%s5145_s21 + $0x14c] sm:$0xff]  ;;  %v1054_v5 = vld [vmem:[%s5145_s21 + $0x154] sm:$0xff]  ;;  %vm7651_vm6 = vcmask 392192  }
 0x2d7   : > { %v2593_v32 = vsel %vm2589_vm15, %v2550_v15, %v6140_v58  ;;  %v2613_v52 = vsel %vm2589_vm15, %v2570_v19, %v1926_v16  ;;  %v990_v0 = vpack.c.bf16 %v969_v9, %v968_v31  ;;  %v7641_v44 = vld [vmem:[#allocation8_spill] sm:$0xff]  ;;  %v1055_v23 = vld [vmem:[%s5145_s21 + $0x15c] sm:$0xff]  ;;  %v7646_v35 = vld [vmem:[#allocation19_spill] sm:$0xff] }
 0x2d8   : > { %2880 = vrot.lane.b32.xlu1 %v2805_v28, %s4189_s12  ;;  %v2636_v18 = vsel %vm2632_vm11, %v2593_v32, %v6150_v42  ;;  %v2656_v12 = vsel %vm2632_vm11, %v2613_v52, %v6170_v7  ;;  %v7637_v42 = vld [vmem:[#allocation38_spill] sm:$0xff]  ;;  %v2061_v28 = vsel %vm2052_vm0, %v338_v63, %v7638_v10  ;;  %v7648_v52 = vld [vmem:[#allocation21_spill] sm:$0xff]  ;;  %vm7649_vm5 = vmmov %vm7647_vm4  ;;  %v1057_v9 = vpack.c.bf16 %v1055_v23, %v1054_v5 }
 0x2d9   : > { %v2679_v6 = vsel %vm2675_vm10, %v2636_v18, %v6161_v27  ;;  %v1030_v27 = vld [vmem:[%s5145_s21 + $0x144] sm:$0xff]  ;;  %v2699_v7 = vsel %vm2675_vm10, %v2656_v12, %v6180_v30  ;;  %v2122_v59 = vsel %vm2116_vm1, %v2061_v28, %v7640_v56  ;;  %v950_v46 = vld [vmem:[%s5145_s21 + $0xb3] sm:$0xff]  ;;  %vm7653_vm7 = vmmov %vm7651_vm6 }
 0x2da   : > { %v2776_v34 = vpop.permute.xlu1 %2775  ;;  %v6334_v3 = vpop.permute.xlu0 %1911  ;;  %v1052_v30 = vpack.c.bf16 %v1031_v38, %v1030_v27  ;;  %v2165_v45 = vsel %vm2159_vm2, %v2122_v59, %v7642_v47  ;;  %v7644_v49 = vld [vmem:[#allocation14_spill] sm:$0xff]  ;;  %v7652_v20 = vld [vmem:[#allocation24_spill] sm:$0xff]  ;;  %v7669_v23 = vld [vmem:[#allocation57_spill] sm:$0xff] }
 0x2db   : > { %v2838_v37 = vsel %vm7552_vm13, %v1118_v4, %v2776_v34  ;;  %v7639_v4 = vld [vmem:[#allocation5_spill] sm:$0xff]  ;;  %v2208_v25 = vsel %vm2202_vm3, %v2165_v45, %v7644_v49  ;;  %v7650_v31 = vld [vmem:[#allocation22_spill] sm:$0xff]  ;;  %vm7655_vm13 = vcmask 457728  }
 0x2dc   : > { %2902 = vrot.lane.b32.xlu0 %v2838_v37, %s4189_s12  ;;  %2900 = vrot.lane.b32.xlu1 %v2835_v61, %s4189_s12  ;;  %v2091_v8 = vsel %vm2052_vm0, %v348_v33, %v7639_v4  ;;  %v7643_v34 = vld [vmem:[#allocation13_spill] sm:$0xff]  ;;  %v7645_v61 = vld [vmem:[#allocation16_spill] sm:$0xff]  ;;  %v2251_v32 = vsel %vm7647_vm4, %v2208_v25, %v7646_v35  ;;  %vm7657_vm4 = vmmov %vm7655_vm13 }
 0x2dd   : > { %v2142_v21 = vsel %vm2116_vm1, %v2091_v8, %v7641_v44  ;;  %v2294_v18 = vsel %vm7651_vm6, %v2251_v32, %v7650_v31  ;;  %v951_v12 = vld [vmem:[%s5145_s21 + $0xbb] sm:$0xff]  ;;  %v949_v33 = vld [vmem:[%s5145_s21 + $0xab] sm:$0xff] }
 0x2de   : > { %v2869_v58 = vpop.permute.xlu1 %2868  ;;  %v6360_v29 = vpop.permute.xlu0 %1931  ;;  %v2185_v36 = vsel %vm2159_vm2, %v2142_v21, %v7643_v34  ;;  %v7660_v38 = vld [vmem:[#allocation34_spill] sm:$0xff]  ;;  %v981_v4 = vpack.c.bf16 %v951_v12, %v950_v46  ;;  %v7665_v44 = vld [vmem:[#allocation44_spill] sm:$0xff]  ;;  %v302_v35 = vld [vmem:[%s4250_s30 + $0x38] sm:$0xff] }
 0x2df   : > { %v2912_v48 = vsel %vm2908_vm9, %v2679_v6, %v2869_v58  ;;  %v2228_v37 = vsel %vm2202_vm3, %v2185_v36, %v7645_v61  ;;  %v7654_v58 = vld [vmem:[#allocation27_spill] sm:$0xff]  ;;  %v7663_v56 = vld [vmem:[#allocation42_spill] sm:$0xff]  ;;  %v1012_v47 = vld [vmem:[%s5145_s21 + $0xb4] sm:$0xff] }
 0x2e0   : > { %1878 = vrot.lane.b32.xlu0 %v928_v26, %s4182_s27  ;;  %1876 = vrot.lane.b32.xlu1 %v7637_v42, %s4182_s27  ;;  %v2271_v26 = vsel %vm7649_vm5, %v2228_v37, %v7648_v52  ;;  %v2337_v63 = vsel %vm7655_vm13, %v2294_v18, %v7654_v58  ;;  %v7656_v42 = vld [vmem:[#allocation30_spill] sm:$0xff]  ;;  %vm7659_vm5 = vcmask 523264   ;;  %vm7664_vm13 = vcmask 621568   ;;  %v301_v37 = vld [vmem:[%s4250_s30 + $0x30] sm:$0xff]  ;;  %v322_v18 = vld [vmem:[%s4250_s30 + $0xd8] sm:$0xff] }
 0x2e1   : > { %4031 = vmatmul.mubr.msk.bf16.gmra.mrb[4].mxu0 %vm3054_vm14, %v2912_v48  ;;  %v2314_v6 = vsel %vm7653_vm7, %v2271_v26, %v7652_v20  ;;  %v948_v48 = vld [vmem:[%s5145_s21 + $0xa3] sm:$0xff]  ;;  %vm7661_vm6 = vmmov %vm7659_vm5  ;;  %v321_v31 = vld [vmem:[%s4250_s30 + $0xd0] sm:$0xff] }
 0x2e2   : > { %v2889_v16 = vpop.permute.xlu1 %2888  ;;  %v6373_v39 = vpop.permute.xlu0 %1994  ;;  %4034 = vmatprep.mubr.msk.bf16.mxu0 %vm4188_vm12, %v7626_v54  ;;  %v980_v8 = vpack.c.bf16 %v949_v33, %v948_v48  ;;  %vm7666_vm7 = vmmov %vm7664_vm13  ;;  %v1013_v45 = vld [vmem:[%s5145_s21 + $0xbc] sm:$0xff]  ;;  %v349_v33 = vpack.c.bf16 %v322_v18, %v321_v31  ;;  %v7690_v31 = vld [vmem:[#allocation23_spill] sm:$0xff] }
 0x2e3   : > { %v2932_v17 = vsel %vm2908_vm9, %v2699_v7, %v2889_v16  ;;  %v7662_v7 = vld [vmem:[#allocation40_spill] sm:$0xff]  ;;  %v7673_v25 = vld [vmem:[#allocation74_spill] sm:$0xff]  ;;  %v1043_v26 = vpack.c.bf16 %v1013_v45, %v1012_v47 }
 0x2e4   : > { %1941 = vrot.lane.b32.xlu0 %v990_v0, %s4184_s29  ;;  %1939 = vrot.lane.b32.xlu1 %v989_v50, %s4184_s29  ;;  %v2357_v0 = vsel %vm7657_vm4, %v2314_v6, %v7656_v42  ;;  %v7658_v50 = vld [vmem:[#allocation31_spill] sm:$0xff]  ;;  %vm7668_vm4 = vcmask 654336   ;;  %v339_v6 = vpack.c.bf16 %v302_v35, %v301_v37  ;;  %v1077_v58 = vld [vmem:[%s5145_s21 + $0xb5] sm:$0xff]  ;;  %v7686_v37 = vld [vmem:[#allocation18_spill] sm:$0xff] }
 0x2e5   : > { %4071 = vmatmul.mubr.msk.bf16.vlgmr.msra.gmra.mrb[0].mxu1 %vm3054_vm14, %v2932_v17  ;;  %v2380_v27 = vsel %vm7659_vm5, %v2337_v63, %v7658_v50  ;;  %v2400_v16 = vsel %vm7661_vm6, %v2357_v0, %v7660_v38  ;;  %vm7670_vm5 = vmmov %vm7668_vm4  ;;  %vm7672_vm6 = vcmask 687104   ;;  %v1078_v63 = vld [vmem:[%s5145_s21 + $0xbd] sm:$0xff]  ;;  %v7681_v47 = vld [vmem:[#allocation12_spill] sm:$0xff] }
 0x2e6   : > { %v6397_v15 = vpop.permute.xlu1 %2757  ;;  %v6399_v19 = vpop.permute.xlu0 %2038  ;;  %4074 = vmatprep.mubr.msk.bf16.mxu1 %vm4188_vm12, %v7626_v54  ;;  %v2423_v10 = vsel %vm2417_vm8, %v2380_v27, %v7662_v7  ;;  %v2443_v28 = vsel %vm2417_vm8, %v2400_v16, %v5661_v60  ;;  %v7667_v60 = vld [vmem:[#allocation47_spill] sm:$0xff]  ;;  %v1109_v27 = vpack.c.bf16 %v1078_v63, %v1077_v58  ;;  %v7676_v16 = vld [vmem:[#allocation4_spill] sm:$0xff]  ;;  %v7696_v58 = vld [vmem:[#allocation29_spill] sm:$0xff] }
 0x2e7   : > { %v2466_v59 = vsel %vm7664_vm13, %v2423_v10, %v7663_v56  ;;  %v2486_v21 = vsel %vm7666_vm7, %v2443_v28, %v7665_v44  ;;  %vm7674_vm13 = vmmov %vm7672_vm6  ;;  %v7677_v7 = vld [vmem:[#allocation7_spill] sm:$0xff]  ;;  %v1097_v28 = vld [vmem:[%s5145_s21 + $0x155] sm:$0xff] }
 0x2e8   : > { %2004 = vrot.lane.b32.xlu0 %v1052_v30, %s4186_s9  ;;  %2002 = vrot.lane.b32.xlu1 %v6155_v24, %s4186_s9  ;;  %v2509_v5 = vsel %vm7668_vm4, %v2466_v59, %v7667_v60  ;;  %v2529_v34 = vsel %vm7670_vm5, %v2486_v21, %v7669_v23  ;;  %v7679_v56 = vld [vmem:[#allocation9_spill] sm:$0xff]  ;;  %v7680_v44 = vld [vmem:[#allocation10_spill] sm:$0xff]  ;;  %v7682_v60 = vld [vmem:[#allocation15_spill] sm:$0xff]  ;;  %vm7687_vm4 = vcmask 326656   ;;  %vm7691_vm5 = vcmask 392192  }
 0x2e9   : > { %v2572_v61 = vsel %vm7674_vm13, %v2529_v34, %v7673_v25  ;;  %v7683_v34 = vld [vmem:[#allocation17_spill] sm:$0xff] }
 0x2ea   : > { %v1928_v24 = vpop.permute.xlu1 %1927  ;;  %v6432_v17 = vpop.permute.xlu0 %1913 }
 0x2eb   : > { %v2615_v52 = vsel %vm2589_vm15, %v2572_v61, %v1928_v24 }
 0x2ec   : > { %2048 = vrot.lane.b32.xlu0 %v1057_v9, %s4185_s8  ;;  %2046 = vrot.lane.b32.xlu1 %v1052_v30, %s4185_s8  ;;  %v7671_v30 = vld [vmem:[#allocation66_spill] sm:$0xff]  ;;  %v2658_v12 = vsel %vm2632_vm11, %v2615_v52, %v6212_v53  ;;  %v7675_v53 = vld [vmem:[#allocation3_spill] sm:$0xff] }
 0x2ed   : > { %v2552_v49 = vsel %vm7672_vm6, %v2509_v5, %v7671_v30  ;;  %v2701_v0 = vsel %vm2675_vm10, %v2658_v12, %v6223_v13  ;;  %v2064_v50 = vsel %vm2052_vm0, %v339_v6, %v7675_v53  ;;  %v7678_v13 = vld [vmem:[#allocation48_spill] sm:$0xff]  ;;  %vm7695_vm6 = vcmask 457728  }
 0x2ee   : > { %v6446_v36 = vpop.permute.xlu1 %2777  ;;  %v2595_v32 = vsel %vm2589_vm15, %v2552_v49, %v6190_v43  ;;  %v6465_v20 = vpop.permute.xlu0 %1933  ;;  %v2124_v10 = vsel %vm2116_vm1, %v2064_v50, %v7677_v7  ;;  %vm7697_vm13 = vmmov %vm7695_vm6  ;;  %v7703_v50 = vld [vmem:[#allocation39_spill] sm:$0xff] }
 0x2ef   : > { %v2638_v9 = vsel %vm2632_vm11, %v2595_v32, %v6197_v1  ;;  %v1079_v1 = vld [vmem:[%s5145_s21 + $0xc5] sm:$0xff]  ;;  %v2167_v21 = vsel %vm2159_vm2, %v2124_v10, %v7680_v44  ;;  %v7688_v32 = vld [vmem:[#allocation20_spill] sm:$0xff]  ;;  %v7707_v10 = vld [vmem:[#allocation45_spill] sm:$0xff] }
 0x2f0   : > { %1923 = vrot.lane.b32.xlu0 %v981_v4, %s4184_s29  ;;  %1921 = vrot.lane.b32.xlu1 %v980_v8, %s4184_s29  ;;  %v2681_v46 = vsel %vm2675_vm10, %v2638_v9, %v6204_v62  ;;  %v1080_v62 = vld [vmem:[%s5145_s21 + $0xcd] sm:$0xff]  ;;  %v1098_v4 = vld [vmem:[%s5145_s21 + $0x15d] sm:$0xff]  ;;  %v2210_v5 = vsel %vm2202_vm3, %v2167_v21, %v7682_v60 }
 0x2f1   : > { %v1110_v38 = vpack.c.bf16 %v1080_v62, %v1079_v1  ;;  %v1119_v25 = vpack.c.bf16 %v1098_v4, %v1097_v28  ;;  %v2253_v35 = vsel %vm7687_vm4, %v2210_v5, %v7686_v37  ;;  %v7692_v9 = vld [vmem:[#allocation25_spill] sm:$0xff]  ;;  %v7700_v62 = vld [vmem:[#allocation36_spill] sm:$0xff] }
 0x2f2   : > { %v2871_v43 = vpop.permute.xlu1 %2870  ;;  %v6491_v8 = vpop.permute.xlu0 %1996  ;;  %v2296_v18 = vsel %vm7691_vm5, %v2253_v35, %v7690_v31  ;;  %v970_v4 = vld [vmem:[%s5145_s21 + $0x153] sm:$0xf]  ;;  %v7713_v21 = vld [vmem:[#allocation65_spill] sm:$0xff] }
 0x2f3   : > { %v2914_v48 = vsel %vm2908_vm9, %v2681_v46, %v2871_v43  ;;  %v927_v46 = vld [vmem:[%s5145_s21 + $0x152] sm:$0xf]  ;;  %v7694_v43 = vld [vmem:[#allocation26_spill] sm:$0xff] }
 0x2f4   : > { %1986 = vrot.lane.b32.xlu0 %v1043_v26, %s4186_s9  ;;  %1984 = vrot.lane.b32.xlu1 %v6186_v14, %s4186_s9  ;;  %v2094_v14 = vsel %vm2052_vm0, %v349_v33, %v7676_v16  ;;  %v2339_v6 = vsel %vm7695_vm6, %v2296_v18, %v7694_v43  ;;  %v7698_v33 = vld [vmem:[#allocation33_spill] sm:$0xff]  ;;  %v929_v16 = vpack.c.bf16 %v927_v46, %v927_v46 }
 0x2f5   : > { %4035 = vmatmul.mubr.msk.bf16.gmra.mrb[8].mxu0 %vm3054_vm14, %v2914_v48  ;;  %v2144_v59 = vsel %vm2116_vm1, %v2094_v14, %v7679_v56  ;;  %vm7684_vm1 = vcmask 31744   ;;  %v7705_v14 = vld [vmem:[#allocation43_spill] sm:$0xff]  ;;  %v7711_v56 = vld [vmem:[#allocation56_spill] sm:$0xff] }
 0x2f6   : > { %v2891_v42 = vpop.permute.xlu1 %2890  ;;  %4038 = vmatprep.mubr.msk.bf16.mxu0 %vm4188_vm12, %v7626_v54  ;;  %v2187_v45 = vsel %vm2159_vm2, %v2144_v59, %v7681_v47  ;;  %v2811_v49 = vsel %vm7684_vm1, %v1109_v27, %v6397_v15  ;;  %vm7685_vm7 = vmmov %vm7684_vm1  ;;  %v6528_v12 = vpop.permute.xlu0 %2040  ;;  %vm7699_vm1 = vcmask 523264   ;;  %v2965_v46 = vld [vmem:[%s7534_s2 + $0x13] sm:$0xff] }
 0x2f7   : > { %v2934_v24 = vsel %vm2908_vm9, %v2701_v0, %v2891_v42  ;;  %v2230_v30 = vsel %vm2202_vm3, %v2187_v45, %v7683_v34  ;;  %vm7689_vm2 = vmmov %vm7687_vm4  ;;  %v2382_v1 = vsel %vm7699_vm1, %v2339_v6, %v7698_v33  ;;  %vm7702_vm4 = vcmask 31744   ;;  %v2973_v6 = vld [vmem:[%s7534_s2 + $0x53] sm:$0xff] }
 0x2f8   : > { %2030 = vrot.lane.b32.xlu0 %v7678_v13, %s4185_s8  ;;  %2028 = vrot.lane.b32.xlu1 %v1043_v26, %s4185_s8  ;;  %v2273_v52 = vsel %vm7689_vm2, %v2230_v30, %v7688_v32  ;;  %v1099_v26 = vld [vmem:[%s5145_s21 + $0x165] sm:$0xf]  ;;  %vm7693_vm3 = vmmov %vm7691_vm5  ;;  %v2841_v0 = vsel %vm7702_vm4, %v1119_v25, %v6446_v36  ;;  %v2425_v27 = vsel %vm2417_vm8, %v2382_v1, %v7703_v50  ;;  %vm7706_vm2 = vcmask 621568   ;;  %v1032_v25 = vld [vmem:[%s5145_s21 + $0x154] sm:$0xf] }
 0x2f9   : > { %4075 = vmatmul.mubr.msk.bf16.gmra.mrb[4].mxu1 %vm3054_vm14, %v2934_v24  ;;  %v2316_v15 = vsel %vm7693_vm3, %v2273_v52, %v7692_v9  ;;  %v1120_v53 = vpack.c.bf16 %v1099_v26, %v1099_v26  ;;  %v7704_v24 = vld [vmem:[#allocation41_spill] sm:$0xff]  ;;  %v2468_v7 = vsel %vm7706_vm2, %v2425_v27, %v7705_v14  ;;  %vm7708_vm5 = vmmov %vm7706_vm2  ;;  %v7709_v13 = vld [vmem:[#allocation46_spill] sm:$0xff]  ;;  %vm7710_vm3 = vcmask 654336  }
 0x2fa   : > { %v2760_v23 = vpop.permute.xlu1 %2759  ;;  %4078 = vmatprep.mubr.msk.bf16.mxu1 %vm4188_vm12, %v7626_v54  ;;  %v2359_v63 = vsel %vm7697_vm13, %v2316_v15, %v7696_v58  ;;  %v2511_v36 = vsel %vm7710_vm3, %v2468_v7, %v7709_v13  ;;  %vm7712_vm6 = vmmov %vm7710_vm3  ;;  %v991_v30 = vpack.c.bf16 %v970_v4, %v970_v4  ;;  %v1053_v32 = vpack.c.bf16 %v1032_v25, %v1032_v25  ;;  %v7717_v58 = vld [vmem:[#allocation68_spill] sm:$0xff]  ;;  %v2975_v50 = vld [vmem:[%s7534_s2 + $0x63] sm:$0xff] }
 0x2fb   : > { %v2814_v61 = vsel %vm7685_vm7, %v1110_v38, %v2760_v23  ;;  %vm7701_vm7 = vmmov %vm7699_vm1  ;;  %v6557_v23 = vpop.permute.xlu0 %1915  ;;  %v7720_v27 = vld [vmem:[#allocation59_spill] sm:$0xff]  ;;  %v7725_v25 = vld [vmem:[#allocation58_spill] sm:$0xff] }
 0x2fc   : > { %2886 = vrot.lane.b32.xlu0 %v2814_v61, %s4189_s12  ;;  %2884 = vrot.lane.b32.xlu1 %v2811_v49, %s4189_s12  ;;  %v2402_v42 = vsel %vm7701_vm7, %v2359_v63, %v7700_v62  ;;  %vm7716_vm1 = vmmov %vm7702_vm4  ;;  %v7718_v63 = vld [vmem:[#allocation50_spill] sm:$0xff]  ;;  %v2968_v14 = vld [vmem:[%s7534_s2 + $0x2b] sm:$0xff] }
 0x2fd   : > { %v2445_v38 = vsel %vm2417_vm8, %v2402_v42, %v7704_v24  ;;  %vm7714_vm8 = vcmask 687104   ;;  %v2967_v62 = vld [vmem:[%s7534_s2 + $0x23] sm:$0xff]  ;;  %v2972_v13 = vld [vmem:[%s7534_s2 + $0x4b] sm:$0xff] }
 0x2fe   : > { %v1930_v48 = vpop.permute.xlu1 %1929  ;;  %v2488_v28 = vsel %vm7708_vm5, %v2445_v38, %v7707_v10  ;;  %v2554_v47 = vsel %vm7714_vm8, %v2511_v36, %v7713_v21  ;;  %vm7715_vm13 = vmmov %vm7714_vm8  ;;  %v2979_v4 = vld [vmem:[%s7534_s2 + $0x83] sm:$0xff]  ;;  %v7723_v21 = vld [vmem:[#allocation49_spill] sm:$0xff] }
 0x2ff   : > { %v2531_v59 = vsel %vm7712_vm6, %v2488_v28, %v7711_v56  ;;  %v2597_v5 = vsel %vm2589_vm15, %v2554_v47, %v6239_v22  ;;  %v2966_v22 = vld [vmem:[%s7534_s2 + $0x1b] sm:$0xff]  ;;  %vm7719_vm7 = vmmov %vm7714_vm8 }
 0x300   : > { %2904 = vrot.lane.b32.xlu1 %v2841_v0, %s4189_s12  ;;  %v2574_v45 = vsel %vm7715_vm13, %v2531_v59, %v6101_v41  ;;  %v2640_v49 = vsel %vm2632_vm11, %v2597_v5, %v6255_v11  ;;  %v1056_v11 = vld [vmem:[%s5145_s21 + $0x164] sm:$0xf]  ;;  %vm7721_vm4 = vmmov %vm7719_vm7  ;;  %v2981_v59 = vld [vmem:[%s7534_s2 + $0x93] sm:$0xff] }
 0x301   : > { %v2617_v34 = vsel %vm2589_vm15, %v2574_v45, %v1930_v48  ;;  %v2683_v41 = vsel %vm2675_vm10, %v2640_v49, %v6263_v40  ;;  %v6578_v40 = vpop.permute.xlu0 %1978  ;;  %v1058_v18 = vpack.c.bf16 %v1056_v11, %v1056_v11  ;;  %v2556_v48 = vsel %vm7719_vm7, %v7718_v63, %v7717_v58  ;;  %vm7724_vm2 = vmmov %vm7721_vm4  ;;  %v2974_v5 = vld [vmem:[%s7534_s2 + $0x5b] sm:$0xff]  ;;  %v2983_v49 = vld [vmem:[%s7534_s2 + $0xa3] sm:$0xff] }
 0x302   : > { %v2780_v44 = vpop.permute.xlu1 %2779  ;;  %v2660_v37 = vsel %vm2632_vm11, %v2617_v34, %v6287_v51  ;;  %v2969_v51 = vld [vmem:[%s7534_s2 + $0x33] sm:$0xff]  ;;  %v2599_v33 = vsel %vm2589_vm15, %v2556_v48, %v6334_v3  ;;  %v2576_v3 = vsel %vm7721_vm4, %v7720_v27, %v6105_v57  ;;  %vm7726_vm5 = vmmov %vm7724_vm2  ;;  %v7727_v11 = vld [vmem:[#allocation70_spill] sm:$0xff] }
 0x303   : > { %v2844_v60 = vsel %vm7716_vm1, %v1120_v53, %v2780_v44  ;;  %v2703_v26 = vsel %vm2675_vm10, %v2660_v37, %v6313_v55  ;;  %v2971_v55 = vld [vmem:[%s7534_s2 + $0x43] sm:$0xff]  ;;  %v2619_v38 = vsel %vm2589_vm15, %v2576_v3, %v6360_v29  ;;  %v2977_v29 = vld [vmem:[%s7534_s2 + $0x73] sm:$0xff]  ;;  %vm7729_vm3 = vmmov %vm7724_vm2 }
 0x304   : > { %2906 = vrot.lane.b32.xlu0 %v2844_v60, %s4189_s12  ;;  %1880 = vrot.lane.b32.xlu1 %v929_v16, %s4182_s27  ;;  %v2662_v16 = vsel %vm2632_vm11, %v2619_v38, %v6373_v39  ;;  %v2970_v39 = vld [vmem:[%s7534_s2 + $0x3b] sm:$0xff]  ;;  %v7722_v44 = vld [vmem:[#allocation67_spill] sm:$0xff]  ;;  %vm7731_vm6 = vmmov %vm7724_vm2 }
 0x305   : > { %v6593_v15 = vpop.permute.xlu0 %2022  ;;  %v2705_v57 = vsel %vm2675_vm10, %v2662_v16, %v6399_v19  ;;  %v2558_v47 = vsel %vm7724_vm2, %v7723_v21, %v7722_v44  ;;  %v2982_v58 = vld [vmem:[%s7534_s2 + $0x9b] sm:$0xff]  ;;  %v2991_v48 = vld [vmem:[%s7534_s2 + $0xe3] sm:$0xff]  ;;  %v2993_v27 = vld [vmem:[%s7534_s2 + $0xf3] sm:$0xff] }
 0x306   : > { %v2873_v61 = vpop.permute.xlu1 %2872  ;;  %v2601_v45 = vsel %vm2589_vm15, %v2558_v47, %v6432_v17  ;;  %v2986_v38 = vld [vmem:[%s7534_s2 + $0xbb] sm:$0xff]  ;;  %vm7734_vm8 = vmmov %vm7724_vm2  ;;  %v2992_v47 = vld [vmem:[%s7534_s2 + $0xeb] sm:$0xff] }
 0x307   : > { %v2916_v35 = vsel %vm2908_vm9, %v2683_v41, %v2873_v61  ;;  %v2578_v41 = vsel %vm7726_vm5, %v7725_v25, %v6210_v2  ;;  %vm7736_vm13 = vmmov %vm7724_vm2 }
 0x308   : > { %1943 = vrot.lane.b32.xlu1 %v991_v30, %s4184_s29  ;;  %4039 = vmatmul.mubr.msk.bf16.gmra.mrb[12].mxu0 %vm3054_vm14, %v2916_v35  ;;  %v2621_v61 = vsel %vm2589_vm15, %v2578_v41, %v6465_v20  ;;  %v2976_v35 = vld [vmem:[%s7534_s2 + $0x6b] sm:$0xff]  ;;  %vm7739_vm1 = vmmov %vm7724_vm2 }
 0x309   : > { %3308 = vperm.xlu0 %4155, %v2966_v22   ;;  %4042 = vmatprep.mubr.msk.bf16.mxu0 %vm4188_vm12, %v7626_v54  ;;  %v6611_v42 = vpop.permute.xlu0 %2878  ;;  %v2664_v37 = vsel %vm2632_vm11, %v2621_v61, %v6491_v8  ;;  %v2994_v61 = vld [vmem:[%s7534_s2 + $0xfb] sm:$0xff]  ;;  %vm7741_vm7 = vmmov %vm7739_vm1 }
 0x30a   : > { %v2893_v52 = vpop.permute.xlu1 %2892  ;;  %v2707_v2 = vsel %vm2675_vm10, %v2664_v37, %v6528_v12  ;;  %vm7744_vm4 = vmmov %vm7739_vm1 }
 0x30b   : > { %v2936_v31 = vsel %vm2908_vm9, %v2703_v26, %v2893_v52  ;;  %v7728_v52 = vld [vmem:[#allocation52_spill] sm:$0xff]  ;;  %vm7746_vm2 = vmmov %vm7739_vm1 }
 0x30c   : > { %2006 = vrot.lane.b32.xlu1 %v1053_v32, %s4186_s9  ;;  %4079 = vmatmul.mubr.msk.bf16.gmra.mrb[8].mxu1 %vm3054_vm14, %v2936_v31  ;;  %v2985_v32 = vld [vmem:[%s7534_s2 + $0xb3] sm:$0xff]  ;;  %v2560_v8 = vsel %vm7729_vm3, %v7728_v52, %v7727_v11  ;;  %v2978_v31 = vld [vmem:[%s7534_s2 + $0x7b] sm:$0xff]  ;;  %vm7749_vm5 = vmmov %vm7739_vm1 }
 0x30d   : > { %3323 = vperm.xlu0 %4155, %v2969_v51   ;;  %4082 = vmatprep.mubr.msk.bf16.mxu1 %vm4188_vm12, %v7626_v54  ;;  %v6637_v28 = vpop.permute.xlu0 %2898  ;;  %v2603_v51 = vsel %vm2589_vm15, %v2560_v8, %v6557_v23  ;;  %vm7751_vm3 = vmmov %vm7739_vm1 }
 0x30e   : > { %v1975_v9 = vpop.permute.xlu1 %1974  ;;  %v2646_v12 = vsel %vm2632_vm11, %v2603_v51, %v6578_v40 }
 0x30f   : > { %v2642_v1 = vsel %vm2632_vm11, %v2599_v33, %v1975_v9  ;;  %v7730_v33 = vld [vmem:[#allocation61_spill] sm:$0xff] }
 0x310   : > { %2050 = vrot.lane.b32.xlu1 %v1058_v18, %s4185_s8  ;;  %v2689_v18 = vsel %vm2675_vm10, %v2646_v12, %v6593_v15 }
 0x311   : > { %3333 = vperm.xlu0 %4155, %v2971_v55   ;;  %v6651_v36 = vpop.permute.xlu0 %1874  ;;  %v2987_v55 = vld [vmem:[%s7534_s2 + $0xc3] sm:$0xff]  ;;  %v2922_v40 = vsel %vm2908_vm9, %v2689_v18, %v6611_v42  ;;  %v2984_v42 = vld [vmem:[%s7534_s2 + $0xab] sm:$0xff]  ;;  %v3005_v18 = vld [vmem:[%s7534_s2 + $0x153] sm:$0xf] }
 0x312   : > { %v2019_v43 = vpop.permute.xlu1 %2018 }
 0x313   : > { %v2685_v0 = vsel %vm2675_vm10, %v2642_v1, %v2019_v43  ;;  %v2989_v43 = vld [vmem:[%s7534_s2 + $0xd3] sm:$0xff] }
 0x314   : > { %3303 = vperm.xlu1 %4154, %v2965_v46   ;;  %v2980_v46 = vld [vmem:[%s7534_s2 + $0x8b] sm:$0xff] }
 0x315   : > { %3343 = vperm.xlu0 %4155, %v2973_v6   ;;  %v6675_v22 = vpop.permute.xlu0 %1937 }
 0x316   : > { %v2875_v53 = vpop.permute.xlu1 %2874 }
 0x317   : > { %v2918_v24 = vsel %vm2908_vm9, %v2685_v0, %v2875_v53 }
 0x318   : > { %3313 = vperm.xlu1 %4154, %v2967_v62   ;;  %4043 = vmatmul.mubr.msk.bf16.gmra.mrb[16].mxu0 %vm3054_vm14, %v2918_v24 }
 0x319   : > { %3353 = vperm.xlu0 %4155, %v2975_v50   ;;  %4046 = vmatprep.mubr.msk.bf16.mxu0 %vm4188_vm12, %v7626_v54  ;;  %v6706_v9 = vpop.permute.xlu0 %2000 }
 0x31a   : > { %v2895_v7 = vpop.permute.xlu1 %2894 }
 0x31b   : > { %v2938_v10 = vsel %vm2908_vm9, %v2705_v57, %v2895_v7  ;;  %v2988_v7 = vld [vmem:[%s7534_s2 + $0xcb] sm:$0xff] }
 0x31c   : > { %3318 = vperm.xlu1 %4154, %v2968_v14   ;;  %4083 = vmatmul.mubr.msk.bf16.gmra.mrb[12].mxu1 %vm3054_vm14, %v2938_v10  ;;  %v2995_v14 = vld [vmem:[%s7534_s2 + $0x103] sm:$0xff]  ;;  %v2997_v10 = vld [vmem:[%s7534_s2 + $0x113] sm:$0xff] }
 0x31d   : > { %3363 = vperm.xlu0 %4155, %v2977_v29   ;;  %4086 = vmatprep.mubr.msk.bf16.mxu1 %vm4188_vm12, %v7626_v54  ;;  %v2045_v6 = vpop.permute.xlu0 %2044 }
 0x31e   : > { %v1977_v19 = vpop.permute.xlu1 %1976 }
 0x31f   : > { %v2644_v60 = vsel %vm2632_vm11, %v2601_v45, %v1977_v19 }
 0x320   : > { %3328 = vperm.xlu1 %4154, %v2970_v39  }
 0x321   : > { %3373 = vperm.xlu0 %4155, %v2979_v4   ;;  %v1920_v0 = vpop.permute.xlu0 %1919  ;;  %v2999_v4 = vld [vmem:[%s7534_s2 + $0x123] sm:$0xff] }
 0x322   : > { %v2021_v56 = vpop.permute.xlu1 %2020 }
 0x323   : > { %v2687_v34 = vsel %vm2675_vm10, %v2644_v60, %v2021_v56  ;;  %v7733_v56 = vld [vmem:[#allocation51_spill] sm:$0xff] }
 0x324   : > { %3338 = vperm.xlu1 %4154, %v2972_v13   ;;  %v7732_v13 = vld [vmem:[#allocation69_spill] sm:$0xff] }
 0x325   : > { %3383 = vperm.xlu0 %4155, %v2981_v59   ;;  %v1983_v57 = vpop.permute.xlu0 %1982  ;;  %v2562_v59 = vsel %vm7734_vm8, %v7733_v56, %v7732_v13 }
 0x326   : > { %v2877_v30 = vpop.permute.xlu1 %2876 }
 0x327   : > { %v2920_v17 = vsel %vm2908_vm9, %v2687_v34, %v2877_v30  ;;  %v3001_v34 = vld [vmem:[%s7534_s2 + $0x133] sm:$0xff] }
 0x328   : > { %3348 = vperm.xlu1 %4154, %v2974_v5   ;;  %4047 = vmatmul.mubr.msk.bf16.gmra.mrb[20].mxu0 %vm3054_vm14, %v2920_v17  ;;  %v7735_v30 = vld [vmem:[#allocation60_spill] sm:$0xff] }
 0x329   : > { %4050 = vmatprep.mubr.msk.bf16.mxu0 %vm4188_vm12, %v7626_v54  ;;  %3393 = vperm.xlu0 %4155, %v2983_v49   ;;  %v2027_v39 = vpop.permute.xlu0 %2026  ;;  %v2582_v49 = vsel %vm7736_vm13, %v7735_v30, %v6651_v36 }
 0x32a   : > { %v2897_v20 = vpop.permute.xlu1 %2896  ;;  %v2625_v41 = vsel %vm2589_vm15, %v2582_v49, %v6675_v22  ;;  %v3003_v22 = vld [vmem:[%s7534_s2 + $0x143] sm:$0xff] }
 0x32b   : > { %v2940_v26 = vsel %vm2908_vm9, %v2707_v2, %v2897_v20  ;;  %v2668_v17 = vsel %vm2632_vm11, %v2625_v41, %v6706_v9  ;;  %v7737_v2 = vld [vmem:[#allocation72_spill] sm:$0xff]  ;;  %v7738_v20 = vld [vmem:[#allocation54_spill] sm:$0xff] }
 0x32c   : > { %3358 = vperm.xlu1 %4154, %v2976_v35   ;;  %4087 = vmatmul.mubr.msk.bf16.gmra.mrb[16].mxu1 %vm3054_vm14, %v2940_v26  ;;  %v2711_v36 = vsel %vm2675_vm10, %v2668_v17, %v2045_v6  ;;  %v2996_v26 = vld [vmem:[%s7534_s2 + $0x10b] sm:$0xff] }
 0x32d   : > { %3403 = vperm.xlu0 %4155, %v2985_v32   ;;  %4090 = vmatprep.mubr.msk.bf16.mxu1 %vm4188_vm12, %v7626_v54  ;;  %v2564_v32 = vsel %vm7739_vm1, %v7738_v20, %v7737_v2  ;;  %v7740_v6 = vld [vmem:[#allocation63_spill] sm:$0xff] }
 0x32e   : > { %v1873_v23 = vpop.permute.xlu1 %1872  ;;  %v2607_v52 = vsel %vm2589_vm15, %v2564_v32, %v1920_v0 }
 0x32f   : > { %v2580_v1 = vsel %vm7731_vm6, %v7730_v33, %v1873_v23  ;;  %v2650_v8 = vsel %vm2632_vm11, %v2607_v52, %v1983_v57  ;;  %v2998_v23 = vld [vmem:[%s7534_s2 + $0x11b] sm:$0xff] }
 0x330   : > { %3368 = vperm.xlu1 %4154, %v2978_v31   ;;  %4051 = vmatmul.mubr.msk.bf16.gmra.mrb[24].mxu0 %vm3054_vm14, %v2922_v40  ;;  %v2693_v51 = vsel %vm2675_vm10, %v2650_v8, %v2027_v39 }
 0x331   : > { %3413 = vperm.xlu0 %4155, %v2987_v55   ;;  %4054 = vmatprep.mubr.msk.bf16.mxu0 %vm4188_vm12, %v7626_v54 }
 0x332   : > { %v1936_v15 = vpop.permute.xlu1 %1935 }
 0x333   : > { %v2623_v62 = vsel %vm2589_vm15, %v2580_v1, %v1936_v15 }
 0x334   : > { %3378 = vperm.xlu1 %4154, %v2980_v46   ;;  %v3000_v46 = vld [vmem:[%s7534_s2 + $0x12b] sm:$0xff] }
 0x335   : > { %3423 = vperm.xlu0 %4155, %v2989_v43  }
 0x336   : > { %v1999_v63 = vpop.permute.xlu1 %1998 }
 0x337   : > { %v2666_v53 = vsel %vm2632_vm11, %v2623_v62, %v1999_v63 }
 0x338   : > { %3388 = vperm.xlu1 %4154, %v2982_v58  }
 0x339   : > { %3433 = vperm.xlu0 %4155, %v2991_v48   ;;  %v3002_v48 = vld [vmem:[%s7534_s2 + $0x13b] sm:$0xff] }
 0x33a   : > { %v2043_v50 = vpop.permute.xlu1 %2042 }
 0x33b   : > { %v2709_v3 = vsel %vm2675_vm10, %v2666_v53, %v2043_v50  ;;  %v3004_v53 = vld [vmem:[%s7534_s2 + $0x14b] sm:$0xff] }
 0x33c   : > { %3398 = vperm.xlu1 %4154, %v2984_v42   ;;  %v2942_v24 = vsel %vm2908_vm9, %v2709_v3, %v6637_v28  ;;  %v2990_v28 = vld [vmem:[%s7534_s2 + $0xdb] sm:$0xff] }
 0x33d   : > { %4091 = vmatmul.mubr.msk.bf16.gmra.mrb[20].mxu1 %vm3054_vm14, %v2942_v24  ;;  %3443 = vperm.xlu0 %4155, %v2993_v27  }
 0x33e   : > { %v1918_v16 = vpop.permute.xlu1 %1917  ;;  %4094 = vmatprep.mubr.msk.bf16.mxu1 %vm4188_vm12, %v7626_v54 }
 0x33f   : > { %v2605_v44 = vsel %vm2589_vm15, %v2562_v59, %v1918_v16  ;;  %v7742_v16 = vld [vmem:[#allocation71_spill] sm:$0xff] }
 0x340   : > { %3408 = vperm.xlu1 %4154, %v2986_v38  }
 0x341   : > { %3453 = vperm.xlu0 %4155, %v2995_v14   ;;  %v7743_v14 = vld [vmem:[#allocation53_spill] sm:$0xff] }
 0x342   : > { %v1981_v29 = vpop.permute.xlu1 %1980  ;;  %v2566_v57 = vsel %vm7744_vm4, %v7743_v14, %v7742_v16 }
 0x343   : > { %v2648_v21 = vsel %vm2632_vm11, %v2605_v44, %v1981_v29 }
 0x344   : > { %3418 = vperm.xlu1 %4154, %v2988_v7  }
 0x345   : > { %3463 = vperm.xlu0 %4155, %v2997_v10  }
 0x346   : > { %v2025_v19 = vpop.permute.xlu1 %2024  ;;  %v2883_v60 = vpop.permute.xlu0 %2882 }
 0x347   : > { %v2691_v45 = vsel %vm2675_vm10, %v2648_v21, %v2025_v19  ;;  %v2926_v9 = vsel %vm2908_vm9, %v2693_v51, %v2883_v60  ;;  %v7745_v19 = vld [vmem:[#allocation62_spill] sm:$0xff] }
 0x348   : > { %3428 = vperm.xlu1 %4154, %v2990_v28  }
 0x349   : > { %3473 = vperm.xlu0 %4155, %v2999_v4  }
 0x34a   : > { %v2881_v5 = vpop.permute.xlu1 %2880 }
 0x34b   : > { %v2924_v25 = vsel %vm2908_vm9, %v2691_v45, %v2881_v5  ;;  %v7748_v45 = vld [vmem:[#allocation55_spill] sm:$0xff] }
 0x34c   : > { %4055 = vmatmul.mubr.msk.bf16.gmra.mrb[28].mxu0 %vm3054_vm14, %v2924_v25  ;;  %3438 = vperm.xlu1 %4154, %v2992_v47   ;;  %v7747_v47 = vld [vmem:[#allocation73_spill] sm:$0xff] }
 0x34d   : > { %4058 = vmatprep.mubr.msk.bf16.mxu0 %vm4188_vm12, %v7626_v54  ;;  %3483 = vperm.xlu0 %4155, %v3001_v34   ;;  %v2568_v60 = vsel %vm7749_vm5, %v7748_v45, %v7747_v47 }
 0x34e   : > { %v2901_v37 = vpop.permute.xlu1 %2900  ;;  %v2903_v35 = vpop.permute.xlu0 %2902 }
 0x34f   : > { %v2944_v11 = vsel %vm2908_vm9, %v2711_v36, %v2901_v37  ;;  %v7750_v37 = vld [vmem:[#allocation64_spill] sm:$0xff] }
 0x350   : > { %4095 = vmatmul.mubr.msk.bf16.gmra.mrb[24].mxu1 %vm3054_vm14, %v2944_v11  ;;  %3448 = vperm.xlu1 %4154, %v2994_v61  }
 0x351   : > { %4098 = vmatprep.mubr.msk.bf16.mxu1 %vm4188_vm12, %v7626_v54  ;;  %3493 = vperm.xlu0 %4155, %v3003_v22  }
 0x352   : > { %v1877_v12 = vpop.permute.xlu1 %1876  ;;  %v1879_v31 = vpop.permute.xlu0 %1878 }
 0x353   : > { %v2584_v58 = vsel %vm7741_vm7, %v7740_v6, %v1877_v12  ;;  %v2586_v4 = vsel %vm7746_vm2, %v7745_v19, %v1879_v31 }
 0x354   : > { %4059 = vmatmul.mubr.msk.bf16.gmra.mrb[32].mxu0 %vm3054_vm14, %v2926_v9  ;;  %3458 = vperm.xlu1 %4154, %v2996_v26  }
 0x355   : > { %4062 = vmatprep.mubr.msk.bf16.mxu0 %vm4188_vm12, %v7626_v54  ;;  %3503 = vperm.xlu0 %4155, %v3005_v18  }
 0x356   : > { %v1940_v55 = vpop.permute.xlu1 %1939  ;;  %v1942_v40 = vpop.permute.xlu0 %1941 }
 0x357   : > { %v2627_v63 = vsel %vm2589_vm15, %v2584_v58, %v1940_v55  ;;  %v2629_v56 = vsel %vm2589_vm15, %v2586_v4, %v1942_v40 }
 0x358   : > { %3468 = vperm.xlu1 %4154, %v2998_v23  }
 0x35a   : > { %v2003_v15 = vpop.permute.xlu1 %2002  ;;  %v2005_v43 = vpop.permute.xlu0 %2004 }
 0x35b   : > { %v2670_v33 = vsel %vm2632_vm11, %v2627_v63, %v2003_v15  ;;  %v2672_v59 = vsel %vm2632_vm11, %v2629_v56, %v2005_v43 }
 0x35c   : > { %3478 = vperm.xlu1 %4154, %v3000_v46   ;;  %v6880_v46 = vld [vmem:[%s7536_s4] ss:$0 sm:$0xff] }
 0x35e   : > { %v2047_v1 = vpop.permute.xlu1 %2046  ;;  %v2049_v62 = vpop.permute.xlu0 %2048 }
 0x35f   : > { %v2713_v42 = vsel %vm2675_vm10, %v2670_v33, %v2047_v1  ;;  %v2715_v44 = vsel %vm2675_vm10, %v2672_v59, %v2049_v62 }
 0x360   : > { %v2946_v0 = vsel %vm2908_vm9, %v2713_v42, %v2903_v35  ;;  %3488 = vperm.xlu1 %4154, %v3002_v48  }
 0x361   : > { %4099 = vmatmul.mubr.msk.bf16.gmra.mrb[28].mxu1 %vm3054_vm14, %v2946_v0 }
 0x362   : > { %v1922_v50 = vpop.permute.xlu1 %1921  ;;  %v1924_v27 = vpop.permute.xlu0 %1923  ;;  %4102 = vmatprep.mubr.msk.bf16.mxu1 %vm4188_vm12, %v7626_v54 }
 0x363   : > { %v2609_v7 = vsel %vm2589_vm15, %v2566_v57, %v1922_v50  ;;  %v2611_v34 = vsel %vm2589_vm15, %v2568_v60, %v1924_v27 }
 0x364   : > { %3498 = vperm.xlu1 %4154, %v3004_v53  }
 0x366   : > { %v1985_v3 = vpop.permute.xlu1 %1984  ;;  %v1987_v24 = vpop.permute.xlu0 %1986 }
 0x367   : > { %v2652_v29 = vsel %vm2632_vm11, %v2609_v7, %v1985_v3  ;;  %v2654_v49 = vsel %vm2632_vm11, %v2611_v34, %v1987_v24 }
 0x36a   : > { %v2029_v38 = vpop.permute.xlu1 %2028  ;;  %v2031_v28 = vpop.permute.xlu0 %2030 }
 0x36b   : > { %v2695_v10 = vsel %vm2675_vm10, %v2652_v29, %v2029_v38  ;;  %v2697_v25 = vsel %vm2675_vm10, %v2654_v49, %v2031_v28 }
 0x36e   : > { %v2885_v39 = vpop.permute.xlu1 %2884  ;;  %v2887_v30 = vpop.permute.xlu0 %2886 }
 0x36f   : > { %v2928_v13 = vsel %vm2908_vm9, %v2695_v10, %v2885_v39  ;;  %v2930_v17 = vsel %vm2908_vm9, %v2697_v25, %v2887_v30 }
 0x370   : > { %4063 = vmatmul.mubr.msk.bf16.gmra.mrb[36].mxu0 %vm3054_vm14, %v2928_v13 }
 0x371   : > { %4066 = vmatprep.mubr.msk.bf16.mxu0 %vm4188_vm12, %v7626_v54 }
 0x372   : > { %v2905_v21 = vpop.permute.xlu1 %2904 }
 0x373   : > { %v2948_v5 = vsel %vm2908_vm9, %v2715_v44, %v2905_v21 }
 0x374   : > { %4103 = vmatmul.mubr.msk.bf16.gmra.mrb[32].mxu1 %vm3054_vm14, %v2948_v5 }
 0x375   : > { %4106 = vmatprep.mubr.msk.bf16.mxu1 %vm4188_vm12, %v7626_v54 }
 0x376   : > { %v1881_v41 = vpop.permute.xlu1 %1880  ;;  %v2907_v32 = vpop.permute.xlu0 %2906 }
 0x377   : > { %v2588_v35 = vsel %vm7751_vm3, %v7750_v37, %v1881_v41 }
 0x378   : > { %4067 = vmatmul.mubr.msk.bf16.gmra.mrb[40].mxu0 %vm3054_vm14, %v2930_v17 }
 0x37a   : > { %v1944_v61 = vpop.permute.xlu1 %1943 }
 0x37b   : > { %v2631_v22 = vsel %vm2589_vm15, %v2588_v35, %v1944_v61 }
 0x37e   : > { %v2007_v36 = vpop.permute.xlu1 %2006 }
 0x37f   : > { %v2674_v2 = vsel %vm2632_vm11, %v2631_v22, %v2007_v36 }
 0x382   : > { %v2051_v20 = vpop.permute.xlu1 %2050 }
 0x383   : > { %v2717_v54 = vsel %vm2675_vm10, %v2674_v2, %v2051_v20 }
 0x384   : > { %v2950_v11 = vsel %vm2908_vm9, %v2717_v54, %v2907_v32  ;;  %vm3551_vm9 = vcmask (!%p3981_p4), 57344  }
 0x385   : > { %4107 = vmatmul.mubr.msk.bf16.gmra.mrb[36].mxu1 %vm3054_vm14, %v2950_v11 }
 0x388   : > { %v3309_v52 = vpop.permute.xlu0 %3308 }
 0x38c   : > { %v3324_v8 = vpop.permute.xlu0 %3323 }
 0x390   : > { %v6867_v26 = vpop.permute.xlu0 %3333 }
 0x393   : > { %v3304_v51 = vpop.permute.xlu1 %3303 }
 0x394   : > { %v6869_v12 = vpop.permute.xlu0 %3343 }
 0x397   : > { %v3314_v31 = vpop.permute.xlu1 %3313 }
 0x398   : > { %v6871_v18 = vpop.permute.xlu0 %3353 }
 0x39b   : > { %v3319_v9 = vpop.permute.xlu1 %3318 }
 0x39c   : > { %v6873_v23 = vpop.permute.xlu0 %3363 }
 0x39f   : > { %v3329_v55 = vpop.permute.xlu1 %3328 }
 0x3a0   : > { %v6875_v40 = vpop.permute.xlu0 %3373 }
 0x3a3   : > { %v6882_v15 = vpop.permute.xlu1 %3338  ;;  %v3135_v43 = vpop.f32.mrb[0].mxu0 }
 0x3a4   : > { %v3136_v6 = vadd.f32 %v6880_v46, %v3135_v43  ;;  %v4028_v58 = vpop.f32.mrb[1].mxu0  ;;  %v6888_v62 = vpop.permute.xlu0 %3383 }
 0x3a5   : > { %v3138_v63 = vpop.f32.mrb[2].mxu0 }
 0x3a6   : > { %v6885_v48 = vmul.f32 %v3304_v51, %v3136_v6  ;;  %v3139_v33 = vadd.f32 %v6880_v46, %v3138_v63  ;;  %v4029_v1 = vpop.f32.mrb[3].mxu0 }
 0x3a7   : > { %v6890_v42 = vpop.permute.xlu1 %3348 }
 0x3a8   : > { %v6892_v0 = vmul.f32 %v3309_v52, %v3139_v33  ;;  %v6896_v50 = vpop.permute.xlu0 %3393 }
 0x3ab   : > { %v6894_v53 = vpop.permute.xlu1 %3358 }
 0x3ac   : > { %v6900_v3 = vpop.permute.xlu0 %3403 }
 0x3af   : > { %v6898_v27 = vpop.permute.xlu1 %3368 }
 0x3b0   : > { %v3414_v19 = vpop.permute.xlu0 %3413 }
 0x3b3   : > { %v6902_v24 = vpop.permute.xlu1 %3378 }
 0x3b4   : > { %v3143_v38 = vpop.f32.mrb[4].mxu0  ;;  %v3424_v35 = vpop.permute.xlu0 %3423 }
 0x3b5   : > { %v3144_v16 = vadd.f32 %v6880_v46, %v3143_v38  ;;  %v4032_v14 = vpop.f32.mrb[5].mxu0 }
 0x3b6   : > { %v3146_v57 = vpop.f32.mrb[6].mxu0 }
 0x3b7   : > { %v6905_v7 = vmul.f32 %v3314_v31, %v3144_v16  ;;  %v3147_v29 = vadd.f32 %v6880_v46, %v3146_v57  ;;  %v4033_v10 = vpop.f32.mrb[7].mxu0  ;;  %v6908_v28 = vpop.permute.xlu1 %3388 }
 0x3b8   : > { %v3223_v39 = vpop.f32.mrb[0].mxu1  ;;  %v3434_v1 = vpop.permute.xlu0 %3433 }
 0x3b9   : > { %v6910_v4 = vmul.f32 %v3319_v9, %v3147_v29  ;;  %v3224_v13 = vadd.f32 %v6880_v46, %v3223_v39  ;;  %v4072_v56 = vpop.f32.mrb[1].mxu1 }
 0x3ba   : > { %v3226_v59 = vpop.f32.mrb[2].mxu1 }
 0x3bb   : > { %v6913_v44 = vmul.f32 %v3414_v19, %v3224_v13  ;;  %v4073_v21 = vpop.f32.mrb[3].mxu1  ;;  %v6915_v47 = vpop.permute.xlu1 %3398  ;;  %v3227_v60 = vadd.f32 %v6880_v46, %v3226_v59 }
 0x3bf   : > { %v6917_v45 = vpop.permute.xlu1 %3408 }
 0x3c3   : > { %v3419_v5 = vpop.permute.xlu1 %3418 }
 0x3c4   : > { %v6920_v34 = vmul.f32 %v3419_v5, %v3227_v60 }
 0x3c7   : > { %v3429_v54 = vpop.permute.xlu1 %3428 }
 0x3c8   : > { %v3151_v30 = vpop.f32.mrb[8].mxu0 }
 0x3c9   : > { %v3152_v49 = vadd.f32 %v6880_v46, %v3151_v30  ;;  %v4036_v25 = vpop.f32.mrb[9].mxu0 }
 0x3ca   : > { %v3154_v41 = vpop.f32.mrb[10].mxu0 }
 0x3cb   : > { %v6923_v17 = vmul.f32 %v3324_v8, %v3152_v49  ;;  %v3155_v61 = vadd.f32 %v6880_v46, %v3154_v41  ;;  %v4037_v36 = vpop.f32.mrb[11].mxu0  ;;  %v3439_v29 = vpop.permute.xlu1 %3438 }
 0x3cc   : > { %v3231_v37 = vpop.f32.mrb[4].mxu1  ;;  %v3444_v49 = vpop.permute.xlu0 %3443 }
 0x3cd   : > { %v6926_v22 = vmul.f32 %v3329_v55, %v3155_v61  ;;  %v3232_v2 = vadd.f32 %v6880_v46, %v3231_v37  ;;  %v4076_v20 = vpop.f32.mrb[5].mxu1 }
 0x3ce   : > { %v3234_v32 = vpop.f32.mrb[6].mxu1 }
 0x3cf   : > { %v6929_v11 = vmul.f32 %v3424_v35, %v3232_v2  ;;  %v3235_v52 = vadd.f32 %v6880_v46, %v3234_v32  ;;  %v4077_v51 = vpop.f32.mrb[7].mxu1  ;;  %v3449_v37 = vpop.permute.xlu1 %3448 }
 0x3d1   : > { %v6932_v31 = vmul.f32 %v3429_v54, %v3235_v52 }
 0x3db   : > { %v3159_v8 = vpop.f32.mrb[12].mxu0 }
 0x3dc   : > { %v3160_v9 = vadd.f32 %v6880_v46, %v3159_v8  ;;  %v4040_v43 = vpop.f32.mrb[13].mxu0 }
 0x3dd   : > { %v3162_v6 = vpop.f32.mrb[14].mxu0 }
 0x3de   : > { %v6936_v55 = vmul.f32 %v6867_v26, %v3160_v9  ;;  %v3163_v58 = vadd.f32 %v6880_v46, %v3162_v6  ;;  %v4041_v63 = vpop.f32.mrb[15].mxu0 }
 0x3df   : > { %v3239_v33 = vpop.f32.mrb[8].mxu1 }
 0x3e0   : > { %v6940_v38 = vmul.f32 %v6882_v15, %v3163_v58  ;;  %v3240_v16 = vadd.f32 %v6880_v46, %v3239_v33  ;;  %v4080_v14 = vpop.f32.mrb[9].mxu1  ;;  %v3454_v33 = vpop.permute.xlu0 %3453 }
 0x3e1   : > { %v3242_v57 = vpop.f32.mrb[10].mxu1 }
 0x3e2   : > { %v6943_v10 = vmul.f32 %v3434_v1, %v3240_v16  ;;  %v3243_v39 = vadd.f32 %v6880_v46, %v3242_v57  ;;  %v4081_v19 = vpop.f32.mrb[11].mxu1 }
 0x3e4   : > { %v6946_v26 = vmul.f32 %v3439_v29, %v3243_v39  ;;  %v3459_v29 = vpop.permute.xlu1 %3458 }
 0x3eb   : > { %v3167_v13 = vpop.f32.mrb[16].mxu0 }
 0x3ec   : > { %v3168_v56 = vadd.f32 %v6880_v46, %v3167_v13  ;;  %v4044_v59 = vpop.f32.mrb[17].mxu0 }
 0x3ed   : > { %v3170_v21 = vpop.f32.mrb[18].mxu0 }
 0x3ee   : > { %v6950_v15 = vmul.f32 %v6869_v12, %v3168_v56  ;;  %v3171_v60 = vadd.f32 %v6880_v46, %v3170_v21  ;;  %v4045_v5 = vpop.f32.mrb[19].mxu0 }
 0x3ef   : > { %v3247_v30 = vpop.f32.mrb[12].mxu1 }
 0x3f0   : > { %v6954_v25 = vmul.f32 %v6890_v42, %v3171_v60  ;;  %v3248_v41 = vadd.f32 %v6880_v46, %v3247_v30  ;;  %v4084_v61 = vpop.f32.mrb[13].mxu1 }
 0x3f1   : > { %v3250_v36 = vpop.f32.mrb[14].mxu1 }
 0x3f2   : > { %v6957_v35 = vmul.f32 %v3444_v49, %v3248_v41  ;;  %v3251_v2 = vadd.f32 %v6880_v46, %v3250_v36  ;;  %v4085_v20 = vpop.f32.mrb[15].mxu1  ;;  %v3464_v41 = vpop.permute.xlu0 %3463 }
 0x3f3   : > { %v3469_v20 = vpop.permute.xlu1 %3468 }
 0x3f4   : > { %v6960_v12 = vmul.f32 %v3449_v37, %v3251_v2 }
 0x3fb   : > { %v3175_v32 = vpop.f32.mrb[20].mxu0 }
 0x3fc   : > { %v3176_v54 = vadd.f32 %v6880_v46, %v3175_v32  ;;  %v4048_v52 = vpop.f32.mrb[21].mxu0 }
 0x3fd   : > { %v3178_v51 = vpop.f32.mrb[22].mxu0 }
 0x3fe   : > { %v6964_v42 = vmul.f32 %v6871_v18, %v3176_v54  ;;  %v3179_v8 = vadd.f32 %v6880_v46, %v3178_v51  ;;  %v4049_v9 = vpop.f32.mrb[23].mxu0 }
 0x3ff   : > { %v3255_v43 = vpop.f32.mrb[16].mxu1 }
 0x400   : > { %v6968_v6 = vmul.f32 %v6894_v53, %v3179_v8  ;;  %v3256_v58 = vadd.f32 %v6880_v46, %v3255_v43  ;;  %v4088_v63 = vpop.f32.mrb[17].mxu1 }
 0x401   : > { %v3258_v1 = vpop.f32.mrb[18].mxu1 }
 0x402   : > { %v6971_v16 = vmul.f32 %v3454_v33, %v3256_v58  ;;  %v3259_v14 = vadd.f32 %v6880_v46, %v3258_v1  ;;  %v4089_v57 = vpop.f32.mrb[19].mxu1  ;;  %v3474_v1 = vpop.permute.xlu0 %3473 }
 0x403   : > { %v3183_v18 = vpop.f32.mrb[24].mxu0 }
 0x404   : > { %v6974_v39 = vmul.f32 %v3459_v29, %v3259_v14  ;;  %v3184_v19 = vadd.f32 %v6880_v46, %v3183_v18  ;;  %v4052_v13 = vpop.f32.mrb[25].mxu0 }
 0x405   : > { %v3186_v56 = vpop.f32.mrb[26].mxu0 }
 0x406   : > { %v6978_v53 = vmul.f32 %v6873_v23, %v3184_v19  ;;  %v3187_v59 = vadd.f32 %v6880_v46, %v3186_v56  ;;  %v4053_v21 = vpop.f32.mrb[27].mxu0  ;;  %v3479_v19 = vpop.permute.xlu1 %3478 }
 0x408   : > { %v6982_v60 = vmul.f32 %v6898_v27, %v3187_v59 }
 0x410   : > { %v3263_v5 = vpop.f32.mrb[20].mxu1 }
 0x411   : > { %v3264_v30 = vadd.f32 %v6880_v46, %v3263_v5  ;;  %v4092_v49 = vpop.f32.mrb[21].mxu1 }
 0x412   : > { %v3266_v61 = vpop.f32.mrb[22].mxu1 }
 0x413   : > { %v6985_v36 = vmul.f32 %v3464_v41, %v3264_v30  ;;  %v3267_v37 = vadd.f32 %v6880_v46, %v3266_v61  ;;  %v4093_v2 = vpop.f32.mrb[23].mxu1 }
 0x414   : > { %v3484_v2 = vpop.permute.xlu0 %3483 }
 0x415   : > { %v6988_v23 = vmul.f32 %v3469_v20, %v3267_v37 }
 0x41f   : > { %v3191_v32 = vpop.f32.mrb[28].mxu0 }
 0x420   : > { %v3192_v54 = vadd.f32 %v6880_v46, %v3191_v32  ;;  %v4056_v52 = vpop.f32.mrb[29].mxu0 }
 0x421   : > { %v3194_v27 = vpop.f32.mrb[30].mxu0 }
 0x422   : > { %v6992_v51 = vmul.f32 %v6875_v40, %v3192_v54  ;;  %v3195_v8 = vadd.f32 %v6880_v46, %v3194_v27  ;;  %v4057_v9 = vpop.f32.mrb[31].mxu0  ;;  %v3489_v27 = vpop.permute.xlu1 %3488 }
 0x423   : > { %v3271_v43 = vpop.f32.mrb[24].mxu1 }
 0x424   : > { %v6996_v58 = vmul.f32 %v6902_v24, %v3195_v8  ;;  %v3272_v63 = vadd.f32 %v6880_v46, %v3271_v43  ;;  %v4096_v33 = vpop.f32.mrb[25].mxu1 }
 0x425   : > { %v3274_v14 = vpop.f32.mrb[26].mxu1 }
 0x426   : > { %v6999_v57 = vmul.f32 %v3474_v1, %v3272_v63  ;;  %v3275_v29 = vadd.f32 %v6880_v46, %v3274_v14  ;;  %v4097_v18 = vpop.f32.mrb[27].mxu1 }
 0x427   : > { %v3199_v40 = vpop.f32.mrb[32].mxu0 }
 0x428   : > { %v7002_v13 = vmul.f32 %v3479_v19, %v3275_v29  ;;  %v3200_v56 = vadd.f32 %v6880_v46, %v3199_v40  ;;  %v4060_v59 = vpop.f32.mrb[33].mxu0  ;;  %v3494_v40 = vpop.permute.xlu0 %3493 }
 0x429   : > { %v3202_v21 = vpop.f32.mrb[34].mxu0 }
 0x42a   : > { %v7006_v24 = vmul.f32 %v6888_v62, %v3200_v56  ;;  %v3203_v5 = vadd.f32 %v6880_v46, %v3202_v21  ;;  %v4061_v30 = vpop.f32.mrb[35].mxu0 }
 0x42b   : > { %v3499_v30 = vpop.permute.xlu1 %3498 }
 0x42c   : > { %v7010_v49 = vmul.f32 %v6908_v28, %v3203_v5 }
 0x434   : > { %v3279_v41 = vpop.f32.mrb[28].mxu1 }
 0x435   : > { %v3280_v61 = vadd.f32 %v6880_v46, %v3279_v41  ;;  %v4100_v37 = vpop.f32.mrb[29].mxu1 }
 0x436   : > { %v3282_v20 = vpop.f32.mrb[30].mxu1 }
 0x437   : > { %v7013_v32 = vmul.f32 %v3484_v2, %v3280_v61  ;;  %v3283_v54 = vadd.f32 %v6880_v46, %v3282_v20  ;;  %v4101_v52 = vpop.f32.mrb[31].mxu1 }
 0x439   : > { %v7016_v62 = vmul.f32 %v3489_v27, %v3283_v54 }
 0x443   : > { %v3207_v8 = vpop.f32.mrb[36].mxu0 }
 0x444   : > { %v3208_v9 = vadd.f32 %v6880_v46, %v3207_v8  ;;  %v4064_v43 = vpop.f32.mrb[37].mxu0 }
 0x445   : > { %v3210_v28 = vpop.f32.mrb[38].mxu0  ;;  %v3504_v43 = vpop.permute.xlu0 %3503 }
 0x446   : > { %v7020_v63 = vmul.f32 %v6896_v50, %v3208_v9  ;;  %v3211_v33 = vadd.f32 %v6880_v46, %v3210_v28  ;;  %v4065_v1 = vpop.f32.mrb[39].mxu0 }
 0x447   : > { %v3287_v14 = vpop.f32.mrb[32].mxu1 }
 0x448   : > { %v7024_v29 = vmul.f32 %v6915_v47, %v3211_v33  ;;  %v3288_v18 = vadd.f32 %v6880_v46, %v3287_v14  ;;  %v4104_v19 = vpop.f32.mrb[33].mxu1 }
 0x449   : > { %v3290_v56 = vpop.f32.mrb[34].mxu1 }
 0x44a   : > { %v7027_v59 = vmul.f32 %v3494_v40, %v3288_v18  ;;  %v3291_v21 = vadd.f32 %v6880_v46, %v3290_v56  ;;  %v4105_v5 = vpop.f32.mrb[35].mxu1 }
 0x44b   : > { %v3215_v50 = vpop.f32.mrb[40].mxu0 }
 0x44c   : > { %v7030_v41 = vmul.f32 %v3499_v30, %v3291_v21  ;;  %v3216_v61 = vadd.f32 %v6880_v46, %v3215_v50  ;;  %v4068_v37 = vpop.f32.mrb[41].mxu0 }
 0x44d   : > { %v3218_v2 = vpop.f32.mrb[42].mxu0 }
 0x44e   : > { %v7034_v47 = vmul.f32 %v6900_v3, %v3216_v61  ;;  %v3219_v20 = vadd.f32 %v6880_v46, %v3218_v2  ;;  %v4069_v54 = vpop.f32.mrb[43].mxu0  ;;  %v4191_v3 = vmov (!%p3981_p4), 0.0  }
 0x44f   : > { %3552 = vst.msk [vmem:[%s7538_s6] sm:$0x1] (!%p3981_p4), %vm3551_vm9, %v4191_v3  ;;  %3553 = vst.msk [vmem:[%s7539_s7] sm:$0x1] (!%p3981_p4), %vm3551_vm9, %v4191_v3 }
 0x450   : > { %v7038_v52 = vmul.f32 %v6917_v45, %v3219_v20 }
 0x455   : > { %3550 = sbr.rel (%p3981_p4) target bundleno = 1116 (0x45c), region = 44 }
 0x458   : > { %v3295_v27 = vpop.f32.mrb[36].mxu1 }
 0x459   : > { %v3296_v8 = vadd.f32 %v6880_v46, %v3295_v27  ;;  %v4108_v9 = vpop.f32.mrb[37].mxu1 }
 0x45a   : > { %v3298_v28 = vpop.f32.mrb[38].mxu1 }
 0x45b   : > { %v7041_v33 = vmul.f32 %v3504_v43, %v3296_v8  ;;  %v4109_v1 = vpop.f32.mrb[39].mxu1 }
 0x45c PF: > { %v7752_v46 = vmov 0.0   ;;  %v3555_v45 = vsel %vm2052_vm0, %v6885_v48, 0.0  ;;  %v3556_v14 = vsel %vm2052_vm0, %v6892_v0, 0.0  ;;  %v3558_v18 = vsel %vm2052_vm0, %v6905_v7, 0.0 }
 0x45d   : > { %3779 = vst.msk [vmem:[%s4256_s10 + $0x10] sm:$0xff] %vm2052_vm0, %v7752_v46  ;;  %3780 = vst.msk [vmem:[%s4256_s10 + $0x18] sm:$0xff] %vm2052_vm0, %v7752_v46  ;;  %v3557_v19 = vadd.f32 %v3556_v14, %v3555_v45  ;;  %v3560_v40 = vsel %vm2052_vm0, %v6910_v4, 0.0  ;;  %v3562_v21 = vsel %vm2052_vm0, %v6923_v17, 0.0  ;;  %v3564_v30 = vsel %vm2052_vm0, %v6926_v22, 0.0 }
 0x45e   : > { %3781 = vst.msk [vmem:[%s4256_s10 + $0x20] sm:$0xff] %vm2052_vm0, %v7752_v46  ;;  %3782 = vst.msk [vmem:[%s4256_s10 + $0x28] sm:$0xff] %vm2052_vm0, %v7752_v46  ;;  %v3566_v61 = vsel %vm2052_vm0, %v6936_v55, 0.0  ;;  %v3568_v2 = vsel %vm2052_vm0, %v6940_v38, 0.0  ;;  %vm3634_vm10 = vcmask 60416   ;;  %v3570_v54 = vsel %vm2052_vm0, %v6950_v15, 0.0 }
 0x45f   : > { %3783 = vst.msk [vmem:[%s4256_s10 + $0x30] sm:$0xff] %vm2052_vm0, %v7752_v46  ;;  %3784 = vst.msk [vmem:[%s4256_s10 + $0x38] sm:$0xff] %vm2052_vm0, %v7752_v46  ;;  %v3559_v56 = vadd.f32 %v3558_v18, %v3557_v19  ;;  %v3572_v8 = vsel %vm2052_vm0, %v6954_v25, 0.0  ;;  %v3574_v43 = vsel %vm2052_vm0, %v6964_v42, 0.0  ;;  %v3576_v1 = vsel %vm2052_vm0, %v6968_v6, 0.0 }
 0x460   : > { %3785 = vst.msk [vmem:[%s4256_s10 + $0x40] sm:$0xff] %vm2052_vm0, %v7752_v46  ;;  %3786 = vst.msk [vmem:[%s4256_s10 + $0x48] sm:$0xff] %vm2052_vm0, %v7752_v46  ;;  %v3578_v45 = vsel %vm2052_vm0, %v6978_v53, 0.0  ;;  %v3647_v14 = vmul.f32 %v6885_v48, %v6885_v48  ;;  %v3648_v18 = vmul.f32 %v6892_v0, %v6892_v0  ;;  %v3649_v19 = vmul.f32 %v6905_v7, %v6905_v7 }
 0x461   : > { %3787 = vst.msk [vmem:[%s4256_s10 + $0x50] sm:$0xff] %vm2052_vm0, %v7752_v46  ;;  %3788 = vst.msk [vmem:[%s4256_s10 + $0x58] sm:$0xff] %vm2052_vm0, %v7752_v46  ;;  %v3561_v5 = vadd.f32 %v3560_v40, %v3559_v56  ;;  %v3580_v56 = vsel %vm2052_vm0, %v6982_v60, 0.0  ;;  %vm3822_vm12 = vcmask 58368   ;;  %vm3644_vm14 = vcmask 57344  }
 0x462   : > { %3789 = vst.msk [vmem:[%s4256_s10 + $0x60] sm:$0xff] %vm2052_vm0, %v7752_v46  ;;  %3790 = vst.msk [vmem:[%s4256_s10 + $0x68] sm:$0xff] %vm2052_vm0, %v7752_v46 }
 0x463   : > { %3791 = vst.msk [vmem:[%s4256_s10 + $0x70] sm:$0xff] %vm2052_vm0, %v7752_v46  ;;  %3792 = vst.msk [vmem:[%s4256_s10 + $0x78] sm:$0xff] %vm2052_vm0, %v7752_v46  ;;  %v3563_v50 = vadd.f32 %v3562_v21, %v3561_v5  ;;  %v3650_v21 = vmul.f32 %v6910_v4, %v6910_v4 }
 0x464   : > { %3793 = vst.msk [vmem:[%s4256_s10 + $0x80] sm:$0xff] %vm2052_vm0, %v7752_v46  ;;  %3794 = vst.msk [vmem:[%s4256_s10 + $0x88] sm:$0xff] %vm2052_vm0, %v7752_v46 }
 0x465   : > { %3795 = vst.msk [vmem:[%s4256_s10 + $0x90] sm:$0xff] %vm2052_vm0, %v7752_v46  ;;  %3796 = vst.msk [vmem:[%s4256_s10 + $0x98] sm:$0xff] %vm2052_vm0, %v7752_v46  ;;  %v3565_v37 = vadd.f32 %v3564_v30, %v3563_v50  ;;  %v3582_v30 = vsel %vm2052_vm0, %v6992_v51, 0.0  ;;  %v3688_v50 = vsel %vm2052_vm0, %v3647_v14, 0.0 }
 0x466   : > { %3797 = vst.msk [vmem:[%s4256_s10 + $0xa0] sm:$0xff] %vm2052_vm0, %v7752_v46  ;;  %3798 = vst.msk [vmem:[%s4256_s10 + $0xa8] sm:$0xff] %vm2052_vm0, %v7752_v46 }
 0x467   : > { %3799 = vst.msk [vmem:[%s4256_s10 + $0xb0] sm:$0xff] %vm2052_vm0, %v7752_v46  ;;  %3800 = vst.msk [vmem:[%s4256_s10 + $0xb8] sm:$0xff] %vm2052_vm0, %v7752_v46  ;;  %v3567_v20 = vadd.f32 %v3566_v61, %v3565_v37 }
 0x468   : > { %3801 = vst.msk [vmem:[%s4256_s10 + $0xc0] sm:$0xff] %vm2052_vm0, %v7752_v46  ;;  %3802 = vst.msk [vmem:[%s4256_s10 + $0xc8] sm:$0xff] %vm2052_vm0, %v7752_v46 }
 0x469   : > { %3803 = vst.msk [vmem:[%s4256_s10 + $0xd0] sm:$0xff] %vm2052_vm0, %v7752_v46  ;;  %3804 = vst.msk [vmem:[%s4256_s10 + $0xd8] sm:$0xff] %vm2052_vm0, %v7752_v46  ;;  %v3569_v27 = vadd.f32 %v3568_v2, %v3567_v20  ;;  %v3584_v2 = vsel %vm2052_vm0, %v6996_v58, 0.0  ;;  %v3693_v20 = vsel %vm2052_vm0, %v3650_v21, 0.0  ;;  %v3592_v21 = vsel %vm2052_vm0, %v7024_v29, 0.0 }
 0x46a   : > { %3805 = vst.msk [vmem:[%s4256_s10 + $0xe0] sm:$0xff] %vm2052_vm0, %v7752_v46  ;;  %3806 = vst.msk [vmem:[%s4256_s10 + $0xe8] sm:$0xff] %vm2052_vm0, %v7752_v46 }
 0x46b   : > { %3807 = vst.msk [vmem:[%s4256_s10 + $0xf0] sm:$0xff] %vm2052_vm0, %v7752_v46  ;;  %3808 = vst.msk [vmem:[%s4256_s10 + $0xf8] sm:$0xff] %vm2052_vm0, %v7752_v46  ;;  %v3571_v9 = vadd.f32 %v3570_v54, %v3569_v27 }
 0x46c   : > { %3809 = vst.msk [vmem:[%s4256_s10 + $0x100] sm:$0xff] %vm2052_vm0, %v7752_v46  ;;  %3810 = vst.msk [vmem:[%s4256_s10 + $0x108] sm:$0xff] %vm2052_vm0, %v7752_v46 }
 0x46d   : > { %3811 = vst.msk [vmem:[%s4256_s10 + $0x110] sm:$0xff] %vm2052_vm0, %v7752_v46  ;;  %3812 = vst.msk [vmem:[%s4256_s10 + $0x118] sm:$0xff] %vm2052_vm0, %v7752_v46  ;;  %v3573_v28 = vadd.f32 %v3572_v8, %v3571_v9  ;;  %v3653_v8 = vmul.f32 %v6936_v55, %v6936_v55 }
 0x46e   : > { %3813 = vst.msk [vmem:[%s4256_s10 + $0x120] sm:$0xff] %vm2052_vm0, %v7752_v46  ;;  %3814 = vst.msk [vmem:[%s4256_s10 + $0x128] sm:$0xff] %vm2052_vm0, %v7752_v46 }
 0x46f   : > { %3815 = vst.msk [vmem:[%s4256_s10 + $0x130] sm:$0xff] %vm2052_vm0, %v7752_v46  ;;  %3816 = vst.msk [vmem:[%s4256_s10 + $0x138] sm:$0xff] %vm2052_vm0, %v7752_v46  ;;  %v3575_v3 = vadd.f32 %v3574_v43, %v3573_v28 }
 0x470   : > { %3817 = vst.msk [vmem:[%s4256_s10 + $0x140] sm:$0xff] %vm2052_vm0, %v7752_v46  ;;  %3818 = vst.msk [vmem:[%s4256_s10 + $0x148] sm:$0xff] %vm2052_vm0, %v7752_v46 }
 0x471   : > { %3819 = vst.msk [vmem:[%s4256_s10 + $0x150] sm:$0xff] %vm2052_vm0, %v7752_v46  ;;  %3777 = vst.msk [vmem:[%s4256_s10] sm:$0xff] %vm2052_vm0, %v7752_v46  ;;  %v3577_v40 = vadd.f32 %v3576_v1, %v3575_v3  ;;  %v3588_v1 = vsel %vm2052_vm0, %v7010_v49, 0.0 }
 0x472   : > { %3778 = vst.msk [vmem:[%s4256_s10 + $0x8] sm:$0xff] %vm2052_vm0, %v7752_v46  ;;  %3820 = vst.msk [vmem:[%s4256_s10 + $0x158] sm:$0xff] %vm2052_vm0, %v7752_v46 }
 0x473   : > { %3821 = vst.msk [vmem:[%s4256_s10 + $0x160] sm:$0xff] %vm2052_vm0, %v7752_v46  ;;  %3824 = vst.msk [vmem:[%s4256_s10 + $0x13] sm:$0xff] %vm2052_vm0, %v6885_v48  ;;  %v3579_v5 = vadd.f32 %v3578_v45, %v3577_v40  ;;  %v3651_v48 = vmul.f32 %v6923_v17, %v6923_v17 }
 0x474   : > { %3825 = vst.msk [vmem:[%s4256_s10 + $0x1b] sm:$0xff] %vm2052_vm0, %v6892_v0  ;;  %3826 = vst.msk [vmem:[%s4256_s10 + $0x23] sm:$0xff] %vm2052_vm0, %v6905_v7  ;;  %v3689_v0 = vsel %vm2052_vm0, %v3648_v18, 0.0  ;;  %v3691_v7 = vsel %vm2052_vm0, %v3649_v19, 0.0  ;;  %v3590_v18 = vsel %vm2052_vm0, %v7020_v63, 0.0  ;;  %v3699_v19 = vsel %vm2052_vm0, %v3653_v8, 0.0 }
 0x475   : > { %3827 = vst.msk [vmem:[%s4256_s10 + $0x2b] sm:$0xff] %vm2052_vm0, %v6910_v4  ;;  %3828 = vst.msk [vmem:[%s4256_s10 + $0x33] sm:$0xff] %vm2052_vm0, %v6923_v17  ;;  %v3581_v61 = vadd.f32 %v3580_v56, %v3579_v5  ;;  %v3690_v37 = vadd.f32 %v3689_v0, %v3688_v50  ;;  %v3652_v4 = vmul.f32 %v6926_v22, %v6926_v22  ;;  %v3586_v17 = vsel %vm2052_vm0, %v7006_v24, 0.0 }
 0x476   : > { %3829 = vst.msk [vmem:[%s4256_s10 + $0x3b] sm:$0xff] %vm2052_vm0, %v6926_v22  ;;  %3830 = vst.msk [vmem:[%s4256_s10 + $0x43] sm:$0xff] %vm2052_vm0, %v6936_v55  ;;  %v3695_v9 = vsel %vm2052_vm0, %v3651_v48, 0.0  ;;  %v3654_v22 = vmul.f32 %v6940_v38, %v6940_v38  ;;  %v3655_v55 = vmul.f32 %v6950_v15, %v6950_v15  ;;  %v3594_v50 = vsel %vm2052_vm0, %v7034_v47, 0.0 }
 0x477   : > { %3831 = vst.msk [vmem:[%s4256_s10 + $0x4b] sm:$0xff] %vm2052_vm0, %v6940_v38  ;;  %3832 = vst.msk [vmem:[%s4256_s10 + $0x53] sm:$0xff] %vm2052_vm0, %v6950_v15  ;;  %v3583_v54 = vadd.f32 %v3582_v30, %v3581_v61  ;;  %v3692_v27 = vadd.f32 %v3691_v7, %v3690_v37  ;;  %v3697_v3 = vsel %vm2052_vm0, %v3652_v4, 0.0  ;;  %v3656_v38 = vmul.f32 %v6954_v25, %v6954_v25 }
 0x478   : > { %3833 = vst.msk [vmem:[%s4256_s10 + $0x5b] sm:$0xff] %vm2052_vm0, %v6954_v25  ;;  %3834 = vst.msk [vmem:[%s4256_s10 + $0x63] sm:$0xff] %vm2052_vm0, %v6964_v42  ;;  %v3701_v5 = vsel %vm2052_vm0, %v3654_v22, 0.0  ;;  %v3657_v15 = vmul.f32 %v6964_v42, %v6964_v42  ;;  %v3703_v0 = vsel %vm2052_vm0, %v3655_v55, 0.0  ;;  %v3596_v37 = vsel %vm2052_vm0, %v7038_v52, 0.0 }
 0x479   : > { %3835 = vst.msk [vmem:[%s4256_s10 + $0x6b] sm:$0xff] %vm2052_vm0, %v6968_v6  ;;  %3836 = vst.msk [vmem:[%s4256_s10 + $0x73] sm:$0xff] %vm2052_vm0, %v6978_v53  ;;  %v3585_v43 = vadd.f32 %v3584_v2, %v3583_v54  ;;  %v3694_v28 = vadd.f32 %v3693_v20, %v3692_v27  ;;  %v3658_v25 = vmul.f32 %v6968_v6, %v6968_v6  ;;  %v3705_v2 = vsel %vm2052_vm0, %v3656_v38, 0.0 }
 0x47a   : > { %3837 = vst.msk [vmem:[%s4256_s10 + $0x7b] sm:$0xff] %vm2052_vm0, %v6982_v60  ;;  %3838 = vst.msk [vmem:[%s4256_s10 + $0x83] sm:$0xff] %vm2052_vm0, %v6992_v51  ;;  %v3598_v42 = vsel %vm2052_vm0, %v6913_v44, 0.0  ;;  %v3659_v54 = vmul.f32 %v6978_v53, %v6978_v53  ;;  %v3707_v27 = vsel %vm2052_vm0, %v3657_v15, 0.0  ;;  %v3660_v6 = vmul.f32 %v6982_v60, %v6982_v60 }
 0x47b   : > { %3839 = vst.msk [vmem:[%s4256_s10 + $0x8b] sm:$0xff] %vm2052_vm0, %v6996_v58  ;;  %3840 = vst.msk [vmem:[%s4256_s10 + $0x93] sm:$0xff] %vm2052_vm0, %v7006_v24  ;;  %v3587_v45 = vadd.f32 %v3586_v17, %v3585_v43  ;;  %v3696_v14 = vadd.f32 %v3695_v9, %v3694_v28  ;;  %v3600_v9 = vsel %vm2052_vm0, %v6920_v34, 0.0  ;;  %v3661_v53 = vmul.f32 %v6992_v51, %v6992_v51 }
 0x47c   : > { %3841 = vst.msk [vmem:[%s4256_s10 + $0x9b] sm:$0xff] %vm2052_vm0, %v7010_v49  ;;  %3842 = vst.msk [vmem:[%s4256_s10 + $0xa3] sm:$0xff] %vm2052_vm0, %v7020_v63  ;;  %v3711_v22 = vsel %vm2052_vm0, %v3659_v54, 0.0  ;;  %v3662_v60 = vmul.f32 %v6996_v58, %v6996_v58  ;;  %v3663_v51 = vmul.f32 %v7006_v24, %v7006_v24  ;;  %v3664_v58 = vmul.f32 %v7010_v49, %v7010_v49 }
 0x47d   : > { %3843 = vst.msk [vmem:[%s4256_s10 + $0xab] sm:$0xff] %vm2052_vm0, %v7024_v29  ;;  %3844 = vst.msk [vmem:[%s4256_s10 + $0xb3] sm:$0xff] %vm2052_vm0, %v7034_v47  ;;  %v3589_v40 = vadd.f32 %v3588_v1, %v3587_v45  ;;  %v3698_v56 = vadd.f32 %v3697_v3, %v3696_v14  ;;  %v3602_v1 = vsel %vm2052_vm0, %v6929_v11, 0.0  ;;  %v3604_v14 = vsel %vm2052_vm0, %v6932_v31, 0.0 }
 0x47e   : > { %3845 = vst.msk [vmem:[%s4256_s10 + $0xbb] sm:$0xff] %vm2052_vm0, %v7038_v52  ;;  %3846 = vst.msk [vmem:[%s4256_s10 + $0xc3] sm:$0xff] %vm2052_vm0, %v6913_v44  ;;  %v3610_v15 = vsel %vm2052_vm0, %v6957_v35, 0.0  ;;  %v3665_v24 = vmul.f32 %v7020_v63, %v7020_v63  ;;  %v3666_v49 = vmul.f32 %v7024_v29, %v7024_v29  ;;  %v3667_v63 = vmul.f32 %v7034_v47, %v7034_v47 }
 0x47f   : > { %3847 = vst.msk [vmem:[%s4256_s10 + $0xcb] sm:$0xff] %vm2052_vm0, %v6920_v34  ;;  %3848 = vst.msk [vmem:[%s4256_s10 + $0xd3] sm:$0xff] %vm2052_vm0, %v6929_v11  ;;  %v3591_v30 = vadd.f32 %v3590_v18, %v3589_v40  ;;  %v3700_v48 = vadd.f32 %v3699_v19, %v3698_v56  ;;  %v3713_v18 = vsel %vm2052_vm0, %v3660_v6, 0.0  ;;  %v3606_v40 = vsel %vm2052_vm0, %v6943_v10, 0.0 }
 0x480   : > { %3849 = vst.msk [vmem:[%s4256_s10 + $0xdb] sm:$0xff] %vm2052_vm0, %v6932_v31  ;;  %3850 = vst.msk [vmem:[%s4256_s10 + $0xe3] sm:$0xff] %vm2052_vm0, %v6943_v10  ;;  %v3715_v56 = vsel %vm2052_vm0, %v3661_v53, 0.0  ;;  %v3668_v29 = vmul.f32 %v7038_v52, %v7038_v52  ;;  %v3669_v47 = vmul.f32 %v6913_v44, %v6913_v44  ;;  %v3620_v53 = vsel %vm2052_vm0, %v6988_v23, 0.0 }
 0x481   : > { %3851 = vst.msk [vmem:[%s4256_s10 + $0xeb] sm:$0xff] %vm2052_vm0, %v6946_v26  ;;  %3852 = vst.msk [vmem:[%s4256_s10 + $0xf3] sm:$0xff] %vm2052_vm0, %v6957_v35  ;;  %v3593_v7 = vadd.f32 %v3592_v21, %v3591_v30  ;;  %v3702_v61 = vadd.f32 %v3701_v5, %v3700_v48  ;;  %v3608_v5 = vsel %vm2052_vm0, %v6946_v26, 0.0  ;;  %v3717_v30 = vsel %vm2052_vm0, %v3662_v60, 0.0 }
 0x482   : > { %3853 = vst.msk [vmem:[%s4256_s10 + $0xfb] sm:$0xff] %vm2052_vm0, %v6960_v12  ;;  %3854 = vst.msk [vmem:[%s4256_s10 + $0x103] sm:$0xff] %vm2052_vm0, %v6971_v16  ;;  %v3670_v52 = vmul.f32 %v6920_v34, %v6920_v34  ;;  %v3671_v44 = vmul.f32 %v6929_v11, %v6929_v11  ;;  %v3731_v60 = vsel %vm2052_vm0, %v3669_v47, 0.0  ;;  %v3672_v34 = vmul.f32 %v6932_v31, %v6932_v31 }
 0x483   : > { %3855 = vst.msk [vmem:[%s4256_s10 + $0x10b] sm:$0xff] %vm2052_vm0, %v6974_v39  ;;  %3856 = vst.msk [vmem:[%s4256_s10 + $0x113] sm:$0xff] %vm2052_vm0, %v6985_v36  ;;  %v3595_v4 = vadd.f32 %v3594_v50, %v3593_v7  ;;  %v3704_v20 = vadd.f32 %v3703_v0, %v3702_v61  ;;  %v3719_v0 = vsel %vm2052_vm0, %v3663_v51, 0.0  ;;  %v3673_v11 = vmul.f32 %v6943_v10, %v6943_v10 }
 0x484   : > { %3857 = vst.msk [vmem:[%s4256_s10 + $0x11b] sm:$0xff] %vm2052_vm0, %v6988_v23  ;;  %3858 = vst.msk [vmem:[%s4256_s10 + $0x123] sm:$0xff] %vm2052_vm0, %v6999_v57  ;;  %v3674_v31 = vmul.f32 %v6946_v26, %v6946_v26  ;;  %v3675_v10 = vmul.f32 %v6957_v35, %v6957_v35  ;;  %v3676_v26 = vmul.f32 %v6960_v12, %v6960_v12 }
 0x485   : > { %3859 = vst.msk [vmem:[%s4256_s10 + $0x12b] sm:$0xff] %vm2052_vm0, %v7002_v13  ;;  %3860 = vst.msk [vmem:[%s4256_s10 + $0x133] sm:$0xff] %vm2052_vm0, %v7013_v32  ;;  %v3597_v17 = vadd.f32 %v3596_v37, %v3595_v4  ;;  %v3706_v8 = vadd.f32 %v3705_v2, %v3704_v20  ;;  %v3612_v37 = vsel %vm2052_vm0, %v6960_v12, 0.0  ;;  %v3614_v20 = vsel %vm2052_vm0, %v6971_v16, 0.0 }
 0x486   : > { %3861 = vst.msk [vmem:[%s4256_s10 + $0x13b] sm:$0xff] %vm2052_vm0, %v7016_v62  ;;  %3862 = vst.msk [vmem:[%s4256_s10 + $0x143] sm:$0xff] %vm2052_vm0, %v7027_v59  ;;  %v3677_v35 = vmul.f32 %v6971_v16, %v6971_v16  ;;  %v3680_v16 = vmul.f32 %v6988_v23, %v6988_v23  ;;  %v3683_v23 = vmul.f32 %v7013_v32, %v7013_v32 }
 0x487   : > { %3863 = vst.msk [vmem:[%s4256_s10 + $0x14b] sm:$0xff] %vm2052_vm0, %v7030_v41  ;;  %v3599_v43 = vadd.f32 %v3598_v42, %v3597_v17  ;;  %v3708_v28 = vadd.f32 %v3707_v27, %v3706_v8  ;;  %v3723_v42 = vsel %vm2052_vm0, %v3665_v24, 0.0  ;;  %v3616_v17 = vsel %vm2052_vm0, %v6974_v39, 0.0 }
 0x488   : > { %3864 = vst.msk [vmem:[%s4256_s10 + $0x153] sm:$0xf] %vm3634_vm10, %v7041_v33  ;;  %v3725_v8 = vsel %vm2052_vm0, %v3666_v49, 0.0  ;;  %v3630_v24 = vsel %vm2052_vm0, %v7027_v59, 0.0  ;;  %v3741_v49 = vsel %vm2052_vm0, %v3674_v31, 0.0 }
 0x489   : > { %3823 = vst.msk [vmem:[%s4256_s10 + $0x168] sm:$0x3] %vm3822_vm12, %v7752_v46  ;;  %v3709_v46 = vsel %vm2052_vm0, %v3658_v25, 0.0  ;;  %v3601_v3 = vadd.f32 %v3600_v9, %v3599_v43  ;;  %v3721_v25 = vsel %vm2052_vm0, %v3664_v58, 0.0  ;;  %v3727_v43 = vsel %vm2052_vm0, %v3667_v63, 0.0 }
 0x48a   : > { %v3710_v45 = vadd.f32 %v3709_v46, %v3708_v28  ;;  %v3618_v46 = vsel %vm2052_vm0, %v6985_v36, 0.0 }
 0x48b   : > { %v3603_v55 = vadd.f32 %v3602_v1, %v3601_v3 }
 0x48c   : > { %v3712_v19 = vadd.f32 %v3711_v22, %v3710_v45  ;;  %v3729_v22 = vsel %vm2052_vm0, %v3668_v29, 0.0  ;;  %v3679_v29 = vmul.f32 %v6985_v36, %v6985_v36  ;;  %v3682_v36 = vmul.f32 %v7002_v13, %v7002_v13 }
 0x48d   : > { %v3605_v21 = vadd.f32 %v3604_v14, %v3603_v55  ;;  %v3622_v14 = vsel %vm2052_vm0, %v6999_v57, 0.0 }
 0x48e   : > { %v3714_v38 = vadd.f32 %v3713_v18, %v3712_v19  ;;  %v3624_v19 = vsel %vm2052_vm0, %v7002_v13, 0.0  ;;  %v3757_v13 = vsel %vm2052_vm0, %v3682_v36, 0.0 }
 0x48f   : > { %v3607_v48 = vadd.f32 %v3606_v40, %v3605_v21  ;;  %v3733_v40 = vsel %vm2052_vm0, %v3670_v52, 0.0  ;;  %v3626_v21 = vsel %vm2052_vm0, %v7013_v32, 0.0  ;;  %v3753_v52 = vsel %vm2052_vm0, %v3680_v16, 0.0 }
 0x490   : > { %v3716_v50 = vadd.f32 %v3715_v56, %v3714_v38  ;;  %v3735_v38 = vsel %vm2052_vm0, %v3671_v44, 0.0  ;;  %v3759_v32 = vsel %vm2052_vm0, %v3683_v23, 0.0 }
 0x491   : > { %v3609_v7 = vadd.f32 %v3608_v5, %v3607_v48  ;;  %v3737_v48 = vsel %vm2052_vm0, %v3672_v34, 0.0 }
 0x492   : > { %v3718_v61 = vadd.f32 %v3717_v30, %v3716_v50  ;;  %v3628_v30 = vsel %vm2052_vm0, %v7016_v62, 0.0 }
 0x493   : > { %v3611_v2 = vadd.f32 %v3610_v15, %v3609_v7 }
 0x494   : > { %v3720_v4 = vadd.f32 %v3719_v0, %v3718_v61  ;;  %v3739_v0 = vsel %vm2052_vm0, %v3673_v11, 0.0 }
 0x495   : > { %v3613_v54 = vadd.f32 %v3612_v37, %v3611_v2  ;;  %v3632_v37 = vsel %vm2052_vm0, %v7030_v41, 0.0 }
 0x496   : > { %v3722_v27 = vadd.f32 %v3721_v25, %v3720_v4  ;;  %v3635_v4 = vsel %vm3634_vm10, %v7041_v33, 0.0 }
 0x497   : > { %v3615_v9 = vadd.f32 %v3614_v20, %v3613_v54  ;;  %v3743_v20 = vsel %vm2052_vm0, %v3675_v10, 0.0  ;;  %v3678_v54 = vmul.f32 %v6974_v39, %v6974_v39  ;;  %v3681_v39 = vmul.f32 %v6999_v57, %v6999_v57  ;;  %v3554_v57 = vld [vmem:[%s7538_s6] sm:$0x1] }
 0x498   : > { %v3724_v6 = vadd.f32 %v3723_v42, %v3722_v27  ;;  %v3745_v27 = vsel %vm2052_vm0, %v3676_v26, 0.0  ;;  %v3646_v10 = vld [vmem:[%s7539_s7] sm:$0x1] }
 0x499   : > { %v3617_v28 = vadd.f32 %v3616_v17, %v3615_v9 }
 0x49a   : > { %v3726_v1 = vadd.f32 %v3725_v8, %v3724_v6  ;;  %v3747_v8 = vsel %vm2052_vm0, %v3677_v35, 0.0 }
 0x49b   : > { %v3619_v3 = vadd.f32 %v3618_v46, %v3617_v28  ;;  %v3749_v46 = vsel %vm2052_vm0, %v3678_v54, 0.0  ;;  %v3751_v28 = vsel %vm2052_vm0, %v3679_v29, 0.0 }
 0x49c   : > { %v3728_v45 = vadd.f32 %v3727_v43, %v3726_v1 }
 0x49d   : > { %v3621_v18 = vadd.f32 %v3620_v53, %v3619_v3 }
 0x49e   : > { %v3730_v55 = vadd.f32 %v3729_v22, %v3728_v45  ;;  %v3755_v45 = vsel %vm2052_vm0, %v3681_v39, 0.0 }
 0x49f   : > { %v3623_v51 = vadd.f32 %v3622_v14, %v3621_v18 }
 0x4a0   : > { %v3732_v56 = vadd.f32 %v3731_v60, %v3730_v55  ;;  %v3684_v60 = vmul.f32 %v7016_v62, %v7016_v62 }
 0x4a1   : > { %v3625_v5 = vadd.f32 %v3624_v19, %v3623_v51  ;;  %v3685_v19 = vmul.f32 %v7027_v59, %v7027_v59  ;;  %v3686_v51 = vmul.f32 %v7030_v41, %v7030_v41 }
 0x4a2   : > { %v3734_v58 = vadd.f32 %v3733_v40, %v3732_v56  ;;  %v3761_v56 = vsel %vm2052_vm0, %v3684_v60, 0.0 }
 0x4a3   : > { %v3627_v50 = vadd.f32 %v3626_v21, %v3625_v5  ;;  %v3687_v21 = vmul.f32 %v7041_v33, %v7041_v33  ;;  %v3763_v59 = vsel %vm2052_vm0, %v3685_v19, 0.0 }
 0x4a4   : > { %v3736_v15 = vadd.f32 %v3735_v38, %v3734_v58  ;;  %v3765_v38 = vsel %vm2052_vm0, %v3686_v51, 0.0 }
 0x4a5   : > { %v3629_v7 = vadd.f32 %v3628_v30, %v3627_v50  ;;  %v3767_v58 = vsel %vm3634_vm10, %v3687_v21, 0.0 }
 0x4a6   : > { %v3738_v61 = vadd.f32 %v3737_v48, %v3736_v15 }
 0x4a7   : > { %v3631_v25 = vadd.f32 %v3630_v24, %v3629_v7 }
 0x4a8   : > { %v3740_v2 = vadd.f32 %v3739_v0, %v3738_v61 }
 0x4a9   : > { %v3633_v63 = vadd.f32 %v3632_v37, %v3631_v25 }
 0x4aa   : > { %v3742_v42 = vadd.f32 %v3741_v49, %v3740_v2 }
 0x4ab   : > { %v3636_v12 = vadd.f32 %v3635_v4, %v3633_v63 }
 0x4ac   : > { %v3744_v17 = vadd.f32 %v3743_v20, %v3742_v42 }
 0x4ad   : > { %v3637_v9 = vrot.slane %v3636_v12, 4 }
 0x4ae   : > { %v3746_v6 = vadd.f32 %v3745_v27, %v3744_v17 }
 0x4af   : > { %v3638_v47 = vadd.f32 %v3637_v9, %v3636_v12 }
 0x4b0   : > { %v3748_v43 = vadd.f32 %v3747_v8, %v3746_v6 }
 0x4b1   : > { %v3639_v1 = vrot.slane %v3638_v47, 2 }
 0x4b2   : > { %v3750_v53 = vadd.f32 %v3749_v46, %v3748_v43 }
 0x4b3   : > { %v3640_v22 = vadd.f32 %v3639_v1, %v3638_v47 }
 0x4b4   : > { %v3752_v3 = vadd.f32 %v3751_v28, %v3750_v53 }
 0x4b5   : > { %v3641_v14 = vrot.slane %v3640_v22, 1 }
 0x4b6   : > { %v3754_v44 = vadd.f32 %v3753_v52, %v3752_v3 }
 0x4b7   : > { %v3642_v18 = vadd.f32 %v3641_v14, %v3640_v22 }
 0x4b8   : > { %v3756_v55 = vadd.f32 %v3755_v45, %v3754_v44 }
 0x4b9   : > { %v3643_v34 = vadd.f32 %v3642_v18, %v3554_v57 }
 0x4ba   : > { %v3758_v40 = vadd.f32 %v3757_v13, %v3756_v55 }
 0x4bb   : > { %3645 = vst.msk [vmem:[%s7538_s6] sm:$0x1] %vm3644_vm14, %v3643_v34 }
 0x4bc   : > { %v3760_v62 = vadd.f32 %v3759_v32, %v3758_v40 }
 0x4be   : > { %v3762_v11 = vadd.f32 %v3761_v56, %v3760_v62 }
 0x4c0   : > { %v3764_v5 = vadd.f32 %v3763_v59, %v3762_v11 }
 0x4c2   : > { %v3766_v41 = vadd.f32 %v3765_v38, %v3764_v5 }
 0x4c4   : > { %v3768_v30 = vadd.f32 %v3767_v58, %v3766_v41 }
 0x4c6   : > { %v3769_v31 = vrot.slane %v3768_v30, 4 }
 0x4c8   : > { %v3770_v48 = vadd.f32 %v3769_v31, %v3768_v30 }
 0x4ca   : > { %v3771_v50 = vrot.slane %v3770_v48, 2 }
 0x4cc   : > { %v3772_v15 = vadd.f32 %v3771_v50, %v3770_v48 }
 0x4ce   : > { %v3773_v24 = vrot.slane %v3772_v15, 1 }
 0x4d0   : > { %v3774_v33 = vadd.f32 %v3773_v24, %v3772_v15 }
 0x4d2   : > { %v3775_v0 = vadd.f32 %v3774_v33, %v3646_v10 }
 0x4d4   : > { %3776 = vst.msk [vmem:[%s7539_s7] sm:$0x1] %vm3644_vm14, %v3775_v0 }
 0x4d5 PF: > { %s18_s24 = sadd.s32 1, %s4169_s24  }
 0x4d6   : > { %p15_p5 = scmp.ge.s32.totalorder %s18_s24, 4  }
 0x4d8   :  { %17 = sbr.rel (!%p15_p5) target bundleno = 1 (0x1), region = 93 }

// kernel: upconv_block_forward.6
= control target key start
LH: loop header
LB: loop body
LE: loop exit
PB: predicated region body
PF: predicated region fallthrough
CT: control target
= control target key end

     0   :  { %s3782_s27 = smov 0   ;;  %s6728_s0 = inlined_call_operand.vmem [shape: f32[2,362,8], index: 0, kind: input, shape index: {}]   ;;  %s6729_s1 = inlined_call_operand.vmem [shape: f32[1,8], index: 1, kind: input, shape index: {}]   ;;  %s6730_s2 = inlined_call_operand.vmem [shape: f32[1,8], index: 2, kind: input, shape index: {}]   ;;  %s6731_s3 = inlined_call_operand.vmem [shape: f32[362,1], index: 3, kind: input, shape index: {}]   ;;  %s6732_s4 = inlined_call_operand.vmem [shape: bf16[72,8], index: 4, kind: input, shape index: {}]   ;;  %s6733_s5 = inlined_call_operand.vmem [shape: f32[1,8], index: 5, kind: input, shape index: {}]   ;;  %s6734_s6 = inlined_call_operand.vmem [shape: f32[2,324,8], index: 6, kind: output, shape index: {0}]   ;;  %s6735_s7 = inlined_call_operand.vmem [shape: f32[1,8], index: 7, kind: output, shape index: {1}]   ;;  %s6736_s8 = inlined_call_operand.vmem [shape: f32[1,8], index: 8, kind: output, shape index: {2}]  }
   0x1 LB: > { %s3788_s28 = sadd.s32 4294967295, %s3723_s27   ;;  %p3350_p0 = scmp.ge.s32.totalorder %s3723_s27, 1  ;;  %s3723_s27 = sphi %s3782_s27, %s19_s27  }
   0x2   : > { %p257_p1 = scmp.lt.s32.totalorder %s3723_s27, 3 }
   0x4   : > { %p258_p2 = pnand %p3350_p0, %p257_p1 }
   0x6   : > { %261 = sbr.rel (%p258_p2) target bundleno = 999 (0x3e7), region = 44 }
   0xd   : > { %v502_v0 = vld [vmem:[%s6731_s3 + $0x10] sm:$0xff]  ;;  %v500_v1 = vld [vmem:[%s6731_s3] sm:$0xff]  ;;  %v3725_v2 = vmov 0   ;;  %v503_v3 = vld [vmem:[%s6731_s3 + $0x18] sm:$0xff]  ;;  %p291_p3 = scmp.lt.s32.totalorder %s3788_s28, 1  ;;  %vm1006_vm0 = vcmask 60416  }
   0xe   : > { %3663 = vset.pattern.permute.xlu1 %v3725_v2  ;;  %3662 = vset.pattern.permute.xlu0 %v3725_v2  ;;  %v501_v4 = vld [vmem:[%s6731_s3 + $0x8] sm:$0xff]  ;;  %v504_v6 = vld [vmem:[%s6731_s3 + $0x20] sm:$0xff]  ;;  %v507_v7 = vld [vmem:[%s6731_s3 + $0x38] sm:$0xff]  ;;  %vm1427_vm1 = vcmask 1046528   ;;  %s3726_s18 = smov 16   ;;  %s3727_s19 = smov 8  }
   0xf   : > { %558 = vperm.xlu1 %3663, %v502_v0   ;;  %548 = vperm.xlu0 %3662, %v500_v1   ;;  %v505_v5 = vld [vmem:[%s6731_s3 + $0x28] sm:$0xff]  ;;  %v506_v8 = vld [vmem:[%s6731_s3 + $0x30] sm:$0xff]  ;;  %v508_v10 = vld [vmem:[%s6731_s3 + $0x40] sm:$0xff]  ;;  %s3836_s15 = scalar_select %p291_p3, %s3788_s28, 1  ;;  %vm1573_vm2 = vsmask.f32 6400 }
  0x10   : > { %v509_v9 = vld [vmem:[%s6731_s3 + $0x48] sm:$0xff]  ;;  %v511_v11 = vld [vmem:[%s6731_s3 + $0x58] sm:$0xff]  ;;  %v510_v12 = vld [vmem:[%s6731_s3 + $0x50] sm:$0xff]  ;;  %vm1214_vm3 = vsmask.f32 7424  ;;  %vm1052_vm5 = vcmask 57344  }
  0x11   : > { %v513_v13 = vld [vmem:[%s6731_s3 + $0x68] sm:$0xff]  ;;  %v512_v14 = vld [vmem:[%s6731_s3 + $0x60] sm:$0xff]  ;;  %s3641_s16 = smul.u32 328, %s3836_s15  ;;  %v515_v15 = vld [vmem:[%s6731_s3 + $0x78] sm:$0xff]  ;;  %vm1861_vm4 = vsmask.f32 5376 }
  0x12   : > { %v514_v16 = vld [vmem:[%s6731_s3 + $0x70] sm:$0xff]  ;;  %v517_v17 = vld [vmem:[%s6731_s3 + $0x88] sm:$0xff]  ;;  %v516_v18 = vld [vmem:[%s6731_s3 + $0x80] sm:$0xff]  ;;  %s3640_s10 = smul.u32 368, %s3836_s15  ;;  %s3728_s20 = smov 24   ;;  %vm2005_vm6 = vcmask 1044480  }
  0x13   : > { %563 = vperm.xlu1 %3663, %v503_v3   ;;  %553 = vperm.xlu0 %3662, %v501_v4   ;;  %s3848_s23 = scalar_lea.vmem %s6734_s6, %s3641_s16  ;;  %v519_v19 = vld [vmem:[%s6731_s3 + $0x98] sm:$0xff]  ;;  %v518_v20 = vld [vmem:[%s6731_s3 + $0x90] sm:$0xff]  ;;  %v521_v21 = vld [vmem:[%s6731_s3 + $0xa8] sm:$0xff]  ;;  %s3729_s21 = smov 32   ;;  %vm1717_vm7 = vcmask 1045504   ;;  %vm2561_vm8 = vcmask 1043456  }
  0x14   : > { %v520_v22 = vld [vmem:[%s6731_s3 + $0xa0] sm:$0xff]  ;;  %v523_v23 = vld [vmem:[%s6731_s3 + $0xb8] sm:$0xff]  ;;  %v522_v24 = vld [vmem:[%s6731_s3 + $0xb0] sm:$0xff]  ;;  %s3944_s13 = scalar_lea.vmem %s6728_s0, %s3640_s10  ;;  %s3730_s22 = smov 40   ;;  %vm3735_vm9 = vmmov 0   ;;  %vm2089_vm10 = vcmask 64512  }
  0x15   : > { %v525_v25 = vld [vmem:[%s6731_s3 + $0xc8] sm:$0xff]  ;;  %v524_v26 = vld [vmem:[%s6731_s3 + $0xc0] sm:$0xff]  ;;  %v527_v27 = vld [vmem:[%s6731_s3 + $0xd8] sm:$0xff]  ;;  %s3731_s24 = smov 56   ;;  %s3732_s25 = smov 48   ;;  %vm2133_vm11 = vcmask 130048  }
  0x16   : > { %v526_v28 = vld [vmem:[%s6731_s3 + $0xd0] sm:$0xff]  ;;  %v529_v29 = vld [vmem:[%s6731_s3 + $0xe8] sm:$0xff]  ;;  %v528_v30 = vld [vmem:[%s6731_s3 + $0xe0] sm:$0xff]  ;;  %s3734_s30 = smov 64   ;;  %vm2176_vm12 = vcmask 195584   ;;  %vm2219_vm13 = vcmask 261120  }
  0x17   : > { %573 = vperm.xlu1 %3663, %v505_v5   ;;  %568 = vperm.xlu0 %3662, %v504_v6   ;;  %v531_v31 = vld [vmem:[%s6731_s3 + $0xf8] sm:$0xff]  ;;  %v530_v32 = vld [vmem:[%s6731_s3 + $0xf0] sm:$0xff]  ;;  %v533_v33 = vld [vmem:[%s6731_s3 + $0x108] sm:$0xff]  ;;  %vm2262_vm14 = vcmask 326656   ;;  %vm2305_vm15 = vcmask 392192   ;;  %p3461_p4 = scmp.ne.s32.totalorder %s3788_s28, 0 }
  0x18   : > { %v532_v34 = vld [vmem:[%s6731_s3 + $0x100] sm:$0xff]  ;;  %v535_v35 = vld [vmem:[%s6731_s3 + $0x118] sm:$0xff]  ;;  %v534_v36 = vld [vmem:[%s6731_s3 + $0x110] sm:$0xff] }
  0x19   : > { %v537_v37 = vld [vmem:[%s6731_s3 + $0x128] sm:$0xff]  ;;  %v536_v38 = vld [vmem:[%s6731_s3 + $0x120] sm:$0xff]  ;;  %v539_v39 = vld [vmem:[%s6731_s3 + $0x138] sm:$0xff] }
  0x1a   : > { %v538_v40 = vld [vmem:[%s6731_s3 + $0x130] sm:$0xff]  ;;  %v541_v41 = vld [vmem:[%s6731_s3 + $0x148] sm:$0xff]  ;;  %v540_v42 = vld [vmem:[%s6731_s3 + $0x140] sm:$0xff] }
  0x1b   : > { %583 = vperm.xlu1 %3663, %v507_v7   ;;  %578 = vperm.xlu0 %3662, %v506_v8   ;;  %v543_v43 = vld [vmem:[%s6731_s3 + $0x158] sm:$0xff]  ;;  %v542_v44 = vld [vmem:[%s6731_s3 + $0x150] sm:$0xff]  ;;  %v545_v45 = vld [vmem:[%s6731_s3 + $0x168] sm:$0x3] }
  0x1c   : > { %v544_v46 = vld [vmem:[%s6731_s3 + $0x160] sm:$0xff]  ;;  %v304_v47 = vld [vmem:[%s3944_s13 + $0x10] sm:$0xff]  ;;  %v305_v53 = vld [vmem:[%s3944_s13 + $0x18] sm:$0xff] }
  0x1d   : > { %v3950_v48 = vld [vmem:[%s6729_s1] ss:$0 sm:$0xff]  ;;  %v303_v54 = vld [vmem:[%s3944_s13 + $0x8] sm:$0xff]  ;;  %v309_v57 = vld [vmem:[%s3944_s13 + $0x38] sm:$0xff] }
  0x1e   : > { %v302_v49 = vld [vmem:[%s3944_s13] sm:$0xff]  ;;  %v357_v50 = vmul.f32 %v3950_v48, %v304_v47  ;;  %v307_v55 = vld [vmem:[%s3944_s13 + $0x28] sm:$0xff]  ;;  %v358_v60 = vmul.f32 %v3950_v48, %v305_v53  ;;  %v356_v61 = vmul.f32 %v3950_v48, %v303_v54  ;;  %v362_v0 = vmul.f32 %v3950_v48, %v309_v57  ;;  %v308_v1 = vld [vmem:[%s3944_s13 + $0x30] sm:$0xff] }
  0x1f   : > { %593 = vperm.xlu1 %3663, %v509_v9   ;;  %588 = vperm.xlu0 %3662, %v508_v10   ;;  %v355_v51 = vmul.f32 %v3950_v48, %v302_v49  ;;  %v3958_v52 = vld [vmem:[%s6730_s2] ss:$0 sm:$0xff]  ;;  %v360_v62 = vmul.f32 %v3950_v48, %v307_v55  ;;  %v311_v6 = vld [vmem:[%s3944_s13 + $0x48] sm:$0xff]  ;;  %v361_v8 = vmul.f32 %v3950_v48, %v308_v1  ;;  %v320_v55 = vld [vmem:[%s3944_s13 + $0x90] sm:$0xff] }
  0x20   : > { %v306_v56 = vld [vmem:[%s3944_s13 + $0x20] sm:$0xff]  ;;  %v410_v58 = vadd.f32 %v3958_v52, %v357_v50  ;;  %v411_v4 = vadd.f32 %v3958_v52, %v358_v60  ;;  %v409_v5 = vadd.f32 %v3958_v52, %v356_v61  ;;  %v3980_v10 = vadd.f32 %v3958_v52, %v362_v0 }
  0x21   : > { %v408_v59 = vadd.f32 %v3958_v52, %v355_v51  ;;  %v359_v63 = vmul.f32 %v3950_v48, %v306_v56  ;;  %v413_v7 = vadd.f32 %v3958_v52, %v360_v62 }
  0x22   : > { %v456_v2 = vmax.f32 %v410_v58, 0.0 }
  0x23   : > { %603 = vperm.xlu1 %3663, %v511_v11   ;;  %598 = vperm.xlu0 %3662, %v510_v12   ;;  %v454_v3 = vmax.f32 %v408_v59, 0.0  ;;  %v412_v9 = vadd.f32 %v3958_v52, %v359_v63  ;;  %v310_v11 = vld [vmem:[%s3944_s13 + $0x40] sm:$0xff] }
  0x27   : > { %613 = vperm.xlu1 %3663, %v513_v13   ;;  %608 = vperm.xlu0 %3662, %v512_v14   ;;  %v364_v14 = vmul.f32 %v3950_v48, %v311_v6  ;;  %v373_v6 = vmul.f32 %v3950_v48, %v320_v55 }
  0x2b   : > { %623 = vperm.xlu1 %3663, %v515_v15   ;;  %618 = vperm.xlu0 %3662, %v514_v16  }
  0x2f   : > { %633 = vperm.xlu1 %3663, %v517_v17   ;;  %628 = vperm.xlu0 %3662, %v516_v18   ;;  %v457_v17 = vmax.f32 %v411_v4, 0.0  ;;  %v455_v18 = vmax.f32 %v409_v5, 0.0 }
  0x33   : > { %643 = vperm.xlu1 %3663, %v519_v19   ;;  %638 = vperm.xlu0 %3662, %v518_v20   ;;  %v313_v19 = vld [vmem:[%s3944_s13 + $0x58] sm:$0xff]  ;;  %v312_v20 = vld [vmem:[%s3944_s13 + $0x50] sm:$0xff] }
  0x37   : > { %653 = vperm.xlu1 %3663, %v521_v21   ;;  %648 = vperm.xlu0 %3662, %v520_v22   ;;  %v315_v21 = vld [vmem:[%s3944_s13 + $0x68] sm:$0xff]  ;;  %v459_v22 = vmax.f32 %v413_v7, 0.0 }
  0x3b   : > { %663 = vperm.xlu1 %3663, %v523_v23   ;;  %658 = vperm.xlu0 %3662, %v522_v24   ;;  %v3988_v23 = vadd.f32 %v3958_v52, %v361_v8  ;;  %v363_v24 = vmul.f32 %v3950_v48, %v310_v11  ;;  %v322_v11 = vld [vmem:[%s3944_s13 + $0xa0] sm:$0xff] }
  0x3f   : > { %673 = vperm.xlu1 %3663, %v525_v25   ;;  %668 = vperm.xlu0 %3662, %v524_v26   ;;  %v314_v25 = vld [vmem:[%s3944_s13 + $0x60] sm:$0xff]  ;;  %v317_v26 = vld [vmem:[%s3944_s13 + $0x78] sm:$0xff] }
  0x43   : > { %683 = vperm.xlu1 %3663, %v527_v27   ;;  %678 = vperm.xlu0 %3662, %v526_v28  }
  0x47   : > { %693 = vperm.xlu1 %3663, %v529_v29   ;;  %688 = vperm.xlu0 %3662, %v528_v30   ;;  %v458_v29 = vmax.f32 %v412_v9, 0.0  ;;  %v461_v30 = vmax.f32 %v3980_v10, 0.0 }
  0x4b   : > { %703 = vperm.xlu1 %3663, %v531_v31   ;;  %698 = vperm.xlu0 %3662, %v530_v32   ;;  %v316_v31 = vld [vmem:[%s3944_s13 + $0x70] sm:$0xff]  ;;  %v319_v32 = vld [vmem:[%s3944_s13 + $0x88] sm:$0xff] }
  0x4c   : > { %v369_v47 = vmul.f32 %v3950_v48, %v316_v31  ;;  %v372_v49 = vmul.f32 %v3950_v48, %v319_v32  ;;  %v324_v32 = vld [vmem:[%s3944_s13 + $0xb0] sm:$0xff] }
  0x4e   : > { %v4038_v4 = vadd.f32 %v3958_v52, %v369_v47  ;;  %v4041_v5 = vadd.f32 %v3958_v52, %v372_v49 }
  0x4f   : > { %713 = vperm.xlu1 %3663, %v533_v33   ;;  %708 = vperm.xlu0 %3662, %v532_v34  }
  0x53   : > { %723 = vperm.xlu1 %3663, %v535_v35   ;;  %718 = vperm.xlu0 %3662, %v534_v36   ;;  %v3997_v35 = vadd.f32 %v3958_v52, %v364_v14  ;;  %v366_v36 = vmul.f32 %v3950_v48, %v313_v19 }
  0x55   : > { %v463_v58 = vmax.f32 %v3997_v35, 0.0  ;;  %v4019_v59 = vadd.f32 %v3958_v52, %v366_v36 }
  0x57   : > { %733 = vperm.xlu1 %3663, %v537_v37   ;;  %728 = vperm.xlu0 %3662, %v536_v38   ;;  %v365_v37 = vmul.f32 %v3950_v48, %v312_v20  ;;  %v368_v38 = vmul.f32 %v3950_v48, %v315_v21  ;;  %v465_v14 = vmax.f32 %v4019_v59, 0.0 }
  0x59   : > { %v4022_v60 = vadd.f32 %v3958_v52, %v365_v37  ;;  %v4025_v61 = vadd.f32 %v3958_v52, %v368_v38 }
  0x5b   : > { %743 = vperm.xlu1 %3663, %v539_v39   ;;  %738 = vperm.xlu0 %3662, %v538_v40   ;;  %v318_v39 = vld [vmem:[%s3944_s13 + $0x80] sm:$0xff]  ;;  %v321_v40 = vld [vmem:[%s3944_s13 + $0x98] sm:$0xff] }
  0x5c   : > { %v371_v53 = vmul.f32 %v3950_v48, %v318_v39  ;;  %v374_v54 = vmul.f32 %v3950_v48, %v321_v40 }
  0x5e   : > { %v4045_v9 = vadd.f32 %v3958_v52, %v371_v53  ;;  %v4048_v10 = vadd.f32 %v3958_v52, %v374_v54 }
  0x5f   : > { %753 = vperm.xlu1 %3663, %v541_v41   ;;  %748 = vperm.xlu0 %3662, %v540_v42  }
  0x60   : > { %v473_v31 = vmax.f32 %v4048_v10, 0.0 }
  0x63   : > { %763 = vperm.xlu1 %3663, %v543_v43   ;;  %758 = vperm.xlu0 %3662, %v542_v44   ;;  %v367_v43 = vmul.f32 %v3950_v48, %v314_v25  ;;  %v370_v44 = vmul.f32 %v3950_v48, %v317_v26  ;;  %v471_v25 = vmax.f32 %v4041_v5, 0.0  ;;  %v4063_v26 = vadd.f32 %v3958_v52, %v373_v6 }
  0x65   : > { %v4030_v0 = vadd.f32 %v3958_v52, %v367_v43  ;;  %v4033_v1 = vadd.f32 %v3958_v52, %v370_v44  ;;  %v472_v47 = vmax.f32 %v4063_v26, 0.0 }
  0x67   : > { %773 = vperm.xlu1 %3663, %v545_v45   ;;  %768 = vperm.xlu0 %3662, %v544_v46   ;;  %v460_v45 = vmax.f32 %v3988_v23, 0.0  ;;  %v4010_v46 = vadd.f32 %v3958_v52, %v363_v24  ;;  %v466_v20 = vmax.f32 %v4030_v0, 0.0  ;;  %v469_v21 = vmax.f32 %v4033_v1, 0.0 }
  0x68   : > { %v468_v24 = vmax.f32 %v4038_v4, 0.0 }
  0x8e   : > { %v559_v12 = vpop.permute.xlu1 %558  ;;  %v549_v13 = vpop.permute.xlu0 %548 }
  0x8f   : > { %v778_v15 = vmul.f32 %v559_v12, %v456_v2  ;;  %v776_v16 = vmul.f32 %v549_v13, %v454_v3  ;;  %v323_v2 = vld [vmem:[%s3944_s13 + $0xa8] sm:$0xff]  ;;  %v462_v3 = vmax.f32 %v4010_v46, 0.0  ;;  %v329_v46 = vld [vmem:[%s3944_s13 + $0xd8] sm:$0xff] }
  0x91   : > { %v3466_v27 = vpack.c.bf16 %v778_v15, %v778_v15  ;;  %v3464_v28 = vpack.c.bf16 %v776_v16, %v776_v16  ;;  %v464_v15 = vmax.f32 %v4022_v60, 0.0  ;;  %v467_v16 = vmax.f32 %v4025_v61, 0.0 }
  0x92   : > { %v564_v33 = vpop.permute.xlu1 %563  ;;  %v554_v34 = vpop.permute.xlu0 %553 }
  0x93   : > { %1009 = vst.msk [vmem:[#allocation2 + $0x8] sm:$0xf] %vm1006_vm0, %v3466_v27  ;;  %1007 = vst.msk [vmem:[#allocation2] sm:$0xf] %vm1006_vm0, %v3464_v28  ;;  %v779_v41 = vmul.f32 %v564_v33, %v457_v17  ;;  %v777_v42 = vmul.f32 %v554_v34, %v455_v18  ;;  %v376_v17 = vmul.f32 %v3950_v48, %v323_v2  ;;  %v327_v33 = vld [vmem:[%s3944_s13 + $0xc8] sm:$0xff] }
  0x94   : > { %v375_v27 = vmul.f32 %v3950_v48, %v322_v11 }
  0x95   : > { %v3467_v50 = vpack.c.bf16 %v779_v41, %v779_v41  ;;  %v3465_v51 = vpack.c.bf16 %v777_v42, %v777_v42  ;;  %v4073_v39 = vadd.f32 %v3958_v52, %v376_v17 }
  0x96   : > { %v574_v56 = vpop.permute.xlu1 %573  ;;  %v569_v57 = vpop.permute.xlu0 %568  ;;  %v4085_v49 = vadd.f32 %v3958_v52, %v375_v27 }
  0x97   : > { %1010 = vst.msk [vmem:[#allocation2 + $0xc] sm:$0xf] %vm1006_vm0, %v3467_v50  ;;  %1008 = vst.msk [vmem:[#allocation2 + $0x4] sm:$0xf] %vm1006_vm0, %v3465_v51  ;;  %v781_v62 = vmul.f32 %v574_v56, %v459_v22  ;;  %v780_v63 = vmul.f32 %v569_v57, %v458_v29  ;;  %v325_v22 = vld [vmem:[%s3944_s13 + $0xb8] sm:$0xff]  ;;  %v377_v50 = vmul.f32 %v3950_v48, %v324_v32  ;;  %v328_v57 = vld [vmem:[%s3944_s13 + $0xd0] sm:$0xff] }
  0x98   : > { %v378_v40 = vmul.f32 %v3950_v48, %v325_v22  ;;  %v380_v51 = vmul.f32 %v3950_v48, %v327_v33  ;;  %v475_v2 = vmax.f32 %v4073_v39, 0.0  ;;  %v381_v22 = vmul.f32 %v3950_v48, %v328_v57 }
  0x99   : > { %v3469_v7 = vpack.c.bf16 %v781_v62, %v781_v62  ;;  %v3468_v8 = vpack.c.bf16 %v780_v63, %v780_v63 }
  0x9a   : > { %v584_v12 = vpop.permute.xlu1 %583  ;;  %v579_v13 = vpop.permute.xlu0 %578  ;;  %v1056_v23 = vld [vmem:[#allocation2 + $0x8] sm:$0xf]  ;;  %v1096_v38 = vld [vmem:[#allocation2] sm:$0xe] }
  0x9b   : > { %1012 = vst.msk [vmem:[#allocation2 + $0x14] sm:$0xf] %vm1006_vm0, %v3469_v7  ;;  %1011 = vst.msk [vmem:[#allocation2 + $0x10] sm:$0xf] %vm1006_vm0, %v3468_v8  ;;  %v783_v18 = vmul.f32 %v584_v12, %v461_v30  ;;  %v782_v19 = vmul.f32 %v579_v13, %v460_v45  ;;  %v470_v30 = vmax.f32 %v4045_v9, 0.0  ;;  %v326_v45 = vld [vmem:[%s3944_s13 + $0xc0] sm:$0xff]  ;;  %v382_v7 = vmul.f32 %v3950_v48, %v329_v46 }
  0x9c   : > { %v379_v6 = vmul.f32 %v3950_v48, %v326_v45  ;;  %v1097_v17 = vld [vmem:[#allocation2 + $0x8] sm:$0xe]  ;;  %v4142_v46 = vadd.f32 %v3958_v52, %v381_v22 }
  0x9d   : > { %v3471_v28 = vpack.c.bf16 %v783_v18, %v783_v18  ;;  %v3470_v29 = vpack.c.bf16 %v782_v19, %v782_v19  ;;  %v474_v18 = vmax.f32 %v4085_v49, 0.0  ;;  %v4109_v19 = vadd.f32 %v3958_v52, %v377_v50 }
  0x9e   : > { %v594_v34 = vpop.permute.xlu1 %593  ;;  %v589_v35 = vpop.permute.xlu0 %588  ;;  %v4070_v36 = vld [vmem:[#allocation2 + $0x4] sm:$0xf]  ;;  %v1057_v37 = vld [vmem:[#allocation2 + $0xc] sm:$0xf]  ;;  %v4137_v45 = vadd.f32 %v3958_v52, %v382_v7  ;;  %v480_v7 = vmax.f32 %v4142_v46, 0.0 }
  0x9f   : > { %1014 = vst.msk [vmem:[#allocation2 + $0x1c] sm:$0xf] %vm1006_vm0, %v3471_v28  ;;  %1013 = vst.msk [vmem:[#allocation2 + $0x18] sm:$0xf] %vm1006_vm0, %v3470_v29  ;;  %v785_v41 = vmul.f32 %v594_v34, %v463_v58  ;;  %v784_v42 = vmul.f32 %v589_v35, %v462_v3  ;;  %v4078_v43 = vcombine.low %v1056_v23, %v1057_v37  ;;  %v331_v58 = vld [vmem:[%s3944_s13 + $0xe8] sm:$0xff]  ;;  %v330_v29 = vld [vmem:[%s3944_s13 + $0xe0] sm:$0xff] }
  0xa0   : > { %v3423_v44 = vcombine.low %v1096_v38, %v4070_v36  ;;  %v4096_v3 = vadd.f32 %v3958_v52, %v378_v40  ;;  %v384_v23 = vmul.f32 %v3950_v48, %v331_v58  ;;  %v4117_v28 = vadd.f32 %v3958_v52, %v380_v51 }
  0xa1   : > { %6807 = vst [vmem:[#allocation3_spill] sm:$0xff] %v4078_v43  ;;  %v3473_v53 = vpack.c.bf16 %v785_v41, %v785_v41  ;;  %v3472_v54 = vpack.c.bf16 %v784_v42, %v784_v42  ;;  %v1429_v56 = vrot.slane %v4078_v43, 1  ;;  %v4124_v38 = vadd.f32 %v3958_v52, %v379_v6 }
  0xa2   : > { %v1428_v55 = vrot.slane %v3423_v44, 1  ;;  %v604_v59 = vpop.permute.xlu1 %603  ;;  %v599_v60 = vpop.permute.xlu0 %598  ;;  %v1058_v62 = vld [vmem:[#allocation2 + $0x10] sm:$0xf]  ;;  %v4092_v63 = vld [vmem:[#allocation2 + $0x14] sm:$0xf]  ;;  %v477_v35 = vmax.f32 %v4096_v3, 0.0  ;;  %v4126_v40 = vcombine.low %v1097_v17, %v1057_v37  ;;  %v4145_v50 = vadd.f32 %v3958_v52, %v384_v23 }
  0xa3   : > { %1016 = vst.msk [vmem:[#allocation2 + $0x24] sm:$0xf] %vm1006_vm0, %v3473_v53  ;;  %1015 = vst.msk [vmem:[#allocation2 + $0x20] sm:$0xf] %vm1006_vm0, %v3472_v54  ;;  %v787_v8 = vmul.f32 %v604_v59, %v465_v14  ;;  %v786_v11 = vmul.f32 %v599_v60, %v464_v15  ;;  %v4104_v13 = vcombine.low %v1058_v62, %v4092_v63  ;;  %v479_v51 = vmax.f32 %v4117_v28, 0.0 }
  0xa4   : > { %v1430_v12 = vsel %vm1427_vm1, %v1428_v55, %v1429_v56  ;;  %v383_v61 = vmul.f32 %v3950_v48, %v330_v29  ;;  %v1575_v57 = vshrl.u32 %v4126_v40, 16  ;;  %v478_v60 = vmax.f32 %v4124_v38, 0.0 }
  0xa5   : > { %6808 = vst [vmem:[#allocation4_spill] sm:$0xff] %v4104_v13  ;;  %1469 = vrot.lane.b32.xlu1 %v1430_v12, %s3726_s18  ;;  %v3475_v14 = vpack.c.bf16 %v787_v8, %v787_v8  ;;  %v3474_v15 = vpack.c.bf16 %v786_v11, %v786_v11  ;;  %v4114_v27 = vrot.slane %v4104_v13, 1  ;;  %v481_v62 = vmax.f32 %v4137_v45, 0.0  ;;  %v335_v12 = vld [vmem:[%s3944_s13 + $0x108] sm:$0xff] }
  0xa6   : > { %v614_v32 = vpop.permute.xlu1 %613  ;;  %v609_v33 = vpop.permute.xlu0 %608  ;;  %v4120_v34 = vld [vmem:[#allocation2 + $0x18] sm:$0xff]   ;;  %v483_v8 = vmax.f32 %v4145_v50, 0.0  ;;  %v4171_v11 = vadd.f32 %v3958_v52, %v383_v61  ;;  %v6737_v17 = vshrl.u32 %v4104_v13, 16  ;;  %v1578_v22 = vshll.u32 %v4126_v40, 16 }
  0xa7   : > { %1018 = vst.msk [vmem:[#allocation2 + $0x2c] sm:$0xf] %vm1006_vm0, %v3475_v14  ;;  %1017 = vst.msk [vmem:[#allocation2 + $0x28] sm:$0xf] %vm1006_vm0, %v3474_v15  ;;  %v789_v41 = vmul.f32 %v614_v32, %v467_v16  ;;  %v788_v42 = vmul.f32 %v609_v33, %v466_v20  ;;  %v1432_v44 = vsel %vm1427_vm1, %v1429_v56, %v4114_v27  ;;  %v1433_v37 = vrot.slane %v4120_v34, 1 }
  0xa8   : > { %1471 = vrot.lane.b32.xlu0 %v1432_v44, %s3726_s18  ;;  %v476_v20 = vmax.f32 %v4109_v19, 0.0  ;;  %v1577_v32 = vrot.slane %v1575_v57, 1  ;;  %v1580_v44 = vrot.slane %v1578_v22, 2  ;;  %v482_v9 = vmax.f32 %v4171_v11, 0.0 }
  0xa9   : > { %v3477_v0 = vpack.c.bf16 %v789_v41, %v789_v41  ;;  %v3476_v16 = vpack.c.bf16 %v788_v42, %v788_v42  ;;  %v4152_v55 = vsel %vm1427_vm1, %v4114_v27, %v1433_v37  ;;  %v1231_v42 = vshll.u32 %v4104_v13, 16 }
  0xaa   : > { %v624_v53 = vpop.permute.xlu1 %623  ;;  %v619_v54 = vpop.permute.xlu0 %618  ;;  %v4154_v56 = vld [vmem:[#allocation2 + $0x20] sm:$0xff]   ;;  %1473 = vrot.lane.b32.xlu1 %v4152_v55, %s3726_s18  ;;  %v1227_v19 = vshrl.u32 %v4078_v43, 16 }
  0xab   : > { %1020 = vst.msk [vmem:[#allocation2 + $0x34] sm:$0xf] %vm1006_vm0, %v3477_v0  ;;  %1019 = vst.msk [vmem:[#allocation2 + $0x30] sm:$0xf] %vm1006_vm0, %v3476_v16  ;;  %v791_v58 = vmul.f32 %v624_v53, %v469_v21  ;;  %v790_v59 = vmul.f32 %v619_v54, %v468_v24  ;;  %v1435_v6 = vrot.slane %v4154_v56, 1  ;;  %v333_v21 = vld [vmem:[%s3944_s13 + $0xf8] sm:$0xff]  ;;  %v388_v16 = vmul.f32 %v3950_v48, %v335_v12 }
  0xac   : > { %v332_v24 = vld [vmem:[%s3944_s13 + $0xf0] sm:$0xff]  ;;  %v386_v61 = vmul.f32 %v3950_v48, %v333_v21  ;;  %v1522_v12 = vrot.slane %v4126_v40, 1 }
  0xad   : > { %v3479_v1 = vpack.c.bf16 %v791_v58, %v791_v58  ;;  %v3478_v4 = vpack.c.bf16 %v790_v59, %v790_v59  ;;  %v4179_v15 = vsel %vm1427_vm1, %v1433_v37, %v1435_v6  ;;  %v385_v0 = vmul.f32 %v3950_v48, %v332_v24 }
  0xae   : > { %v634_v23 = vpop.permute.xlu1 %633  ;;  %v629_v14 = vpop.permute.xlu0 %628  ;;  %6809 = vst [vmem:[#allocation5_spill] sm:$0xff] %v4179_v15  ;;  %v4181_v29 = vld [vmem:[#allocation2 + $0x28] sm:$0xff]   ;;  %1475 = vrot.lane.b32.xlu0 %v4179_v15, %s3726_s18  ;;  %v4205_v59 = vshrl.u32 %v4120_v34, 16  ;;  %v1583_v24 = vrot.slane %v1231_v42, 2  ;;  %v4227_v26 = vadd.f32 %v3958_v52, %v388_v16  ;;  %v4243_v16 = vsel %vm1427_vm1, %v1522_v12, %v4114_v27 }
  0xaf   : > { %1022 = vst.msk [vmem:[#allocation2 + $0x3c] sm:$0xf] %vm1006_vm0, %v3479_v1  ;;  %1021 = vst.msk [vmem:[#allocation2 + $0x38] sm:$0xf] %vm1006_vm0, %v3478_v4  ;;  %v793_v33 = vmul.f32 %v634_v23, %v471_v25  ;;  %v792_v41 = vmul.f32 %v629_v14, %v470_v30  ;;  %v1437_v37 = vrot.slane %v4181_v29, 1  ;;  %v1582_v30 = vrot.slane %v6737_v17, 1 }
  0xb0   : > { %v1581_v1 = vor.u32 %v1580_v44, %v1577_v32  ;;  %v4221_v23 = vadd.f32 %v3958_v52, %v386_v61  ;;  %v4224_v10 = vadd.f32 %v3958_v52, %v385_v0  ;;  %v4230_v14 = vshll.u32 %v4120_v34, 16 }
  0xb1   : > { %v3481_v5 = vpack.c.bf16 %v793_v33, %v793_v33  ;;  %v3480_v25 = vpack.c.bf16 %v792_v41, %v792_v41  ;;  %v4200_v57 = vsel %vm1427_vm1, %v1435_v6, %v1437_v37  ;;  %v334_v6 = vld [vmem:[%s3944_s13 + $0x100] sm:$0xff]  ;;  %v1584_v32 = vor.u32 %v1583_v24, %v1582_v30 }
  0xb2   : > { %v644_v53 = vpop.permute.xlu1 %643  ;;  %v639_v54 = vpop.permute.xlu0 %638  ;;  %v4202_v58 = vld [vmem:[#allocation2 + $0x30] sm:$0xff]   ;;  %1477 = vrot.lane.b32.xlu1 %v4200_v57, %s3726_s18  ;;  %v387_v61 = vmul.f32 %v3950_v48, %v334_v6  ;;  %v4239_v0 = vshrl.u32 %v4154_v56, 16  ;;  %v484_v39 = vmax.f32 %v4224_v10, 0.0  ;;  %v338_v6 = vld [vmem:[%s3944_s13 + $0x120] sm:$0xff] }
  0xb3   : > { %1024 = vst.msk [vmem:[#allocation2 + $0x44] sm:$0xf] %vm1006_vm0, %v3481_v5  ;;  %1023 = vst.msk [vmem:[#allocation2 + $0x40] sm:$0xf] %vm1006_vm0, %v3480_v25  ;;  %v795_v4 = vmul.f32 %v644_v53, %v473_v31  ;;  %v794_v21 = vmul.f32 %v639_v54, %v472_v47  ;;  %v1439_v22 = vrot.slane %v4202_v58, 1  ;;  %v337_v5 = vld [vmem:[%s3944_s13 + $0x118] sm:$0xff]  ;;  %v4255_v27 = vsel %vm1573_vm2, %v1581_v1, %v1584_v32 }
  0xb4   : > { %v1586_v25 = vrot.slane %v4205_v59, 1  ;;  %v485_v53 = vmax.f32 %v4221_v23, 0.0  ;;  %v1587_v1 = vrot.slane %v4230_v14, 2  ;;  %v1590_v17 = vrot.slane %v4239_v0, 1 }
  0xb5   : > { %v3483_v31 = vpack.c.bf16 %v795_v4, %v795_v4  ;;  %v3482_v47 = vpack.c.bf16 %v794_v21, %v794_v21  ;;  %v4233_v41 = vsel %vm1427_vm1, %v1437_v37, %v1439_v22  ;;  %v336_v4 = vld [vmem:[%s3944_s13 + $0x110] sm:$0xff]  ;;  %v339_v21 = vld [vmem:[%s3944_s13 + $0x128] sm:$0xff] }
  0xb6   : > { %v654_v33 = vpop.permute.xlu1 %653  ;;  %v649_v40 = vpop.permute.xlu0 %648  ;;  %6810 = vst [vmem:[#allocation6_spill] sm:$0xff] %v4233_v41  ;;  %v4235_v44 = vld [vmem:[#allocation2 + $0x38] sm:$0xff]   ;;  %1479 = vrot.lane.b32.xlu0 %v4233_v41, %s3726_s18 }
  0xb7   : > { %1026 = vst.msk [vmem:[#allocation2 + $0x4c] sm:$0xf] %vm1006_vm0, %v3483_v31  ;;  %1025 = vst.msk [vmem:[#allocation2 + $0x48] sm:$0xf] %vm1006_vm0, %v3482_v47  ;;  %v797_v34 = vmul.f32 %v654_v33, %v475_v2  ;;  %v796_v37 = vmul.f32 %v649_v40, %v474_v18  ;;  %v1441_v30 = vrot.slane %v4235_v44, 1  ;;  %v4263_v18 = vshll.u32 %v4154_v56, 16 }
  0xb8   : > { %v1223_v33 = vshll.u32 %v4078_v43, 16  ;;  %v4276_v40 = vadd.f32 %v3958_v52, %v387_v61  ;;  %v390_v56 = vmul.f32 %v3950_v48, %v337_v5  ;;  %v389_v5 = vmul.f32 %v3950_v48, %v336_v4  ;;  %v341_v2 = vld [vmem:[%s3944_s13 + $0x138] sm:$0xff] }
  0xb9   : > { %v3485_v54 = vpack.c.bf16 %v797_v34, %v797_v34  ;;  %v3484_v49 = vpack.c.bf16 %v796_v37, %v796_v37  ;;  %v4270_v31 = vsel %vm1427_vm1, %v1439_v22, %v1441_v30  ;;  %v1588_v37 = vor.u32 %v1587_v1, %v1586_v25 }
  0xba   : > { %v664_v24 = vpop.permute.xlu1 %663  ;;  %v659_v12 = vpop.permute.xlu0 %658  ;;  %v4272_v47 = vld [vmem:[#allocation2 + $0x40] sm:$0xff]   ;;  %1481 = vrot.lane.b32.xlu1 %v4270_v31, %s3726_s18  ;;  %v4300_v4 = vrot.slane %v1223_v33, 1  ;;  %v394_v33 = vmul.f32 %v3950_v48, %v341_v2 }
  0xbb   : > { %1028 = vst.msk [vmem:[#allocation2 + $0x54] sm:$0xf] %vm1006_vm0, %v3485_v54  ;;  %1027 = vst.msk [vmem:[#allocation2 + $0x50] sm:$0xf] %vm1006_vm0, %v3484_v49  ;;  %v799_v34 = vmul.f32 %v664_v24, %v477_v35  ;;  %v798_v22 = vmul.f32 %v659_v12, %v476_v20  ;;  %v1443_v61 = vrot.slane %v4272_v47, 1  ;;  %v392_v54 = vmul.f32 %v3950_v48, %v339_v21 }
  0xbc   : > { %v391_v49 = vmul.f32 %v3950_v48, %v338_v6  ;;  %v1591_v20 = vrot.slane %v4263_v18, 2  ;;  %v4303_v21 = vadd.f32 %v3958_v52, %v390_v56  ;;  %v4306_v6 = vsel %vm1573_vm2, %v1584_v32, %v1588_v37  ;;  %v340_v56 = vld [vmem:[%s3944_s13 + $0x130] sm:$0xff] }
  0xbd   : > { %v3487_v3 = vpack.c.bf16 %v799_v34, %v799_v34  ;;  %v3486_v35 = vpack.c.bf16 %v798_v22, %v798_v22  ;;  %v4296_v24 = vsel %vm1427_vm1, %v1441_v30, %v1443_v61  ;;  %6812 = vst [vmem:[#allocation8_spill] sm:$0xff] %v4306_v6  ;;  %v4326_v28 = vadd.f32 %v3958_v52, %v392_v54 }
  0xbe   : > { %v674_v25 = vpop.permute.xlu1 %673  ;;  %v669_v1 = vpop.permute.xlu0 %668  ;;  %6811 = vst [vmem:[#allocation7_spill] sm:$0xff] %v4296_v24  ;;  %v4298_v12 = vld [vmem:[#allocation2 + $0x48] sm:$0xff]   ;;  %1483 = vrot.lane.b32.xlu0 %v4296_v24, %s3726_s18  ;;  %v4318_v22 = vor.u32 %v1591_v20, %v1590_v17  ;;  %v1229_v54 = vor.u32 %v1227_v19, %v4300_v4  ;;  %v6739_v19 = vrot.slane %v4230_v14, 1 }
  0xbf   : > { %1030 = vst.msk [vmem:[#allocation2 + $0x5c] sm:$0xf] %vm1006_vm0, %v3487_v3  ;;  %1029 = vst.msk [vmem:[#allocation2 + $0x58] sm:$0xf] %vm1006_vm0, %v3486_v35  ;;  %v801_v34 = vmul.f32 %v674_v25, %v479_v51  ;;  %v800_v30 = vmul.f32 %v669_v1, %v478_v60  ;;  %v6738_v32 = vrot.slane %v4298_v12, 1  ;;  %v486_v3 = vmax.f32 %v4276_v40, 0.0 }
  0xc0   : > { %6813 = vst [vmem:[#allocation9_spill] sm:$0xff] %v4318_v22  ;;  %v4323_v35 = vadd.f32 %v3958_v52, %v389_v5  ;;  %v4329_v60 = vadd.f32 %v3958_v52, %v391_v49  ;;  %v343_v25 = vld [vmem:[%s3944_s13 + $0x148] sm:$0xff]  ;;  %v4334_v17 = vsel %vm1573_vm2, %v1588_v37, %v4318_v22  ;;  %v4344_v1 = vrot.slane %v1231_v42, 1 }
  0xc1   : > { %v3489_v38 = vpack.c.bf16 %v801_v34, %v801_v34  ;;  %v3488_v51 = vpack.c.bf16 %v800_v30, %v800_v30  ;;  %6814 = vst [vmem:[#allocation10_spill] sm:$0xff] %v4334_v17  ;;  %v4339_v5 = vsel %vm1427_vm1, %v1443_v61, %v6738_v32  ;;  %v393_v49 = vmul.f32 %v3950_v48, %v340_v56 }
  0xc2   : > { %v684_v2 = vpop.permute.xlu1 %683  ;;  %v679_v20 = vpop.permute.xlu0 %678  ;;  %1485 = vrot.lane.b32.xlu1 %v4339_v5, %s3726_s18  ;;  %v4357_v42 = vadd.f32 %v3958_v52, %v394_v33  ;;  %v4361_v30 = vshll.u32 %v4181_v29, 16  ;;  %v396_v45 = vmul.f32 %v3950_v48, %v343_v25  ;;  %v6740_v32 = vrot.slane %v4263_v18, 1 }
  0xc3   : > { %1032 = vst.msk [vmem:[#allocation2 + $0x64] sm:$0xf] %vm1006_vm0, %v3489_v38  ;;  %1031 = vst.msk [vmem:[#allocation2 + $0x60] sm:$0xf] %vm1006_vm0, %v3488_v51  ;;  %v803_v37 = vmul.f32 %v684_v2, %v481_v62  ;;  %v802_v34 = vmul.f32 %v679_v20, %v480_v7  ;;  %v342_v62 = vld [vmem:[%s3944_s13 + $0x140] sm:$0xff]  ;;  %v4367_v38 = vshll.u32 %v4202_v58, 16  ;;  %v1234_v20 = vsel %vm1214_vm3, %v1229_v54, %v4344_v1 }
  0xc4   : > { %v4375_v25 = vadd.f32 %v3958_v52, %v393_v49  ;;  %v395_v56 = vmul.f32 %v3950_v48, %v342_v62  ;;  %v1245_v49 = vor.u32 %v4205_v59, %v6739_v19  ;;  %v4394_v50 = vadd.f32 %v3958_v52, %v396_v45  ;;  %v4407_v45 = vld [vmem:[#allocation2 + $0x50] sm:$0xff]  }
  0xc5   : > { %v3491_v46 = vpack.c.bf16 %v803_v37, %v803_v37  ;;  %v3490_v7 = vpack.c.bf16 %v802_v34, %v802_v34  ;;  %v6742_v62 = vrot.slane %v4367_v38, 1  ;;  %v4405_v54 = vshll.u32 %v4272_v47, 16 }
  0xc6   : > { %v694_v2 = vpop.permute.xlu1 %693  ;;  %v689_v33 = vpop.permute.xlu0 %688  ;;  %1384 = vrot.lane.b32.xlu1 %v1234_v20, %s3727_s19  ;;  %v1250_v19 = vsel %vm1214_vm3, %v1245_v49, %v6740_v32  ;;  %v4425_v23 = vld [vmem:[#allocation2 + $0x58] sm:$0xff]   ;;  %v4428_v10 = vadd.f32 %v3958_v52, %v395_v56  ;;  %v4442_v56 = vshll.u32 %v4407_v45, 16  ;;  %v6822_v43 = vmax.f32 %v4323_v35, 0.0 }
  0xc7   : > { %1034 = vst.msk [vmem:[#allocation2 + $0x6c] sm:$0xf] %vm1006_vm0, %v3491_v46  ;;  %1033 = vst.msk [vmem:[#allocation2 + $0x68] sm:$0xf] %vm1006_vm0, %v3490_v7  ;;  %v805_v37 = vmul.f32 %v694_v2, %v483_v8  ;;  %v804_v34 = vmul.f32 %v689_v33, %v482_v9  ;;  %v6741_v46 = vrot.slane %v4361_v30, 1  ;;  %v4391_v7 = vshll.u32 %v4235_v44, 16 }
  0xc8   : > { %v345_v8 = vld [vmem:[%s3944_s13 + $0x158] sm:$0xff]  ;;  %v4398_v2 = vshrl.u32 %v4181_v29, 16  ;;  %v6746_v61 = vrot.slane %v4405_v54, 1  ;;  %6817 = vst [vmem:[#allocation13_spill] sm:$0xff] %v4442_v56 }
  0xc9   : > { %6815 = vst [vmem:[#allocation11_spill] sm:$0xff] %v4391_v7  ;;  %v3493_v11 = vpack.c.bf16 %v805_v37, %v805_v37  ;;  %v3492_v9 = vpack.c.bf16 %v804_v34, %v804_v34  ;;  %v398_v49 = vmul.f32 %v3950_v48, %v345_v8 }
  0xca   : > { %v704_v33 = vpop.permute.xlu1 %703  ;;  %v699_v20 = vpop.permute.xlu0 %698  ;;  %1388 = vrot.lane.b32.xlu1 %v1250_v19, %s3727_s19  ;;  %v1261_v32 = vor.u32 %v4398_v2, %v6741_v46  ;;  %v4434_v8 = vld [vmem:[#allocation2 + $0x60] sm:$0xff]  }
  0xcb   : > { %1036 = vst.msk [vmem:[#allocation2 + $0x74] sm:$0xf] %vm1006_vm0, %v3493_v11  ;;  %1035 = vst.msk [vmem:[#allocation2 + $0x70] sm:$0xf] %vm1006_vm0, %v3492_v9  ;;  %v807_v29 = vmul.f32 %v704_v33, %v485_v53  ;;  %v806_v37 = vmul.f32 %v699_v20, %v484_v39  ;;  %v6743_v11 = vrot.slane %v4391_v7, 1  ;;  %v4423_v9 = vshll.u32 %v4298_v12, 16 }
  0xcc   : > { %v344_v53 = vld [vmem:[%s3944_s13 + $0x150] sm:$0xff]  ;;  %v4432_v33 = vshrl.u32 %v4235_v44, 16  ;;  %v1266_v51 = vsel %vm1214_vm3, %v1261_v32, %v6742_v62  ;;  %v6818_v44 = vmax.f32 %v4227_v26, 0.0  ;;  %v4452_v20 = vadd.f32 %v3958_v52, %v398_v49 }
  0xcd   : > { %v3495_v39 = vpack.c.bf16 %v807_v29, %v807_v29  ;;  %v3494_v19 = vpack.c.bf16 %v806_v37, %v806_v37  ;;  %v397_v32 = vmul.f32 %v3950_v48, %v344_v53  ;;  %v1103_v49 = vld [vmem:[#allocation2 + $0x10] sm:$0xc] }
  0xce   : > { %6816 = vst [vmem:[#allocation12_spill] sm:$0xff] %v4432_v33  ;;  %v714_v46 = vpop.permute.xlu1 %713  ;;  %v709_v34 = vpop.permute.xlu0 %708  ;;  %1392 = vrot.lane.b32.xlu1 %v1266_v51, %s3727_s19  ;;  %v1277_v62 = vor.u32 %v4432_v33, %v6743_v11  ;;  %v4463_v40 = vld [vmem:[#allocation2 + $0x68] sm:$0xff]   ;;  %v4497_v35 = vcombine.low %v1103_v49, %v4092_v63  ;;  %v6827_v63 = vmax.f32 %v4326_v28, 0.0  ;;  %v6828_v49 = vmax.f32 %v4329_v60, 0.0 }
  0xcf   : > { %1038 = vst.msk [vmem:[#allocation2 + $0x7c] sm:$0xf] %vm1006_vm0, %v3495_v39  ;;  %1037 = vst.msk [vmem:[#allocation2 + $0x78] sm:$0xf] %vm1006_vm0, %v3494_v19  ;;  %v809_v29 = vmul.f32 %v714_v46, %v6818_v44  ;;  %v808_v37 = vmul.f32 %v709_v34, %v486_v3  ;;  %v4460_v19 = vshll.u32 %v4425_v23, 16  ;;  %v4466_v46 = vshrl.u32 %v4298_v12, 16 }
  0xd0   : > { %v4469_v34 = vshll.u32 %v4434_v8, 16  ;;  %v1282_v11 = vsel %vm1214_vm3, %v1277_v62, %v6746_v61  ;;  %v4486_v62 = vadd.f32 %v3958_v52, %v397_v32  ;;  %v6823_v61 = vrot.slane %v4423_v9, 1  ;;  %6824 = vst [vmem:[#allocation16_spill] sm:$0xff] %v4497_v35 }
  0xd1   : > { %6819 = vst [vmem:[#allocation14_spill] sm:$0xff] %v4460_v19  ;;  %v3497_v3 = vpack.c.bf16 %v809_v29, %v809_v29  ;;  %v3496_v51 = vpack.c.bf16 %v808_v37, %v808_v37  ;;  %6820 = vst [vmem:[#allocation15_spill] sm:$0xff] %v4466_v46  ;;  %v6821_v29 = vmax.f32 %v4303_v21, 0.0  ;;  %v347_v21 = vld [vmem:[%s3944_s13 + $0x168] sm:$0x3]  ;;  %v1870_v33 = vrot.slane %v4205_v59, 2 }
  0xd2   : > { %v724_v53 = vpop.permute.xlu1 %723  ;;  %v719_v44 = vpop.permute.xlu0 %718  ;;  %v4475_v39 = vld [vmem:[#allocation2 + $0x70] sm:$0xff]   ;;  %1396 = vrot.lane.b32.xlu1 %v1282_v11, %s3727_s19  ;;  %v496_v32 = vmax.f32 %v4486_v62, 0.0 }
  0xd3   : > { %1040 = vst.msk [vmem:[#allocation2 + $0x84] sm:$0xf] %vm1006_vm0, %v3497_v3  ;;  %1039 = vst.msk [vmem:[#allocation2 + $0x80] sm:$0xf] %vm1006_vm0, %v3496_v51  ;;  %v811_v37 = vmul.f32 %v724_v53, %v6821_v29  ;;  %v810_v22 = vmul.f32 %v719_v44, %v6822_v43  ;;  %v1293_v3 = vor.u32 %v4466_v46, %v6823_v61  ;;  %v4493_v51 = vshll.u32 %v4463_v40, 16  ;;  %v346_v44 = vld [vmem:[%s3944_s13 + $0x160] sm:$0xff] }
  0xd4   : > { %v4500_v53 = vshrl.u32 %v4425_v23, 16  ;;  %v6826_v61 = vrot.slane %v4442_v56, 1  ;;  %v4508_v46 = vshll.u32 %v4475_v39, 16  ;;  %v399_v28 = vmul.f32 %v3950_v48, %v346_v44 }
  0xd5   : > { %v3499_v43 = vpack.c.bf16 %v811_v37, %v811_v37  ;;  %v3498_v11 = vpack.c.bf16 %v810_v22, %v810_v22 }
  0xd6   : > { %6825 = vst [vmem:[#allocation17_spill] sm:$0xff] %v4500_v53  ;;  %v734_v29 = vpop.permute.xlu1 %733  ;;  %v729_v6 = vpop.permute.xlu0 %728  ;;  %v1298_v26 = vsel %vm1214_vm3, %v1293_v3, %v6826_v61  ;;  %v4510_v24 = vld [vmem:[#allocation2 + $0x78] sm:$0xff]   ;;  %v400_v3 = vmul.f32 %v3950_v48, %v347_v21  ;;  %v6829_v61 = vrot.slane %v4460_v19, 1  ;;  %v6831_v48 = vmax.f32 %v4357_v42, 0.0 }
  0xd7   : > { %1042 = vst.msk [vmem:[#allocation2 + $0x8c] sm:$0xf] %vm1006_vm0, %v3499_v43  ;;  %1041 = vst.msk [vmem:[#allocation2 + $0x88] sm:$0xf] %vm1006_vm0, %v3498_v11  ;;  %v813_v22 = vmul.f32 %v734_v29, %v6827_v63  ;;  %v812_v37 = vmul.f32 %v729_v6, %v6828_v49  ;;  %1400 = vrot.lane.b32.xlu1 %v1298_v26, %s3727_s19  ;;  %v4526_v11 = vshll.u32 %v4510_v24, 16  ;;  %v4530_v6 = vshrl.u32 %v4463_v40, 16 }
  0xd8   : > { %v1309_v41 = vor.u32 %v4500_v53, %v6829_v61  ;;  %v1863_v26 = vshrl.u32 %v4497_v35, 16  ;;  %v6830_v63 = vrot.slane %v4469_v34, 1  ;;  %v453_v53 = vadd.f32 %v3958_v52, %v400_v3 }
  0xd9   : > { %v3501_v29 = vpack.c.bf16 %v813_v22, %v813_v22  ;;  %v3500_v60 = vpack.c.bf16 %v812_v37, %v812_v37  ;;  %v6832_v22 = vmax.f32 %v4375_v25, 0.0  ;;  %v452_v42 = vadd.f32 %v3958_v52, %v399_v28 }
  0xda   : > { %v744_v62 = vpop.permute.xlu1 %743  ;;  %v739_v21 = vpop.permute.xlu0 %738  ;;  %v1314_v49 = vsel %vm1214_vm3, %v1309_v41, %v6830_v63  ;;  %v4537_v43 = vld [vmem:[#allocation2 + $0x80] sm:$0xff]   ;;  %v1866_v41 = vshll.u32 %v4497_v35, 16  ;;  %v6833_v63 = vrot.slane %v4493_v51, 1  ;;  %v6835_v52 = vmax.f32 %v4394_v50, 0.0 }
  0xdb   : > { %1044 = vst.msk [vmem:[#allocation2 + $0x94] sm:$0xf] %vm1006_vm0, %v3501_v29  ;;  %1043 = vst.msk [vmem:[#allocation2 + $0x90] sm:$0xf] %vm1006_vm0, %v3500_v60  ;;  %v815_v44 = vmul.f32 %v744_v62, %v6831_v48  ;;  %v814_v37 = vmul.f32 %v739_v21, %v6832_v22  ;;  %1404 = vrot.lane.b32.xlu1 %v1314_v49, %s3727_s19  ;;  %v4553_v60 = vshll.u32 %v4537_v43, 16  ;;  %v4557_v21 = vshrl.u32 %v4510_v24, 16 }
  0xdc   : > { %v1325_v61 = vor.u32 %v4530_v6, %v6833_v63  ;;  %v1865_v49 = vrot.slane %v1863_v26, 2  ;;  %v6834_v22 = vrot.slane %v4508_v46, 1  ;;  %v499_v63 = vmax.f32 %v453_v53, 0.0  ;;  %v1054_v53 = vld [vmem:[#allocation2] sm:$0xf] }
  0xdd   : > { %v3503_v62 = vpack.c.bf16 %v815_v44, %v815_v44  ;;  %v3502_v25 = vpack.c.bf16 %v814_v37, %v814_v37  ;;  %v6836_v44 = vmax.f32 %v4428_v10, 0.0  ;;  %v1868_v37 = vrot.slane %v1866_v41, 3 }
  0xde   : > { %v754_v3 = vpop.permute.xlu1 %753  ;;  %v749_v48 = vpop.permute.xlu0 %748  ;;  %v1330_v35 = vsel %vm1214_vm3, %v1325_v61, %v6834_v22  ;;  %v4563_v29 = vld [vmem:[#allocation2 + $0x88] sm:$0xff]   ;;  %v6837_v61 = vrot.slane %v4526_v11, 1  ;;  %v1871_v10 = vrot.slane %v4230_v14, 3  ;;  %v4592_v17 = vcombine.low %v1054_v53, %v4070_v36 }
  0xdf   : > { %1046 = vst.msk [vmem:[#allocation2 + $0x9c] sm:$0xf] %vm1006_vm0, %v3503_v62  ;;  %1045 = vst.msk [vmem:[#allocation2 + $0x98] sm:$0xf] %vm1006_vm0, %v3502_v25  ;;  %v817_v28 = vmul.f32 %v754_v3, %v6835_v52  ;;  %v816_v26 = vmul.f32 %v749_v48, %v6836_v44  ;;  %1408 = vrot.lane.b32.xlu1 %v1330_v35, %s3727_s19  ;;  %v4577_v62 = vshll.u32 %v4563_v29, 16  ;;  %v498_v3 = vmax.f32 %v452_v42, 0.0 }
  0xe0   : > { %v1341_v22 = vor.u32 %v4557_v21, %v6837_v61  ;;  %v6838_v35 = vrot.slane %v4553_v60, 1  ;;  %v1869_v61 = vor.u32 %v1868_v37, %v1865_v49  ;;  %v1872_v15 = vor.u32 %v1871_v10, %v1870_v33  ;;  %6840 = vst [vmem:[#allocation18_spill] sm:$0xff] %v4592_v17 }
  0xe1   : > { %v3505_v25 = vpack.c.bf16 %v817_v28, %v817_v28  ;;  %v3504_v50 = vpack.c.bf16 %v816_v26, %v816_v26  ;;  %v6839_v28 = vmax.f32 %v4452_v20, 0.0  ;;  %v1218_v53 = vshll.u32 %v4592_v17, 16 }
  0xe2   : > { %v764_v48 = vpop.permute.xlu1 %763  ;;  %v759_v52 = vpop.permute.xlu0 %758  ;;  %v1346_v59 = vsel %vm1214_vm3, %v1341_v22, %v6838_v35  ;;  %v4583_v41 = vld [vmem:[#allocation2 + $0x90] sm:$0xff]   ;;  %v4595_v22 = vshrl.u32 %v4563_v29, 16 }
  0xe3   : > { %1048 = vst.msk [vmem:[#allocation2 + $0xa4] sm:$0xf] %vm1006_vm0, %v3505_v25  ;;  %1047 = vst.msk [vmem:[#allocation2 + $0xa0] sm:$0xf] %vm1006_vm0, %v3504_v50  ;;  %v819_v42 = vmul.f32 %v764_v48, %v6839_v28  ;;  %v818_v26 = vmul.f32 %v759_v52, %v496_v32  ;;  %1412 = vrot.lane.b32.xlu1 %v1346_v59, %s3727_s19  ;;  %v4598_v35 = vshll.u32 %v4583_v41, 16  ;;  %v6842_v48 = vrot.slane %v4577_v62, 1 }
  0xe4   : > { %v4601_v50 = vsel %vm1861_vm4, %v1869_v61, %v1872_v15 }
  0xe5   : > { %v3507_v25 = vpack.c.bf16 %v819_v42, %v819_v42  ;;  %v3506_v44 = vpack.c.bf16 %v818_v26, %v818_v26  ;;  %6841 = vst [vmem:[#allocation19_spill] sm:$0xff] %v4601_v50  ;;  %v1357_v33 = vor.u32 %v4595_v22, %v6842_v48  ;;  %v6757_v36 = vrot.slane %v4598_v35, 1 }
  0xe6   : > { %v774_v20 = vpop.permute.xlu1 %773  ;;  %v769_v32 = vpop.permute.xlu0 %768  ;;  %v4607_v49 = vld [vmem:[#allocation2 + $0x98] sm:$0xff]   ;;  %v1874_v26 = vrot.slane %v4239_v0, 2 }
  0xe7   : > { %1050 = vst.msk [vmem:[#allocation2 + $0xac] sm:$0xf] %vm1006_vm0, %v3507_v25  ;;  %1049 = vst.msk [vmem:[#allocation2 + $0xa8] sm:$0xf] %vm1006_vm0, %v3506_v44  ;;  %v821_v37 = vmul.f32 %v774_v20, %v499_v63  ;;  %v820_v10 = vmul.f32 %v769_v32, %v498_v3  ;;  %v1362_v52 = vsel %vm1214_vm3, %v1357_v33, %v6757_v36  ;;  %v4615_v59 = vshll.u32 %v4607_v49, 16 }
  0xe8   : > { %1416 = vrot.lane.b32.xlu1 %v1362_v52, %s3727_s19  ;;  %v1875_v3 = vrot.slane %v4263_v18, 3  ;;  %v4627_v44 = vshrl.u32 %v4607_v49, 16  ;;  %v1220_v20 = vrot.slane %v1218_v53, 1  ;;  %v4631_v32 = vshrl.u32 %v4475_v39, 16 }
  0xe9   : > { %v3509_v28 = vpack.c.bf16 %v821_v37, %v821_v37  ;;  %v3508_v42 = vpack.c.bf16 %v820_v10, %v820_v10  ;;  %v6758_v63 = vrot.slane %v4615_v59, 1  ;;  %v1216_v52 = vshrl.u32 %v4592_v17, 16 }
  0xea   : > { %v4620_v61 = vld [vmem:[#allocation2 + $0xa0] ss:$0 sps:$4 sm:$0x77]   ;;  %v4633_v48 = vor.u32 %v1875_v3, %v1874_v26  ;;  %v6761_v3 = vrot.slane %v4407_v45, 1  ;;  %v1630_v17 = vrot.slane %v4631_v32, 1 }
  0xeb   : > { %1053 = vst.msk [vmem:[#allocation2 + $0xb4] sm:$0x1] %vm1052_vm5, %v3509_v28  ;;  %v1375_v25 = vshll.u32 %v4620_v61, 16  ;;  %v1373_v33 = vor.u32 %v4627_v44, %v6758_v63  ;;  %v1379_v10 = vshrl.u32 %v4620_v61, 16  ;;  %v1221_v26 = vor.u32 %v1220_v20, %v1216_v52 }
  0xec   : > { %1051 = vst.msk [vmem:[#allocation2 + $0xb0] sm:$0xf] %vm1006_vm0, %v3508_v42  ;;  %6843 = vst [vmem:[#allocation20_spill] sm:$0xff] %v4633_v48  ;;  %v4643_v42 = vsel %vm1861_vm4, %v1872_v15, %v4633_v48  ;;  %v1627_v63 = vrot.slane %v4493_v51, 2  ;;  %v1631_v28 = vrot.slane %v4508_v46, 2  ;;  %v6845_v15 = vrot.slane %v4425_v23, 1 }
  0xed   : > { %v1377_v37 = vrot.slane %v1375_v25, 1  ;;  %6844 = vst [vmem:[#allocation21_spill] sm:$0xff] %v4643_v42  ;;  %v1626_v25 = vrot.slane %v4530_v6, 1  ;;  %v1919_v48 = vrot.slane %v4526_v11, 3  ;;  %v6849_v42 = vrot.slane %v4463_v40, 1 }
  0xee   : > { %v4658_v20 = vsel %vm1427_vm1, %v6761_v3, %v6845_v15  ;;  %v4664_v52 = vor.u32 %v1631_v28, %v1630_v17  ;;  %v1226_v15 = vsel %vm1214_vm3, %v1221_v26, %v4300_v4  ;;  %v6764_v17 = vrot.slane %v4434_v8, 1 }
  0xef   : > { %v1378_v53 = vsel %vm1214_vm3, %v1373_v33, %v1377_v37  ;;  %v1381_v36 = vor.u32 %v1379_v10, %v1377_v37  ;;  %v4661_v37 = vor.u32 %v1627_v63, %v1626_v25  ;;  %v1914_v10 = vrot.slane %v4631_v32, 2 }
  0xf0   : > { %1420 = vrot.lane.b32.xlu1 %v1378_v53, %s3727_s19  ;;  %v1915_v53 = vrot.slane %v4508_v46, 3  ;;  %v6847_v63 = vshrl.u32 %v4104_v13, 16  ;;  %v4688_v4 = vsel %vm1427_vm1, %v6764_v17, %v6849_v42  ;;  %v6852_v42 = vrot.slane %v4263_v18, 1 }
  0xf1   : > { %1422 = vrot.lane.b32.xlu0 %v1381_v36, %s3727_s19  ;;  %6846 = vst [vmem:[#allocation22_spill] sm:$0xff] %v4661_v37  ;;  %v1918_v36 = vrot.slane %v4557_v21, 2  ;;  %v4681_v28 = vsel %vm1573_vm2, %v4661_v37, %v4664_v52 }
  0xf2   : > { %v1237_v25 = vor.u32 %v6847_v63, %v4344_v1  ;;  %6848 = vst [vmem:[#allocation23_spill] sm:$0xff] %v4681_v28  ;;  %v1916_v3 = vor.u32 %v1915_v53, %v1914_v10  ;;  %v6762_v1 = vrot.slane %v4510_v24, 1  ;;  %v4702_v53 = vshrl.u32 %v4202_v58, 16 }
  0xf3   : > { %v1920_v33 = vor.u32 %v1919_v48, %v1918_v36  ;;  %v6763_v48 = vrot.slane %v4475_v39, 1  ;;  %v1253_v36 = vor.u32 %v4239_v0, %v6852_v42  ;;  %v4708_v63 = vshrl.u32 %v4537_v43, 16 }
  0xf4   : > { %1489 = vrot.lane.b32.xlu1 %v4658_v20, %s3726_s18  ;;  %v6854_v0 = vrot.slane %v4361_v30, 1  ;;  %v1635_v42 = vrot.slane %v4526_v11, 2  ;;  %v6858_v28 = vrot.slane %v4405_v54, 1 }
  0xf5   : > { %1382 = vrot.lane.b32.xlu0 %v1226_v15, %s3727_s19  ;;  %v4692_v26 = vsel %vm1861_vm4, %v1916_v3, %v1920_v33  ;;  %v6851_v15 = vrot.slane %v4230_v14, 1  ;;  %v4715_v14 = vsel %vm1427_vm1, %v6763_v48, %v6762_v1  ;;  %v6766_v1 = vrot.slane %v4537_v43, 1 }
  0xf6   : > { %6850 = vst [vmem:[#allocation24_spill] sm:$0xff] %v4692_v26  ;;  %v1258_v18 = vsel %vm1214_vm3, %v1253_v36, %v6854_v0  ;;  %v6855_v48 = vrot.slane %v4391_v7, 1  ;;  %v1638_v37 = vrot.slane %v4708_v63, 1  ;;  %v1639_v36 = vrot.slane %v4553_v60, 2 }
  0xf7   : > { %v1242_v10 = vsel %vm1214_vm3, %v1237_v25, %v6851_v15  ;;  %v6853_v15 = vrot.slane %v4367_v38, 1  ;;  %v1926_v26 = vrot.slane %v4595_v22, 2 }
  0xf8   : > { %1493 = vrot.lane.b32.xlu1 %v4688_v4, %s3726_s18 }
  0xf9   : > { %1386 = vrot.lane.b32.xlu0 %v1242_v10, %s3727_s19  ;;  %v1269_v58 = vor.u32 %v4702_v53, %v6853_v15  ;;  %v1634_v10 = vrot.slane %v4557_v21, 1  ;;  %v4734_v15 = vshrl.u32 %v4272_v47, 16  ;;  %v6856_v21 = vrot.slane %v4563_v29, 1 }
  0xfa   : > { %v1911_v47 = vrot.slane %v4493_v51, 3 }
  0xfb   : > { %v1274_v17 = vsel %vm1214_vm3, %v1269_v58, %v6855_v48  ;;  %v1636_v25 = vor.u32 %v1635_v42, %v1634_v10  ;;  %v4743_v0 = vsel %vm1427_vm1, %v6766_v1, %v6856_v21  ;;  %v1910_v48 = vrot.slane %v4530_v6, 2 }
  0xfc   : > { %1497 = vrot.lane.b32.xlu1 %v4715_v14, %s3726_s18  ;;  %v1640_v58 = vor.u32 %v1639_v36, %v1638_v37  ;;  %v1922_v10 = vrot.slane %v4708_v63, 2  ;;  %v1923_v42 = vrot.slane %v4553_v60, 3  ;;  %v6769_v21 = vrot.slane %v4583_v41, 1 }
  0xfd   : > { %1390 = vrot.lane.b32.xlu0 %v1258_v18, %s3727_s19  ;;  %v4746_v18 = vrot.slane %v4607_v49, 1  ;;  %v4757_v1 = vor.u32 %v1911_v47, %v1910_v48  ;;  %v1927_v6 = vrot.slane %v4577_v62, 3  ;;  %v1285_v50 = vor.u32 %v4734_v15, %v6858_v28 }
  0xfe   : > { %v4764_v37 = vsel %vm1573_vm2, %v1636_v25, %v1640_v58  ;;  %v1924_v36 = vor.u32 %v1923_v42, %v1922_v10  ;;  %v6861_v28 = vrot.slane %v4423_v9, 1  ;;  %v1363_v42 = vshrl.u32 %v4583_v41, 16 }
  0xff   : > { %6857 = vst [vmem:[#allocation25_spill] sm:$0xff] %v4757_v1  ;;  %6859 = vst [vmem:[#allocation26_spill] sm:$0xff] %v4764_v37  ;;  %v4770_v13 = vsel %vm1427_vm1, %v6769_v21, %v4746_v18  ;;  %v4777_v48 = vsel %vm1861_vm4, %v4757_v1, %v1916_v3  ;;  %v1928_v47 = vor.u32 %v1927_v6, %v1926_v26  ;;  %v6862_v21 = vrot.slane %v4442_v56, 1 }
 0x100   : > { %1501 = vrot.lane.b32.xlu1 %v4743_v0, %s3726_s18  ;;  %v1290_v10 = vsel %vm1214_vm3, %v1285_v50, %v6861_v28  ;;  %v6775_v3 = vrot.slane %v4620_v61, 1  ;;  %v4795_v26 = vsel %vm1573_vm2, %v4664_v52, %v1636_v25  ;;  %v6864_v6 = vrot.slane %v4460_v19, 1 }
 0x101   : > { %1394 = vrot.lane.b32.xlu0 %v1274_v17, %s3727_s19  ;;  %v4773_v17 = vshrl.u32 %v4407_v45, 16  ;;  %v4790_v7 = vsel %vm1861_vm4, %v1924_v36, %v1928_v47  ;;  %6863 = vst [vmem:[#allocation28_spill] sm:$0xff] %v4795_v26  ;;  %v1642_v28 = vrot.slane %v4595_v22, 1  ;;  %v1646_v1 = vrot.slane %v1363_v42, 1 }
 0x102   : > { %v1647_v56 = vrot.slane %v4598_v35, 2  ;;  %v4811_v52 = vsel %vm1861_vm4, %v1920_v33, %v1924_v36  ;;  %v6866_v25 = vrot.slane %v4469_v34, 1  ;;  %v1931_v19 = vrot.slane %v4598_v35, 3 }
 0x103   : > { %6860 = vst [vmem:[#allocation27_spill] sm:$0xff] %v4773_v17  ;;  %v1301_v37 = vor.u32 %v4773_v17, %v6862_v21  ;;  %v4805_v21 = vshrl.u32 %v4434_v8, 16  ;;  %6865 = vst [vmem:[#allocation29_spill] sm:$0xff] %v4811_v52  ;;  %v1934_v17 = vrot.slane %v4627_v44, 2  ;;  %v1935_v26 = vrot.slane %v4615_v59, 3 }
 0x104   : > { %1505 = vrot.lane.b32.xlu1 %v4770_v13, %s3726_s18  ;;  %v6867_v33 = vrot.slane %v4493_v51, 1 }
 0x105   : > { %1398 = vrot.lane.b32.xlu0 %v1290_v10, %s3727_s19  ;;  %v1306_v50 = vsel %vm1214_vm3, %v1301_v37, %v6864_v6  ;;  %v1643_v10 = vrot.slane %v4577_v62, 2  ;;  %v1317_v22 = vor.u32 %v4805_v21, %v6866_v25  ;;  %v1648_v6 = vor.u32 %v1647_v56, %v1646_v1  ;;  %v4828_v56 = vld [vmem:[#allocation2 + $0xa0] sm:$0xff]  }
 0x107   : > { %v1644_v37 = vor.u32 %v1643_v10, %v1642_v28  ;;  %v1322_v36 = vsel %vm1214_vm3, %v1317_v22, %v6867_v33  ;;  %v1936_v28 = vor.u32 %v1935_v26, %v1934_v17  ;;  %v6868_v10 = vrot.slane %v4508_v46, 1  ;;  %v4850_v17 = vld [vmem:[#allocation2 + $0xa8] sm:$0xf] }
 0x108   : > { %1509 = vrot.lane.b32.xlu1 %v6775_v3, %s3726_s18  ;;  %v1930_v3 = vrot.slane %v1363_v42, 2  ;;  %v2041_v46 = vrot.slane %v4828_v56, 3  ;;  %v6871_v26 = vrot.slane %v4577_v62, 1  ;;  %v1650_v33 = vrot.slane %v4627_v44, 1 }
 0x109   : > { %1402 = vrot.lane.b32.xlu0 %v1306_v50, %s3727_s19  ;;  %v4825_v50 = vsel %vm1573_vm2, %v1644_v37, %v1648_v6  ;;  %v1333_v25 = vor.u32 %v4631_v32, %v6868_v10  ;;  %v4842_v22 = vsel %vm1573_vm2, %v1640_v58, %v1644_v37  ;;  %v6784_v10 = vrot.slane %v4463_v40, 3 }
 0x10a   : > { %v1932_v1 = vor.u32 %v1931_v19, %v1930_v3  ;;  %v6782_v19 = vrot.slane %v4607_v49, 3  ;;  %v1104_v3 = vld [vmem:[#allocation2 + $0xac] sm:$0xf]  ;;  %v1655_v44 = vshrl.u32 %v4828_v56, 16 }
 0x10b   : > { %v4866_v37 = vcombine.low %v4850_v17, %v1104_v3 }
 0x10c   : > { %1530 = vrot.lane.b32.xlu1 %v4152_v55, %s3728_s20  ;;  %v4834_v52 = vsel %vm1861_vm4, %v1932_v1, %v1936_v28  ;;  %v6869_v55 = vrot.slane %v4526_v11, 1  ;;  %v4848_v32 = vsel %vm1861_vm4, %v1928_v47, %v1932_v1  ;;  %v4858_v58 = vsel %vm2005_vm6, %v6782_v19, %v2041_v46  ;;  %v6895_v19 = vld [vmem:[#allocation11_spill] sm:$0xff] }
 0x10d   : > { %1406 = vrot.lane.b32.xlu0 %v1322_v36, %s3727_s19  ;;  %v6780_v36 = vrot.slane %v4866_v37, 3  ;;  %v1651_v1 = vrot.slane %v4615_v59, 2 }
 0x10e   : > { %v1338_v51 = vsel %vm1214_vm3, %v1333_v25, %v6869_v55  ;;  %v1658_v25 = vshll.u32 %v4828_v56, 16  ;;  %v6781_v55 = vrot.slane %v4434_v8, 3 }
 0x110   : > { %1534 = vrot.lane.b32.xlu1 %v4200_v57, %s3728_s20  ;;  %v6870_v57 = vrot.slane %v4553_v60, 1  ;;  %v6872_v60 = vrot.slane %v4598_v35, 1  ;;  %v4883_v35 = vsel %vm2005_vm6, %v2041_v46, %v6780_v36  ;;  %v1939_v3 = vrot.slane %v1658_v25, 3  ;;  %v6894_v36 = vld [vmem:[#allocation12_spill] sm:$0xff] }
 0x111   : > { %1410 = vrot.lane.b32.xlu0 %v1338_v51, %s3727_s19  ;;  %v1938_v51 = vrot.slane %v1655_v44, 2  ;;  %v6874_v46 = vrot.slane %v4407_v45, 1 }
 0x112   : > { %v1349_v11 = vor.u32 %v4708_v63, %v6870_v57  ;;  %v1365_v63 = vor.u32 %v1363_v42, %v6872_v60  ;;  %v1652_v42 = vor.u32 %v1651_v1, %v1650_v33  ;;  %v6875_v57 = vrot.slane %v4298_v12, 1 }
 0x113   : > { %v6880_v60 = vrot.slane %v4425_v23, 1  ;;  %v6882_v1 = vrot.slane %v4463_v40, 1 }
 0x114   : > { %1538 = vrot.lane.b32.xlu1 %v4270_v31, %s3728_s20  ;;  %v1354_v47 = vsel %vm1214_vm3, %v1349_v11, %v6871_v26  ;;  %v6873_v31 = vrot.slane %v4615_v59, 1  ;;  %v4889_v59 = vsel %vm1573_vm2, %v1648_v6, %v1652_v42  ;;  %v4899_v11 = vsel %vm1427_vm1, %v6875_v57, %v6874_v46 }
 0x115   : > { %1414 = vrot.lane.b32.xlu0 %v1354_v47, %s3727_s19  ;;  %v4901_v26 = vor.u32 %v1939_v3, %v1938_v51  ;;  %v1660_v47 = vrot.slane %v1658_v25, 2  ;;  %v4908_v6 = vsel %vm2005_vm6, %v6781_v55, %v6784_v10  ;;  %v6887_v3 = vrot.slane %v4583_v41, 1  ;;  %v3698_v10 = vld [vmem:[#allocation2 + $0xc] sm:$0xf] }
 0x116   : > { %v1370_v62 = vsel %vm1214_vm3, %v1365_v63, %v6873_v31  ;;  %6877 = vst [vmem:[#allocation31_spill] sm:$0xff] %v4908_v6  ;;  %v4946_v31 = vld [vmem:[#allocation2 + $0xa8] ss:$0 sps:$4 sm:$0x77]   ;;  %v6785_v46 = vrot.slane %v4828_v56, 1  ;;  %v1602_v55 = vrot.slane %v6894_v36, 1 }
 0x117   : > { %6876 = vst [vmem:[#allocation30_spill] sm:$0xff] %v4901_v26  ;;  %v4914_v45 = vsel %vm1861_vm4, %v1936_v28, %v4901_v26  ;;  %v4933_v28 = vpop.permute.xlu1 %1469  ;;  %v6783_v25 = vrot.slane %v4946_v31, 1  ;;  %v5203_v6 = vld [vmem:[#allocation2 + $0x30] sm:$0xff]   ;;  %vm2518_vm3 = vcmask 588800  }
 0x118   : > { %1542 = vrot.lane.b32.xlu1 %v4339_v5, %s3728_s20  ;;  %v1657_v5 = vrot.slane %v1655_v44, 1  ;;  %6931 = vst [vmem:[#allocation40_spill] sm:$0xff] %v5203_v6 }
 0x119   : > { %1418 = vrot.lane.b32.xlu0 %v1370_v62, %s3727_s19  ;;  %v1527_v57 = vsel %vm1427_vm1, %v6785_v46, %v6783_v25 }
 0x11a   : > { %v4916_v12 = vor.u32 %v1660_v47, %v1657_v5 }
 0x11c   : > { %1546 = vrot.lane.b32.xlu1 %v4658_v20, %s3728_s20  ;;  %6878 = vst [vmem:[#allocation32_spill] sm:$0xff] %v4916_v12  ;;  %v6879_v20 = vrot.slane %v4434_v8, 1  ;;  %v4929_v33 = vsel %vm1573_vm2, %v1652_v42, %v4916_v12  ;;  %v4948_v62 = vpop.permute.xlu1 %1473  ;;  %v6884_v42 = vrot.slane %v4537_v43, 1 }
 0x11d   : > { %1487 = vrot.lane.b32.xlu0 %v4899_v11, %s3726_s18  ;;  %6883 = vst [vmem:[#allocation33_spill] sm:$0xff] %v4948_v62 }
 0x11e   : > { %v4925_v63 = vsel %vm1427_vm1, %v6880_v60, %v6879_v20  ;;  %v1598_v60 = vrot.slane %v4702_v53, 1 }
 0x120   : > { %1550 = vrot.lane.b32.xlu1 %v4688_v4, %s3728_s20  ;;  %v6881_v4 = vrot.slane %v4475_v39, 1 }
 0x121   : > { %1491 = vrot.lane.b32.xlu0 %v4925_v63, %s3726_s18 }
 0x122   : > { %v4942_v23 = vsel %vm1427_vm1, %v6882_v1, %v6881_v4  ;;  %v1599_v4 = vrot.slane %v4367_v38, 2 }
 0x124   : > { %1554 = vrot.lane.b32.xlu1 %v4715_v14, %s3728_s20  ;;  %v6885_v14 = vrot.slane %v4510_v24, 1  ;;  %v4962_v51 = vpop.permute.xlu1 %1477 }
 0x125   : > { %1495 = vrot.lane.b32.xlu0 %v4942_v23, %s3726_s18  ;;  %6886 = vst [vmem:[#allocation34_spill] sm:$0xff] %v4962_v51 }
 0x126   : > { %v4957_v44 = vsel %vm1427_vm1, %v6885_v14, %v6884_v42  ;;  %v1595_v42 = vrot.slane %v4361_v30, 2  ;;  %v4999_v14 = vor.u32 %v1599_v4, %v1598_v60  ;;  %v1603_v60 = vrot.slane %v6895_v19, 2 }
 0x128   : > { %1558 = vrot.lane.b32.xlu1 %v4743_v0, %s3728_s20  ;;  %v6888_v0 = vrot.slane %v4563_v29, 1 }
 0x129   : > { %1499 = vrot.lane.b32.xlu0 %v4957_v44, %s3726_s18 }
 0x12a   : > { %v4971_v5 = vsel %vm1427_vm1, %v6888_v0, %v6887_v3  ;;  %v1606_v3 = vrot.slane %v4734_v15, 1  ;;  %v1607_v0 = vrot.slane %v4405_v54, 2 }
 0x12c   : > { %1562 = vrot.lane.b32.xlu1 %v4770_v13, %s3728_s20  ;;  %v4981_v47 = vpop.permute.xlu1 %1481  ;;  %v6890_v13 = vrot.slane %v4620_v61, 1  ;;  %v1594_v61 = vrot.slane %v4398_v2, 1  ;;  %v5016_v25 = vor.u32 %v1607_v0, %v1606_v3 }
 0x12d   : > { %1503 = vrot.lane.b32.xlu0 %v4971_v5, %s3726_s18  ;;  %6889 = vst [vmem:[#allocation35_spill] sm:$0xff] %v4981_v47  ;;  %v6898_v47 = vld [vmem:[#allocation4_spill] sm:$0xff] }
 0x12e   : > { %v1468_v20 = vsel %vm1427_vm1, %v4746_v18, %v6890_v13  ;;  %v1719_v51 = vrot.slane %v6898_v47, 2 }
 0x130   : > { %1566 = vrot.lane.b32.xlu1 %v1527_v57, %s3728_s20  ;;  %v6892_v57 = vld [vmem:[#allocation10_spill] sm:$0xff] }
 0x131   : > { %1507 = vrot.lane.b32.xlu0 %v1468_v20, %s3726_s18  ;;  %v6893_v20 = vld [vmem:[#allocation5_spill] sm:$0xff] }
 0x134   : > { %1672 = vrot.lane.b32.xlu1 %v4255_v27, %s3729_s21  ;;  %v4993_v1 = vpop.permute.xlu1 %1485  ;;  %v1102_v27 = vld [vmem:[#allocation2 + $0x8] sm:$0xc] }
 0x135   : > { %6891 = vst [vmem:[#allocation36_spill] sm:$0xff] %v4993_v1  ;;  %1528 = vrot.lane.b32.xlu0 %v4243_v16, %s3728_s20  ;;  %v5009_v16 = vor.u32 %v1595_v42, %v1594_v61  ;;  %v5023_v61 = vor.u32 %v1603_v60, %v1602_v55 }
 0x137   : > { %v1601_v4 = vsel %vm1573_vm2, %v5009_v16, %v4999_v14  ;;  %v1609_v42 = vsel %vm1573_vm2, %v5023_v61, %v5016_v25 }
 0x138   : > { %1676 = vrot.lane.b32.xlu1 %v6892_v57, %s3729_s21  ;;  %v5005_v13 = vpop.permute.xlu1 %1384  ;;  %v3428_v57 = vcombine.low %v1102_v27, %v3698_v10  ;;  %v6900_v10 = vld [vmem:[#allocation7_spill] sm:$0xff] }
 0x139   : > { %1532 = vrot.lane.b32.xlu0 %v6893_v20, %s3728_s20  ;;  %v6897_v20 = vld [vmem:[#allocation6_spill] sm:$0xff]  ;;  %v5040_v27 = vld [vmem:[#allocation2 + $0x18] sm:$0xff]  }
 0x13a   : > { %v1718_v1 = vrot.slane %v3428_v57, 2  ;;  %v5043_v60 = vrot.slane %v5040_v27, 2 }
 0x13c   : > { %1680 = vrot.lane.b32.xlu1 %v1601_v4, %s3729_s21  ;;  %v5019_v46 = vpop.permute.xlu1 %1388  ;;  %v1720_v0 = vsel %vm1717_vm7, %v1718_v1, %v1719_v51  ;;  %v6902_v4 = vld [vmem:[#allocation19_spill] sm:$0xff]  ;;  %v1722_v1 = vsel %vm1717_vm7, %v1719_v51, %v5043_v60 }
 0x13d   : > { %6896 = vst [vmem:[#allocation10_spill] sm:$0xff] %v5019_v46  ;;  %1536 = vrot.lane.b32.xlu0 %v6897_v20, %s3728_s20  ;;  %v5053_v20 = vld [vmem:[#allocation2 + $0x20] sm:$0xff]  }
 0x13e   : > { %6904 = vst [vmem:[#allocation6_spill] sm:$0xff] %v5053_v20  ;;  %v6787_v51 = vrot.slane %v5053_v20, 3 }
 0x140   : > { %1684 = vrot.lane.b32.xlu1 %v1609_v42, %s3729_s21  ;;  %v5030_v3 = vpop.permute.xlu1 %1392 }
 0x141   : > { %6899 = vst [vmem:[#allocation5_spill] sm:$0xff] %v5030_v3  ;;  %1540 = vrot.lane.b32.xlu0 %v6900_v10, %s3728_s20  ;;  %v6912_v3 = vrot.slane %v4463_v40, 3 }
 0x144   : > { %1759 = vrot.lane.b32.xlu1 %v1720_v0, %s3730_s22  ;;  %v5036_v55 = vpop.permute.xlu1 %1396  ;;  %v6906_v0 = vld [vmem:[#allocation21_spill] sm:$0xff] }
 0x145   : > { %6901 = vst [vmem:[#allocation12_spill] sm:$0xff] %v5036_v55  ;;  %1544 = vrot.lane.b32.xlu0 %v4899_v11, %s3728_s20  ;;  %v6786_v11 = vrot.slane %v5053_v20, 2 }
 0x147   : > { %v5065_v10 = vsel %vm1717_vm7, %v5043_v60, %v6786_v11 }
 0x148   : > { %1960 = vrot.lane.b32.xlu1 %v6902_v4, %s3731_s24  ;;  %v6788_v4 = vrot.slane %v5040_v27, 3 }
 0x149   : > { %v5047_v57 = vpop.permute.xlu1 %1400  ;;  %1548 = vrot.lane.b32.xlu0 %v4925_v63, %s3728_s20  ;;  %v5071_v63 = vpop.permute.xlu0 %1471 }
 0x14a   : > { %6903 = vst [vmem:[#allocation11_spill] sm:$0xff] %v5047_v57 }
 0x14c   : > { %1761 = vrot.lane.b32.xlu1 %v1722_v1, %s3730_s22  ;;  %v3689_v1 = vld [vmem:[%s6732_s4] sm:$0xff]  }
 0x14d   : > { %1552 = vrot.lane.b32.xlu0 %v4942_v23, %s3728_s20  ;;  %v5059_v42 = vpop.permute.xlu1 %1404  ;;  %v5084_v11 = vpop.permute.xlu0 %1475 }
 0x14e   : > { %6907 = vst [vmem:[#allocation7_spill] sm:$0xff] %v5084_v11 }
 0x150   : > { %1818 = vrot.lane.b32.xlu1 %v5065_v10, %s3732_s25 }
 0x151   : > { %1556 = vrot.lane.b32.xlu0 %v4957_v44, %s3728_s20  ;;  %v5074_v23 = vpop.permute.xlu1 %1408  ;;  %v2010_v44 = vsel %vm2005_vm6, %v6788_v4, %v6787_v51  ;;  %v3690_v51 = vld [vmem:[%s6732_s4 + $0x8] sm:$0xff]   ;;  %v5106_v57 = vpop.permute.xlu0 %1479 }
 0x152   : > { %6905 = vst [vmem:[#allocation4_spill] sm:$0xff] %v5074_v23  ;;  %6910 = vst [vmem:[#allocation21_spill] sm:$0xff] %v5106_v57 }
 0x154   : > { %1962 = vrot.lane.b32.xlu1 %v6906_v0, %s3731_s24  ;;  %v6791_v0 = vmov 0.0  }
 0x155   : > { %1560 = vrot.lane.b32.xlu0 %v4971_v5, %s3728_s20  ;;  %3536 = vmatprep.subr.bf16.mxu0 %v6791_v0  ;;  %v6908_v5 = vrot.slane %v4828_v56, 1  ;;  %v5104_v4 = vpop.permute.xlu1 %1412 }
 0x156   : > { %3630 = vmatprep.subr.bf16.mxu1 %v6791_v0  ;;  %3537 = vmatpush3.bf16.msra.mxu0 %v3689_v1  ;;  %6909 = vst [vmem:[#allocation19_spill] sm:$0xff] %v5104_v4  ;;  %v5124_v4 = vpop.permute.xlu0 %1483 }
 0x157   : > { %v1525_v55 = vsel %vm1427_vm1, %v4746_v18, %v6908_v5  ;;  %3538 = vmatprep.subr.bf16.mxu0 %v6791_v0  ;;  %3635 = vmatpush3.bf16.msra.mxu1 %v3689_v1  ;;  %v3692_v1 = vld [vmem:[%s6732_s4 + $0x10] sm:$0xff]   ;;  %6915 = vst [vmem:[#allocation38_spill] sm:$0xff] %v5124_v4  ;;  %v6920_v4 = vld [vmem:[#allocation9_spill] sm:$0xff]  ;;  %vm2348_vm1 = vcmask 457728  }
 0x158   : > { %2049 = vrot.lane.b32.xlu1 %v2010_v44, %s3734_s30  ;;  %v6911_v44 = vrot.slane %v4475_v39, 3  ;;  %3631 = vmatprep.subr.bf16.mxu1 %v6791_v0  ;;  %v1597_v57 = vsel %vm1573_vm2, %v6920_v4, %v5009_v16  ;;  %v6923_v16 = vrot.slane %v4510_v24, 2 }
 0x159   : > { %1564 = vrot.lane.b32.xlu0 %v1525_v55, %s3728_s20  ;;  %v6913_v55 = vrot.slane %v4946_v31, 1  ;;  %v6917_v31 = vld [vmem:[#allocation8_spill] sm:$0xff]  ;;  %3546 = vmatprep.mubr.msk.bf16.mxu0 %vm3735_vm9, %v6791_v0 }
 0x15a   : > { %v2030_v18 = vsel %vm2005_vm6, %v6912_v3, %v6911_v44  ;;  %3539 = vmatpush3.bf16.msra.mxu0 %v3690_v51  ;;  %v5122_v5 = vpop.permute.xlu1 %1416  ;;  %v1743_v3 = vrot.slane %v4475_v39, 2  ;;  %v6916_v44 = vld [vmem:[#allocation23_spill] sm:$0xff]  ;;  %3590 = vmatprep.mubr.msk.bf16.mxu1 %vm3735_vm9, %v6791_v0 }
 0x15b   : > { %3540 = vmatprep.subr.bf16.mxu0 %v6791_v0  ;;  %6914 = vst [vmem:[#allocation37_spill] sm:$0xff] %v5122_v5  ;;  %3636 = vmatpush3.bf16.msra.mxu1 %v3690_v51  ;;  %v3693_v51 = vld [vmem:[%s6732_s4 + $0x18] sm:$0xff]  }
 0x15c   : > { %2069 = vrot.lane.b32.xlu1 %v2030_v18, %s3734_s30  ;;  %3632 = vmatprep.subr.bf16.mxu1 %v6791_v0  ;;  %v6789_v18 = vrot.slane %v4463_v40, 2  ;;  %v5167_v4 = vsel %vm1717_vm7, %v1743_v3, %v6923_v16  ;;  %v6928_v16 = vld [vmem:[#allocation16_spill] sm:$0xff] }
 0x15d   : > { %1568 = vrot.lane.b32.xlu0 %v6913_v55, %s3728_s20 }
 0x15e   : > { %3541 = vmatpush3.bf16.msra.mxu0 %v3692_v1 }
 0x15f   : > { %3542 = vmatprep.subr.bf16.mxu0 %v6791_v0  ;;  %3637 = vmatpush3.bf16.msra.mxu1 %v3692_v1 }
 0x160   : > { %1696 = vrot.lane.b32.xlu1 %v6916_v44, %s3729_s21  ;;  %v5144_v44 = vsel %vm1717_vm7, %v6789_v18, %v1743_v3  ;;  %3633 = vmatprep.subr.bf16.mxu1 %v6791_v0  ;;  %v3694_v18 = vld [vmem:[%s6732_s4 + $0x20] ss:$0 sps:$4 sm:$0xff]  }
 0x161   : > { %1674 = vrot.lane.b32.xlu0 %v6917_v31, %s3729_s21  ;;  %v2563_v12 = vsel %vm2561_vm8, %v3694_v18, 0  ;;  %vm2391_vm8 = vcmask 523264  }
 0x162   : > { %v5137_v55 = vpop.permute.xlu1 %1420  ;;  %3543 = vmatpush3.bf16.msra.mxu0 %v3693_v51 }
 0x163   : > { %6918 = vst [vmem:[#allocation23_spill] sm:$0xff] %v5137_v55  ;;  %v5139_v5 = vpop.permute.xlu0 %1422  ;;  %v6921_v55 = vld [vmem:[#allocation15_spill] sm:$0xff]  ;;  %3544 = vmatprep.subr.bf16.mxu0 %v6791_v0  ;;  %3638 = vmatpush3.bf16.msra.mxu1 %v3693_v51  ;;  %v5186_v51 = vld [vmem:[#allocation2 + $0x28] sm:$0xff]  }
 0x164   : > { %6919 = vst [vmem:[#allocation8_spill] sm:$0xff] %v5139_v5  ;;  %1783 = vrot.lane.b32.xlu1 %v5144_v44, %s3730_s22  ;;  %v1610_v1 = vrot.slane %v6921_v55, 1  ;;  %v1611_v5 = vrot.slane %v4423_v9, 2  ;;  %3634 = vmatprep.subr.bf16.mxu1 %v6791_v0  ;;  %6925 = vst [vmem:[#allocation39_spill] sm:$0xff] %v5186_v51  ;;  %v3702_v0 = vld [vmem:[#allocation2 + $0x14] sm:$0xf] }
 0x165   : > { %1678 = vrot.lane.b32.xlu0 %v1597_v57, %s3729_s21  ;;  %v1605_v57 = vsel %vm1573_vm2, %v4999_v14, %v5023_v61  ;;  %v1725_v14 = vrot.slane %v5186_v51, 2  ;;  %v1107_v61 = vld [vmem:[#allocation2 + $0x10] sm:$0x8] }
 0x166   : > { %v5160_v31 = vpop.permute.xlu1 %1489  ;;  %v5175_v11 = vor.u32 %v1611_v5, %v1610_v1  ;;  %3545 = vmatpush3.bf16.msra.mxu0 %v2563_v12  ;;  %v6926_v5 = vld [vmem:[#allocation24_spill] sm:$0xff] }
 0x167   : > { %6922 = vst [vmem:[#allocation9_spill] sm:$0xff] %v5160_v31  ;;  %v5162_v23 = vpop.permute.xlu0 %1382  ;;  %3639 = vmatpush3.bf16.msra.mxu1 %v2563_v12  ;;  %v3433_v31 = vcombine.low %v1107_v61, %v3702_v0  ;;  %v1878_v0 = vrot.slane %v4398_v2, 2  ;;  %v1879_v61 = vrot.slane %v4361_v30, 3  ;;  %v6935_v30 = vrot.slane %v5040_v27, 3 }
 0x168   : > { %1840 = vrot.lane.b32.xlu1 %v5167_v4, %s3732_s25  ;;  %v1613_v1 = vsel %vm1573_vm2, %v5016_v25, %v5175_v11  ;;  %v1882_v25 = vrot.slane %v4702_v53, 2  ;;  %v1623_v53 = vrot.slane %v4469_v34, 2 }
 0x169   : > { %1682 = vrot.lane.b32.xlu0 %v1605_v57, %s3729_s21  ;;  %v1810_v57 = vrot.slane %v6928_v16, 2 }
 0x16a   : > { %v5180_v3 = vpop.permute.xlu1 %1493 }
 0x16b   : > { %6924 = vst [vmem:[#allocation15_spill] sm:$0xff] %v5180_v3  ;;  %v5184_v18 = vpop.permute.xlu0 %1386  ;;  %v6930_v3 = vrot.slane %v5053_v20, 2  ;;  %v1811_v16 = vsel %vm1717_vm7, %v1810_v57, %v5043_v60 }
 0x16c   : > { %1984 = vrot.lane.b32.xlu1 %v6926_v5, %s3731_s24  ;;  %v1622_v5 = vrot.slane %v4805_v21, 1 }
 0x16d   : > { %1686 = vrot.lane.b32.xlu0 %v1613_v1, %s3729_s21  ;;  %v1726_v26 = vsel %vm1717_vm7, %v6930_v3, %v1725_v14  ;;  %v1883_v1 = vrot.slane %v4367_v38, 3  ;;  %v6934_v38 = vrot.slane %v5203_v6, 2 }
 0x16e   : > { %v5195_v12 = vpop.permute.xlu1 %1497 }
 0x16f   : > { %6927 = vst [vmem:[#allocation24_spill] sm:$0xff] %v5195_v12  ;;  %v5198_v46 = vpop.permute.xlu0 %1390  ;;  %v2006_v12 = vrot.slane %v3433_v31, 3  ;;  %v5223_v62 = vsel %vm1717_vm7, %v1725_v14, %v6934_v38  ;;  %v5225_v60 = vor.u32 %v1883_v1, %v1882_v25  ;;  %v1880_v31 = vor.u32 %v1879_v61, %v1878_v0  ;;  %v6939_v1 = vld [vmem:[#allocation22_spill] sm:$0xff] }
 0x170   : > { %6929 = vst [vmem:[#allocation16_spill] sm:$0xff] %v5198_v46  ;;  %1765 = vrot.lane.b32.xlu1 %v1726_v26, %s3730_s22  ;;  %v6795_v25 = vrot.slane %v5203_v6, 3  ;;  %v2011_v0 = vrot.slane %v5186_v51, 3  ;;  %v1890_v51 = vrot.slane %v4734_v15, 2 }
 0x171   : > { %1816 = vrot.lane.b32.xlu0 %v1811_v16, %s3732_s25  ;;  %v2008_v2 = vsel %vm2005_vm6, %v2006_v12, %v6935_v30  ;;  %v5235_v16 = vor.u32 %v1623_v53, %v1622_v5  ;;  %v1885_v14 = vsel %vm1861_vm4, %v1880_v31, %v5225_v60  ;;  %v6794_v5 = vrot.slane %v4434_v8, 2 }
 0x172   : > { %v5214_v3 = vpop.permute.xlu1 %1501  ;;  %v2014_v38 = vsel %vm2005_vm6, %v2011_v0, %v6795_v25  ;;  %v6796_v30 = vrot.slane %v4537_v43, 3  ;;  %v6945_v25 = vld [vmem:[#allocation26_spill] sm:$0xff] }
 0x173   : > { %6932 = vst [vmem:[#allocation41_spill] sm:$0xff] %v5214_v3  ;;  %v5218_v46 = vpop.permute.xlu0 %1394  ;;  %6937 = vst [vmem:[#allocation44_spill] sm:$0xff] %v5235_v16  ;;  %v1629_v12 = vsel %vm1573_vm2, %v5235_v16, %v6939_v1  ;;  %v2031_v1 = vrot.slane %v4510_v24, 3 }
 0x174   : > { %6933 = vst [vmem:[#allocation42_spill] sm:$0xff] %v5218_v46  ;;  %1822 = vrot.lane.b32.xlu1 %v5223_v62, %s3732_s25 }
 0x175   : > { %2047 = vrot.lane.b32.xlu0 %v2008_v2, %s3734_s30  ;;  %v6942_v2 = vrot.slane %v4463_v40, 2 }
 0x176   : > { %v5233_v57 = vpop.permute.xlu1 %1505 }
 0x177   : > { %6936 = vst [vmem:[#allocation43_spill] sm:$0xff] %v5233_v57  ;;  %v5237_v3 = vpop.permute.xlu0 %1398  ;;  %v1749_v57 = vrot.slane %v4563_v29, 2 }
 0x178   : > { %6938 = vst [vmem:[#allocation45_spill] sm:$0xff] %v5237_v3  ;;  %1966 = vrot.lane.b32.xlu1 %v1885_v14, %s3731_s24  ;;  %v5263_v14 = vsel %vm1717_vm7, %v6794_v5, %v6942_v2  ;;  %v1747_v5 = vrot.slane %v4537_v43, 2 }
 0x179   : > { %1694 = vrot.lane.b32.xlu0 %v1629_v12, %s3729_s21 }
 0x17a   : > { %v5248_v61 = vpop.permute.xlu1 %1509 }
 0x17b   : > { %6940 = vst [vmem:[#allocation22_spill] sm:$0xff] %v5248_v61  ;;  %v5251_v53 = vpop.permute.xlu0 %1402 }
 0x17c   : > { %6941 = vst [vmem:[#allocation46_spill] sm:$0xff] %v5251_v53  ;;  %2053 = vrot.lane.b32.xlu1 %v2014_v38, %s3734_s30  ;;  %v2034_v38 = vsel %vm2005_vm6, %v2031_v1, %v6796_v30 }
 0x17d   : > { %1781 = vrot.lane.b32.xlu0 %v5263_v14, %s3730_s22 }
 0x17e   : > { %v5268_v12 = vpop.permute.xlu1 %1530 }
 0x17f   : > { %v5270_v61 = vpop.permute.xlu0 %1406 }
 0x180   : > { %2073 = vrot.lane.b32.xlu1 %v2034_v38, %s3734_s30  ;;  %v6948_v38 = vrot.slane %v4510_v24, 2 }
 0x181   : > { %1838 = vrot.lane.b32.xlu0 %v5144_v44, %s3732_s25 }
 0x182   : > { %v5278_v40 = vpop.permute.xlu1 %1534  ;;  %v1748_v44 = vsel %vm1717_vm7, %v6948_v38, %v1747_v5 }
 0x183   : > { %6943 = vst [vmem:[#allocation47_spill] sm:$0xff] %v5278_v40  ;;  %v5280_v2 = vpop.permute.xlu0 %1410  ;;  %v6979_v40 = vrot.slane %v4537_v43, 3 }
 0x184   : > { %6944 = vst [vmem:[#allocation48_spill] sm:$0xff] %v5280_v2  ;;  %1700 = vrot.lane.b32.xlu1 %v6945_v25, %s3729_s21 }
 0x185   : > { %1982 = vrot.lane.b32.xlu0 %v4777_v48, %s3731_s24  ;;  %v5303_v48 = vsel %vm1717_vm7, %v1747_v5, %v1749_v57 }
 0x186   : > { %v5287_v53 = vpop.permute.xlu1 %1538 }
 0x187   : > { %6946 = vst [vmem:[#allocation26_spill] sm:$0xff] %v5287_v53  ;;  %v5289_v30 = vpop.permute.xlu0 %1414 }
 0x188   : > { %6947 = vst [vmem:[#allocation49_spill] sm:$0xff] %v5289_v30  ;;  %1787 = vrot.lane.b32.xlu1 %v1748_v44, %s3730_s22  ;;  %v5312_v30 = vld [vmem:[#allocation2 + $0x38] sm:$0xff]  }
 0x189   : > { %1763 = vrot.lane.b32.xlu0 %v5065_v10, %s3730_s22  ;;  %6953 = vst [vmem:[#allocation54_spill] sm:$0xff] %v5312_v30  ;;  %v1729_v10 = vrot.slane %v5312_v30, 2 }
 0x18a   : > { %v5298_v3 = vpop.permute.xlu1 %1542 }
 0x18b   : > { %6949 = vst [vmem:[#allocation50_spill] sm:$0xff] %v5298_v3  ;;  %v5300_v25 = vpop.permute.xlu0 %1418 }
 0x18c   : > { %6950 = vst [vmem:[#allocation51_spill] sm:$0xff] %v5300_v25  ;;  %1844 = vrot.lane.b32.xlu1 %v5303_v48, %s3732_s25  ;;  %v6954_v25 = vld [vmem:[#allocation20_spill] sm:$0xff] }
 0x18d   : > { %1820 = vrot.lane.b32.xlu0 %v1726_v26, %s3732_s25  ;;  %v1881_v5 = vsel %vm1861_vm4, %v6954_v25, %v1880_v31  ;;  %v6955_v26 = vrot.slane %v5203_v6, 2  ;;  %v6956_v31 = vrot.slane %v5053_v20, 3 }
 0x18e   : > { %v5308_v24 = vpop.permute.xlu1 %1546 }
 0x18f   : > { %6951 = vst [vmem:[#allocation52_spill] sm:$0xff] %v5308_v24  ;;  %v5310_v38 = vpop.permute.xlu0 %1487  ;;  %v1730_v24 = vsel %vm1717_vm7, %v6955_v26, %v1729_v10  ;;  %v2012_v25 = vsel %vm2005_vm6, %v6956_v31, %v2011_v0  ;;  %v1887_v26 = vrot.slane %v6895_v19, 3  ;;  %v6959_v0 = vrot.slane %v4475_v39, 3 }
 0x190   : > { %6952 = vst [vmem:[#allocation53_spill] sm:$0xff] %v5310_v38  ;;  %1988 = vrot.lane.b32.xlu1 %v4790_v7, %s3731_s24  ;;  %v5327_v38 = vld [vmem:[#allocation2 + $0x40] sm:$0xff]   ;;  %v1891_v7 = vrot.slane %v4405_v54, 3  ;;  %v2015_v39 = vrot.slane %v5312_v30, 3  ;;  %v5420_v30 = vld [vmem:[#allocation2 + $0x48] sm:$0xff]  }
 0x191   : > { %1964 = vrot.lane.b32.xlu0 %v1881_v5, %s3731_s24  ;;  %v1731_v53 = vrot.slane %v5327_v38, 2  ;;  %v1886_v5 = vrot.slane %v6894_v36, 2  ;;  %v2032_v31 = vsel %vm2005_vm6, %v6959_v0, %v2031_v1  ;;  %6972 = vst [vmem:[#allocation64_spill] sm:$0xff] %v5420_v30  ;;  %v2019_v43 = vrot.slane %v5420_v30, 3 }
 0x192   : > { %v5320_v3 = vpop.permute.xlu1 %1550  ;;  %v5346_v54 = vor.u32 %v1891_v7, %v1890_v51  ;;  %v6799_v51 = vrot.slane %v5327_v38, 3  ;;  %v6962_v7 = vld [vmem:[#allocation28_spill] sm:$0xff] }
 0x193   : > { %v5322_v46 = vpop.permute.xlu0 %1491  ;;  %v5344_v15 = vsel %vm1717_vm7, %v1729_v10, %v1731_v53  ;;  %v1888_v36 = vor.u32 %v1887_v26, %v1886_v5  ;;  %v6800_v26 = vrot.slane %v4583_v41, 3 }
 0x194   : > { %1769 = vrot.lane.b32.xlu1 %v1730_v24, %s3730_s22  ;;  %v2018_v5 = vsel %vm2005_vm6, %v2015_v39, %v6799_v51 }
 0x195   : > { %2051 = vrot.lane.b32.xlu0 %v2012_v25, %s3734_s30  ;;  %v1893_v10 = vsel %vm1861_vm4, %v1888_v36, %v5346_v54 }
 0x196   : > { %v5339_v2 = vpop.permute.xlu1 %1554 }
 0x197   : > { %6957 = vst [vmem:[#allocation20_spill] sm:$0xff] %v5339_v2  ;;  %v5341_v16 = vpop.permute.xlu0 %1495 }
 0x198   : > { %6958 = vst [vmem:[#allocation55_spill] sm:$0xff] %v5341_v16  ;;  %1826 = vrot.lane.b32.xlu1 %v5344_v15, %s3732_s25 }
 0x199   : > { %2071 = vrot.lane.b32.xlu0 %v2032_v31, %s3734_s30  ;;  %v2035_v31 = vrot.slane %v4563_v29, 3  ;;  %v6967_v29 = vld [vmem:[#allocation29_spill] sm:$0xff] }
 0x19a   : > { %v5354_v19 = vpop.permute.xlu1 %1558 }
 0x19b   : > { %6960 = vst [vmem:[#allocation56_spill] sm:$0xff] %v5354_v19  ;;  %v5356_v25 = vpop.permute.xlu0 %1499 }
 0x19c   : > { %6961 = vst [vmem:[#allocation57_spill] sm:$0xff] %v5356_v25  ;;  %1970 = vrot.lane.b32.xlu1 %v1893_v10, %s3731_s24  ;;  %v6975_v25 = vld [vmem:[#allocation27_spill] sm:$0xff] }
 0x19d   : > { %1698 = vrot.lane.b32.xlu0 %v6962_v7, %s3729_s21 }
 0x19e   : > { %v5365_v1 = vpop.permute.xlu1 %1562 }
 0x19f   : > { %6963 = vst [vmem:[#allocation28_spill] sm:$0xff] %v5365_v1  ;;  %v5367_v0 = vpop.permute.xlu0 %1503  ;;  %v2038_v1 = vsel %vm2005_vm6, %v2035_v31, %v6800_v26 }
 0x1a0   : > { %6964 = vst [vmem:[#allocation58_spill] sm:$0xff] %v5367_v0  ;;  %2057 = vrot.lane.b32.xlu1 %v2018_v5, %s3734_s30 }
 0x1a1   : > { %1785 = vrot.lane.b32.xlu0 %v5167_v4, %s3730_s22  ;;  %v1751_v4 = vrot.slane %v4583_v41, 2 }
 0x1a2   : > { %v5377_v10 = vpop.permute.xlu1 %1566 }
 0x1a3   : > { %6965 = vst [vmem:[#allocation59_spill] sm:$0xff] %v5377_v10  ;;  %v5379_v7 = vpop.permute.xlu0 %1507 }
 0x1a4   : > { %6966 = vst [vmem:[#allocation60_spill] sm:$0xff] %v5379_v7  ;;  %2077 = vrot.lane.b32.xlu1 %v2038_v1, %s3734_s30  ;;  %v1752_v1 = vsel %vm1717_vm7, %v1749_v57, %v1751_v4 }
 0x1a5   : > { %1842 = vrot.lane.b32.xlu0 %v1748_v44, %s3732_s25  ;;  %v6802_v44 = vrot.slane %v4607_v49, 2 }
 0x1a6   : > { %v5386_v51 = vpop.permute.xlu1 %1672 }
 0x1a7   : > { %v5388_v5 = vpop.permute.xlu0 %1528 }
 0x1a8   : > { %1704 = vrot.lane.b32.xlu1 %v4825_v50, %s3729_s21  ;;  %v5411_v50 = vsel %vm1717_vm7, %v1751_v4, %v6802_v44  ;;  %v1889_v4 = vsel %vm1861_vm4, %v5225_v60, %v1888_v36  ;;  %v1894_v36 = vrot.slane %v6921_v55, 2 }
 0x1a9   : > { %1986 = vrot.lane.b32.xlu0 %v6967_v29, %s3731_s24 }
 0x1aa   : > { %v5395_v10 = vpop.permute.xlu1 %1676 }
 0x1ab   : > { %v5397_v7 = vpop.permute.xlu0 %1532 }
 0x1ac   : > { %1791 = vrot.lane.b32.xlu1 %v1752_v1, %s3730_s22 }
 0x1ad   : > { %1767 = vrot.lane.b32.xlu0 %v5223_v62, %s3730_s22  ;;  %v1733_v62 = vrot.slane %v5420_v30, 2 }
 0x1ae   : > { %v5404_v26 = vpop.permute.xlu1 %1680 }
 0x1af   : > { %6968 = vst [vmem:[#allocation29_spill] sm:$0xff] %v5404_v26  ;;  %v5406_v0 = vpop.permute.xlu0 %1536  ;;  %v1898_v26 = vrot.slane %v6975_v25, 2 }
 0x1b0   : > { %6969 = vst [vmem:[#allocation61_spill] sm:$0xff] %v5406_v0  ;;  %1848 = vrot.lane.b32.xlu1 %v5411_v50, %s3732_s25  ;;  %v6976_v0 = vld [vmem:[#allocation13_spill] sm:$0xff] }
 0x1b1   : > { %1824 = vrot.lane.b32.xlu0 %v1730_v24, %s3732_s25  ;;  %v1734_v24 = vsel %vm1717_vm7, %v1731_v53, %v1733_v62  ;;  %v1899_v20 = vrot.slane %v6976_v0, 3  ;;  %v1895_v53 = vrot.slane %v4423_v9, 3 }
 0x1b2   : > { %v5416_v57 = vpop.permute.xlu1 %1684 }
 0x1b3   : > { %6970 = vst [vmem:[#allocation62_spill] sm:$0xff] %v5416_v57  ;;  %v5418_v29 = vpop.permute.xlu0 %1540  ;;  %v5433_v57 = vld [vmem:[#allocation2 + $0x50] sm:$0xff]   ;;  %v1900_v16 = vor.u32 %v1899_v20, %v1898_v26 }
 0x1b4   : > { %6971 = vst [vmem:[#allocation63_spill] sm:$0xff] %v5418_v29  ;;  %1992 = vrot.lane.b32.xlu1 %v4834_v52, %s3731_s24  ;;  %6974 = vst [vmem:[#allocation66_spill] sm:$0xff] %v5433_v57  ;;  %v1735_v29 = vrot.slane %v5433_v57, 2  ;;  %v6977_v52 = vrot.slane %v5203_v6, 3  ;;  %v2036_v6 = vsel %vm2005_vm6, %v6979_v40, %v2035_v31 }
 0x1b5   : > { %1968 = vrot.lane.b32.xlu0 %v1889_v4, %s3731_s24 }
 0x1b6   : > { %v5428_v44 = vpop.permute.xlu1 %1759  ;;  %v2016_v60 = vsel %vm2005_vm6, %v6977_v52, %v2015_v39  ;;  %v1736_v2 = vsel %vm1717_vm7, %v1733_v62, %v1735_v29  ;;  %v1896_v39 = vor.u32 %v1895_v53, %v1894_v36  ;;  %v5484_v36 = vld [vmem:[#allocation2 + $0x58] sm:$0xff]  }
 0x1b7   : > { %v5430_v19 = vpop.permute.xlu0 %1544  ;;  %v1737_v53 = vrot.slane %v5484_v36, 2 }
 0x1b8   : > { %6973 = vst [vmem:[#allocation65_spill] sm:$0xff] %v5430_v19  ;;  %1773 = vrot.lane.b32.xlu1 %v1734_v24, %s3730_s22  ;;  %v1901_v9 = vsel %vm1861_vm4, %v1896_v39, %v1900_v16 }
 0x1b9   : > { %2055 = vrot.lane.b32.xlu0 %v2016_v60, %s3734_s30  ;;  %v2021_v60 = vrot.slane %v5433_v57, 3  ;;  %v1738_v57 = vsel %vm1717_vm7, %v1735_v29, %v1737_v53 }
 0x1ba   : > { %v5445_v4 = vpop.permute.xlu1 %1960 }
 0x1bb   : > { %v5447_v19 = vpop.permute.xlu0 %1548 }
 0x1bc   : > { %6978 = vst [vmem:[#allocation27_spill] sm:$0xff] %v5447_v19  ;;  %1830 = vrot.lane.b32.xlu1 %v1736_v2, %s3732_s25 }
 0x1bd   : > { %2075 = vrot.lane.b32.xlu0 %v2036_v6, %s3734_s30  ;;  %v2022_v6 = vsel %vm2005_vm6, %v2019_v43, %v2021_v60 }
 0x1be   : > { %v5455_v52 = vpop.permute.xlu1 %1761 }
 0x1bf   : > { %v5457_v55 = vpop.permute.xlu0 %1552 }
 0x1c0   : > { %1974 = vrot.lane.b32.xlu1 %v1901_v9, %s3731_s24  ;;  %v6983_v9 = vld [vmem:[#allocation17_spill] sm:$0xff] }
 0x1c1   : > { %1702 = vrot.lane.b32.xlu0 %v4842_v22, %s3729_s21 }
 0x1c2   : > { %v5465_v20 = vpop.permute.xlu1 %1818 }
 0x1c3   : > { %v5467_v40 = vpop.permute.xlu0 %1556 }
 0x1c4   : > { %6980 = vst [vmem:[#allocation13_spill] sm:$0xff] %v5467_v40  ;;  %2061 = vrot.lane.b32.xlu1 %v2022_v6, %s3734_s30  ;;  %v1902_v6 = vrot.slane %v6983_v9, 2  ;;  %v2023_v40 = vrot.slane %v5484_v36, 3 }
 0x1c5   : > { %1789 = vrot.lane.b32.xlu0 %v5303_v48, %s3730_s22  ;;  %v6984_v48 = vld [vmem:[#allocation14_spill] sm:$0xff] }
 0x1c6   : > { %v5473_v26 = vpop.permute.xlu1 %1962  ;;  %v1903_v19 = vrot.slane %v6984_v48, 3 }
 0x1c7   : > { %v5475_v31 = vpop.permute.xlu0 %1560 }
 0x1c8   : > { %6981 = vst [vmem:[#allocation67_spill] sm:$0xff] %v5475_v31  ;;  %2081 = vrot.lane.b32.xlu1 %v4858_v58, %s3734_s30  ;;  %v1904_v30 = vor.u32 %v1903_v19, %v1902_v6  ;;  %v2024_v19 = vsel %vm2005_vm6, %v2021_v60, %v2023_v40  ;;  %v6986_v60 = vrot.slane %v5327_v38, 3 }
 0x1c9   : > { %1846 = vrot.lane.b32.xlu0 %v1752_v1, %s3732_s25 }
 0x1ca   : > { %v5480_v22 = vpop.permute.xlu1 %2049 }
 0x1cb   : > { %v5482_v62 = vpop.permute.xlu0 %1564 }
 0x1cc   : > { %6982 = vst [vmem:[#allocation68_spill] sm:$0xff] %v5482_v62  ;;  %1775 = vrot.lane.b32.xlu1 %v1736_v2, %s3730_s22  ;;  %v1905_v2 = vsel %vm1861_vm4, %v1900_v16, %v1904_v30 }
 0x1cd   : > { %1990 = vrot.lane.b32.xlu0 %v4848_v32, %s3731_s24 }
 0x1ce   : > { %v5492_v58 = vpop.permute.xlu1 %2069 }
 0x1cf   : > { %v5494_v1 = vpop.permute.xlu0 %1568 }
 0x1d0   : > { %1832 = vrot.lane.b32.xlu1 %v1738_v57, %s3732_s25 }
 0x1d1   : > { %1771 = vrot.lane.b32.xlu0 %v5344_v15, %s3730_s22  ;;  %v1897_v15 = vsel %vm1861_vm4, %v5346_v54, %v1896_v39 }
 0x1d2   : > { %v5500_v62 = vpop.permute.xlu1 %1696 }
 0x1d3   : > { %v1675_v31 = vpop.permute.xlu0 %1674 }
 0x1d4   : > { %1976 = vrot.lane.b32.xlu1 %v1905_v2, %s3731_s24 }
 0x1d5   : > { %1828 = vrot.lane.b32.xlu0 %v1734_v24, %s3732_s25  ;;  %v6985_v24 = vld [vmem:[#allocation18_spill] sm:$0xff] }
 0x1d6   : > { %v5506_v32 = vpop.permute.xlu1 %1783  ;;  %v2091_v6 = vsel %vm2089_vm10, %v6985_v24, %v5162_v23  ;;  %v1906_v23 = vrot.slane %v4805_v21, 2 }
 0x1d7   : > { %v5508_v29 = vpop.permute.xlu0 %1678  ;;  %v2135_v54 = vsel %vm2133_vm11, %v2091_v6, %v4933_v28  ;;  %v6988_v28 = vrot.slane %v4607_v49, 3  ;;  %v6989_v6 = vrot.slane %v4583_v41, 3 }
 0x1d8   : > { %2063 = vrot.lane.b32.xlu1 %v2024_v19, %s3734_s30  ;;  %v2020_v19 = vsel %vm2005_vm6, %v6986_v60, %v2019_v43  ;;  %v1907_v60 = vrot.slane %v4469_v34, 3  ;;  %v6990_v34 = vrot.slane %v4434_v8, 2 }
 0x1d9   : > { %1972 = vrot.lane.b32.xlu0 %v1897_v15, %s3731_s24  ;;  %v6987_v15 = vld [vmem:[#allocation3_spill] sm:$0xff]  ;;  %v2040_v21 = vsel %vm2005_vm6, %v6989_v6, %v6988_v28  ;;  %v5586_v6 = vrot.slane %v4828_v56, 2 }
 0x1da   : > { %v5517_v16 = vpop.permute.xlu1 %1840  ;;  %v2093_v24 = vsel %vm2089_vm10, %v6987_v15, %v5005_v13  ;;  %v5563_v28 = vor.u32 %v1907_v60, %v1906_v23 }
 0x1db   : > { %v5522_v2 = vpop.permute.xlu0 %1682  ;;  %v2137_v13 = vsel %vm2133_vm11, %v2093_v24, %v5071_v63  ;;  %v5565_v63 = vld [vmem:[#allocation2 + $0xb0] sm:$0xf]  ;;  %v1106_v24 = vld [vmem:[#allocation2 + $0xb4] sm:$0x1] }
 0x1dc   : > { %2083 = vrot.lane.b32.xlu1 %v4883_v35, %s3734_s30  ;;  %v2178_v35 = vsel %vm2176_vm12, %v2135_v54, %v5388_v5  ;;  %v2180_v54 = vsel %vm2176_vm12, %v2137_v13, %v5268_v12  ;;  %v1909_v60 = vsel %vm1861_vm4, %v1904_v30, %v5563_v28  ;;  %v6992_v13 = vrot.slane %v4434_v8, 3 }
 0x1dd   : > { %2059 = vrot.lane.b32.xlu0 %v2020_v19, %s3734_s30  ;;  %v2221_v5 = vsel %vm2219_vm13, %v2178_v35, %v5386_v51  ;;  %v2223_v51 = vsel %vm2219_vm13, %v2180_v54, %v1675_v31  ;;  %v1615_v54 = vrot.slane %v6976_v0, 2 }
 0x1de   : > { %v5532_v39 = vpop.permute.xlu1 %1984  ;;  %v2264_v41 = vsel %vm2262_vm14, %v2221_v5, %v5428_v44  ;;  %v5575_v44 = vcombine.low %v5565_v63, %v1106_v24  ;;  %v2026_v56 = vsel %vm2005_vm6, %v2023_v40, %v6992_v13 }
 0x1df   : > { %v5540_v43 = vpop.permute.xlu0 %1686 }
 0x1e0   : > { %1777 = vrot.lane.b32.xlu1 %v1738_v57, %s3730_s22  ;;  %v1740_v57 = vsel %vm1717_vm7, %v1737_v53, %v6990_v34  ;;  %v2266_v53 = vsel %vm2262_vm14, %v2223_v51, %v5455_v52  ;;  %v2045_v5 = vrot.slane %v5575_v44, 3  ;;  %v1614_v34 = vrot.slane %v6975_v25, 1 }
 0x1e1   : > { %2079 = vrot.lane.b32.xlu0 %v2040_v21, %s3734_s30  ;;  %v6991_v21 = vmov 0.0   ;;  %v2113_v25 = vsel %vm2089_vm10, %v5484_v36, %v5059_v42 }
 0x1e2   : > { %v5554_v19 = vpop.permute.xlu1 %1765  ;;  %v5626_v24 = vor.u32 %v1615_v54, %v1614_v34  ;;  %v1618_v54 = vrot.slane %v6983_v9, 1 }
 0x1e3   : > { %v1817_v15 = vpop.permute.xlu0 %1816 }
 0x1e4   : > { %v2307_v35 = vsel %vm2305_vm15, %v2264_v41, %v1817_v15  ;;  %1834 = vrot.lane.b32.xlu1 %v1740_v57, %s3732_s25  ;;  %v6994_v15 = vrot.slane %v4866_v37, 3 }
 0x1e5   : > { %1706 = vrot.lane.b32.xlu0 %v4889_v59, %s3729_s21  ;;  %v2350_v31 = vsel %vm2348_vm1, %v2307_v35, %v5445_v4  ;;  %v2309_v4 = vsel %vm2305_vm15, %v2266_v53, %v5465_v20 }
 0x1e6   : > { %v5572_v12 = vpop.permute.xlu1 %1822  ;;  %v2352_v8 = vsel %vm2348_vm1, %v2309_v4, %v5473_v26  ;;  %v2157_v26 = vsel %vm2133_vm11, %v2113_v25, %v5322_v46  ;;  %v1617_v46 = vsel %vm1573_vm2, %v5175_v11, %v5626_v24  ;;  %v1946_v11 = vshll.u32 %v4866_v37, 16  ;;  %v6995_v4 = vld [vmem:[#allocation25_spill] sm:$0xff] }
 0x1e7   : > { %v2048_v23 = vpop.permute.xlu0 %2047  ;;  %v2395_v0 = vsel %vm2391_vm8, %v2352_v8, %v5480_v22  ;;  %v2200_v36 = vsel %vm2176_vm12, %v2157_v26, %v5320_v3  ;;  %v1943_v3 = vshrl.u32 %v4866_v37, 16  ;;  %v1619_v8 = vrot.slane %v6984_v48, 2  ;;  %v3709_v48 = vld [vmem:[#allocation2 + $0x60] sm:$0xff]  }
 0x1e8   : > { %v2393_v59 = vsel %vm2391_vm8, %v2350_v31, %v2048_v23  ;;  %1978 = vrot.lane.b32.xlu1 %v1909_v60, %s3731_s24  ;;  %v1948_v13 = vrot.slane %v1946_v11, 3  ;;  %v2115_v25 = vsel %vm2089_vm10, %v3709_v48, %v5270_v61  ;;  %v2444_v61 = vld [vmem:[%s6731_s3 + $0x1b] sm:$0xff] }
 0x1e9   : > { %1793 = vrot.lane.b32.xlu0 %v5411_v50, %s3730_s22  ;;  %3547 = vmatmul.mubr.msk.bf16.vlgmr.msra.gmra.mrb[0].mxu0 %vm2518_vm3, %v2393_v59  ;;  %v6993_v50 = vrot.slane %v4607_v49, 2  ;;  %v2046_v49 = vsel %vm2005_vm6, %v6994_v15, %v2045_v5  ;;  %v6997_v15 = vld [vmem:[#allocation31_spill] sm:$0xff]  ;;  %v5699_v26 = vor.u32 %v1619_v8, %v1618_v54 }
 0x1ea   : > { %v5593_v52 = vpop.permute.xlu1 %1966  ;;  %3550 = vmatprep.mubr.msk.bf16.mxu0 %vm3735_vm9, %v6991_v21 }
 0x1eb   : > { %v1695_v30 = vpop.permute.xlu0 %1694  ;;  %v1756_v20 = vsel %vm1717_vm7, %v6993_v50, %v5586_v6 }
 0x1ec   : > { %2065 = vrot.lane.b32.xlu1 %v2026_v56, %s3734_s30  ;;  %v2243_v22 = vsel %vm2219_vm13, %v2200_v36, %v1695_v30  ;;  %v1913_v30 = vsel %vm1861_vm4, %v5563_v28, %v6995_v4  ;;  %v2095_v56 = vsel %vm2089_vm10, %v6898_v47, %v5184_v18 }
 0x1ed   : > { %1850 = vrot.lane.b32.xlu0 %v1756_v20, %s3732_s25 }
 0x1ee   : > { %v5613_v41 = vpop.permute.xlu1 %2053 }
 0x1ef   : > { %v1782_v40 = vpop.permute.xlu0 %1781 }
 0x1f0   : > { %2085 = vrot.lane.b32.xlu1 %v2046_v49, %s3734_s30 }
 0x1f1   : > { %1994 = vrot.lane.b32.xlu0 %v4914_v45, %s3731_s24  ;;  %3551 = vmatmul.mubr.msk.bf16.gmra.mrb[4].mxu0 %vm2518_vm3, %v2395_v0  ;;  %v2286_v45 = vsel %vm2262_vm14, %v2243_v22, %v1782_v40 }
 0x1f2   : > { %v5633_v51 = vpop.permute.xlu1 %2073  ;;  %3554 = vmatprep.mubr.msk.bf16.mxu0 %vm3735_vm9, %v6991_v21 }
 0x1f3   : > { %v1839_v42 = vpop.permute.xlu0 %1838 }
 0x1f4   : > { %1779 = vrot.lane.b32.xlu1 %v1740_v57, %s3730_s22  ;;  %v2329_v53 = vsel %vm2305_vm15, %v2286_v45, %v1839_v42 }
 0x1f5   : > { %1688 = vrot.lane.b32.xlu0 %v1617_v46, %s3729_s21 }
 0x1f6   : > { %v5646_v35 = vpop.permute.xlu1 %1700 }
 0x1f7   : > { %v1983_v31 = vpop.permute.xlu0 %1982 }
 0x1f8   : > { %v2372_v23 = vsel %vm2348_vm1, %v2329_v53, %v1983_v31  ;;  %1836 = vrot.lane.b32.xlu1 %v5263_v14, %s3732_s25  ;;  %v1812_v14 = vrot.slane %v4866_v37, 2  ;;  %v6999_v53 = vld [vmem:[#allocation15_spill] sm:$0xff] }
 0x1f9   : > { %1708 = vrot.lane.b32.xlu0 %v4929_v33, %s3729_s21  ;;  %v2415_v57 = vsel %vm2391_vm8, %v2372_v23, %v5492_v58  ;;  %v1945_v33 = vrot.slane %v1943_v3, 2  ;;  %v5670_v58 = vcombine.low %v4850_v17, %v4850_v17  ;;  %v6996_v17 = vld [vmem:[#allocation33_spill] sm:$0xff]  ;;  %v7000_v23 = vld [vmem:[#allocation10_spill] sm:$0xff] }
 0x1fa   : > { %v5658_v60 = vpop.permute.xlu1 %1787  ;;  %3591 = vmatmul.mubr.msk.bf16.vlgmr.msra.gmra.mrb[0].mxu1 %vm2518_vm3, %v2415_v57  ;;  %v1813_v34 = vsel %vm1717_vm7, %v5586_v6, %v1812_v14  ;;  %v2139_v40 = vsel %vm2133_vm11, %v2095_v56, %v6996_v17  ;;  %v2097_v3 = vsel %vm2089_vm10, %v5040_v27, %v7000_v23 }
 0x1fb   : > { %v1764_v59 = vpop.permute.xlu0 %1763  ;;  %3594 = vmatprep.mubr.msk.bf16.mxu1 %vm3735_vm9, %v6991_v21  ;;  %v5688_v47 = vor.u32 %v1948_v13, %v1945_v33  ;;  %v1664_v18 = vshrl.u32 %v5670_v58, 16  ;;  %v2182_v49 = vsel %vm2176_vm12, %v2139_v40, %v5397_v7  ;;  %v6998_v7 = vld [vmem:[#allocation30_spill] sm:$0xff]  ;;  %v1621_v33 = vsel %vm1573_vm2, %v5626_v24, %v5699_v26 }
 0x1fc   : > { %1980 = vrot.lane.b32.xlu1 %v1913_v30, %s3731_s24  ;;  %v2225_v42 = vsel %vm2219_vm13, %v2182_v49, %v5395_v10  ;;  %v2159_v10 = vsel %vm2133_vm11, %v2115_v25, %v6999_v53  ;;  %v1952_v40 = vshrl.u32 %v5575_v44, 16  ;;  %v1757_v49 = vrot.slane %v5670_v58, 2  ;;  %v7005_v53 = vld [vmem:[#allocation55_spill] sm:$0xff] }
 0x1fd   : > { %1795 = vrot.lane.b32.xlu0 %v1756_v20, %s3730_s22  ;;  %v1667_v20 = vshll.u32 %v5670_v58, 16  ;;  %v1950_v36 = vsel %vm1861_vm4, %v6998_v7, %v5688_v47  ;;  %v1666_v46 = vrot.slane %v1664_v18, 1  ;;  %v2268_v45 = vsel %vm2262_vm14, %v2225_v42, %v1764_v59 }
 0x1fe   : > { %v5676_v28 = vpop.permute.xlu1 %1844  ;;  %v2202_v11 = vsel %vm2176_vm12, %v2159_v10, %v5457_v55  ;;  %v2446_v55 = vld [vmem:[%s6731_s3 + $0x2b] sm:$0xff]  ;;  %v1758_v42 = vsel %vm1717_vm7, %v5586_v6, %v1757_v49  ;;  %v1954_v7 = vrot.slane %v1952_v40, 2 }
 0x1ff   : > { %v1821_v50 = vpop.permute.xlu0 %1820  ;;  %v1669_v22 = vrot.slane %v1667_v20, 2  ;;  %v2245_v4 = vsel %vm2219_vm13, %v2202_v11, %v5500_v62  ;;  %v7001_v62 = vld [vmem:[#allocation7_spill] sm:$0xff]  ;;  %v7003_v20 = vld [vmem:[#allocation32_spill] sm:$0xff] }
 0x200   : > { %2067 = vrot.lane.b32.xlu1 %v6997_v15, %s3734_s30  ;;  %v2311_v31 = vsel %vm2305_vm15, %v2268_v45, %v1821_v50  ;;  %v2288_v27 = vsel %vm2262_vm14, %v2245_v4, %v5506_v32  ;;  %v2141_v56 = vsel %vm2133_vm11, %v2097_v3, %v7001_v62  ;;  %v3431_v32 = vcombine.low %v5565_v63, %v5565_v63  ;;  %v7006_v11 = vld [vmem:[#allocation20_spill] sm:$0xff] }
 0x201   : > { %1852 = vrot.lane.b32.xlu0 %v1813_v34, %s3732_s25  ;;  %v5731_v13 = vor.u32 %v1669_v22, %v1666_v46  ;;  %v2331_v50 = vsel %vm2305_vm15, %v2288_v27, %v5517_v16  ;;  %v7002_v34 = vld [vmem:[#allocation47_spill] sm:$0xff]  ;;  %v1955_v15 = vshll.u32 %v5575_v44, 16  ;;  %v3710_v46 = vld [vmem:[#allocation2 + $0x68] sm:$0xff]   ;;  %v7004_v22 = vld [vmem:[#allocation4_spill] sm:$0xff] }
 0x202   : > { %v5695_v9 = vpop.permute.xlu1 %1988  ;;  %v2184_v54 = vsel %vm2176_vm12, %v2141_v56, %v7002_v34  ;;  %v2374_v8 = vsel %vm2348_vm1, %v2331_v50, %v5532_v39  ;;  %v1814_v25 = vrot.slane %v3431_v32, 2  ;;  %v2117_v6 = vsel %vm2089_vm10, %v3710_v46, %v7004_v22  ;;  %v7007_v62 = vld [vmem:[#allocation44_spill] sm:$0xff]  ;;  %v7015_v46 = vld [vmem:[#allocation5_spill] sm:$0xff]  ;;  %v7016_v22 = vld [vmem:[#allocation39_spill] sm:$0xff] }
 0x203   : > { %v1965_v0 = vpop.permute.xlu0 %1964  ;;  %v2227_v16 = vsel %vm2219_vm13, %v2184_v54, %v5508_v29  ;;  %v1671_v63 = vsel %vm1573_vm2, %v7003_v20, %v5731_v13  ;;  %v2448_v29 = vld [vmem:[%s6731_s3 + $0x3b] sm:$0xff]  ;;  %v2161_v10 = vsel %vm2133_vm11, %v2117_v6, %v7005_v53  ;;  %v2101_v6 = vsel %vm2089_vm10, %v7016_v22, %v7015_v46  ;;  %v2474_v46 = vld [vmem:[%s6731_s3 + $0x10b] sm:$0xff] }
 0x204   : > { %2087 = vrot.lane.b32.xlu1 %v2045_v5, %s3734_s30  ;;  %v2354_v57 = vsel %vm2348_vm1, %v2311_v31, %v1965_v0  ;;  %v2270_v39 = vsel %vm2262_vm14, %v2227_v16, %v5554_v19  ;;  %v1815_v45 = vsel %vm1717_vm7, %v1812_v14, %v1814_v25  ;;  %v2452_v31 = vld [vmem:[%s6731_s3 + $0x5b] sm:$0xff] }
 0x205   : > { %1996 = vrot.lane.b32.xlu0 %v1950_v36, %s3731_s24  ;;  %v2313_v44 = vsel %vm2305_vm15, %v2270_v39, %v5572_v12  ;;  %v1957_v36 = vrot.slane %v1955_v15, 3  ;;  %v2450_v12 = vld [vmem:[%s6731_s3 + $0x4b] sm:$0xff]  ;;  %v2456_v50 = vld [vmem:[%s6731_s3 + $0x7b] sm:$0xff] }
 0x206   : > { %v5717_v5 = vpop.permute.xlu1 %1769  ;;  %v2356_v58 = vsel %vm2348_vm1, %v2313_v44, %v5593_v52  ;;  %v7008_v54 = vld [vmem:[#allocation16_spill] sm:$0xff]  ;;  %v7010_v15 = vld [vmem:[#allocation34_spill] sm:$0xff] }
 0x207   : > { %v2052_v59 = vpop.permute.xlu0 %2051  ;;  %v2399_v0 = vsel %vm2391_vm8, %v2356_v58, %v5613_v41  ;;  %v3711_v39 = vld [vmem:[#allocation2 + $0x70] sm:$0xff]  }
 0x208   : > { %v2397_v30 = vsel %vm2391_vm8, %v2354_v57, %v2052_v59  ;;  %2772 = vperm.xlu1 %3663, %v2444_v61   ;;  %v1958_v61 = vor.u32 %v1957_v36, %v1954_v7  ;;  %v2204_v57 = vsel %vm2176_vm12, %v2161_v10, %v7006_v11  ;;  %v2454_v59 = vld [vmem:[%s6731_s3 + $0x6b] sm:$0xff]  ;;  %v7014_v7 = vld [vmem:[#allocation24_spill] sm:$0xff] }
 0x209   : > { %1690 = vrot.lane.b32.xlu0 %v1621_v33, %s3729_s21  ;;  %3555 = vmatmul.mubr.msk.bf16.gmra.mrb[8].mxu0 %vm2518_vm3, %v2397_v30 }
 0x20a   : > { %v5744_v24 = vpop.permute.xlu1 %1826  ;;  %3558 = vmatprep.mubr.msk.bf16.mxu0 %vm3735_vm9, %v6991_v21  ;;  %v1959_v37 = vsel %vm1861_vm4, %v5688_v47, %v1958_v61  ;;  %v1625_v47 = vsel %vm1573_vm2, %v5699_v26, %v7007_v62  ;;  %v7009_v26 = vld [vmem:[#allocation6_spill] sm:$0xff] }
 0x20b   : > { %v2072_v17 = vpop.permute.xlu0 %2071 }
 0x20c   : > { %v2417_v18 = vsel %vm2391_vm8, %v2374_v8, %v2072_v17  ;;  %2782 = vperm.xlu1 %3663, %v2446_v55   ;;  %v2099_v8 = vsel %vm2089_vm10, %v7009_v26, %v7008_v54  ;;  %v2447_v26 = vld [vmem:[%s6731_s3 + $0x33] sm:$0xff] }
 0x20d   : > { %1710 = vrot.lane.b32.xlu0 %v1671_v63, %s3729_s21  ;;  %3595 = vmatmul.mubr.msk.bf16.gmra.mrb[4].mxu1 %vm2518_vm3, %v2417_v18  ;;  %v2143_v16 = vsel %vm2133_vm11, %v2099_v8, %v7010_v15  ;;  %v7011_v18 = vld [vmem:[#allocation61_spill] sm:$0xff]  ;;  %v3712_v8 = vld [vmem:[#allocation2 + $0x78] sm:$0xff]  }
 0x20e   : > { %v5772_v48 = vpop.permute.xlu1 %1970  ;;  %3598 = vmatprep.mubr.msk.bf16.mxu1 %vm3735_vm9, %v6991_v21  ;;  %v2186_v20 = vsel %vm2176_vm12, %v2143_v16, %v7011_v18  ;;  %v2470_v16 = vld [vmem:[%s6731_s3 + $0xeb] sm:$0xff] }
 0x20f   : > { %v1699_v19 = vpop.permute.xlu0 %1698 }
 0x210   : > { %2792 = vperm.xlu1 %3663, %v2448_v29   ;;  %v2247_v14 = vsel %vm2219_vm13, %v2204_v57, %v1699_v19  ;;  %v7012_v29 = vld [vmem:[#allocation48_spill] sm:$0xff]  ;;  %v7013_v19 = vld [vmem:[#allocation29_spill] sm:$0xff] }
 0x211   : > { %1797 = vrot.lane.b32.xlu0 %v1758_v42, %s3730_s22  ;;  %3559 = vmatmul.mubr.msk.bf16.gmra.mrb[12].mxu0 %vm2518_vm3, %v2399_v0  ;;  %v2119_v44 = vsel %vm2089_vm10, %v3711_v39, %v7012_v29  ;;  %v2229_v0 = vsel %vm2219_vm13, %v2186_v20, %v7013_v19  ;;  %v2464_v57 = vld [vmem:[%s6731_s3 + $0xbb] sm:$0xff]  ;;  %v2449_v20 = vld [vmem:[%s6731_s3 + $0x43] sm:$0xff] }
 0x212   : > { %v5787_v52 = vpop.permute.xlu1 %2057  ;;  %3562 = vmatprep.mubr.msk.bf16.mxu0 %vm3735_vm9, %v6991_v21  ;;  %v2163_v36 = vsel %vm2133_vm11, %v2119_v44, %v7014_v7  ;;  %v7022_v39 = vld [vmem:[#allocation56_spill] sm:$0xff] }
 0x213   : > { %v1786_v41 = vpop.permute.xlu0 %1785 }
 0x214   : > { %2802 = vperm.xlu1 %3663, %v2450_v12   ;;  %v2290_v4 = vsel %vm2262_vm14, %v2247_v14, %v1786_v41 }
 0x215   : > { %1854 = vrot.lane.b32.xlu0 %v1815_v45, %s3732_s25  ;;  %v7017_v45 = vld [vmem:[#allocation13_spill] sm:$0xff] }
 0x216   : > { %v5802_v23 = vpop.permute.xlu1 %2077  ;;  %v2206_v53 = vsel %vm2176_vm12, %v2163_v36, %v7017_v45 }
 0x217   : > { %v1843_v3 = vpop.permute.xlu0 %1842 }
 0x218   : > { %2812 = vperm.xlu1 %3663, %v2452_v31   ;;  %v2333_v33 = vsel %vm2305_vm15, %v2290_v4, %v1843_v3  ;;  %v2249_v31 = vsel %vm2219_vm13, %v2206_v53, %v5646_v35  ;;  %v7023_v53 = vld [vmem:[#allocation42_spill] sm:$0xff] }
 0x219   : > { %1998 = vrot.lane.b32.xlu0 %v1959_v37, %s3731_s24  ;;  %v2292_v11 = vsel %vm2262_vm14, %v2249_v31, %v5658_v60  ;;  %v7018_v37 = vld [vmem:[#allocation21_spill] sm:$0xff]  ;;  %v2443_v60 = vld [vmem:[%s6731_s3 + $0x13] sm:$0xff] }
 0x21a   : > { %v5814_v30 = vpop.permute.xlu1 %1704  ;;  %v2145_v14 = vsel %vm2133_vm11, %v2101_v6, %v7018_v37  ;;  %v2335_v35 = vsel %vm2305_vm15, %v2292_v11, %v5676_v28  ;;  %v2453_v6 = vld [vmem:[%s6731_s3 + $0x63] sm:$0xff] }
 0x21b   : > { %v1987_v27 = vpop.permute.xlu0 %1986 }
 0x21c   : > { %v2376_v55 = vsel %vm2348_vm1, %v2333_v33, %v1987_v27  ;;  %2822 = vperm.xlu1 %3663, %v2454_v59   ;;  %v2378_v33 = vsel %vm2348_vm1, %v2335_v35, %v5695_v9 }
 0x21d   : > { %1692 = vrot.lane.b32.xlu0 %v1625_v47, %s3729_s21  ;;  %v2419_v56 = vsel %vm2391_vm8, %v2376_v55, %v5633_v51  ;;  %v2458_v51 = vld [vmem:[%s6731_s3 + $0x8b] sm:$0xff] }
 0x21e   : > { %v5827_v32 = vpop.permute.xlu1 %1791  ;;  %3599 = vmatmul.mubr.msk.bf16.gmra.mrb[8].mxu1 %vm2518_vm3, %v2419_v56  ;;  %v2466_v47 = vld [vmem:[%s6731_s3 + $0xcb] sm:$0xff] }
 0x21f   : > { %v1768_v34 = vpop.permute.xlu0 %1767  ;;  %3602 = vmatprep.mubr.msk.bf16.mxu1 %vm3735_vm9, %v6991_v21 }
 0x220   : > { %2832 = vperm.xlu1 %3663, %v2456_v50   ;;  %v2272_v42 = vsel %vm2262_vm14, %v2229_v0, %v1768_v34 }
 0x221   : > { %1712 = vrot.lane.b32.xlu0 %v5731_v13, %s3729_s21  ;;  %v2460_v13 = vld [vmem:[%s6731_s3 + $0x9b] sm:$0xff] }
 0x222   : > { %v5840_v17 = vpop.permute.xlu1 %1848 }
 0x223   : > { %v1825_v40 = vpop.permute.xlu0 %1824 }
 0x224   : > { %2842 = vperm.xlu1 %3663, %v2458_v51   ;;  %v2315_v12 = vsel %vm2305_vm15, %v2272_v42, %v1825_v40  ;;  %v7021_v40 = vld [vmem:[#allocation57_spill] sm:$0xff]  ;;  %v2451_v42 = vld [vmem:[%s6731_s3 + $0x53] sm:$0xff] }
 0x225   : > { %1799 = vrot.lane.b32.xlu0 %v1757_v49, %s3730_s22  ;;  %v2462_v49 = vld [vmem:[%s6731_s3 + $0xab] sm:$0xff] }
 0x226   : > { %v5850_v63 = vpop.permute.xlu1 %1992 }
 0x227   : > { %v1969_v58 = vpop.permute.xlu0 %1968 }
 0x228   : > { %2852 = vperm.xlu1 %3663, %v2460_v13  }
 0x229   : > { %1856 = vrot.lane.b32.xlu0 %v1814_v25, %s3732_s25  ;;  %v2358_v25 = vsel %vm2348_vm1, %v2315_v12, %v1969_v58  ;;  %v2472_v58 = vld [vmem:[%s6731_s3 + $0xfb] sm:$0xff] }
 0x22a   : > { %v5864_v41 = vpop.permute.xlu1 %1773 }
 0x22b   : > { %v2056_v10 = vpop.permute.xlu0 %2055 }
 0x22c   : > { %v2401_v3 = vsel %vm2391_vm8, %v2358_v25, %v2056_v10  ;;  %2862 = vperm.xlu1 %3663, %v2462_v49   ;;  %v7024_v25 = vld [vmem:[#allocation40_spill] sm:$0xff] }
 0x22d   : > { %2000 = vrot.lane.b32.xlu0 %v1958_v61, %s3731_s24  ;;  %3563 = vmatmul.mubr.msk.bf16.gmra.mrb[16].mxu0 %vm2518_vm3, %v2401_v3  ;;  %v7019_v61 = vld [vmem:[#allocation26_spill] sm:$0xff]  ;;  %v2476_v10 = vld [vmem:[%s6731_s3 + $0x11b] sm:$0xff] }
 0x22e   : > { %v5886_v59 = vpop.permute.xlu1 %1830  ;;  %3566 = vmatprep.mubr.msk.bf16.mxu0 %vm3735_vm9, %v6991_v21  ;;  %v2188_v4 = vsel %vm2176_vm12, %v2145_v14, %v7019_v61  ;;  %v2455_v3 = vld [vmem:[%s6731_s3 + $0x73] sm:$0xff] }
 0x22f   : > { %v2076_v27 = vpop.permute.xlu0 %2075  ;;  %v2231_v55 = vsel %vm2219_vm13, %v2188_v4, %v5522_v2  ;;  %v2445_v2 = vld [vmem:[%s6731_s3 + $0x23] sm:$0xff]  ;;  %v7026_v14 = vld [vmem:[#allocation63_spill] sm:$0xff] }
 0x230   : > { %v2421_v28 = vsel %vm2391_vm8, %v2378_v33, %v2076_v27  ;;  %2872 = vperm.xlu1 %3663, %v2464_v57   ;;  %v2274_v62 = vsel %vm2262_vm14, %v2231_v55, %v5717_v5  ;;  %v7025_v57 = vld [vmem:[#allocation35_spill] sm:$0xff]  ;;  %v2457_v4 = vld [vmem:[%s6731_s3 + $0x83] sm:$0xff] }
 0x231   : > { %2767 = vperm.xlu0 %3662, %v2443_v60   ;;  %3603 = vmatmul.mubr.msk.bf16.gmra.mrb[12].mxu1 %vm2518_vm3, %v2421_v28  ;;  %v2317_v9 = vsel %vm2305_vm15, %v2274_v62, %v5744_v24  ;;  %v2468_v24 = vld [vmem:[%s6731_s3 + $0xdb] sm:$0xff]  ;;  %v2478_v60 = vld [vmem:[%s6731_s3 + $0x12b] sm:$0xff] }
 0x232   : > { %v5908_v56 = vpop.permute.xlu1 %1974  ;;  %3606 = vmatprep.mubr.msk.bf16.mxu1 %vm3735_vm9, %v6991_v21  ;;  %v2360_v5 = vsel %vm2348_vm1, %v2317_v9, %v5772_v48  ;;  %v3713_v33 = vld [vmem:[#allocation2 + $0x80] sm:$0xff]   ;;  %v7027_v27 = vld [vmem:[#allocation49_spill] sm:$0xff]  ;;  %v7028_v62 = vld [vmem:[#allocation62_spill] sm:$0xff] }
 0x233   : > { %v1703_v50 = vpop.permute.xlu0 %1702  ;;  %v2403_v34 = vsel %vm2391_vm8, %v2360_v5, %v5787_v52  ;;  %v7020_v52 = vld [vmem:[#allocation19_spill] sm:$0xff]  ;;  %v2123_v55 = vsel %vm2089_vm10, %v3713_v33, %v7027_v27  ;;  %v7029_v5 = vld [vmem:[#allocation41_spill] sm:$0xff] }
 0x234   : > { %2882 = vperm.xlu1 %3663, %v2466_v47   ;;  %v2121_v51 = vsel %vm2089_vm10, %v3712_v8, %v7020_v52  ;;  %v7032_v52 = vld [vmem:[#allocation67_spill] sm:$0xff]  ;;  %v2469_v33 = vld [vmem:[%s6731_s3 + $0xe3] sm:$0xff] }
 0x235   : > { %2777 = vperm.xlu0 %3662, %v2445_v2   ;;  %3567 = vmatmul.mubr.msk.bf16.gmra.mrb[20].mxu0 %vm2518_vm3, %v2403_v34  ;;  %v2165_v15 = vsel %vm2133_vm11, %v2121_v51, %v7021_v40  ;;  %v2480_v2 = vld [vmem:[%s6731_s3 + $0x13b] sm:$0xff]  ;;  %v7038_v27 = vld [vmem:[#allocation45_spill] sm:$0xff] }
 0x236   : > { %v5923_v54 = vpop.permute.xlu1 %2061  ;;  %3570 = vmatprep.mubr.msk.bf16.mxu0 %vm3735_vm9, %v6991_v21  ;;  %v2208_v29 = vsel %vm2176_vm12, %v2165_v15, %v7022_v39 }
 0x237   : > { %v1790_v48 = vpop.permute.xlu0 %1789  ;;  %v2251_v44 = vsel %vm2219_vm13, %v2208_v29, %v1703_v50  ;;  %v2167_v50 = vsel %vm2133_vm11, %v2123_v55, %v7029_v5  ;;  %v2482_v29 = vld [vmem:[%s6731_s3 + $0x14b] sm:$0xff]  ;;  %v2107_v55 = vsel %vm2089_vm10, %v5327_v38, %v7038_v27 }
 0x238   : > { %2892 = vperm.xlu1 %3663, %v2468_v24   ;;  %v2294_v19 = vsel %vm2262_vm14, %v2251_v44, %v1790_v48  ;;  %v2459_v24 = vld [vmem:[%s6731_s3 + $0x93] sm:$0xff]  ;;  %v2210_v51 = vsel %vm2176_vm12, %v2167_v50, %v7032_v52  ;;  %v2473_v52 = vld [vmem:[%s6731_s3 + $0x103] sm:$0xff] }
 0x239   : > { %2787 = vperm.xlu0 %3662, %v2447_v26   ;;  %v7030_v26 = vld [vmem:[#allocation12_spill] sm:$0xff]  ;;  %v7031_v48 = vld [vmem:[#allocation54_spill] sm:$0xff] }
 0x23a   : > { %v5937_v18 = vpop.permute.xlu1 %2081  ;;  %v2105_v8 = vsel %vm2089_vm10, %v7031_v48, %v7030_v26  ;;  %v7033_v44 = vld [vmem:[#allocation38_spill] sm:$0xff] }
 0x23b   : > { %v1847_v13 = vpop.permute.xlu0 %1846  ;;  %v2471_v50 = vld [vmem:[%s6731_s3 + $0xf3] sm:$0xff] }
 0x23c   : > { %2902 = vperm.xlu1 %3663, %v2470_v16   ;;  %v2337_v49 = vsel %vm2305_vm15, %v2294_v19, %v1847_v13 }
 0x23d   : > { %2797 = vperm.xlu0 %3662, %v2449_v20   ;;  %v2253_v20 = vsel %vm2219_vm13, %v2210_v51, %v5814_v30  ;;  %v2461_v30 = vld [vmem:[%s6731_s3 + $0xa3] sm:$0xff] }
 0x23e   : > { %v5949_v0 = vpop.permute.xlu1 %1775  ;;  %v2296_v39 = vsel %vm2262_vm14, %v2253_v20, %v5827_v32  ;;  %v7034_v32 = vld [vmem:[#allocation50_spill] sm:$0xff] }
 0x23f   : > { %v1991_v7 = vpop.permute.xlu0 %1990  ;;  %v2339_v19 = vsel %vm2305_vm15, %v2296_v39, %v5840_v17  ;;  %v7041_v39 = vld [vmem:[#allocation51_spill] sm:$0xff] }
 0x240   : > { %v2380_v36 = vsel %vm2348_vm1, %v2337_v49, %v1991_v7  ;;  %2912 = vperm.xlu1 %3663, %v2472_v58   ;;  %v2149_v58 = vsel %vm2133_vm11, %v2105_v8, %v7033_v44  ;;  %v2382_v49 = vsel %vm2348_vm1, %v2339_v19, %v5850_v63  ;;  %v2463_v63 = vld [vmem:[%s6731_s3 + $0xb3] sm:$0xff] }
 0x241   : > { %2807 = vperm.xlu0 %3662, %v2451_v42   ;;  %v2423_v12 = vsel %vm2391_vm8, %v2380_v36, %v5802_v23  ;;  %v2103_v23 = vsel %vm2089_vm10, %v7024_v25, %v7023_v53  ;;  %v2192_v42 = vsel %vm2176_vm12, %v2149_v58, %v7034_v32 }
 0x242   : > { %v5961_v22 = vpop.permute.xlu1 %1832  ;;  %3607 = vmatmul.mubr.msk.bf16.gmra.mrb[16].mxu1 %vm2518_vm3, %v2423_v12  ;;  %v2147_v37 = vsel %vm2133_vm11, %v2103_v23, %v7025_v57  ;;  %v2235_v36 = vsel %vm2219_vm13, %v2192_v42, %v5540_v43  ;;  %v3714_v23 = vld [vmem:[#allocation2 + $0x88] sm:$0xff]  }
 0x243   : > { %v1772_v45 = vpop.permute.xlu0 %1771  ;;  %3610 = vmatprep.mubr.msk.bf16.mxu1 %vm3735_vm9, %v6991_v21  ;;  %v2190_v35 = vsel %vm2176_vm12, %v2147_v37, %v7026_v14  ;;  %v2278_v17 = vsel %vm2262_vm14, %v2235_v36, %v5864_v41  ;;  %v7037_v37 = vld [vmem:[#allocation28_spill] sm:$0xff]  ;;  %v7044_v36 = vld [vmem:[#allocation11_spill] sm:$0xff] }
 0x244   : > { %2922 = vperm.xlu1 %3663, %v2474_v46   ;;  %v2233_v47 = vsel %vm2219_vm13, %v2190_v35, %v7028_v62 }
 0x245   : > { %2817 = vperm.xlu0 %3662, %v2453_v6   ;;  %v2276_v9 = vsel %vm2262_vm14, %v2233_v47, %v1772_v45  ;;  %v2321_v6 = vsel %vm2305_vm15, %v2278_v17, %v5886_v59  ;;  %v2465_v59 = vld [vmem:[%s6731_s3 + $0xc3] sm:$0xff] }
 0x246   : > { %v5975_v31 = vpop.permute.xlu1 %1976  ;;  %v2364_v43 = vsel %vm2348_vm1, %v2321_v6, %v5908_v56 }
 0x247   : > { %v1829_v11 = vpop.permute.xlu0 %1828  ;;  %v2407_v41 = vsel %vm2391_vm8, %v2364_v43, %v5923_v54  ;;  %v7046_v43 = vld [vmem:[#allocation53_spill] sm:$0xff] }
 0x248   : > { %2932 = vperm.xlu1 %3663, %v2476_v10   ;;  %v2319_v34 = vsel %vm2305_vm15, %v2276_v9, %v1829_v11  ;;  %v7035_v10 = vld [vmem:[#allocation37_spill] sm:$0xff]  ;;  %v2467_v11 = vld [vmem:[%s6731_s3 + $0xd3] sm:$0xff] }
 0x249   : > { %2827 = vperm.xlu0 %3662, %v2455_v3   ;;  %v2125_v56 = vsel %vm2089_vm10, %v3714_v23, %v7035_v10  ;;  %v7036_v3 = vld [vmem:[#allocation58_spill] sm:$0xff]  ;;  %v2481_v23 = vld [vmem:[%s6731_s3 + $0x143] sm:$0xff] }
 0x24a   : > { %v5987_v61 = vpop.permute.xlu1 %2063  ;;  %v2169_v54 = vsel %vm2133_vm11, %v2125_v56, %v7036_v3  ;;  %v7047_v10 = vld [vmem:[#allocation52_spill] sm:$0xff] }
 0x24b   : > { %v1973_v28 = vpop.permute.xlu0 %1972  ;;  %v2212_v14 = vsel %vm2176_vm12, %v2169_v54, %v7037_v37 }
 0x24c   : > { %2942 = vperm.xlu1 %3663, %v2478_v60   ;;  %v2362_v40 = vsel %vm2348_vm1, %v2319_v34, %v1973_v28  ;;  %v7040_v34 = vld [vmem:[#allocation65_spill] sm:$0xff] }
 0x24d   : > { %2837 = vperm.xlu0 %3662, %v2457_v4  }
 0x24e   : > { %v6012_v15 = vpop.permute.xlu1 %2083 }
 0x24f   : > { %v2060_v16 = vpop.permute.xlu0 %2059 }
 0x250   : > { %v2405_v13 = vsel %vm2391_vm8, %v2362_v40, %v2060_v16  ;;  %2952 = vperm.xlu1 %3663, %v2480_v2   ;;  %v7039_v2 = vld [vmem:[#allocation36_spill] sm:$0xff] }
 0x251   : > { %2847 = vperm.xlu0 %3662, %v2459_v24   ;;  %3571 = vmatmul.mubr.msk.bf16.gmra.mrb[24].mxu0 %vm2518_vm3, %v2405_v13  ;;  %v2151_v5 = vsel %vm2133_vm11, %v2107_v55, %v7039_v2  ;;  %v3715_v13 = vld [vmem:[#allocation2 + $0x90] sm:$0xff]   ;;  %v7049_v55 = vld [vmem:[#allocation60_spill] sm:$0xff] }
 0x252   : > { %3574 = vmatprep.mubr.msk.bf16.mxu0 %vm3735_vm9, %v6991_v21  ;;  %v6041_v46 = vpop.permute.xlu1 %1777  ;;  %v2194_v38 = vsel %vm2176_vm12, %v2151_v5, %v7040_v34  ;;  %v7052_v34 = vld [vmem:[#allocation66_spill] sm:$0xff] }
 0x253   : > { %v2080_v7 = vpop.permute.xlu0 %2079 }
 0x254   : > { %v2425_v12 = vsel %vm2391_vm8, %v2382_v49, %v2080_v7  ;;  %2962 = vperm.xlu1 %3663, %v2482_v29   ;;  %v2127_v29 = vsel %vm2089_vm10, %v3715_v13, %v7041_v39  ;;  %v2479_v7 = vld [vmem:[%s6731_s3 + $0x133] sm:$0xff] }
 0x255   : > { %2857 = vperm.xlu0 %3662, %v2461_v30   ;;  %3611 = vmatmul.mubr.msk.bf16.gmra.mrb[20].mxu1 %vm2518_vm3, %v2425_v12  ;;  %v7043_v30 = vld [vmem:[#allocation68_spill] sm:$0xff] }
 0x256   : > { %3614 = vmatprep.mubr.msk.bf16.mxu1 %vm3735_vm9, %v6991_v21  ;;  %v6061_v53 = vpop.permute.xlu1 %1834  ;;  %v7045_v12 = vld [vmem:[#allocation64_spill] sm:$0xff] }
 0x257   : > { %v1707_v45 = vpop.permute.xlu0 %1706  ;;  %v2109_v17 = vsel %vm2089_vm10, %v7045_v12, %v7044_v36 }
 0x258   : > { %v2255_v35 = vsel %vm2219_vm13, %v2212_v14, %v1707_v45  ;;  %v2153_v45 = vsel %vm2133_vm11, %v2109_v17, %v7046_v43 }
 0x259   : > { %2867 = vperm.xlu0 %3662, %v2463_v63   ;;  %3575 = vmatmul.mubr.msk.bf16.gmra.mrb[28].mxu0 %vm2518_vm3, %v2407_v41  ;;  %v2196_v56 = vsel %vm2176_vm12, %v2153_v45, %v7047_v10 }
 0x25a   : > { %3578 = vmatprep.mubr.msk.bf16.mxu0 %vm3735_vm9, %v6991_v21  ;;  %v6073_v60 = vpop.permute.xlu1 %1978 }
 0x25b   : > { %v1794_v25 = vpop.permute.xlu0 %1793 }
 0x25c   : > { %v2298_v4 = vsel %vm2262_vm14, %v2255_v35, %v1794_v25 }
 0x25d   : > { %2877 = vperm.xlu0 %3662, %v2465_v59  }
 0x25e   : > { %v2066_v24 = vpop.permute.xlu1 %2065 }
 0x25f   : > { %v1851_v57 = vpop.permute.xlu0 %1850 }
 0x260   : > { %v2341_v28 = vsel %vm2305_vm15, %v2298_v4, %v1851_v57  ;;  %v2483_v57 = vld [vmem:[%s6731_s3 + $0x153] sm:$0xf] }
 0x261   : > { %2887 = vperm.xlu0 %3662, %v2467_v11  }
 0x262   : > { %v2086_v20 = vpop.permute.xlu1 %2085 }
 0x263   : > { %v1995_v62 = vpop.permute.xlu0 %1994 }
 0x264   : > { %v2384_v47 = vsel %vm2348_vm1, %v2341_v28, %v1995_v62 }
 0x265   : > { %2897 = vperm.xlu0 %3662, %v2469_v33   ;;  %v2427_v9 = vsel %vm2391_vm8, %v2384_v47, %v5937_v18  ;;  %v3716_v33 = vld [vmem:[#allocation2 + $0x98] sm:$0xff]  }
 0x266   : > { %3615 = vmatmul.mubr.msk.bf16.gmra.mrb[24].mxu1 %vm2518_vm3, %v2427_v9  ;;  %v1780_v58 = vpop.permute.xlu1 %1779  ;;  %v7050_v9 = vld [vmem:[#allocation59_spill] sm:$0xff] }
 0x267   : > { %v1689_v26 = vpop.permute.xlu0 %1688  ;;  %3618 = vmatprep.mubr.msk.bf16.mxu1 %vm3735_vm9, %v6991_v21 }
 0x268   : > { %v2237_v48 = vsel %vm2219_vm13, %v2194_v38, %v1689_v26 }
 0x269   : > { %v2280_v18 = vsel %vm2262_vm14, %v2237_v48, %v5949_v0  ;;  %2907 = vperm.xlu0 %3662, %v2471_v50   ;;  %v2475_v0 = vld [vmem:[%s6731_s3 + $0x113] sm:$0xff] }
 0x26a   : > { %v2323_v8 = vsel %vm2305_vm15, %v2280_v18, %v5961_v22  ;;  %v1837_v59 = vpop.permute.xlu1 %1836  ;;  %v7051_v50 = vld [vmem:[#allocation46_spill] sm:$0xff] }
 0x26b   : > { %v1709_v51 = vpop.permute.xlu0 %1708  ;;  %v2366_v40 = vsel %vm2348_vm1, %v2323_v8, %v5975_v31  ;;  %v2477_v31 = vld [vmem:[%s6731_s3 + $0x123] sm:$0xff]  ;;  %v2111_v38 = vsel %vm2089_vm10, %v7052_v34, %v7051_v50 }
 0x26c   : > { %v2409_v16 = vsel %vm2391_vm8, %v2366_v40, %v5987_v61  ;;  %v7042_v61 = vld [vmem:[#allocation43_spill] sm:$0xff] }
 0x26d   : > { %2917 = vperm.xlu0 %3662, %v2473_v52   ;;  %3579 = vmatmul.mubr.msk.bf16.gmra.mrb[32].mxu0 %vm2518_vm3, %v2409_v16  ;;  %v2171_v44 = vsel %vm2133_vm11, %v2127_v29, %v7042_v61  ;;  %v7053_v52 = vld [vmem:[#allocation9_spill] sm:$0xff]  ;;  %v7054_v40 = vld [vmem:[#allocation27_spill] sm:$0xff] }
 0x26e   : > { %3582 = vmatprep.mubr.msk.bf16.mxu0 %vm3735_vm9, %v6991_v21  ;;  %v2214_v32 = vsel %vm2176_vm12, %v2171_v44, %v7043_v30  ;;  %v1981_v37 = vpop.permute.xlu1 %1980  ;;  %v3688_v30 = vld [vmem:[#allocation2 + $0xa0] ss:$0 sps:$4 sm:$0x33]  }
 0x26f   : > { %v1796_v22 = vpop.permute.xlu0 %1795  ;;  %v2257_v42 = vsel %vm2219_vm13, %v2214_v32, %v1709_v51  ;;  %v2155_v51 = vsel %vm2133_vm11, %v2111_v38, %v7053_v52  ;;  %v7055_v32 = vld [vmem:[#allocation8_spill] sm:$0xff] }
 0x270   : > { %v2300_v49 = vsel %vm2262_vm14, %v2257_v42, %v1796_v22  ;;  %v2198_v16 = vsel %vm2176_vm12, %v2155_v51, %v7054_v40  ;;  %v2132_v42 = vsel %vm2089_vm10, %v3688_v30, %v7055_v32 }
 0x271   : > { %2927 = vperm.xlu0 %3662, %v2475_v0  }
 0x272   : > { %v2068_v62 = vpop.permute.xlu1 %2067 }
 0x273   : > { %v1853_v19 = vpop.permute.xlu0 %1852 }
 0x274   : > { %v2343_v6 = vsel %vm2305_vm15, %v2300_v49, %v1853_v19 }
 0x275   : > { %2937 = vperm.xlu0 %3662, %v2477_v31  }
 0x277   : > { %v1997_v63 = vpop.permute.xlu0 %1996 }
 0x278   : > { %v2386_v41 = vsel %vm2348_vm1, %v2343_v6, %v1997_v63 }
 0x279   : > { %2947 = vperm.xlu0 %3662, %v2479_v7   ;;  %v2429_v25 = vsel %vm2391_vm8, %v2386_v41, %v6012_v15 }
 0x27a   : > { %3619 = vmatmul.mubr.msk.bf16.gmra.mrb[28].mxu1 %vm2518_vm3, %v2429_v25 }
 0x27b   : > { %v1691_v3 = vpop.permute.xlu0 %1690  ;;  %3622 = vmatprep.mubr.msk.bf16.mxu1 %vm3735_vm9, %v6991_v21 }
 0x27c   : > { %v2239_v54 = vsel %vm2219_vm13, %v2196_v56, %v1691_v3 }
 0x27d   : > { %v2282_v11 = vsel %vm2262_vm14, %v2239_v54, %v6041_v46  ;;  %2957 = vperm.xlu0 %3662, %v2481_v23   ;;  %v6213_v54 = vld [vmem:[%s6733_s5] ss:$0 sm:$0xff] }
 0x27e   : > { %v2325_v15 = vsel %vm2305_vm15, %v2282_v11, %v6061_v53  ;;  %v7048_v53 = vld [vmem:[#allocation23_spill] sm:$0xff] }
 0x27f   : > { %v1711_v14 = vpop.permute.xlu0 %1710  ;;  %v2368_v35 = vsel %vm2348_vm1, %v2325_v15, %v6073_v60  ;;  %v2129_v27 = vsel %vm2089_vm10, %v3716_v33, %v7048_v53 }
 0x280   : > { %v2411_v4 = vsel %vm2391_vm8, %v2368_v35, %v2066_v24  ;;  %v2173_v28 = vsel %vm2133_vm11, %v2129_v27, %v7049_v55  ;;  %v2088_v24 = vpop.permute.xlu1 %2087 }
 0x281   : > { %2967 = vperm.xlu0 %3662, %v2483_v57   ;;  %3583 = vmatmul.mubr.msk.bf16.gmra.mrb[36].mxu0 %vm2518_vm3, %v2411_v4  ;;  %v2216_v60 = vsel %vm2176_vm12, %v2173_v28, %v7050_v9 }
 0x282   : > { %3586 = vmatprep.mubr.msk.bf16.mxu0 %vm3735_vm9, %v6991_v21  ;;  %v2259_v2 = vsel %vm2219_vm13, %v2216_v60, %v1711_v14 }
 0x283   : > { %v1798_v46 = vpop.permute.xlu0 %1797 }
 0x284   : > { %v2302_v5 = vsel %vm2262_vm14, %v2259_v2, %v1798_v46 }
 0x287   : > { %v1855_v47 = vpop.permute.xlu0 %1854  ;;  %v2773_v0 = vpop.permute.xlu1 %2772 }
 0x288   : > { %v2345_v26 = vsel %vm2305_vm15, %v2302_v5, %v1855_v47 }
 0x28b   : > { %v1999_v48 = vpop.permute.xlu0 %1998  ;;  %v2783_v44 = vpop.permute.xlu1 %2782 }
 0x28c   : > { %v2388_v18 = vsel %vm2348_vm1, %v2345_v26, %v1999_v48 }
 0x28d   : > { %v2431_v8 = vsel %vm2391_vm8, %v2388_v18, %v2086_v20 }
 0x28e   : > { %3623 = vmatmul.mubr.msk.bf16.gmra.mrb[32].mxu1 %vm2518_vm3, %v2431_v8 }
 0x28f   : > { %v1693_v22 = vpop.permute.xlu0 %1692  ;;  %3626 = vmatprep.mubr.msk.bf16.mxu1 %vm3735_vm9, %v6991_v21  ;;  %v7056_v21 = vld [vmem:[#allocation22_spill] sm:$0xff]  ;;  %v6190_v7 = vpop.permute.xlu1 %2792 }
 0x290   : > { %v2241_v13 = vsel %vm2219_vm13, %v2198_v16, %v1693_v22  ;;  %v2175_v49 = vsel %vm2133_vm11, %v2132_v42, %v7056_v21 }
 0x291   : > { %v2284_v39 = vsel %vm2262_vm14, %v2241_v13, %v1780_v58  ;;  %v2218_v36 = vsel %vm2176_vm12, %v2175_v49, %v5494_v1 }
 0x292   : > { %v2327_v29 = vsel %vm2305_vm15, %v2284_v39, %v1837_v59 }
 0x293   : > { %v1713_v20 = vpop.permute.xlu0 %1712  ;;  %v2370_v31 = vsel %vm2348_vm1, %v2327_v29, %v1981_v37  ;;  %v6198_v45 = vpop.permute.xlu1 %2802 }
 0x294   : > { %v2413_v61 = vsel %vm2391_vm8, %v2370_v31, %v2068_v62  ;;  %v2261_v12 = vsel %vm2219_vm13, %v2218_v36, %v1713_v20 }
 0x295   : > { %3587 = vmatmul.mubr.msk.bf16.gmra.mrb[40].mxu0 %vm2518_vm3, %v2413_v61 }
 0x297   : > { %v1800_v19 = vpop.permute.xlu0 %1799  ;;  %v6202_v59 = vpop.permute.xlu1 %2812 }
 0x298   : > { %v2304_v17 = vsel %vm2262_vm14, %v2261_v12, %v1800_v19 }
 0x29b   : > { %v1857_v58 = vpop.permute.xlu0 %1856  ;;  %v6204_v25 = vpop.permute.xlu1 %2822 }
 0x29c   : > { %v2347_v6 = vsel %vm2305_vm15, %v2304_v17, %v1857_v58 }
 0x29f   : > { %v2001_v63 = vpop.permute.xlu0 %2000  ;;  %v6206_v23 = vpop.permute.xlu1 %2832 }
 0x2a0   : > { %v2390_v43 = vsel %vm2348_vm1, %v2347_v6, %v2001_v63 }
 0x2a1   : > { %v2433_v41 = vsel %vm2391_vm8, %v2390_v43, %v2088_v24 }
 0x2a2   : > { %3627 = vmatmul.mubr.msk.bf16.gmra.mrb[36].mxu1 %vm2518_vm3, %v2433_v41 }
 0x2a3   : > { %v6208_v3 = vpop.permute.xlu1 %2842 }
 0x2a7   : > { %v6216_v35 = vpop.permute.xlu1 %2852 }
 0x2ab   : > { %v6227_v62 = vpop.permute.xlu1 %2862 }
 0x2af   : > { %v6237_v24 = vpop.permute.xlu1 %2872 }
 0x2b0   : > { %v2768_v1 = vpop.permute.xlu0 %2767 }
 0x2b3   : > { %v2883_v16 = vpop.permute.xlu1 %2882 }
 0x2b4   : > { %v2778_v10 = vpop.permute.xlu0 %2777 }
 0x2b7   : > { %v2893_v41 = vpop.permute.xlu1 %2892 }
 0x2b8   : > { %v2788_v56 = vpop.permute.xlu0 %2787 }
 0x2bc   : > { %v2599_v11 = vpop.f32.mrb[0].mxu0  ;;  %v2798_v15 = vpop.permute.xlu0 %2797 }
 0x2bd   : > { %v2600_v57 = vadd.f32 %v6213_v54, %v2599_v11  ;;  %v3548_v37 = vpop.f32.mrb[1].mxu0 }
 0x2be   : > { %v2602_v14 = vpop.f32.mrb[2].mxu0 }
 0x2bf   : > { %v6218_v4 = vmul.f32 %v2768_v1, %v2600_v57  ;;  %v2603_v46 = vadd.f32 %v6213_v54, %v2602_v14  ;;  %v3549_v33 = vpop.f32.mrb[3].mxu0 }
 0x2c0   : > { %v6221_v53 = vpop.permute.xlu0 %2807 }
 0x2c1   : > { %v6223_v27 = vmul.f32 %v2773_v0, %v2603_v46 }
 0x2c4   : > { %v2607_v55 = vpop.f32.mrb[4].mxu0  ;;  %v6225_v28 = vpop.permute.xlu0 %2817 }
 0x2c5   : > { %v2608_v47 = vadd.f32 %v6213_v54, %v2607_v55  ;;  %v3552_v9 = vpop.f32.mrb[5].mxu0 }
 0x2c6   : > { %v2610_v60 = vpop.f32.mrb[6].mxu0 }
 0x2c7   : > { %v6230_v2 = vmul.f32 %v2778_v10, %v2608_v47  ;;  %v2611_v5 = vadd.f32 %v6213_v54, %v2610_v60  ;;  %v3553_v50 = vpop.f32.mrb[7].mxu0 }
 0x2c8   : > { %v6233_v34 = vpop.permute.xlu0 %2827 }
 0x2c9   : > { %v6235_v38 = vmul.f32 %v2783_v44, %v2611_v5 }
 0x2cc   : > { %v6239_v26 = vpop.permute.xlu0 %2837 }
 0x2cd   : > { %v2687_v48 = vpop.f32.mrb[0].mxu1 }
 0x2ce   : > { %v3592_v18 = vpop.f32.mrb[1].mxu1  ;;  %v2688_v39 = vadd.f32 %v6213_v54, %v2687_v48 }
 0x2cf   : > { %v2690_v8 = vpop.f32.mrb[2].mxu1  ;;  %v2903_v18 = vpop.permute.xlu1 %2902 }
 0x2d0   : > { %v2691_v52 = vadd.f32 %v6213_v54, %v2690_v8  ;;  %v3593_v51 = vpop.f32.mrb[3].mxu1  ;;  %v6242_v40 = vpop.permute.xlu0 %2847 }
 0x2d2   : > { %v6244_v0 = vmul.f32 %v2883_v16, %v2691_v52 }
 0x2d4   : > { %v6246_v22 = vpop.permute.xlu0 %2857 }
 0x2d8   : > { %v6248_v13 = vpop.permute.xlu0 %2867 }
 0x2dc   : > { %v2615_v29 = vpop.f32.mrb[8].mxu0  ;;  %v2878_v20 = vpop.permute.xlu0 %2877 }
 0x2dd   : > { %v2616_v31 = vadd.f32 %v6213_v54, %v2615_v29  ;;  %v6252_v61 = vmul.f32 %v2878_v20, %v2688_v39  ;;  %v3556_v44 = vpop.f32.mrb[9].mxu0 }
 0x2de   : > { %v2618_v19 = vpop.f32.mrb[10].mxu0 }
 0x2df   : > { %v6254_v30 = vmul.f32 %v2788_v56, %v2616_v31  ;;  %v2619_v32 = vadd.f32 %v6213_v54, %v2618_v19  ;;  %v3557_v42 = vpop.f32.mrb[11].mxu0 }
 0x2e0   : > { %v2695_v21 = vpop.f32.mrb[4].mxu1  ;;  %v2888_v12 = vpop.permute.xlu0 %2887 }
 0x2e1   : > { %v6258_v49 = vmul.f32 %v6190_v7, %v2619_v32  ;;  %v2696_v58 = vadd.f32 %v6213_v54, %v2695_v21  ;;  %v3596_v36 = vpop.f32.mrb[5].mxu1 }
 0x2e2   : > { %v2698_v17 = vpop.f32.mrb[6].mxu1 }
 0x2e3   : > { %v6261_v6 = vmul.f32 %v2888_v12, %v2696_v58  ;;  %v2699_v63 = vadd.f32 %v6213_v54, %v2698_v17  ;;  %v3597_v43 = vpop.f32.mrb[7].mxu1  ;;  %v2913_v12 = vpop.permute.xlu1 %2912 }
 0x2e4   : > { %v2623_v1 = vpop.f32.mrb[12].mxu0  ;;  %v2898_v9 = vpop.permute.xlu0 %2897 }
 0x2e5   : > { %v6264_v10 = vmul.f32 %v2893_v41, %v2699_v63  ;;  %v2624_v56 = vadd.f32 %v6213_v54, %v2623_v1  ;;  %v3560_v11 = vpop.f32.mrb[13].mxu0 }
 0x2e6   : > { %v2626_v57 = vpop.f32.mrb[14].mxu0 }
 0x2e7   : > { %v6267_v7 = vmul.f32 %v2798_v15, %v2624_v56  ;;  %v2627_v37 = vadd.f32 %v6213_v54, %v2626_v57  ;;  %v3561_v14 = vpop.f32.mrb[15].mxu0 }
 0x2e8   : > { %v2908_v32 = vpop.permute.xlu0 %2907 }
 0x2e9   : > { %v6271_v46 = vmul.f32 %v6198_v45, %v2627_v37 }
 0x2f1   : > { %v2703_v33 = vpop.f32.mrb[8].mxu1 }
 0x2f2   : > { %v2704_v55 = vadd.f32 %v6213_v54, %v2703_v33  ;;  %v3600_v47 = vpop.f32.mrb[9].mxu1  ;;  %v2918_v33 = vpop.permute.xlu0 %2917 }
 0x2f3   : > { %v2706_v60 = vpop.f32.mrb[10].mxu1 }
 0x2f4   : > { %v6274_v5 = vmul.f32 %v2898_v9, %v2704_v55  ;;  %v2707_v50 = vadd.f32 %v6213_v54, %v2706_v60  ;;  %v3601_v48 = vpop.f32.mrb[11].mxu1 }
 0x2f6   : > { %v6277_v15 = vmul.f32 %v2903_v18, %v2707_v50  ;;  %v2923_v50 = vpop.permute.xlu1 %2922 }
 0x300   : > { %v2631_v8 = vpop.f32.mrb[16].mxu0 }
 0x301   : > { %v2632_v52 = vadd.f32 %v6213_v54, %v2631_v8  ;;  %v3564_v51 = vpop.f32.mrb[17].mxu0 }
 0x302   : > { %v2634_v45 = vpop.f32.mrb[18].mxu0 }
 0x303   : > { %v6281_v16 = vmul.f32 %v6221_v53, %v2632_v52  ;;  %v2635_v39 = vadd.f32 %v6213_v54, %v2634_v45  ;;  %v3565_v29 = vpop.f32.mrb[19].mxu0 }
 0x304   : > { %v2711_v20 = vpop.f32.mrb[12].mxu1 }
 0x305   : > { %v6285_v31 = vmul.f32 %v6202_v59, %v2635_v39  ;;  %v2712_v44 = vadd.f32 %v6213_v54, %v2711_v20  ;;  %v3604_v19 = vpop.f32.mrb[13].mxu1 }
 0x306   : > { %v2714_v42 = vpop.f32.mrb[14].mxu1  ;;  %v2928_v19 = vpop.permute.xlu0 %2927 }
 0x307   : > { %v6288_v21 = vmul.f32 %v2908_v32, %v2712_v44  ;;  %v2715_v58 = vadd.f32 %v6213_v54, %v2714_v42  ;;  %v3605_v36 = vpop.f32.mrb[15].mxu1 }
 0x308   : > { %v2639_v53 = vpop.f32.mrb[20].mxu0 }
 0x309   : > { %v6291_v17 = vmul.f32 %v2913_v12, %v2715_v58  ;;  %v2640_v63 = vadd.f32 %v6213_v54, %v2639_v53  ;;  %v3568_v43 = vpop.f32.mrb[21].mxu0  ;;  %v2933_v12 = vpop.permute.xlu1 %2932 }
 0x30a   : > { %v2642_v41 = vpop.f32.mrb[22].mxu0 }
 0x30b   : > { %v6295_v59 = vmul.f32 %v6225_v28, %v2640_v63  ;;  %v2643_v1 = vadd.f32 %v6213_v54, %v2642_v41  ;;  %v3569_v56 = vpop.f32.mrb[23].mxu0 }
 0x30d   : > { %v6299_v11 = vmul.f32 %v6204_v25, %v2643_v1 }
 0x315   : > { %v2719_v57 = vpop.f32.mrb[16].mxu1 }
 0x316   : > { %v2720_v37 = vadd.f32 %v6213_v54, %v2719_v57  ;;  %v3608_v14 = vpop.f32.mrb[17].mxu1 }
 0x317   : > { %v2722_v55 = vpop.f32.mrb[18].mxu1 }
 0x318   : > { %v6302_v47 = vmul.f32 %v2918_v33, %v2720_v37  ;;  %v2723_v9 = vadd.f32 %v6213_v54, %v2722_v55  ;;  %v3609_v60 = vpop.f32.mrb[19].mxu1  ;;  %v2938_v55 = vpop.permute.xlu0 %2937 }
 0x31a   : > { %v6305_v28 = vmul.f32 %v2923_v50, %v2723_v9 }
 0x324   : > { %v2647_v48 = vpop.f32.mrb[24].mxu0 }
 0x325   : > { %v2648_v18 = vadd.f32 %v6213_v54, %v2647_v48  ;;  %v3572_v8 = vpop.f32.mrb[25].mxu0 }
 0x326   : > { %v2650_v25 = vpop.f32.mrb[26].mxu0 }
 0x327   : > { %v6309_v52 = vmul.f32 %v6233_v34, %v2648_v18  ;;  %v2651_v51 = vadd.f32 %v6213_v54, %v2650_v25  ;;  %v3573_v45 = vpop.f32.mrb[27].mxu0  ;;  %v2943_v18 = vpop.permute.xlu1 %2942 }
 0x328   : > { %v2727_v39 = vpop.f32.mrb[20].mxu1 }
 0x329   : > { %v6313_v29 = vmul.f32 %v6206_v23, %v2651_v51  ;;  %v2728_v20 = vadd.f32 %v6213_v54, %v2727_v39  ;;  %v3612_v44 = vpop.f32.mrb[21].mxu1 }
 0x32a   : > { %v2730_v32 = vpop.f32.mrb[22].mxu1 }
 0x32b   : > { %v6316_v42 = vmul.f32 %v2928_v19, %v2728_v20  ;;  %v2731_v58 = vadd.f32 %v6213_v54, %v2730_v32  ;;  %v3613_v36 = vpop.f32.mrb[23].mxu1 }
 0x32c   : > { %v2655_v34 = vpop.f32.mrb[28].mxu0  ;;  %v2948_v36 = vpop.permute.xlu0 %2947 }
 0x32d   : > { %v6319_v53 = vmul.f32 %v2933_v12, %v2731_v58  ;;  %v2656_v63 = vadd.f32 %v6213_v54, %v2655_v34  ;;  %v3576_v43 = vpop.f32.mrb[29].mxu0 }
 0x32e   : > { %v2658_v41 = vpop.f32.mrb[30].mxu0 }
 0x32f   : > { %v6323_v23 = vmul.f32 %v6239_v26, %v2656_v63  ;;  %v2659_v1 = vadd.f32 %v6213_v54, %v2658_v41  ;;  %v3577_v56 = vpop.f32.mrb[31].mxu0  ;;  %v2953_v41 = vpop.permute.xlu1 %2952 }
 0x331   : > { %v6327_v57 = vmul.f32 %v6208_v3, %v2659_v1 }
 0x339   : > { %v2735_v37 = vpop.f32.mrb[24].mxu1 }
 0x33a   : > { %v2736_v14 = vadd.f32 %v6213_v54, %v2735_v37  ;;  %v3616_v33 = vpop.f32.mrb[25].mxu1 }
 0x33b   : > { %v2738_v9 = vpop.f32.mrb[26].mxu1 }
 0x33c   : > { %v6330_v60 = vmul.f32 %v2938_v55, %v2736_v14  ;;  %v2739_v50 = vadd.f32 %v6213_v54, %v2738_v9  ;;  %v3617_v48 = vpop.f32.mrb[27].mxu1 }
 0x33e   : > { %v6333_v26 = vmul.f32 %v2943_v18, %v2739_v50 }
 0x340   : > { %v2663_v8 = vpop.f32.mrb[32].mxu0 }
 0x341   : > { %v2664_v25 = vadd.f32 %v6213_v54, %v2663_v8  ;;  %v3580_v51 = vpop.f32.mrb[33].mxu0  ;;  %v2958_v8 = vpop.permute.xlu0 %2957 }
 0x342   : > { %v2666_v3 = vpop.f32.mrb[34].mxu0 }
 0x343   : > { %v6337_v45 = vmul.f32 %v6242_v40, %v2664_v25  ;;  %v2667_v39 = vadd.f32 %v6213_v54, %v2666_v3  ;;  %v3581_v20 = vpop.f32.mrb[35].mxu0 }
 0x344   : > { %v2963_v20 = vpop.permute.xlu1 %2962 }
 0x345   : > { %v6341_v44 = vmul.f32 %v6216_v35, %v2667_v39 }
 0x34d   : > { %v2743_v19 = vpop.f32.mrb[28].mxu1 }
 0x34e   : > { %v2744_v32 = vadd.f32 %v6213_v54, %v2743_v19  ;;  %v3620_v58 = vpop.f32.mrb[29].mxu1 }
 0x34f   : > { %v2746_v12 = vpop.f32.mrb[30].mxu1 }
 0x350   : > { %v6344_v34 = vmul.f32 %v2948_v36, %v2744_v32  ;;  %v2747_v63 = vadd.f32 %v6213_v54, %v2746_v12  ;;  %v3621_v43 = vpop.f32.mrb[31].mxu1 }
 0x352   : > { %v6347_v40 = vmul.f32 %v2953_v41, %v2747_v63 }
 0x354   : > { %v2671_v1 = vpop.f32.mrb[36].mxu0 }
 0x355   : > { %v2672_v56 = vadd.f32 %v6213_v54, %v2671_v1  ;;  %v3584_v37 = vpop.f32.mrb[37].mxu0 }
 0x356   : > { %v2674_v35 = vpop.f32.mrb[38].mxu0  ;;  %v2968_v37 = vpop.permute.xlu0 %2967 }
 0x357   : > { %v6351_v14 = vmul.f32 %v6246_v22, %v2672_v56  ;;  %v2675_v33 = vadd.f32 %v6213_v54, %v2674_v35  ;;  %v3585_v55 = vpop.f32.mrb[39].mxu0 }
 0x359   : > { %v6355_v9 = vmul.f32 %v6227_v62, %v2675_v33 }
 0x361   : > { %v2751_v50 = vpop.f32.mrb[32].mxu1 }
 0x362   : > { %v2752_v48 = vadd.f32 %v6213_v54, %v2751_v50  ;;  %v3624_v18 = vpop.f32.mrb[33].mxu1 }
 0x363   : > { %v2754_v25 = vpop.f32.mrb[34].mxu1 }
 0x364   : > { %v6358_v51 = vmul.f32 %v2958_v8, %v2752_v48  ;;  %v2755_v3 = vadd.f32 %v6213_v54, %v2754_v25  ;;  %v3625_v39 = vpop.f32.mrb[35].mxu1 }
 0x366   : > { %v6361_v22 = vmul.f32 %v2963_v20, %v2755_v3 }
 0x368   : > { %v2679_v19 = vpop.f32.mrb[40].mxu0 }
 0x369   : > { %v2680_v32 = vadd.f32 %v6213_v54, %v2679_v19  ;;  %v3588_v58 = vpop.f32.mrb[41].mxu0 }
 0x36a   : > { %v2682_v62 = vpop.f32.mrb[42].mxu0 }
 0x36b   : > { %v6365_v36 = vmul.f32 %v6248_v13, %v2680_v32  ;;  %v2683_v12 = vadd.f32 %v6213_v54, %v2682_v62  ;;  %v3589_v63 = vpop.f32.mrb[43].mxu0  ;;  %v3736_v13 = vmov (!%p3461_p4), 0.0  }
 0x36c   : > { %3015 = vst.msk [vmem:[%s6735_s7] sm:$0x1] (!%p3461_p4), %vm1052_vm5, %v3736_v13  ;;  %3016 = vst.msk [vmem:[%s6736_s8] sm:$0x1] (!%p3461_p4), %vm1052_vm5, %v3736_v13 }
 0x36d   : > { %v6369_v43 = vmul.f32 %v6237_v24, %v2683_v12 }
 0x372   : > { %3014 = sbr.rel (%p3461_p4) target bundleno = 889 (0x379), region = 48 }
 0x375   : > { %v2759_v41 = vpop.f32.mrb[36].mxu1 }
 0x376   : > { %v2760_v1 = vadd.f32 %v6213_v54, %v2759_v41  ;;  %v3628_v56 = vpop.f32.mrb[37].mxu1 }
 0x377   : > { %v2762_v35 = vpop.f32.mrb[38].mxu1 }
 0x378   : > { %v6372_v33 = vmul.f32 %v2968_v37, %v2760_v1  ;;  %v3629_v55 = vpop.f32.mrb[39].mxu1 }
 0x379 PF: > { %v3018_v54 = vsel %vm2089_vm10, %v6218_v4, 0.0  ;;  %v3019_v24 = vsel %vm2089_vm10, %v6223_v27, 0.0  ;;  %v3021_v50 = vsel %vm2089_vm10, %v6230_v2, 0.0  ;;  %3238 = vst.msk [vmem:[%s3848_s23] sm:$0xff] %vm2089_vm10, %v6218_v4  ;;  %3239 = vst.msk [vmem:[%s3848_s23 + $0x8] sm:$0xff] %vm2089_vm10, %v6223_v27  ;;  %v3023_v18 = vsel %vm2089_vm10, %v6235_v38, 0.0 }
 0x37a   : > { %3240 = vst.msk [vmem:[%s3848_s23 + $0x10] sm:$0xff] %vm2089_vm10, %v6230_v2  ;;  %3241 = vst.msk [vmem:[%s3848_s23 + $0x18] sm:$0xff] %vm2089_vm10, %v6235_v38  ;;  %v3020_v48 = vadd.f32 %v3019_v24, %v3018_v54  ;;  %v3025_v25 = vsel %vm2089_vm10, %v6254_v30, 0.0  ;;  %v3027_v39 = vsel %vm2089_vm10, %v6258_v49, 0.0  ;;  %v3029_v19 = vsel %vm2089_vm10, %v6267_v7, 0.0 }
 0x37b   : > { %3242 = vst.msk [vmem:[%s3848_s23 + $0x20] sm:$0xff] %vm2089_vm10, %v6254_v30  ;;  %3243 = vst.msk [vmem:[%s3848_s23 + $0x28] sm:$0xff] %vm2089_vm10, %v6258_v49  ;;  %v3031_v58 = vsel %vm2089_vm10, %v6271_v46, 0.0  ;;  %v3033_v12 = vsel %vm2089_vm10, %v6281_v16, 0.0  ;;  %v3035_v41 = vsel %vm2089_vm10, %v6285_v31, 0.0  ;;  %v3037_v56 = vsel %vm2089_vm10, %v6295_v59, 0.0 }
 0x37c   : > { %3244 = vst.msk [vmem:[%s3848_s23 + $0x30] sm:$0xff] %vm2089_vm10, %v6267_v7  ;;  %3245 = vst.msk [vmem:[%s3848_s23 + $0x38] sm:$0xff] %vm2089_vm10, %v6271_v46  ;;  %v3022_v8 = vadd.f32 %v3021_v50, %v3020_v48  ;;  %v3039_v35 = vsel %vm2089_vm10, %v6299_v11, 0.0  ;;  %v3108_v13 = vmul.f32 %v6218_v4, %v6218_v4  ;;  %v3109_v54 = vmul.f32 %v6223_v27, %v6223_v27 }
 0x37d   : > { %3246 = vst.msk [vmem:[%s3848_s23 + $0x40] sm:$0xff] %vm2089_vm10, %v6281_v16  ;;  %3247 = vst.msk [vmem:[%s3848_s23 + $0x48] sm:$0xff] %vm2089_vm10, %v6285_v31  ;;  %v3041_v24 = vsel %vm2089_vm10, %v6309_v52, 0.0  ;;  %v3110_v50 = vmul.f32 %v6230_v2, %v6230_v2  ;;  %v3112_v4 = vmul.f32 %v6254_v30, %v6254_v30 }
 0x37e   : > { %3248 = vst.msk [vmem:[%s3848_s23 + $0x50] sm:$0xff] %vm2089_vm10, %v6295_v59  ;;  %3249 = vst.msk [vmem:[%s3848_s23 + $0x58] sm:$0xff] %vm2089_vm10, %v6299_v11  ;;  %v3024_v3 = vadd.f32 %v3023_v18, %v3022_v8  ;;  %v3111_v18 = vmul.f32 %v6235_v38, %v6235_v38  ;;  %v3043_v8 = vsel %vm2089_vm10, %v6313_v29, 0.0  ;;  %v3150_v27 = vsel %vm2089_vm10, %v3109_v54, 0.0 }
 0x37f   : > { %3250 = vst.msk [vmem:[%s3848_s23 + $0x60] sm:$0xff] %vm2089_vm10, %v6309_v52  ;;  %3251 = vst.msk [vmem:[%s3848_s23 + $0x68] sm:$0xff] %vm2089_vm10, %v6313_v29  ;;  %v3152_v2 = vsel %vm2089_vm10, %v3110_v50, 0.0  ;;  %v3113_v38 = vmul.f32 %v6258_v49, %v6258_v49  ;;  %v3115_v49 = vmul.f32 %v6271_v46, %v6271_v46  ;;  %v3117_v46 = vmul.f32 %v6285_v31, %v6285_v31 }
 0x380   : > { %3252 = vst.msk [vmem:[%s3848_s23 + $0x70] sm:$0xff] %vm2089_vm10, %v6323_v23  ;;  %3253 = vst.msk [vmem:[%s3848_s23 + $0x78] sm:$0xff] %vm2089_vm10, %v6327_v57  ;;  %v3026_v20 = vadd.f32 %v3025_v25, %v3024_v3  ;;  %v3149_v3 = vsel %vm2089_vm10, %v3108_v13, 0.0  ;;  %v3119_v31 = vmul.f32 %v6299_v11, %v6299_v11  ;;  %v3121_v11 = vmul.f32 %v6313_v29, %v6313_v29 }
 0x381   : > { %3254 = vst.msk [vmem:[%s3848_s23 + $0x80] sm:$0xff] %vm2089_vm10, %v6337_v45  ;;  %3255 = vst.msk [vmem:[%s3848_s23 + $0x88] sm:$0xff] %vm2089_vm10, %v6341_v44  ;;  %v3123_v29 = vmul.f32 %v6327_v57, %v6327_v57 }
 0x382   : > { %3256 = vst.msk [vmem:[%s3848_s23 + $0x90] sm:$0xff] %vm2089_vm10, %v6351_v14  ;;  %3257 = vst.msk [vmem:[%s3848_s23 + $0x98] sm:$0xff] %vm2089_vm10, %v6355_v9  ;;  %v3028_v32 = vadd.f32 %v3027_v39, %v3026_v20  ;;  %v3045_v39 = vsel %vm2089_vm10, %v6323_v23, 0.0  ;;  %v3151_v20 = vadd.f32 %v3150_v27, %v3149_v3  ;;  %v3057_v27 = vsel %vm2089_vm10, %v6365_v36, 0.0 }
 0x383   : > { %3258 = vst.msk [vmem:[%s3848_s23 + $0xa0] sm:$0xff] %vm2089_vm10, %v6365_v36  ;;  %3259 = vst.msk [vmem:[%s3848_s23 + $0xa8] sm:$0xff] %vm2089_vm10, %v6369_v43 }
 0x384   : > { %3260 = vst.msk [vmem:[%s3848_s23 + $0xb0] sm:$0xff] %vm2089_vm10, %v6252_v61  ;;  %3261 = vst.msk [vmem:[%s3848_s23 + $0xb8] sm:$0xff] %vm2089_vm10, %v6244_v0  ;;  %v3030_v62 = vadd.f32 %v3029_v19, %v3028_v32  ;;  %v3154_v32 = vsel %vm2089_vm10, %v3111_v18, 0.0  ;;  %v3153_v30 = vadd.f32 %v3152_v2, %v3151_v20  ;;  %v3162_v18 = vsel %vm2089_vm10, %v3115_v49, 0.0 }
 0x385   : > { %3262 = vst.msk [vmem:[%s3848_s23 + $0xc0] sm:$0xff] %vm2089_vm10, %v6261_v6  ;;  %3263 = vst.msk [vmem:[%s3848_s23 + $0xc8] sm:$0xff] %vm2089_vm10, %v6264_v10  ;;  %v3166_v2 = vsel %vm2089_vm10, %v3117_v46, 0.0 }
 0x386   : > { %3264 = vst.msk [vmem:[%s3848_s23 + $0xd0] sm:$0xff] %vm2089_vm10, %v6274_v5  ;;  %3265 = vst.msk [vmem:[%s3848_s23 + $0xd8] sm:$0xff] %vm2089_vm10, %v6277_v15  ;;  %v3032_v63 = vadd.f32 %v3031_v58, %v3030_v62  ;;  %v3047_v58 = vsel %vm2089_vm10, %v6327_v57, 0.0  ;;  %v3125_v57 = vmul.f32 %v6341_v44, %v6341_v44 }
 0x387   : > { %3266 = vst.msk [vmem:[%s3848_s23 + $0xe0] sm:$0xff] %vm2089_vm10, %v6288_v21  ;;  %3267 = vst.msk [vmem:[%s3848_s23 + $0xe8] sm:$0xff] %vm2089_vm10, %v6291_v17 }
 0x388   : > { %3268 = vst.msk [vmem:[%s3848_s23 + $0xf0] sm:$0xff] %vm2089_vm10, %v6302_v47  ;;  %3269 = vst.msk [vmem:[%s3848_s23 + $0xf8] sm:$0xff] %vm2089_vm10, %v6305_v28  ;;  %v3034_v1 = vadd.f32 %v3033_v12, %v3032_v63  ;;  %v3114_v12 = vmul.f32 %v6267_v7, %v6267_v7  ;;  %v3156_v63 = vsel %vm2089_vm10, %v3112_v4, 0.0  ;;  %v3116_v7 = vmul.f32 %v6281_v16, %v6281_v16 }
 0x389   : > { %3270 = vst.msk [vmem:[%s3848_s23 + $0x100] sm:$0xff] %vm2089_vm10, %v6316_v42  ;;  %3271 = vst.msk [vmem:[%s3848_s23 + $0x108] sm:$0xff] %vm2089_vm10, %v6319_v53  ;;  %v3118_v16 = vmul.f32 %v6295_v59, %v6295_v59  ;;  %v3120_v59 = vmul.f32 %v6309_v52, %v6309_v52  ;;  %v3122_v52 = vmul.f32 %v6323_v23, %v6323_v23 }
 0x38a   : > { %3272 = vst.msk [vmem:[%s3848_s23 + $0x110] sm:$0xff] %vm2089_vm10, %v6330_v60  ;;  %3273 = vst.msk [vmem:[%s3848_s23 + $0x118] sm:$0xff] %vm2089_vm10, %v6333_v26  ;;  %v3036_v37 = vadd.f32 %v3035_v41, %v3034_v1  ;;  %v3049_v41 = vsel %vm2089_vm10, %v6337_v45, 0.0  ;;  %v3155_v1 = vadd.f32 %v3154_v32, %v3153_v30  ;;  %v3160_v54 = vsel %vm2089_vm10, %v3114_v12, 0.0 }
 0x38b   : > { %3274 = vst.msk [vmem:[%s3848_s23 + $0x120] sm:$0xff] %vm2089_vm10, %v6344_v34  ;;  %3275 = vst.msk [vmem:[%s3848_s23 + $0x128] sm:$0xff] %vm2089_vm10, %v6347_v40  ;;  %v3164_v3 = vsel %vm2089_vm10, %v3116_v7, 0.0  ;;  %v3061_v30 = vsel %vm2089_vm10, %v6252_v61, 0.0  ;;  %v3172_v49 = vsel %vm2089_vm10, %v3120_v59, 0.0  ;;  %v3067_v7 = vsel %vm2089_vm10, %v6264_v10, 0.0 }
 0x38c   : > { %3276 = vst.msk [vmem:[%s3848_s23 + $0x130] sm:$0xff] %vm2089_vm10, %v6358_v51  ;;  %3277 = vst.msk [vmem:[%s3848_s23 + $0x138] sm:$0xff] %vm2089_vm10, %v6361_v22  ;;  %v3038_v55 = vadd.f32 %v3037_v56, %v3036_v37  ;;  %v3158_v37 = vsel %vm2089_vm10, %v3113_v38, 0.0  ;;  %v3124_v23 = vmul.f32 %v6337_v45, %v6337_v45  ;;  %v3126_v45 = vmul.f32 %v6351_v14, %v6351_v14 }
 0x38d   : > { %3278 = vst.msk [vmem:[%s3848_s23 + $0x140] sm:$0xf] %vm1006_vm0, %v6372_v33  ;;  %v3077_v59 = vsel %vm2089_vm10, %v6302_v47, 0.0 }
 0x38e   : > { %v3040_v48 = vadd.f32 %v3039_v35, %v3038_v55  ;;  %v3051_v35 = vsel %vm2089_vm10, %v6341_v44, 0.0  ;;  %v3157_v55 = vadd.f32 %v3156_v63, %v3155_v1  ;;  %v3170_v63 = vsel %vm2089_vm10, %v3119_v31, 0.0 }
 0x38f   : > { %v3127_v44 = vmul.f32 %v6355_v9, %v6355_v9  ;;  %v3182_v31 = vsel %vm2089_vm10, %v3125_v57, 0.0 }
 0x390   : > { %v3042_v25 = vadd.f32 %v3041_v24, %v3040_v48  ;;  %v3053_v24 = vsel %vm2089_vm10, %v6351_v14, 0.0  ;;  %v3159_v50 = vadd.f32 %v3158_v37, %v3157_v55  ;;  %v3065_v37 = vsel %vm2089_vm10, %v6261_v6, 0.0 }
 0x391   : > { %v3128_v14 = vmul.f32 %v6365_v36, %v6365_v36  ;;  %v3130_v36 = vmul.f32 %v6252_v61, %v6252_v61  ;;  %v3132_v61 = vmul.f32 %v6261_v6, %v6261_v6  ;;  %v3134_v6 = vmul.f32 %v6274_v5, %v6274_v5 }
 0x392   : > { %v3044_v19 = vadd.f32 %v3043_v8, %v3042_v25  ;;  %v3055_v8 = vsel %vm2089_vm10, %v6355_v9, 0.0  ;;  %v3161_v25 = vadd.f32 %v3160_v54, %v3159_v50  ;;  %v3176_v50 = vsel %vm2089_vm10, %v3122_v52, 0.0 }
 0x393   : > { %v3129_v9 = vmul.f32 %v6369_v43, %v6369_v43 }
 0x394   : > { %v3046_v62 = vadd.f32 %v3045_v39, %v3044_v19  ;;  %v3163_v39 = vadd.f32 %v3162_v18, %v3161_v25  ;;  %v3059_v19 = vsel %vm2089_vm10, %v6369_v43, 0.0  ;;  %v3071_v25 = vsel %vm2089_vm10, %v6277_v15, 0.0 }
 0x395   : > { %v3131_v43 = vmul.f32 %v6244_v0, %v6244_v0 }
 0x396   : > { %v3048_v56 = vadd.f32 %v3047_v58, %v3046_v62  ;;  %v3165_v38 = vadd.f32 %v3164_v3, %v3163_v39  ;;  %v3168_v58 = vsel %vm2089_vm10, %v3118_v16, 0.0  ;;  %v3180_v3 = vsel %vm2089_vm10, %v3124_v23, 0.0 }
 0x397   : > { %v3087_v23 = vsel %vm2089_vm10, %v6333_v26, 0.0 }
 0x398   : > { %v3050_v13 = vadd.f32 %v3049_v41, %v3048_v56  ;;  %v3167_v62 = vadd.f32 %v3166_v2, %v3165_v38  ;;  %v3063_v41 = vsel %vm2089_vm10, %v6244_v0, 0.0  ;;  %v3075_v2 = vsel %vm2089_vm10, %v6291_v17, 0.0 }
 0x399   : > { %v3133_v0 = vmul.f32 %v6264_v10, %v6264_v10  ;;  %v3135_v10 = vmul.f32 %v6277_v15, %v6277_v15  ;;  %v3137_v15 = vmul.f32 %v6291_v17, %v6291_v17  ;;  %v3139_v17 = vmul.f32 %v6305_v28, %v6305_v28 }
 0x39a   : > { %v3052_v48 = vadd.f32 %v3051_v35, %v3050_v13  ;;  %v3169_v1 = vadd.f32 %v3168_v58, %v3167_v62  ;;  %v3174_v13 = vsel %vm2089_vm10, %v3121_v11, 0.0  ;;  %v3186_v62 = vsel %vm2089_vm10, %v3127_v44, 0.0 }
 0x39b   : > { %v3202_v44 = vsel %vm2089_vm10, %v3135_v10, 0.0 }
 0x39c   : > { %v3054_v4 = vadd.f32 %v3053_v24, %v3052_v48  ;;  %v3171_v35 = vadd.f32 %v3170_v63, %v3169_v1  ;;  %v3069_v48 = vsel %vm2089_vm10, %v6274_v5, 0.0  ;;  %v3081_v1 = vsel %vm2089_vm10, %v6316_v42, 0.0 }
 0x39d   : > { %v3136_v5 = vmul.f32 %v6288_v21, %v6288_v21 }
 0x39e   : > { %v3056_v20 = vadd.f32 %v3055_v8, %v3054_v4  ;;  %v3173_v54 = vadd.f32 %v3172_v49, %v3171_v35  ;;  %v3178_v8 = vsel %vm2089_vm10, %v3123_v29, 0.0  ;;  %v3190_v49 = vsel %vm2089_vm10, %v3129_v9, 0.0 }
 0x39f   : > { %v3192_v29 = vsel %vm2089_vm10, %v3130_v36, 0.0  ;;  %v3210_v36 = vsel %vm2089_vm10, %v3139_v17, 0.0 }
 0x3a0   : > { %v3058_v32 = vadd.f32 %v3057_v27, %v3056_v20  ;;  %v3175_v46 = vadd.f32 %v3174_v13, %v3173_v54  ;;  %v3073_v27 = vsel %vm2089_vm10, %v6288_v21, 0.0  ;;  %v3085_v13 = vsel %vm2089_vm10, %v6330_v60, 0.0 }
 0x3a1   : > { %v3138_v21 = vmul.f32 %v6302_v47, %v6302_v47 }
 0x3a2   : > { %v3060_v12 = vadd.f32 %v3059_v19, %v3058_v32  ;;  %v3177_v4 = vadd.f32 %v3176_v50, %v3175_v46  ;;  %v3184_v32 = vsel %vm2089_vm10, %v3126_v45, 0.0  ;;  %v3196_v46 = vsel %vm2089_vm10, %v3132_v61, 0.0 }
 0x3a4   : > { %v3062_v56 = vadd.f32 %v3061_v30, %v3060_v12  ;;  %v3179_v39 = vadd.f32 %v3178_v8, %v3177_v4  ;;  %v3079_v12 = vsel %vm2089_vm10, %v6305_v28, 0.0  ;;  %v3091_v4 = vsel %vm2089_vm10, %v6347_v40, 0.0 }
 0x3a5   : > { %v3142_v28 = vmul.f32 %v6330_v60, %v6330_v60  ;;  %v3145_v60 = vmul.f32 %v6347_v40, %v6347_v40 }
 0x3a6   : > { %v3064_v55 = vadd.f32 %v3063_v41, %v3062_v56  ;;  %v3181_v19 = vadd.f32 %v3180_v3, %v3179_v39  ;;  %v3188_v41 = vsel %vm2089_vm10, %v3128_v14, 0.0  ;;  %v3200_v3 = vsel %vm2089_vm10, %v3134_v6, 0.0 }
 0x3a7   : > { %v3097_v14 = vsel %vm1006_vm0, %v6372_v33, 0.0  ;;  %v3222_v40 = vsel %vm2089_vm10, %v3145_v60, 0.0  ;;  %v3148_v6 = vmul.f32 %v6372_v33, %v6372_v33 }
 0x3a8   : > { %v3066_v24 = vadd.f32 %v3065_v37, %v3064_v55  ;;  %v3183_v58 = vadd.f32 %v3182_v31, %v3181_v19  ;;  %v3083_v37 = vsel %vm2089_vm10, %v6319_v53, 0.0  ;;  %v3095_v31 = vsel %vm2089_vm10, %v6361_v22, 0.0 }
 0x3aa   : > { %v3068_v18 = vadd.f32 %v3067_v7, %v3066_v24  ;;  %v3185_v11 = vadd.f32 %v3184_v32, %v3183_v58  ;;  %v3194_v24 = vsel %vm2089_vm10, %v3131_v43, 0.0  ;;  %v3206_v58 = vsel %vm2089_vm10, %v3137_v15, 0.0 }
 0x3ac   : > { %v3070_v16 = vadd.f32 %v3069_v48, %v3068_v18  ;;  %v3187_v56 = vadd.f32 %v3186_v62, %v3185_v11  ;;  %v3089_v18 = vsel %vm2089_vm10, %v6344_v34, 0.0  ;;  %v3140_v62 = vmul.f32 %v6316_v42, %v6316_v42 }
 0x3ad   : > { %v3143_v42 = vmul.f32 %v6333_v26, %v6333_v26  ;;  %v3017_v26 = vld [vmem:[%s6735_s7] sm:$0x1] }
 0x3ae   : > { %v3072_v20 = vadd.f32 %v3071_v25, %v3070_v16  ;;  %v3189_v35 = vadd.f32 %v3188_v41, %v3187_v56  ;;  %v3198_v25 = vsel %vm2089_vm10, %v3133_v0, 0.0  ;;  %v3212_v56 = vsel %vm2089_vm10, %v3140_v62, 0.0 }
 0x3af   : > { %v3146_v0 = vmul.f32 %v6358_v51, %v6358_v51 }
 0x3b0   : > { %v3074_v38 = vadd.f32 %v3073_v27, %v3072_v20  ;;  %v3191_v7 = vadd.f32 %v3190_v49, %v3189_v35  ;;  %v3093_v27 = vsel %vm2089_vm10, %v6358_v51, 0.0 }
 0x3b1   : > { %v3224_v51 = vsel %vm2089_vm10, %v3146_v0, 0.0 }
 0x3b2   : > { %v3076_v30 = vadd.f32 %v3075_v2, %v3074_v38  ;;  %v3193_v50 = vadd.f32 %v3192_v29, %v3191_v7  ;;  %v3204_v38 = vsel %vm2089_vm10, %v3136_v5, 0.0 }
 0x3b4   : > { %v3078_v63 = vadd.f32 %v3077_v59, %v3076_v30  ;;  %v3195_v57 = vadd.f32 %v3194_v24, %v3193_v50  ;;  %v3147_v50 = vmul.f32 %v6361_v22, %v6361_v22 }
 0x3b6   : > { %v3080_v52 = vadd.f32 %v3079_v12, %v3078_v63  ;;  %v3197_v16 = vadd.f32 %v3196_v46, %v3195_v57  ;;  %v3208_v12 = vsel %vm2089_vm10, %v3138_v21, 0.0  ;;  %v3141_v63 = vmul.f32 %v6319_v53, %v6319_v53 }
 0x3b7   : > { %v3144_v53 = vmul.f32 %v6344_v34, %v6344_v34 }
 0x3b8   : > { %v3082_v55 = vadd.f32 %v3081_v1, %v3080_v52  ;;  %v3199_v39 = vadd.f32 %v3198_v25, %v3197_v16  ;;  %v3214_v49 = vsel %vm2089_vm10, %v3141_v63, 0.0 }
 0x3b9   : > { %v3220_v34 = vsel %vm2089_vm10, %v3144_v53, 0.0 }
 0x3ba   : > { %v3084_v54 = vadd.f32 %v3083_v37, %v3082_v55  ;;  %v3201_v2 = vadd.f32 %v3200_v3, %v3199_v39  ;;  %v3216_v55 = vsel %vm2089_vm10, %v3142_v28, 0.0  ;;  %v3107_v3 = vld [vmem:[%s6736_s8] sm:$0x1] }
 0x3bc   : > { %v3086_v48 = vadd.f32 %v3085_v13, %v3084_v54  ;;  %v3203_v32 = vadd.f32 %v3202_v44, %v3201_v2  ;;  %v3218_v13 = vsel %vm2089_vm10, %v3143_v42, 0.0 }
 0x3be   : > { %v3088_v8 = vadd.f32 %v3087_v23, %v3086_v48  ;;  %v3205_v30 = vadd.f32 %v3204_v38, %v3203_v32 }
 0x3c0   : > { %v3090_v45 = vadd.f32 %v3089_v18, %v3088_v8  ;;  %v3207_v47 = vadd.f32 %v3206_v58, %v3205_v30  ;;  %v3226_v18 = vsel %vm2089_vm10, %v3147_v50, 0.0  ;;  %v3228_v8 = vsel %vm1006_vm0, %v3148_v6, 0.0 }
 0x3c2   : > { %v3092_v20 = vadd.f32 %v3091_v4, %v3090_v45  ;;  %v3209_v41 = vadd.f32 %v3208_v12, %v3207_v47 }
 0x3c4   : > { %v3094_v19 = vadd.f32 %v3093_v27, %v3092_v20  ;;  %v3211_v52 = vadd.f32 %v3210_v36, %v3209_v41 }
 0x3c6   : > { %v3096_v59 = vadd.f32 %v3095_v31, %v3094_v19  ;;  %v3213_v37 = vadd.f32 %v3212_v56, %v3211_v52 }
 0x3c8   : > { %v3098_v9 = vadd.f32 %v3097_v14, %v3096_v59  ;;  %v3215_v61 = vadd.f32 %v3214_v49, %v3213_v37 }
 0x3ca   : > { %v3099_v11 = vrot.slane %v3098_v9, 4  ;;  %v3217_v7 = vadd.f32 %v3216_v55, %v3215_v61 }
 0x3cc   : > { %v3100_v1 = vadd.f32 %v3099_v11, %v3098_v9  ;;  %v3219_v24 = vadd.f32 %v3218_v13, %v3217_v7 }
 0x3ce   : > { %v3101_v43 = vrot.slane %v3100_v1, 2  ;;  %v3221_v48 = vadd.f32 %v3220_v34, %v3219_v24 }
 0x3d0   : > { %v3102_v35 = vadd.f32 %v3101_v43, %v3100_v1  ;;  %v3223_v46 = vadd.f32 %v3222_v40, %v3221_v48 }
 0x3d2   : > { %v3103_v29 = vrot.slane %v3102_v35, 1  ;;  %v3225_v57 = vadd.f32 %v3224_v51, %v3223_v46 }
 0x3d4   : > { %v3104_v54 = vadd.f32 %v3103_v29, %v3102_v35  ;;  %v3227_v22 = vadd.f32 %v3226_v18, %v3225_v57 }
 0x3d6   : > { %v3105_v23 = vadd.f32 %v3104_v54, %v3017_v26  ;;  %v3229_v10 = vadd.f32 %v3228_v8, %v3227_v22 }
 0x3d8   : > { %3106 = vst.msk [vmem:[%s6735_s7] sm:$0x1] %vm1052_vm5, %v3105_v23  ;;  %v3230_v25 = vrot.slane %v3229_v10, 4 }
 0x3da   : > { %v3231_v4 = vadd.f32 %v3230_v25, %v3229_v10 }
 0x3dc   : > { %v3232_v16 = vrot.slane %v3231_v4, 2 }
 0x3de   : > { %v3233_v45 = vadd.f32 %v3232_v16, %v3231_v4 }
 0x3e0   : > { %v3234_v5 = vrot.slane %v3233_v45, 1 }
 0x3e2   : > { %v3235_v33 = vadd.f32 %v3234_v5, %v3233_v45 }
 0x3e4   : > { %v3236_v27 = vadd.f32 %v3235_v33, %v3107_v3 }
 0x3e6   : > { %3237 = vst.msk [vmem:[%s6736_s8] sm:$0x1] %vm1052_vm5, %v3236_v27 }
 0x3e7 PF: > { %s19_s27 = sadd.s32 1, %s3723_s27  }
 0x3e8   : > { %p16_p5 = scmp.ge.s32.totalorder %s19_s27, 4  }
 0x3ea   :  { %18 = sbr.rel (!%p16_p5) target bundleno = 1 (0x1), region = 94 }

</bundles_post_ra>
